<compile_context>
chip_gen: v7x
topology: tpu7x:2x2x1
jax: 0.10.0
libtpu: 0.0.40
codegen_flags: <defaults>
</compile_context>

<pallas_src>
import functools

import jax
import jax.numpy as jnp
from jax.experimental import pallas as pl
from jax.experimental.pallas import tpu as pltpu


_VMEM_BUDGET = 24 * 1024 * 1024        # conservative working-set target (fits every gen)
_VMEM_LIMIT_BYTES = 48 * 1024 * 1024   # explicit scoped-VMEM limit (< v7x 64 MiB physical)


# ----------------------------------------------------------------------------
# exact-erf GELU (PyTorch nn.GELU default)
# ----------------------------------------------------------------------------
# TODO(synk): exact-erf GELU uses the Abramowitz & Stegun 7.1.26 polynomial
# (|err| <= 1.5e-7) because lax.erf lowering inside Mosaic is not guaranteed;
# only exp / mul / add / select / reciprocal are used.
def _erf(x):
    a1 = 0.254829592
    a2 = -0.284496736
    a3 = 1.421413741
    a4 = -1.453152027
    a5 = 1.061405429
    p = 0.3275911
    sgn = jnp.where(x >= 0.0, 1.0, -1.0)
    ax = jnp.abs(x)
    # EUP approximate reciprocal (frees the VALU slot; ~1e-4 rel err).
    t = pl.reciprocal(1.0 + p * ax, approx=True)
    poly = t * (a1 + t * (a2 + t * (a3 + t * (a4 + t * a5))))
    y = 1.0 - poly * jnp.exp(-ax * ax)
    return sgn * y


def _gelu_exact(x):
    return 0.5 * x * (1.0 + _erf(x * 0.7071067811865476))


# ----------------------------------------------------------------------------
# Path A: weights fully VMEM-resident, grid over row tiles only
# ----------------------------------------------------------------------------
def _mlp_resident_kernel(x_ref, w1_ref, b1_ref, w2_ref, b2_ref, o_ref):
    # lin1 on the MXU (native-dtype operands, f32 accumulation) + GELU epilogue.
    h = jnp.dot(x_ref[...], w1_ref[...], preferred_element_type=jnp.float32)
    h = _gelu_exact(h + b1_ref[...].astype(jnp.float32))
    # lin2 on the MXU; cast h down to the weight dtype right before the dot.
    y = jnp.dot(h.astype(w2_ref.dtype), w2_ref[...],
                preferred_element_type=jnp.float32)
    o_ref[...] = (y + b2_ref[...].astype(jnp.float32)).astype(o_ref.dtype)


# ----------------------------------------------------------------------------
# Path B (fallback for huge mlp_dim): hidden axis as an "arbitrary" reduction
# ----------------------------------------------------------------------------
def _mlp_split_kernel(x_ref, w1_ref, b1_ref, w2_ref, b2_ref, o_ref, acc_ref):
    f = pl.program_id(1)

    h = jnp.dot(x_ref[...], w1_ref[...], preferred_element_type=jnp.float32)
    h = _gelu_exact(h + b1_ref[...].astype(jnp.float32))
    partial = jnp.dot(h.astype(w2_ref.dtype), w2_ref[...],
                      preferred_element_type=jnp.float32)

    @pl.when(f == 0)
    def _():                       # first step: write directly (no zero + RMW)
        acc_ref[...] = partial

    @pl.when(f > 0)
    def _():
        acc_ref[...] += partial

    @pl.when(f == pl.num_programs(1) - 1)
    def _():
        o_ref[...] = (acc_ref[...] + b2_ref[...].astype(jnp.float32)).astype(o_ref.dtype)


# ----------------------------------------------------------------------------
# tiling heuristic
# ----------------------------------------------------------------------------
def _choose_tiling(M, C, F, x_bytes, w_bytes, out_bytes, budget=_VMEM_BUDGET):
    row_cands = [c for c in (1024, 512, 256, 128, 64, 32, 16, 8)
                 if c <= M and M % c == 0]
    if not row_cands:
        row_cands = [M]            # full-extent row block (always layout-legal)

    def pick_rows(fits):
        good = [c for c in row_cands if fits(c)]
        if not good:
            return None
        # biggest tile that still leaves >=2 grid steps (v7x megacore); weights
        # are resident so the extra steps are essentially free on v5e/v6e too.
        for c in good:
            if M // c >= 2:
                return c
        return good[0]

    # Path A: hold W1/W2 fully resident in VMEM.
    w_resident = 2 * (C * F + F * C) * w_bytes + 2 * (F + C) * 4
    def fits_resident(bm):
        per_rows = 2 * bm * C * x_bytes + 2 * bm * C * out_bytes + bm * F * 4
        return w_resident + per_rows <= budget
    bm = pick_rows(fits_resident)
    if bm is not None:
        return "resident", bm, F

    # Path B: split the hidden axis.
    hid_cands = [c for c in (2048, 1024, 512, 256, 128)
                 if c <= F and F % c == 0] or [F]
    for bf in hid_cands:
        def fits_split(bm, bf=bf):
            w_slices = 2 * (C * bf + bf * C) * w_bytes + 2 * (bf + C) * 4
            per_rows = (2 * bm * C * x_bytes + 2 * bm * C * out_bytes
                        + bm * C * 4 + bm * bf * 4)
            return w_slices + per_rows <= budget
        bm = pick_rows(fits_split)
        if bm is not None:
            return "split", bm, bf
    return "split", row_cands[-1], hid_cands[-1]


# ----------------------------------------------------------------------------
# wrapper
# ----------------------------------------------------------------------------
def mlp_block(x, w1, b1, w2, b2, *, compute_dtype=jnp.bfloat16):
    """y = lin2(GELU(lin1(x))), fused in a single pallas_call.

    x: (..., C); w1: (C, F); b1: (F,); w2: (F, C); b2: (C,).
    compute_dtype: MXU operand dtype (bf16 by default; None keeps input dtypes).
    """
    orig_shape = x.shape
    out_dtype = x.dtype
    C, F = w1.shape
    M = x.size // C
    x2 = x.reshape(M, C)

    if compute_dtype is not None:
        x2 = x2.astype(compute_dtype)
        w1 = w1.astype(compute_dtype)
        w2 = w2.astype(compute_dtype)
    b1 = b1.reshape(1, F).astype(jnp.float32)
    b2 = b2.reshape(1, C).astype(jnp.float32)

    mode, bm, bf = _choose_tiling(
        M, C, F,
        jnp.dtype(x2.dtype).itemsize,
        jnp.dtype(w1.dtype).itemsize,
        jnp.dtype(out_dtype).itemsize,
    )

    if mode == "resident":
        out = pl.pallas_call(
            _mlp_resident_kernel,
            out_shape=jax.ShapeDtypeStruct((M, C), out_dtype),
            grid=(M // bm,),
            in_specs=[
                pl.BlockSpec((bm, C), lambda i: (i, 0)),   # x row tile
                pl.BlockSpec((C, F), lambda i: (0, 0)),    # W1 (resident, fetched once)
                pl.BlockSpec((1, F), lambda i: (0, 0)),    # b1
                pl.BlockSpec((F, C), lambda i: (0, 0)),    # W2 (resident)
                pl.BlockSpec((1, C), lambda i: (0, 0)),    # b2
            ],
            out_specs=pl.BlockSpec((bm, C), lambda i: (i, 0)),
            compiler_params=pltpu.CompilerParams(
                dimension_semantics=("parallel",),
                vmem_limit_bytes=_VMEM_LIMIT_BYTES),
        )(x2, w1, b1, w2, b2)
    else:
        out = pl.pallas_call(
            _mlp_split_kernel,
            out_shape=jax.ShapeDtypeStruct((M, C), out_dtype),
            grid=(M // bm, F // bf),
            in_specs=[
                pl.BlockSpec((bm, C), lambda i, f: (i, 0)),   # x rows (resident over f)
                pl.BlockSpec((C, bf), lambda i, f: (0, f)),   # W1 hidden slice
                pl.BlockSpec((1, bf), lambda i, f: (0, f)),   # b1 hidden slice
                pl.BlockSpec((bf, C), lambda i, f: (f, 0)),   # W2 hidden slice
                pl.BlockSpec((1, C), lambda i, f: (0, 0)),    # b2
            ],
            out_specs=pl.BlockSpec((bm, C), lambda i, f: (i, 0)),
            scratch_shapes=[pltpu.VMEM((bm, C), jnp.float32)],
            compiler_params=pltpu.CompilerParams(
                dimension_semantics=("parallel", "arbitrary"),
                vmem_limit_bytes=_VMEM_LIMIT_BYTES),
        )(x2, w1, b1, w2, b2)

    return out.reshape(orig_shape).astype(out_dtype)


# ----------------------------------------------------------------------------
# main
# ----------------------------------------------------------------------------
if __name__ == "__main__":
    # Small, module-consistent shapes: x (batch, tokens, embedding_dim),
    # mlp_dim = 4 * embedding_dim.
    B, N = 2, 256
    C, F = 128, 512

    root = jax.random.PRNGKey(0)
    k0, k1, k2, k3, k4 = jax.random.split(root, 5)

    x = jax.random.normal(k0, (B, N, C), jnp.float32)
    w1 = (1.0 / (C ** 0.5)) * jax.random.normal(k1, (C, F), jnp.float32)
    b1 = 0.02 * jax.random.normal(k2, (F,), jnp.float32)
    w2 = (1.0 / (F ** 0.5)) * jax.random.normal(k3, (F, C), jnp.float32)
    b2 = 0.02 * jax.random.normal(k4, (C,), jnp.float32)

    # Reference (plain JAX, exact-erf GELU, high-precision dots).
    hp = jax.lax.Precision.HIGHEST
    h_ref = jax.nn.gelu(jnp.dot(x, w1, precision=hp) + b1, approximate=False)
    y_ref = jnp.dot(h_ref, w2, precision=hp) + b2

    # 1) Performance path: bf16 MXU operands, f32 accumulation.
    y = jax.block_until_ready(jax.jit(mlp_block)(x, w1, b1, w2, b2))
    assert y.shape == (B, N, C)
    assert bool(jnp.all(jnp.isfinite(y)))
    err_bf16 = float(jnp.max(jnp.abs(y - y_ref)))
    assert err_bf16 < 6e-2, f"bf16 path max abs err {err_bf16}"

    # 2) Kernel-math check with native f32 operands (tight tolerance).
    y32 = jax.block_until_ready(
        jax.jit(functools.partial(mlp_block, compute_dtype=None))(x, w1, b1, w2, b2))
    err_f32 = float(jnp.max(jnp.abs(y32 - y_ref)))
    assert err_f32 < 1e-2, f"f32 path max abs err {err_f32}"

    print("KERNEL_OK")
</pallas_src>

<mosaic_0001>
module attributes {stable_mosaic.version = 11 : i64} {
  func.func @_mlp_resident_kernel(%arg0: i32, %arg1: memref<256x128xbf16, #tpu.memory_space<vmem>>, %arg2: memref<128x512xbf16, #tpu.memory_space<vmem>>, %arg3: memref<1x512xf32, #tpu.memory_space<vmem>>, %arg4: memref<512x128xbf16, #tpu.memory_space<vmem>>, %arg5: memref<1x128xf32, #tpu.memory_space<vmem>>, %arg6: memref<256x128xf32, #tpu.memory_space<vmem>>) attributes {dimension_semantics = [#tpu.dimension_semantics<parallel>], iteration_bounds = array<i64: 2>, scalar_prefetch = 0 : i64, scratch_operands = 0 : i64, tpu.core_type = #tpu.core_type<tc>, window_params = [{transform_indices = @transform_0, window_bounds = array<i64: 256, 128>}, {pipeline_mode = #tpu.pipeline_mode<synchronous>, transform_indices = @transform_1, window_bounds = array<i64: 128, 512>}, {pipeline_mode = #tpu.pipeline_mode<synchronous>, transform_indices = @transform_2, window_bounds = array<i64: 1, 512>}, {pipeline_mode = #tpu.pipeline_mode<synchronous>, transform_indices = @transform_3, window_bounds = array<i64: 512, 128>}, {pipeline_mode = #tpu.pipeline_mode<synchronous>, transform_indices = @transform_4, window_bounds = array<i64: 1, 128>}, {transform_indices = @transform_5, window_bounds = array<i64: 256, 128>}]} {
    %c0 = arith.constant 0 : index
    %c0_0 = arith.constant 0 : index
    %0 = vector.load %arg1[%c0, %c0_0] : memref<256x128xbf16, #tpu.memory_space<vmem>>, vector<256x128xbf16>
    %c0_1 = arith.constant 0 : index
    %c0_2 = arith.constant 0 : index
    %1 = vector.load %arg2[%c0_1, %c0_2] : memref<128x512xbf16, #tpu.memory_space<vmem>>, vector<128x512xbf16>
    %cst = arith.constant dense<0.000000e+00> : vector<256x512xf32>
    %2 = tpu.matmul %0, %1, %cst {dimension_numbers = #tpu.dot_dimension_numbers<[1], [0], [0], [1], [0, 0, 1, 1], [], []>} : vector<256x128xbf16>, vector<128x512xbf16>, vector<256x512xf32> -> vector<256x512xf32>
    %c0_3 = arith.constant 0 : index
    %c0_4 = arith.constant 0 : index
    %3 = vector.load %arg3[%c0_3, %c0_4] : memref<1x512xf32, #tpu.memory_space<vmem>>, vector<1x512xf32>
    %4 = vector.broadcast %3 : vector<1x512xf32> to vector<256x512xf32>
    %5 = arith.addf %2, %4 : vector<256x512xf32>
    %cst_5 = arith.constant 5.000000e-01 : f32
    %6 = vector.broadcast %cst_5 : f32 to vector<256x512xf32>
    %7 = arith.mulf %6, %5 : vector<256x512xf32>
    %cst_6 = arith.constant 0.707106769 : f32
    %8 = vector.broadcast %cst_6 : f32 to vector<256x512xf32>
    %9 = arith.mulf %5, %8 : vector<256x512xf32>
    %cst_7 = arith.constant 0.000000e+00 : f32
    %10 = vector.broadcast %cst_7 : f32 to vector<256x512xf32>
    %11 = arith.cmpf oge, %9, %10 : vector<256x512xf32>
    %cst_8 = arith.constant 1.000000e+00 : f32
    %cst_9 = arith.constant -1.000000e+00 : f32
    %12 = vector.broadcast %cst_8 : f32 to vector<256x512xf32>
    %13 = vector.broadcast %cst_9 : f32 to vector<256x512xf32>
    %14 = arith.select %11, %12, %13 : vector<256x512xi1>, vector<256x512xf32>
    %15 = math.absf %9 : vector<256x512xf32>
    %cst_10 = arith.constant 0.327591091 : f32
    %16 = vector.broadcast %cst_10 : f32 to vector<256x512xf32>
    %17 = arith.mulf %16, %15 : vector<256x512xf32>
    %cst_11 = arith.constant 1.000000e+00 : f32
    %18 = vector.broadcast %cst_11 : f32 to vector<256x512xf32>
    %19 = arith.addf %18, %17 : vector<256x512xf32>
    %20 = tpu.reciprocal %19 {approx = true} : vector<256x512xf32> -> vector<256x512xf32>
    %cst_12 = arith.constant 1.06140542 : f32
    %21 = vector.broadcast %cst_12 : f32 to vector<256x512xf32>
    %22 = arith.mulf %20, %21 : vector<256x512xf32>
    %cst_13 = arith.constant -1.45315206 : f32
    %23 = vector.broadcast %cst_13 : f32 to vector<256x512xf32>
    %24 = arith.addf %23, %22 : vector<256x512xf32>
    %25 = arith.mulf %20, %24 : vector<256x512xf32>
    %cst_14 = arith.constant 1.42141378 : f32
    %26 = vector.broadcast %cst_14 : f32 to vector<256x512xf32>
    %27 = arith.addf %26, %25 : vector<256x512xf32>
    %28 = arith.mulf %20, %27 : vector<256x512xf32>
    %cst_15 = arith.constant -0.284496725 : f32
    %29 = vector.broadcast %cst_15 : f32 to vector<256x512xf32>
    %30 = arith.addf %29, %28 : vector<256x512xf32>
    %31 = arith.mulf %20, %30 : vector<256x512xf32>
    %cst_16 = arith.constant 0.254829586 : f32
    %32 = vector.broadcast %cst_16 : f32 to vector<256x512xf32>
    %33 = arith.addf %32, %31 : vector<256x512xf32>
    %34 = arith.mulf %20, %33 : vector<256x512xf32>
    %cst_17 = arith.constant 0.000000e+00 : f32
    %35 = vector.broadcast %cst_17 : f32 to vector<256x512xf32>
    %36 = arith.subf %35, %15 : vector<256x512xf32>
    %37 = arith.mulf %36, %15 : vector<256x512xf32>
    %38 = math.exp %37 : vector<256x512xf32>
    %39 = arith.mulf %34, %38 : vector<256x512xf32>
    %cst_18 = arith.constant 1.000000e+00 : f32
    %40 = vector.broadcast %cst_18 : f32 to vector<256x512xf32>
    %41 = arith.subf %40, %39 : vector<256x512xf32>
    %42 = arith.mulf %14, %41 : vector<256x512xf32>
    %cst_19 = arith.constant 1.000000e+00 : f32
    %43 = vector.broadcast %cst_19 : f32 to vector<256x512xf32>
    %44 = arith.addf %43, %42 : vector<256x512xf32>
    %45 = arith.mulf %7, %44 : vector<256x512xf32>
    %46 = arith.truncf %45 : vector<256x512xf32> to vector<256x512xbf16>
    %c0_20 = arith.constant 0 : index
    %c0_21 = arith.constant 0 : index
    %47 = vector.load %arg4[%c0_20, %c0_21] : memref<512x128xbf16, #tpu.memory_space<vmem>>, vector<512x128xbf16>
    %cst_22 = arith.constant dense<0.000000e+00> : vector<256x128xf32>
    %48 = tpu.matmul %46, %47, %cst_22 {dimension_numbers = #tpu.dot_dimension_numbers<[1], [0], [0], [1], [0, 0, 1, 1], [], []>} : vector<256x512xbf16>, vector<512x128xbf16>, vector<256x128xf32> -> vector<256x128xf32>
    %c0_23 = arith.constant 0 : index
    %c0_24 = arith.constant 0 : index
    %49 = vector.load %arg5[%c0_23, %c0_24] : memref<1x128xf32, #tpu.memory_space<vmem>>, vector<1x128xf32>
    %50 = vector.broadcast %49 : vector<1x128xf32> to vector<256x128xf32>
    %51 = arith.addf %48, %50 : vector<256x128xf32>
    %c0_25 = arith.constant 0 : index
    %c0_26 = arith.constant 0 : index
    %52 = vector.load %arg6[%c0_25, %c0_26] : memref<256x128xf32, #tpu.memory_space<vmem>>, vector<256x128xf32>
    tpu.vector_store %arg6[%c0_25, %c0_26], %51 {strides = array<i32>} : memref<256x128xf32, #tpu.memory_space<vmem>>, vector<256x128xf32>,
    return
  }
  func.func @transform_0(%arg0: i32) -> (i32, i32) {
    %c0_i32 = arith.constant 0 : i32
    %c0_i32_0 = arith.constant 0 : i32
    return %arg0, %c0_i32 : i32, i32
  }
  func.func @transform_1(%arg0: i32) -> (i32, i32) {
    %c0_i32 = arith.constant 0 : i32
    %c0_i32_0 = arith.constant 0 : i32
    %c0_i32_1 = arith.constant 0 : i32
    return %c0_i32, %c0_i32_0 : i32, i32
  }
  func.func @transform_2(%arg0: i32) -> (i32, i32) {
    %c0_i32 = arith.constant 0 : i32
    %c0_i32_0 = arith.constant 0 : i32
    %c0_i32_1 = arith.constant 0 : i32
    return %c0_i32, %c0_i32_0 : i32, i32
  }
  func.func @transform_3(%arg0: i32) -> (i32, i32) {
    %c0_i32 = arith.constant 0 : i32
    %c0_i32_0 = arith.constant 0 : i32
    %c0_i32_1 = arith.constant 0 : i32
    return %c0_i32, %c0_i32_0 : i32, i32
  }
  func.func @transform_4(%arg0: i32) -> (i32, i32) {
    %c0_i32 = arith.constant 0 : i32
    %c0_i32_0 = arith.constant 0 : i32
    %c0_i32_1 = arith.constant 0 : i32
    return %c0_i32, %c0_i32_0 : i32, i32
  }
  func.func @transform_5(%arg0: i32) -> (i32, i32) {
    %c0_i32 = arith.constant 0 : i32
    %c0_i32_0 = arith.constant 0 : i32
    return %arg0, %c0_i32 : i32, i32
  }
}

</mosaic_0001>

<bundles_post_ra>
// kernel: mlp_block.1
= control target key start
LH: loop header
LB: loop body
LE: loop exit
PB: predicated region body
PF: predicated region fallthrough
CT: control target
= control target key end

     0   :  { %10 = vsyncpa [#allocation3], 0  ;;  %s9607_s0 = inlined_call_operand.vmem [shape: bf16[512,128], index: 0, kind: input, shape index: {}]   ;;  %s9608_s1 = inlined_call_operand.vmem [shape: bf16[128,512], index: 1, kind: input, shape index: {}]   ;;  %s9609_s2 = inlined_call_operand.vmem [shape: f32[1,512], index: 2, kind: input, shape index: {}]   ;;  %s9610_s3 = inlined_call_operand.vmem [shape: bf16[512,128], index: 3, kind: input, shape index: {}]   ;;  %s9611_s4 = inlined_call_operand.vmem [shape: f32[1,128], index: 4, kind: input, shape index: {}]   ;;  %s9612_s5 = inlined_call_operand.hbm [shape: f32[512,128], index: 5, kind: output, shape index: {}]  }
   0x1   :  { %12 = vsyncpa [#allocation3 + $0x1], 0  ;;  %s6108_s18 = smov 0   ;;  %s6110_s19 = smov 0  }
   0x2   :  { %s6112_s20 = smov 0   ;;  %s6114_s21 = smov 0  }
   0x3 LB: > { %s6129_s22 = sadd.s32 4294967295, %s6071_s21   ;;  %s5040_s23 = sadd.s32 4294967294, %s6071_s21   ;;  %s6071_s21 = sphi %s6114_s21, %s10000_s21   ;;  %s6067_s20 = sphi %s6112_s20, %s9999_s20   ;;  %s6063_s19 = sphi %s6110_s19, %s9998_s19   ;;  %s6059_s18 = sphi %s6108_s18, %s9997_s18  }
   0x4   : > { %s6133_s24 = sadd.s32 1, %s6071_s21   ;;  %s135_s25 = sadd.s32 1, %s6067_s20 }
   0x5   : > { %s132_s26 = ssub.s32 %s6071_s21, %s6133_s24  ;;  %p145_p0 = scmp.ne.s32.totalorder %s6067_s20, %s6063_s19 }
   0x6   : > { %p133_p1 = scmp.eq.s32.totalorder %s132_s26, 0  ;;  %p146_p2 = scmp.eq.s32.totalorder %s6129_s22, 1 }
   0x7   : > { %p151_p3 = scmp.ne.s32.totalorder %s6063_s19, %s6059_s18  ;;  %p152_p4 = scmp.eq.s32.totalorder %s5040_s23, 1 }
   0x8   : > { %s6144_s27 = scalar_select %p133_p1, %s6067_s20, %s135_s25  }
   0x9   : > { %p6146_p5 = por %p146_p2, %p145_p0  ;;  %p6150_p6 = por %p152_p4, %p151_p3 }
   0xa   : > { %p5043_p7 = scmp.ge.s32.totalorder %s6071_s21, 1  ;;  %p191_p8 = scmp.lt.s32.totalorder %s6071_s21, 3 }
   0xc   : > { %p192_p9 = pnand %p5043_p7, %p191_p8 }
   0xe   : > { %195 = sbr.rel (%p192_p9) target bundleno = 1410 (0x582), region = 40 }
  0x15   : > { %v5401_v0 = vld [vmem:[%s9608_s1 + $0x4] ss:$16 sps:$4 sm:$0xff]   ;;  %v5403_v1 = vld [vmem:[%s9608_s1 + $0xc] ss:$16 sps:$4 sm:$0xff]   ;;  %v6073_v2 = vmov 0   ;;  %s5045_s7 = sshll.u32 %s6129_s22, 5 }
  0x16   : > { %601 = vmatprep.mubr.bf16.mxu0 %v6073_v2  ;;  %794 = vmatprep.mubr.bf16.mxu1 %v6073_v2  ;;  %v5405_v3 = vld [vmem:[%s9608_s1] ss:$16 sps:$4 sm:$0xff]   ;;  %v5406_v4 = vld [vmem:[%s9608_s1 + $0x8] ss:$16 sps:$4 sm:$0xff]   ;;  %v5407_v5 = vld [vmem:[%s9608_s1 + $0x24] ss:$16 sps:$4 sm:$0xff]  }
  0x17   : > { %569 = vmatprep.subr.bf16.mxu0 %v5401_v0  ;;  %762 = vmatprep.subr.bf16.mxu1 %v5403_v1  ;;  %v5409_v6 = vld [vmem:[%s9608_s1 + $0x2c] ss:$16 sps:$4 sm:$0xff]   ;;  %v5411_v7 = vld [vmem:[%s9608_s1 + $0x20] ss:$16 sps:$4 sm:$0xff]   ;;  %v5412_v8 = vld [vmem:[%s9608_s1 + $0x28] ss:$16 sps:$4 sm:$0xff]  }
  0x18   : > { %570 = vmatpush1.bf16.msra.mxu0 %v5405_v3  ;;  %763 = vmatpush1.bf16.msra.mxu1 %v5406_v4  ;;  %v5413_v9 = vld [vmem:[%s9608_s1 + $0x44] ss:$16 sps:$4 sm:$0xff]   ;;  %v5415_v10 = vld [vmem:[%s9608_s1 + $0x4c] ss:$16 sps:$4 sm:$0xff]   ;;  %v5417_v11 = vld [vmem:[%s9608_s1 + $0x40] ss:$16 sps:$4 sm:$0xff]  }
  0x19   : > { %571 = vmatprep.subr.bf16.mxu0 %v5407_v5  ;;  %764 = vmatprep.subr.bf16.mxu1 %v5409_v6  ;;  %v5418_v12 = vld [vmem:[%s9608_s1 + $0x48] ss:$16 sps:$4 sm:$0xff]   ;;  %v5419_v13 = vld [vmem:[%s9608_s1 + $0x64] ss:$16 sps:$4 sm:$0xff]   ;;  %v5421_v14 = vld [vmem:[%s9608_s1 + $0x6c] ss:$16 sps:$4 sm:$0xff]  }
  0x1a   : > { %p220_p10 = scmp.lt.s32.totalorder %s5045_s7, 63  ;;  %v5423_v15 = vld [vmem:[%s9608_s1 + $0x60] ss:$16 sps:$4 sm:$0xff]   ;;  %v5424_v16 = vld [vmem:[%s9608_s1 + $0x68] ss:$16 sps:$4 sm:$0xff]   ;;  %s216_s16 = sand.u32 1, %s6063_s19  }
  0x1b   : > { %v5425_v17 = vld [vmem:[%s9608_s1 + $0x84] ss:$16 sps:$4 sm:$0xff]   ;;  %v5427_v18 = vld [vmem:[%s9608_s1 + $0x8c] ss:$16 sps:$4 sm:$0xff]   ;;  %v5429_v19 = vld [vmem:[%s9608_s1 + $0x80] ss:$16 sps:$4 sm:$0xff]  }
  0x1c   : > { %572 = vmatpush1.bf16.msra.mxu0 %v5411_v7  ;;  %765 = vmatpush1.bf16.msra.mxu1 %v5412_v8  ;;  %s10002_s7 = smov (!%p220_p10, %s5045_s7), 63  ;;  %v5430_v20 = vld [vmem:[%s9608_s1 + $0x88] ss:$16 sps:$4 sm:$0xff]   ;;  %v5431_v21 = vld [vmem:[%s9608_s1 + $0xa4] ss:$16 sps:$4 sm:$0xff]   ;;  %s5044_s26 = sshll.u32 %s216_s16, 8 }
  0x1d   : > { %573 = vmatprep.subr.bf16.mxu0 %v5413_v9  ;;  %766 = vmatprep.subr.bf16.mxu1 %v5415_v10  ;;  %v5433_v22 = vld [vmem:[%s9608_s1 + $0xac] ss:$16 sps:$4 sm:$0xff]   ;;  %s5046_s25 = sshll.u32 %s10002_s7, 2  ;;  %v5435_v23 = vld [vmem:[%s9608_s1 + $0xa0] ss:$16 sps:$4 sm:$0xff]   ;;  %v293_v9 = vlaneseq  ;;  %s5133_s30 = sshll.u32 %s6129_s22, 12 }
  0x1e   : > { %v5436_v24 = vld [vmem:[%s9608_s1 + $0xa8] ss:$16 sps:$4 sm:$0xff]   ;;  %v5437_v25 = vld [vmem:[%s9608_s1 + $0xc4] ss:$16 sps:$4 sm:$0xff]   ;;  %s6237_s13 = scalar_lea.vmem %s9607_s0, %s5046_s25  ;;  %v5439_v26 = vld [vmem:[%s9608_s1 + $0xcc] ss:$16 sps:$4 sm:$0xff]   ;;  %s9558_s10 = scalar_lea.hbm %s9612_s5, %s5133_s30 }
  0x1f   : > { %v5441_v27 = vld [vmem:[%s9608_s1 + $0xc0] ss:$16 sps:$4 sm:$0xff]   ;;  %v5442_v28 = vld [vmem:[%s9608_s1 + $0xc8] ss:$16 sps:$4 sm:$0xff]   ;;  %v5443_v29 = vld [vmem:[%s9608_s1 + $0xe4] ss:$16 sps:$4 sm:$0xff]  }
  0x20   : > { %574 = vmatpush1.bf16.msra.mxu0 %v5417_v11  ;;  %767 = vmatpush1.bf16.msra.mxu1 %v5418_v12  ;;  %v5445_v30 = vld [vmem:[%s9608_s1 + $0xec] ss:$16 sps:$4 sm:$0xff]   ;;  %v5447_v31 = vld [vmem:[%s9608_s1 + $0xe0] ss:$16 sps:$4 sm:$0xff]   ;;  %v5448_v32 = vld [vmem:[%s9608_s1 + $0xe8] ss:$16 sps:$4 sm:$0xff]  }
  0x21   : > { %575 = vmatprep.subr.bf16.mxu0 %v5419_v13  ;;  %768 = vmatprep.subr.bf16.mxu1 %v5421_v14  ;;  %v5449_v33 = vld [vmem:[%s6237_s13] sm:$0xff]   ;;  %v5450_v34 = vld [vmem:[%s6237_s13 + $0x8] sm:$0xff]   ;;  %v5451_v42 = vld [vmem:[%s6237_s13 + $0x10] sm:$0xff]   ;;  %v294_v10 = vshrl.u32 %v293_v9, 7  ;;  %s9408_s25 = scalar_lea.vmem [#allocation2], %s5044_s26  ;;  %s9566_s22 = scalar_lea.sflag [#allocation3], %s216_s16 }
  0x22   : > { %v5465_v35 = vld [vmem:[%s9610_s3 + $0x40] sm:$0xff]   ;;  %v5469_v39 = vld [vmem:[%s9610_s3 + $0x48] sm:$0xff]   ;;  %v5473_v44 = vld [vmem:[%s9610_s3 + $0x50] sm:$0xff]   ;;  %s4978_s6 = sshll.u32 %s9408_s25, 4  ;;  %s6075_s12 = smov [#allocation2]   ;;  %s9560_s6 = int_to_ptr.vmem [resolvable:$true] %s4978_s6 }
  0x23   : > { %v5466_v36 = vld [vmem:[%s9610_s3] sm:$0xff]   ;;  %v5470_v40 = vld [vmem:[%s9610_s3 + $0x8] sm:$0xff]   ;;  %v5474_v45 = vld [vmem:[%s9610_s3 + $0x10] sm:$0xff]   ;;  %v295_v11 = vsub.s32 0, %v294_v10  ;;  %v303_v12 = vsub.s32 2, %v294_v10  ;;  %v299_v14 = vsub.s32 1, %v294_v10 }
  0x24   : > { %576 = vmatpush1.bf16.msra.mxu0 %v5423_v15  ;;  %769 = vmatpush1.bf16.msra.mxu1 %v5424_v16  ;;  %v5467_v37 = vld [vmem:[%s9610_s3 + $0xc0] sm:$0xff]   ;;  %v5471_v41 = vld [vmem:[%s9610_s3 + $0xc8] sm:$0xff]   ;;  %v5475_v46 = vld [vmem:[%s9610_s3 + $0xd0] sm:$0xff]   ;;  %v307_v15 = vsub.s32 3, %v294_v10  ;;  %s6009_s11 = scalar_lea.vmem %s9560_s6, 4096  ;;  %s6013_s7 = sshll.u32 %s6075_s12, 4  ;;  %s6014_s7 = int_to_ptr.vmem [resolvable:$false] %s6013_s7 }
  0x25   : > { %577 = vmatprep.subr.bf16.mxu0 %v5425_v17  ;;  %770 = vmatprep.subr.bf16.mxu1 %v5427_v18  ;;  %v5468_v38 = vld [vmem:[%s9610_s3 + $0x80] sm:$0xff]   ;;  %v5472_v43 = vld [vmem:[%s9610_s3 + $0x88] sm:$0xff]   ;;  %v5476_v47 = vld [vmem:[%s9610_s3 + $0x90] sm:$0xff]   ;;  %p6010_p11 = scmp.ne.s32.totalorder %s9560_s6, %s6009_s11  ;;  %s6015_s14 = scalar_lea.vmem %s6014_s7, 8192 }
  0x26   : > { %v5477_v48 = vld [vmem:[%s9610_s3 + $0x58] sm:$0xff]   ;;  %v5481_v53 = vld [vmem:[%s9610_s3 + $0x60] sm:$0xff]   ;;  %v5454_v58 = vld [vmem:[%s6237_s13 + $0x28] sm:$0xff]   ;;  %p6016_p0 = scmp.lt.s32.totalorder %s9560_s6, %s6014_s7  ;;  %p6017_p1 = scmp.lt.s32.totalorder %s6015_s14, %s6009_s11 }
  0x27   : > { %v5478_v49 = vld [vmem:[%s9610_s3 + $0x18] sm:$0xff]   ;;  %v5482_v54 = vld [vmem:[%s9610_s3 + $0x20] sm:$0xff]   ;;  %v5455_v59 = vld [vmem:[%s6237_s13 + $0x30] sm:$0xff]   ;;  %p6011_p12 = pnand %p6010_p11, %p6146_p5 }
  0x28   : > { %578 = vmatpush1.bf16.msra.mxu0 %v5429_v19  ;;  %771 = vmatpush1.bf16.msra.mxu1 %v5430_v20  ;;  %v5479_v50 = vld [vmem:[%s9610_s3 + $0xd8] sm:$0xff]   ;;  %v5483_v55 = vld [vmem:[%s9610_s3 + $0xe0] sm:$0xff]   ;;  %v5458_v62 = vld [vmem:[%s6237_s13 + $0x48] sm:$0xff]   ;;  %p6018_p2 = por %p6017_p1, %p6016_p0 }
  0x29   : > { %579 = vmatprep.subr.bf16.mxu0 %v5431_v21  ;;  %772 = vmatprep.subr.bf16.mxu1 %v5433_v22  ;;  %v5452_v51 = vld [vmem:[%s6237_s13 + $0x18] sm:$0xff]   ;;  %v5484_v56 = vld [vmem:[%s9610_s3 + $0xa0] sm:$0xff]   ;;  %v5459_v63 = vld [vmem:[%s6237_s13 + $0x50] sm:$0xff]   ;;  %p6012_p13 = pneg %p6011_p12 }
  0x2a   : > { %v5480_v52 = vld [vmem:[%s9610_s3 + $0x98] sm:$0xff]   ;;  %v5453_v57 = vld [vmem:[%s6237_s13 + $0x20] sm:$0xff]   ;;  %v5462_v3 = vld [vmem:[%s6237_s13 + $0x68] sm:$0xff]  }
  0x2b   : > { %v5456_v60 = vld [vmem:[%s6237_s13 + $0x38] sm:$0xff]   ;;  %v5457_v61 = vld [vmem:[%s6237_s13 + $0x40] sm:$0xff]   ;;  %v5463_v4 = vld [vmem:[%s6237_s13 + $0x70] sm:$0xff]   ;;  %p6019_p3 = pnand %p6018_p2, %p6012_p13 }
  0x2c   : > { %580 = vmatpush1.bf16.msra.mxu0 %v5435_v23  ;;  %773 = vmatpush1.bf16.msra.mxu1 %v5436_v24  ;;  %v5460_v0 = vld [vmem:[%s6237_s13 + $0x58] sm:$0xff]   ;;  %v5461_v1 = vld [vmem:[%s6237_s13 + $0x60] sm:$0xff]   ;;  %v5485_v6 = vld [vmem:[%s9610_s3 + $0x68] sm:$0xff]  }
  0x2d   : > { %581 = vmatprep.subr.bf16.mxu0 %v5437_v25  ;;  %774 = vmatprep.subr.bf16.mxu1 %v5439_v26  ;;  %v5464_v5 = vld [vmem:[%s6237_s13 + $0x78] sm:$0xff]   ;;  %v5486_v7 = vld [vmem:[%s9610_s3 + $0x28] sm:$0xff]   ;;  %v291_v13 = vld [vmem:[%s9609_s2] sm:$0xf] }
  0x2e   : > { %v5487_v8 = vld [vmem:[%s9610_s3 + $0xe8] sm:$0xff]   ;;  %v6381_v16 = vrot.slane %v291_v13, %v295_v11  ;;  %v6383_v17 = vrot.slane %v291_v13, %v303_v12  ;;  %v6385_v18 = vrot.slane %v291_v13, %v299_v14  ;;  %v6387_v19 = vrot.slane %v291_v13, %v307_v15 }
  0x30   : > { %582 = vmatpush1.bf16.msra.mxu0 %v5441_v27  ;;  %775 = vmatpush1.bf16.msra.mxu1 %v5442_v28 }
  0x31   : > { %583 = vmatprep.subr.bf16.mxu0 %v5443_v29  ;;  %776 = vmatprep.subr.bf16.mxu1 %v5445_v30 }
  0x34   : > { %584 = vmatpush1.bf16.msra.mxu0 %v5447_v31  ;;  %777 = vmatpush1.bf16.msra.mxu1 %v5448_v32 }
  0x35   : > { %5134 = vmatprep.subr.bf16.mxu0 %v5465_v35  ;;  %5246 = vmatprep.subr.bf16.mxu1 %v5467_v37 }
  0x37   : > { %602 = vmatmul.mubr.bf16.vlgmr.msra.gmra.mrb[0].mxu0 %v5449_v33  ;;  %795 = vmatmul.mubr.bf16.vlgmr.msra.gmra.mrb[0].mxu1 %v5449_v33 }
  0x38   : > { %611 = vmatprep.mubr.bf16.mxu0 %v6073_v2  ;;  %804 = vmatprep.mubr.bf16.mxu1 %v6073_v2 }
  0x39   : > { %5135 = vmatpush3.bf16.msra.mxu0 %v5466_v36  ;;  %5247 = vmatpush3.bf16.msra.mxu1 %v5468_v38 }
  0x3a   : > { %5136 = vmatprep.subr.bf16.mxu0 %v5469_v39  ;;  %5248 = vmatprep.subr.bf16.mxu1 %v5471_v41 }
  0x3d   : > { %5137 = vmatpush3.bf16.msra.mxu0 %v5470_v40  ;;  %5249 = vmatpush3.bf16.msra.mxu1 %v5472_v43 }
  0x3e   : > { %5138 = vmatprep.subr.bf16.mxu0 %v5473_v44  ;;  %5250 = vmatprep.subr.bf16.mxu1 %v5475_v46 }
  0x3f   : > { %612 = vmatmul.mubr.bf16.gmra.mrb[4].mxu0 %v5450_v34  ;;  %805 = vmatmul.mubr.bf16.gmra.mrb[4].mxu1 %v5450_v34 }
  0x40   : > { %621 = vmatprep.mubr.bf16.mxu0 %v6073_v2  ;;  %814 = vmatprep.mubr.bf16.mxu1 %v6073_v2 }
  0x41   : > { %5139 = vmatpush3.bf16.msra.mxu0 %v5474_v45  ;;  %5251 = vmatpush3.bf16.msra.mxu1 %v5476_v47 }
  0x42   : > { %5140 = vmatprep.subr.bf16.mxu0 %v5477_v48  ;;  %5252 = vmatprep.subr.bf16.mxu1 %v5479_v50 }
  0x45   : > { %5141 = vmatpush3.bf16.msra.mxu0 %v5478_v49  ;;  %5253 = vmatpush3.bf16.msra.mxu1 %v5480_v52 }
  0x46   : > { %5142 = vmatprep.subr.bf16.mxu0 %v5481_v53  ;;  %5254 = vmatprep.subr.bf16.mxu1 %v5483_v55 }
  0x47   : > { %622 = vmatmul.mubr.bf16.gmra.mrb[8].mxu0 %v5451_v42  ;;  %815 = vmatmul.mubr.bf16.gmra.mrb[8].mxu1 %v5451_v42 }
  0x48   : > { %631 = vmatprep.mubr.bf16.mxu0 %v6073_v2  ;;  %824 = vmatprep.mubr.bf16.mxu1 %v6073_v2 }
  0x49   : > { %5143 = vmatpush3.bf16.msra.mxu0 %v5482_v54  ;;  %5255 = vmatpush3.bf16.msra.mxu1 %v5484_v56 }
  0x4a   : > { %5144 = vmatprep.subr.bf16.mxu0 %v5485_v6  ;;  %5256 = vmatprep.subr.bf16.mxu1 %v5487_v8 }
  0x4d   : > { %5145 = vmatpush3.bf16.msra.mxu0 %v5486_v7 }
  0x4f   : > { %632 = vmatmul.mubr.bf16.gmra.mrb[12].mxu0 %v5452_v51  ;;  %825 = vmatmul.mubr.bf16.gmra.mrb[12].mxu1 %v5452_v51 }
  0x50   : > { %641 = vmatprep.mubr.bf16.mxu0 %v6073_v2  ;;  %834 = vmatprep.mubr.bf16.mxu1 %v6073_v2 }
  0x57   : > { %642 = vmatmul.mubr.bf16.gmra.mrb[16].mxu0 %v5453_v57  ;;  %835 = vmatmul.mubr.bf16.gmra.mrb[16].mxu1 %v5453_v57 }
  0x58   : > { %651 = vmatprep.mubr.bf16.mxu0 %v6073_v2  ;;  %844 = vmatprep.mubr.bf16.mxu1 %v6073_v2 }
  0x5f   : > { %652 = vmatmul.mubr.bf16.gmra.mrb[20].mxu0 %v5454_v58  ;;  %845 = vmatmul.mubr.bf16.gmra.mrb[20].mxu1 %v5454_v58 }
  0x60   : > { %661 = vmatprep.mubr.bf16.mxu0 %v6073_v2  ;;  %854 = vmatprep.mubr.bf16.mxu1 %v6073_v2 }
  0x67   : > { %662 = vmatmul.mubr.bf16.gmra.mrb[24].mxu0 %v5455_v59  ;;  %855 = vmatmul.mubr.bf16.gmra.mrb[24].mxu1 %v5455_v59 }
  0x68   : > { %671 = vmatprep.mubr.bf16.mxu0 %v6073_v2  ;;  %864 = vmatprep.mubr.bf16.mxu1 %v6073_v2 }
  0x6f   : > { %672 = vmatmul.mubr.bf16.gmra.mrb[28].mxu0 %v5456_v60  ;;  %865 = vmatmul.mubr.bf16.gmra.mrb[28].mxu1 %v5456_v60 }
  0x70   : > { %681 = vmatprep.mubr.bf16.mxu0 %v6073_v2  ;;  %874 = vmatprep.mubr.bf16.mxu1 %v6073_v2 }
  0x77   : > { %682 = vmatmul.mubr.bf16.gmra.mrb[32].mxu0 %v5457_v61  ;;  %875 = vmatmul.mubr.bf16.gmra.mrb[32].mxu1 %v5457_v61 }
  0x78   : > { %691 = vmatprep.mubr.bf16.mxu0 %v6073_v2  ;;  %884 = vmatprep.mubr.bf16.mxu1 %v6073_v2 }
  0x7f   : > { %692 = vmatmul.mubr.bf16.gmra.mrb[36].mxu0 %v5458_v62  ;;  %885 = vmatmul.mubr.bf16.gmra.mrb[36].mxu1 %v5458_v62 }
  0x80   : > { %701 = vmatprep.mubr.bf16.mxu0 %v6073_v2  ;;  %894 = vmatprep.mubr.bf16.mxu1 %v6073_v2 }
  0x87   : > { %702 = vmatmul.mubr.bf16.gmra.mrb[40].mxu0 %v5459_v63  ;;  %895 = vmatmul.mubr.bf16.gmra.mrb[40].mxu1 %v5459_v63 }
  0x88   : > { %711 = vmatprep.mubr.bf16.mxu0 %v6073_v2  ;;  %904 = vmatprep.mubr.bf16.mxu1 %v6073_v2 }
  0x8f   : > { %712 = vmatmul.mubr.bf16.gmra.mrb[44].mxu0 %v5460_v0  ;;  %905 = vmatmul.mubr.bf16.gmra.mrb[44].mxu1 %v5460_v0 }
  0x90   : > { %721 = vmatprep.mubr.bf16.mxu0 %v6073_v2  ;;  %914 = vmatprep.mubr.bf16.mxu1 %v6073_v2 }
  0x97   : > { %722 = vmatmul.mubr.bf16.gmra.mrb[48].mxu0 %v5461_v1  ;;  %915 = vmatmul.mubr.bf16.gmra.mrb[48].mxu1 %v5461_v1 }
  0x98   : > { %731 = vmatprep.mubr.bf16.mxu0 %v6073_v2  ;;  %924 = vmatprep.mubr.bf16.mxu1 %v6073_v2 }
  0x9f   : > { %732 = vmatmul.mubr.bf16.gmra.mrb[52].mxu0 %v5462_v3  ;;  %925 = vmatmul.mubr.bf16.gmra.mrb[52].mxu1 %v5462_v3  ;;  %v9613_v3 = vmov -1.0  }
  0xa0   : > { %741 = vmatprep.mubr.bf16.mxu0 %v6073_v2  ;;  %934 = vmatprep.mubr.bf16.mxu1 %v6073_v2 }
  0xa7   : > { %742 = vmatmul.mubr.bf16.gmra.mrb[56].mxu0 %v5463_v4  ;;  %935 = vmatmul.mubr.bf16.gmra.mrb[56].mxu1 %v5463_v4 }
  0xa8   : > { %751 = vmatprep.mubr.bf16.mxu0 %v6073_v2  ;;  %944 = vmatprep.mubr.bf16.mxu1 %v6073_v2  ;;  %v5488_v2 = vld [vmem:[%s9610_s3 + $0xa8] sm:$0xff]  }
  0xa9   : > { %5257 = vmatpush3.bf16.msra.mxu1 %v5488_v2 }
  0xaf   : > { %752 = vmatmul.mubr.bf16.gmra.mrb[60].mxu0 %v5464_v5  ;;  %945 = vmatmul.mubr.bf16.gmra.mrb[60].mxu1 %v5464_v5 }
 0x10a   : > { %v603_v20 = vpop.f32.mrb[0].mxu0  ;;  %v796_v21 = vpop.f32.mrb[0].mxu1 }
 0x10b   : > { %v604_v22 = vadd.f32 %v603_v20, %v6381_v16  ;;  %v797_v23 = vadd.f32 %v796_v21, %v6383_v17  ;;  %v605_v24 = vpop.f32.mrb[1].mxu0  ;;  %v798_v25 = vpop.f32.mrb[1].mxu1 }
 0x10c   : > { %v606_v26 = vadd.f32 %v605_v24, %v6385_v18  ;;  %v799_v27 = vadd.f32 %v798_v25, %v6387_v19  ;;  %v607_v28 = vpop.f32.mrb[2].mxu0  ;;  %v800_v29 = vpop.f32.mrb[2].mxu1 }
 0x10d   : > { %v1083_v30 = vmul.f32 0.70710677, %v604_v22  ;;  %v1085_v31 = vmul.f32 0.70710677, %v797_v23  ;;  %v6393_v35 = vmul.f32 0.5, %v604_v22  ;;  %v609_v38 = vpop.f32.mrb[3].mxu0  ;;  %v608_v59 = vadd.f32 %v607_v28, %v6381_v16 }
 0x10e   : > { %v1084_v32 = vmul.f32 0.70710677, %v606_v26  ;;  %v1086_v37 = vmul.f32 0.70710677, %v799_v27  ;;  %v6395_v43 = vmul.f32 0.5, %v797_v23  ;;  %v6397_v44 = vmul.f32 0.5, %v606_v26 }
 0x10f   : > { %v1467_v33 = vand.u32 2147483647, %v1083_v30  ;;  %v1469_v34 = vand.u32 2147483647, %v1085_v31  ;;  %v802_v47 = vpop.f32.mrb[3].mxu1  ;;  %vm1211_vm0 = vcmp.ge.f32.partialorder %v1083_v30, 0.0  ;;  %v801_v6 = vadd.f32 %v800_v29, %v6383_v17 }
 0x110   : > { %v1468_v36 = vand.u32 2147483647, %v1084_v32  ;;  %v6399_v50 = vmul.f32 0.5, %v799_v27  ;;  %vm1213_vm1 = vcmp.ge.f32.partialorder %v1085_v31, 0.0  ;;  %vm1212_vm2 = vcmp.ge.f32.partialorder %v1084_v32, 0.0 }
 0x111   : > { %v1595_v39 = vmul.f32 0.3275911, %v1467_v33  ;;  %v3131_v40 = vsub.f32 0.0, %v1467_v33  ;;  %v1597_v41 = vmul.f32 0.3275911, %v1469_v34  ;;  %v3133_v42 = vsub.f32 0.0, %v1469_v34 }
 0x112   : > { %v1596_v45 = vmul.f32 0.3275911, %v1468_v36  ;;  %v3132_v46 = vsub.f32 0.0, %v1468_v36  ;;  %v6401_v51 = vpop.f32.mrb[4].mxu0  ;;  %v6403_v52 = vpop.f32.mrb[4].mxu1  ;;  %v6418_v4 = vsel %vm1211_vm0, 1.0, %v9613_v3  ;;  %v610_v10 = vadd.f32 %v609_v38, %v6385_v18 }
 0x113   : > { %v1723_v48 = vadd.f32 1.0, %v1595_v39  ;;  %v1725_v49 = vadd.f32 1.0, %v1597_v41  ;;  %v3259_v53 = vmul.f32 %v3131_v40, %v1467_v33  ;;  %v1470_v54 = vand.u32 2147483647, %v1086_v37  ;;  %v6405_v55 = vpop.f32.mrb[5].mxu0  ;;  %v6407_v56 = vpop.f32.mrb[5].mxu1 }
 0x114   : > { %v3261_v57 = vmul.f32 %v3133_v42, %v1469_v34  ;;  %v1724_v58 = vadd.f32 1.0, %v1596_v45  ;;  %v6410_v60 = vpop.f32.mrb[6].mxu0  ;;  %v6412_v61 = vpop.f32.mrb[6].mxu1  ;;  %v3260_v62 = vmul.f32 %v3132_v46, %v1468_v36  ;;  %vm1214_vm3 = vcmp.ge.f32.partialorder %v1086_v37, 0.0 }
 0x115   : > { %5497 = vrcp.f32 %v1723_v48  ;;  %v1598_v63 = vmul.f32 0.3275911, %v1470_v54  ;;  %v3134_v0 = vsub.f32 0.0, %v1470_v54  ;;  %v6414_v1 = vpop.f32.mrb[7].mxu0  ;;  %v1087_v5 = vmul.f32 0.70710677, %v608_v59 }
 0x116   : > { %5499 = vrcp.f32 %v1725_v49  ;;  %v6421_v7 = vpop.f32.mrb[7].mxu1  ;;  %v3387_v8 = vmul.f32 1.442695, %v3259_v53  ;;  %v6425_v2 = vsel %vm1213_vm1, 1.0, %v9613_v3  ;;  %v3391_v11 = vmul.f32 1.442695, %v3261_v57 }
 0x117   : > { %v1726_v9 = vadd.f32 1.0, %v1598_v63  ;;  %v6430_v12 = vsel %vm1212_vm2, 1.0, %v9613_v3  ;;  %5501 = vrcp.f32 %v1724_v58  ;;  %v1471_v13 = vand.u32 2147483647, %v1087_v5 }
 0x118   : > { %v3389_v14 = vmul.f32 1.442695, %v3260_v62  ;;  %v6433_v15 = vsel %vm1214_vm3, 1.0, %v9613_v3  ;;  %v3262_v20 = vmul.f32 %v3134_v0, %v1470_v54  ;;  %v1089_v21 = vmul.f32 0.70710677, %v801_v6 }
 0x119   : > { %5503 = vrcp.f32 %v1726_v9  ;;  %v6437_v23 = vmul.f32 0.5, %v608_v59  ;;  %v1599_v24 = vmul.f32 0.3275911, %v1471_v13  ;;  %v3135_v25 = vsub.f32 0.0, %v1471_v13 }
 0x11a   : > { %v6435_v22 = vpop.f32.mrb[8].mxu0  ;;  %v6439_v26 = vpop.f32.mrb[8].mxu1  ;;  %5505 = vpow2.f32 %v3387_v8  ;;  %vm1215_vm4 = vcmp.ge.f32.partialorder %v1087_v5, 0.0  ;;  %v1473_v28 = vand.u32 2147483647, %v1089_v21  ;;  %v6445_v32 = vmul.f32 0.5, %v801_v6 }
 0x11b   : > { %9630 = vst [vmem:[#allocation5_spill] sm:$0xff] %v6435_v22  ;;  %9631 = vst [vmem:[#allocation6_spill] sm:$0xff] %v6439_v26  ;;  %v6441_v27 = vpop.f32.mrb[9].mxu0  ;;  %v1088_v29 = vmul.f32 0.70710677, %v610_v10  ;;  %v6443_v30 = vpop.f32.mrb[9].mxu1  ;;  %5507 = vpow2.f32 %v3391_v11  ;;  %v803_v33 = vadd.f32 %v802_v47, %v6387_v19  ;;  %v3263_v38 = vmul.f32 %v3135_v25, %v1471_v13 }
 0x11c   : > { %9632 = vst [vmem:[#allocation7_spill] sm:$0xff] %v6441_v27  ;;  %9633 = vst [vmem:[#allocation8_spill] sm:$0xff] %v6443_v30  ;;  %v1727_v31 = vadd.f32 1.0, %v1599_v24  ;;  %v6448_v34 = vpop.f32.mrb[10].mxu0  ;;  %v6450_v36 = vpop.f32.mrb[10].mxu1  ;;  %v6455_v42 = vsel %vm1215_vm4, 1.0, %v9613_v3 }
 0x11d   : > { %9634 = vst [vmem:[#allocation9_spill] sm:$0xff] %v6448_v34  ;;  %9635 = vst [vmem:[#allocation10_spill] sm:$0xff] %v6450_v36  ;;  %v3393_v37 = vmul.f32 1.442695, %v3262_v20  ;;  %v1601_v39 = vmul.f32 0.3275911, %v1473_v28 }
 0x11e   : > { %v1472_v40 = vand.u32 2147483647, %v1088_v29  ;;  %5509 = vrcp.f32 %v1727_v31  ;;  %vm1217_vm5 = vcmp.ge.f32.partialorder %v1089_v21, 0.0  ;;  %v6457_v45 = vmul.f32 0.5, %v610_v10  ;;  %v6459_v46 = vpop.f32.mrb[11].mxu0  ;;  %v6461_v47 = vpop.f32.mrb[11].mxu1 }
 0x11f   : > { %v6452_v41 = vpop.eup %5497  ;;  %9636 = vst [vmem:[#allocation11_spill] sm:$0xff] %v6459_v46  ;;  %9637 = vst [vmem:[#allocation12_spill] sm:$0xff] %v6461_v47  ;;  %v1729_v53 = vadd.f32 1.0, %v1601_v39  ;;  %v3137_v54 = vsub.f32 0.0, %v1473_v28  ;;  %vm1216_vm6 = vcmp.ge.f32.partialorder %v1088_v29, 0.0  ;;  %v6473_v10 = vsel %vm1217_vm5, 1.0, %v9613_v3 }
 0x120   : > { %v6463_v48 = vpop.eup %5499  ;;  %v1979_v49 = vmul.f32 1.0614054, %v6452_v41  ;;  %v1600_v57 = vmul.f32 0.3275911, %v1472_v40  ;;  %v3136_v59 = vsub.f32 0.0, %v1472_v40  ;;  %v6483_v31 = vsel %vm1216_vm6, 1.0, %v9613_v3 }
 0x121   : > { %v1981_v58 = vmul.f32 1.0614054, %v6463_v48  ;;  %v1090_v62 = vmul.f32 0.70710677, %v803_v33  ;;  %v3395_v0 = vmul.f32 1.442695, %v3263_v38  ;;  %5511 = vrcp.f32 %v1729_v53  ;;  %v6469_v8 = vpop.eup %5501 }
 0x122   : > { %v2107_v63 = vadd.f32 -1.4531521, %v1979_v49  ;;  %v1728_v5 = vadd.f32 1.0, %v1600_v57  ;;  %v6467_v6 = vpop.f32.mrb[12].mxu0  ;;  %5513 = vpow2.f32 %v3389_v14  ;;  %v6477_v13 = vpop.f32.mrb[12].mxu1  ;;  %v3265_v25 = vmul.f32 %v3137_v54, %v1473_v28 }
 0x123   : > { %9638 = vst [vmem:[#allocation13_spill] sm:$0xff] %v6467_v6  ;;  %v2109_v9 = vadd.f32 -1.4531521, %v1981_v58  ;;  %v6475_v11 = vand.u32 2147483647, %v1090_v62  ;;  %9639 = vst [vmem:[#allocation14_spill] sm:$0xff] %v6477_v13  ;;  %v6485_v38 = vpop.eup %5503  ;;  %v3264_v21 = vmul.f32 %v3136_v59, %v1472_v40  ;;  %v614_v3 = vadd.f32 %v6401_v51, %v6381_v16 }
 0x124   : > { %v2235_v20 = vmul.f32 %v6452_v41, %v2107_v63  ;;  %v1980_v24 = vmul.f32 1.0614054, %v6469_v8  ;;  %5515 = vrcp.f32 %v1728_v5  ;;  %v5506_v49 = vpop.eup %5505  ;;  %v1982_v58 = vmul.f32 1.0614054, %v6485_v38  ;;  %v6494_v13 = vpop.f32.mrb[13].mxu0 }
 0x125   : > { %v2237_v14 = vmul.f32 %v6463_v48, %v2109_v9  ;;  %v1602_v39 = vmul.f32 0.3275911, %v6475_v11  ;;  %5517 = vpow2.f32 %v3393_v37  ;;  %v5508_v63 = vpop.eup %5507  ;;  %v6490_v54 = vmul.f32 0.5, %v803_v33  ;;  %9640 = vst [vmem:[#allocation15_spill] sm:$0xff] %v6494_v13 }
 0x126   : > { %v2363_v53 = vadd.f32 1.4214138, %v2235_v20  ;;  %v2108_v57 = vadd.f32 -1.4531521, %v1980_v24  ;;  %v2110_v5 = vadd.f32 -1.4531521, %v1982_v58 }
 0x127   : > { %v2365_v28 = vadd.f32 1.4214138, %v2237_v14  ;;  %v1730_v29 = vadd.f32 1.0, %v1602_v39  ;;  %vm1218_vm7 = vcmp.ge.f32.partialorder %v1090_v62, 0.0  ;;  %v3399_v20 = vmul.f32 1.442695, %v3265_v25 }
 0x128   : > { %v2491_v40 = vmul.f32 %v6452_v41, %v2363_v53  ;;  %v2236_v59 = vmul.f32 %v6469_v8, %v2108_v57  ;;  %v6498_v9 = vpop.eup %5509  ;;  %v6501_v24 = vmul.f32 1.442695, %v3264_v21  ;;  %v2238_v51 = vmul.f32 %v6485_v38, %v2110_v5  ;;  %v6510_v58 = vpop.f32.mrb[13].mxu1 }
 0x129   : > { %v2493_v37 = vmul.f32 %v6463_v48, %v2365_v28  ;;  %5519 = vrcp.f32 %v1730_v29  ;;  %v1983_v39 = vmul.f32 1.0614054, %v6498_v9  ;;  %v9641_v53 = vmov -1.0   ;;  %9642 = vst [vmem:[#allocation16_spill] sm:$0xff] %v6510_v58 }
 0x12a   : > { %v2619_v33 = vadd.f32 -0.28449672, %v2491_v40  ;;  %v2364_v14 = vadd.f32 1.4214138, %v2236_v59  ;;  %5521 = vpow2.f32 %v3395_v0  ;;  %v6506_v57 = vsel %vm1218_vm7, 1.0, %v9641_v53 }
 0x12b   : > { %v2621_v13 = vadd.f32 -0.28449672, %v2493_v37  ;;  %v6508_v62 = vmul.f32 0.70710677, %v614_v3  ;;  %v6512_v28 = vpop.eup %5511  ;;  %v2366_v29 = vadd.f32 1.4214138, %v2238_v51  ;;  %5523 = vpow2.f32 %v3399_v20 }
 0x12c   : > { %v2747_v25 = vmul.f32 %v6452_v41, %v2619_v33  ;;  %v2492_v21 = vmul.f32 %v6469_v8, %v2364_v14  ;;  %v2111_v40 = vadd.f32 -1.4531521, %v1983_v39  ;;  %v5514_v59 = vpop.eup %5513  ;;  %v1985_v0 = vmul.f32 1.0614054, %v6512_v28  ;;  %v5489_v33 = vld [vmem:[%s9610_s3 + $0x70] sm:$0xff]  }
 0x12d   : > { %v2749_v5 = vmul.f32 %v6463_v48, %v2621_v13  ;;  %v3138_v37 = vsub.f32 0.0, %v6475_v11  ;;  %v6519_v6 = vmul.f32 0.5, %v614_v3  ;;  %v2494_v58 = vmul.f32 %v6485_v38, %v2366_v29  ;;  %5146 = vmatprep.subr.bf16.mxu0 %v5489_v33 }
 0x12e   : > { %v2875_v47 = vadd.f32 0.2548296, %v2747_v25  ;;  %v2620_v46 = vadd.f32 -0.28449672, %v2492_v21  ;;  %v2239_v36 = vmul.f32 %v6498_v9, %v2111_v40  ;;  %v6526_v14 = vpop.eup %5515  ;;  %v2113_v13 = vadd.f32 -1.4531521, %v1985_v0 }
 0x12f   : > { %9643 = vst [vmem:[#allocation17_spill] sm:$0xff] %v6519_v6  ;;  %v2877_v51 = vadd.f32 0.2548296, %v2749_v5  ;;  %v6529_v39 = vand.u32 2147483647, %v6508_v62  ;;  %v5518_v3 = vpop.eup %5517  ;;  %v3266_v5 = vmul.f32 %v3138_v37, %v6475_v11  ;;  %5525 = vpow2.f32 %v6501_v24 }
 0x130   : > { %v3003_v25 = vmul.f32 %v6452_v41, %v2875_v47  ;;  %v2748_v21 = vmul.f32 %v6469_v8, %v2620_v46  ;;  %v2622_v29 = vadd.f32 -0.28449672, %v2494_v58  ;;  %v2367_v34 = vadd.f32 1.4214138, %v2239_v36 }
 0x131   : > { %v3005_v40 = vmul.f32 %v6463_v48, %v2877_v51  ;;  %v2241_v30 = vmul.f32 %v6512_v28, %v2113_v13  ;;  %v1984_v27 = vmul.f32 1.0614054, %v6526_v14  ;;  %v1603_v58 = vmul.f32 0.3275911, %v6529_v39 }
 0x132   : > { %v3643_v20 = vmul.f32 %v5506_v49, %v3003_v25  ;;  %v2876_v0 = vadd.f32 0.2548296, %v2748_v21  ;;  %v2750_v26 = vmul.f32 %v6485_v38, %v2622_v29  ;;  %v2495_v6 = vmul.f32 %v6498_v9, %v2367_v34  ;;  %v6546_v25 = vpop.f32.mrb[14].mxu0 }
 0x133   : > { %v6539_v41 = vpop.eup %5519  ;;  %v3645_v46 = vmul.f32 %v5508_v63, %v3005_v40  ;;  %v2369_v47 = vadd.f32 1.4214138, %v2241_v30  ;;  %v2112_v36 = vadd.f32 -1.4531521, %v1984_v27  ;;  %v3401_v34 = vmul.f32 1.442695, %v3266_v5 }
 0x134   : > { %v3771_v48 = vsub.f32 1.0, %v3643_v20  ;;  %v3004_v33 = vmul.f32 %v6469_v8, %v2876_v0  ;;  %v2878_v51 = vadd.f32 0.2548296, %v2750_v26  ;;  %v2623_v13 = vadd.f32 -0.28449672, %v2495_v6  ;;  %v5522_v22 = vpop.eup %5521 }
 0x135   : > { %v2497_v11 = vmul.f32 %v6512_v28, %v2369_v47  ;;  %v2240_v49 = vmul.f32 %v6526_v14, %v2112_v36  ;;  %v1986_v37 = vmul.f32 1.0614054, %v6539_v41  ;;  %v3773_v63 = vsub.f32 1.0, %v3645_v46  ;;  %v5524_v47 = vpop.eup %5523  ;;  %v6555_v46 = vpop.f32.mrb[14].mxu1 }
 0x136   : > { %v3644_v30 = vmul.f32 %v5514_v59, %v3004_v33  ;;  %v3006_v27 = vmul.f32 %v6485_v38, %v2878_v51  ;;  %v2751_v21 = vmul.f32 %v6498_v9, %v2623_v13  ;;  %v3899_v6 = vmul.f32 %v3771_v48, %v6418_v4 }
 0x137   : > { %v2625_v29 = vadd.f32 -0.28449672, %v2497_v11  ;;  %v2368_v8 = vadd.f32 1.4214138, %v2240_v49  ;;  %v2114_v26 = vadd.f32 -1.4531521, %v1986_v37  ;;  %v3901_v33 = vmul.f32 %v3773_v63, %v6425_v2 }
 0x138   : > { %v3646_v40 = vmul.f32 %v5518_v3, %v3006_v27  ;;  %v2879_v20 = vadd.f32 0.2548296, %v2751_v21  ;;  %v1731_v0 = vadd.f32 1.0, %v1603_v58  ;;  %v3772_v5 = vsub.f32 1.0, %v3644_v30  ;;  %v5490_v63 = vld [vmem:[%s9610_s3 + $0x30] sm:$0xff]  }
 0x139   : > { %v2753_v36 = vmul.f32 %v6512_v28, %v2625_v29  ;;  %v2496_v59 = vmul.f32 %v6526_v14, %v2368_v8  ;;  %v2242_v38 = vmul.f32 %v6539_v41, %v2114_v26  ;;  %vm1219_vm8 = vcmp.ge.f32.partialorder %v6508_v62, 0.0  ;;  %5147 = vmatpush3.bf16.msra.mxu0 %v5490_v63  ;;  %v5526_v62 = vpop.eup %5525 }
 0x13a   : > { %v3774_v51 = vsub.f32 1.0, %v3646_v40  ;;  %v3007_v24 = vmul.f32 %v6498_v9, %v2879_v20  ;;  %5527 = vpow2.f32 %v3401_v34  ;;  %v4027_v48 = vadd.f32 1.0, %v3899_v6  ;;  %v6584_v6 = vpop.f32.mrb[15].mxu0 }
 0x13b   : > { %v2881_v4 = vadd.f32 0.2548296, %v2753_v36  ;;  %v2624_v3 = vadd.f32 -0.28449672, %v2496_v59  ;;  %v2370_v58 = vadd.f32 1.4214138, %v2242_v38  ;;  %5529 = vrcp.f32 %v1731_v0 }
 0x13c   : > { %v3647_v13 = vmul.f32 %v5522_v22, %v3007_v24  ;;  %v807_v11 = vadd.f32 %v6403_v52, %v6383_v17  ;;  %v3900_v49 = vmul.f32 %v3772_v5, %v6430_v12  ;;  %v4029_v30 = vadd.f32 1.0, %v3901_v33 }
 0x13d   : > { %v3009_v37 = vmul.f32 %v6512_v28, %v2881_v4  ;;  %v2752_v2 = vmul.f32 %v6526_v14, %v2624_v3  ;;  %v2498_v9 = vmul.f32 %v6539_v41, %v2370_v58  ;;  %v3902_v34 = vmul.f32 %v3774_v51, %v6433_v15  ;;  %v6597_v3 = vpop.f32.mrb[15].mxu1 }
 0x13e   : > { %v3775_v22 = vsub.f32 1.0, %v3647_v13  ;;  %v6573_v52 = vsel %vm1219_vm8, 1.0, %v9641_v53  ;;  %v3139_v21 = vsub.f32 0.0, %v6529_v39  ;;  %v6577_v29 = vmul.f32 %v4027_v48, %v6393_v35 }
 0x13f   : > { %v3649_v12 = vmul.f32 %v5524_v47, %v3009_v37  ;;  %v2880_v27 = vadd.f32 0.2548296, %v2752_v2  ;;  %v2626_v28 = vadd.f32 -0.28449672, %v2498_v9  ;;  %v6580_v26 = vmul.f32 0.70710677, %v807_v11 }
 0x140   : > { %9644 = vst [vmem:[#allocation18_spill] sm:$0xff] %v6577_v29  ;;  %v3903_v8 = vmul.f32 %v3775_v22, %v6455_v42  ;;  %v616_v15 = vadd.f32 %v6405_v55, %v6385_v18  ;;  %v4028_v40 = vadd.f32 1.0, %v3900_v49  ;;  %v6589_v5 = vmul.f32 %v4029_v30, %v6395_v43 }
 0x141   : > { %v3777_v20 = vsub.f32 1.0, %v3649_v12  ;;  %v3008_v0 = vmul.f32 %v6526_v14, %v2880_v27  ;;  %v2754_v47 = vmul.f32 %v6539_v41, %v2626_v28  ;;  %v4030_v35 = vadd.f32 1.0, %v3902_v34 }
 0x142   : > { %9645 = vst [vmem:[#allocation19_spill] sm:$0xff] %v6589_v5  ;;  %v4031_v36 = vadd.f32 1.0, %v3903_v8  ;;  %v1477_v42 = vand.u32 2147483647, %v6580_v26  ;;  %v3267_v33 = vmul.f32 %v3139_v21, %v6529_v39  ;;  %v1092_v4 = vmul.f32 0.70710677, %v616_v15 }
 0x143   : > { %v3905_v59 = vmul.f32 %v3777_v20, %v6473_v10  ;;  %v3648_v38 = vmul.f32 %v5526_v62, %v3008_v0  ;;  %v2882_v55 = vadd.f32 0.2548296, %v2754_v47  ;;  %v6600_v58 = vmul.f32 %v4028_v40, %v6397_v44 }
 0x144   : > { %v6595_v51 = vmul.f32 %v4031_v36, %v6437_v23  ;;  %v1605_v24 = vmul.f32 0.3275911, %v1477_v42  ;;  %v3141_v14 = vsub.f32 0.0, %v1477_v42  ;;  %v5528_v43 = vpop.eup %5527  ;;  %v6603_v10 = vmul.f32 0.5, %v807_v11 }
 0x145   : > { %9647 = vst [vmem:[#allocation21_spill] sm:$0xff] %v6600_v58  ;;  %v4033_v48 = vadd.f32 1.0, %v3905_v59  ;;  %v3010_v13 = vmul.f32 %v6539_v41, %v2882_v55  ;;  %v6605_v49 = vpop.eup %5529  ;;  %v6608_v39 = vmul.f32 %v4030_v35, %v6399_v50  ;;  %v3776_v37 = vsub.f32 1.0, %v3648_v38  ;;  %v6644_v55 = vpop.f32.mrb[16].mxu0 }
 0x146   : > { %9646 = vst [vmem:[#allocation20_spill] sm:$0xff] %v6595_v51  ;;  %v1733_v2 = vadd.f32 1.0, %v1605_v24  ;;  %v1987_v63 = vmul.f32 1.0614054, %v6605_v49  ;;  %v3269_v30 = vmul.f32 %v3141_v14, %v1477_v42  ;;  %v3403_v41 = vmul.f32 1.442695, %v3267_v33 }
 0x147   : > { %9648 = vst [vmem:[#allocation22_spill] sm:$0xff] %v6608_v39  ;;  %v6613_v9 = vmul.f32 %v4033_v48, %v6445_v32  ;;  %v3650_v44 = vmul.f32 %v5528_v43, %v3010_v13  ;;  %v1476_v11 = vand.u32 2147483647, %v1092_v4  ;;  %v809_v34 = vadd.f32 %v6407_v56, %v6387_v19  ;;  %v5491_v32 = vld [vmem:[%s9610_s3 + $0xf0] sm:$0xff]  }
 0x148   : > { %5531 = vrcp.f32 %v1733_v2  ;;  %v2115_v12 = vadd.f32 -1.4531521, %v1987_v63  ;;  %v6620_v27 = vmul.f32 0.5, %v616_v15  ;;  %v3904_v28 = vmul.f32 %v3776_v37, %v6483_v31  ;;  %5258 = vmatprep.subr.bf16.mxu1 %v5491_v32 }
 0x149   : > { %9649 = vst [vmem:[#allocation23_spill] sm:$0xff] %v6613_v9  ;;  %v3778_v22 = vsub.f32 1.0, %v3650_v44  ;;  %vm1221_vm9 = vcmp.ge.f32.partialorder %v6580_v26, 0.0  ;;  %v1604_v21 = vmul.f32 0.3275911, %v1476_v11  ;;  %v3140_v8 = vsub.f32 0.0, %v1476_v11 }
 0x14a   : > { %v2243_v62 = vmul.f32 %v6605_v49, %v2115_v12  ;;  %v3407_v56 = vmul.f32 1.442695, %v3269_v30  ;;  %vm1220_vm10 = vcmp.ge.f32.partialorder %v1092_v4, 0.0  ;;  %v1094_v40 = vmul.f32 0.70710677, %v809_v34 }
 0x14b   : > { %5533 = vpow2.f32 %v3403_v41  ;;  %v1732_v20 = vadd.f32 1.0, %v1604_v21  ;;  %v618_v15 = vadd.f32 %v6410_v60, %v6381_v16  ;;  %v6632_v0 = vadd.f32 %v6412_v61, %v6383_v17 }
 0x14c   : > { %v3906_v31 = vmul.f32 %v3778_v22, %v6506_v57  ;;  %v2371_v47 = vadd.f32 1.4214138, %v2243_v62  ;;  %v3268_v35 = vmul.f32 %v3140_v8, %v1476_v11  ;;  %v1478_v36 = vand.u32 2147483647, %v1094_v40 }
 0x14d   : > { %v4032_v42 = vadd.f32 1.0, %v3904_v28  ;;  %v6638_v59 = vsel %vm1221_vm9, 1.0, %v9641_v53  ;;  %v6641_v38 = vsel %vm1220_vm10, 1.0, %v9641_v53  ;;  %5535 = vrcp.f32 %v1732_v20  ;;  %v5492_v28 = vld [vmem:[%s9610_s3 + $0xb0] sm:$0xff]  }
 0x14e   : > { %v2499_v60 = vmul.f32 %v6605_v49, %v2371_v47  ;;  %5537 = vpow2.f32 %v3407_v56  ;;  %vm1222_vm11 = vcmp.ge.f32.partialorder %v1094_v40, 0.0  ;;  %v1606_v61 = vmul.f32 0.3275911, %v1478_v36  ;;  %5259 = vmatpush3.bf16.msra.mxu1 %v5492_v28 }
 0x14f   : > { %v6646_v57 = vmul.f32 0.5, %v809_v34  ;;  %v3142_v33 = vsub.f32 0.0, %v1478_v36  ;;  %v1095_v24 = vmul.f32 0.70710677, %v618_v15  ;;  %v1097_v14 = vmul.f32 0.70710677, %v6632_v0 }
 0x150   : > { %v4034_v26 = vadd.f32 1.0, %v3906_v31  ;;  %v2627_v4 = vadd.f32 -0.28449672, %v2499_v60  ;;  %v3405_v43 = vmul.f32 1.442695, %v3268_v35  ;;  %v1734_v48 = vadd.f32 1.0, %v1606_v61 }
 0x151   : > { %v6652_v37 = vsel %vm1222_vm11, 1.0, %v9641_v53  ;;  %v6654_v2 = vmul.f32 0.5, %v618_v15  ;;  %v1479_v44 = vand.u32 2147483647, %v1095_v24  ;;  %v1481_v63 = vand.u32 2147483647, %v1097_v14 }
 0x152   : > { %v6649_v13 = vpop.eup %5531  ;;  %v2755_v30 = vmul.f32 %v6605_v49, %v2627_v4  ;;  %5539 = vrcp.f32 %v1734_v48  ;;  %v620_v11 = vadd.f32 %v6414_v1, %v6385_v18  ;;  %v6660_v34 = vpop.f32.mrb[16].mxu1  ;;  %v3270_v22 = vmul.f32 %v3142_v33, %v1478_v36 }
 0x153   : > { %v1989_v41 = vmul.f32 1.0614054, %v6649_v13  ;;  %vm1223_vm12 = vcmp.ge.f32.partialorder %v1095_v24, 0.0  ;;  %v1607_v12 = vmul.f32 0.3275911, %v1479_v44  ;;  %v3143_v32 = vsub.f32 0.0, %v1479_v44 }
 0x154   : > { %v6666_v21 = vmul.f32 %v4032_v42, %v6457_v45  ;;  %v2883_v8 = vadd.f32 0.2548296, %v2755_v30  ;;  %v1609_v56 = vmul.f32 0.3275911, %v1481_v63  ;;  %vm1225_vm13 = vcmp.ge.f32.partialorder %v1097_v14, 0.0  ;;  %v6675_v30 = vpop.f32.mrb[17].mxu0 }
 0x155   : > { %v2117_v62 = vadd.f32 -1.4531521, %v1989_v41  ;;  %v5534_v40 = vpop.eup %5533  ;;  %v1735_v20 = vadd.f32 1.0, %v1607_v12  ;;  %v3271_v15 = vmul.f32 %v3143_v32, %v1479_v44  ;;  %v3145_v1 = vsub.f32 0.0, %v1481_v63 }
 0x156   : > { %9650 = vst [vmem:[#allocation24_spill] sm:$0xff] %v6666_v21  ;;  %v3011_v31 = vmul.f32 %v6605_v49, %v2883_v8  ;;  %v1737_v35 = vadd.f32 1.0, %v1609_v56  ;;  %v1096_v36 = vmul.f32 0.70710677, %v620_v11  ;;  %v3409_v61 = vmul.f32 1.442695, %v3270_v22 }
 0x157   : > { %v2245_v47 = vmul.f32 %v6649_v13, %v2117_v62  ;;  %v6670_v60 = vpop.eup %5535  ;;  %5541 = vrcp.f32 %v1735_v20  ;;  %v3273_v45 = vmul.f32 %v3145_v1, %v1481_v63  ;;  %v813_v42 = vadd.f32 %v6421_v7, %v6387_v19 }
 0x158   : > { %v5538_v33 = vpop.eup %5537  ;;  %v3651_v4 = vmul.f32 %v5534_v40, %v3011_v31  ;;  %v1988_v44 = vmul.f32 1.0614054, %v6670_v60  ;;  %5543 = vrcp.f32 %v1737_v35  ;;  %v6678_v49 = vmul.f32 %v4034_v26, %v6490_v54  ;;  %v9652_v35 = vld [vmem:[#allocation5_spill] sm:$0xff] }
 0x159   : > { %v2373_v48 = vadd.f32 1.4214138, %v2245_v47  ;;  %5545 = vpow2.f32 %v3405_v43  ;;  %v6681_v41 = vmul.f32 0.5, %v6632_v0  ;;  %v1480_v22 = vand.u32 2147483647, %v1096_v36 }
 0x15a   : > { %9651 = vst [vmem:[#allocation25_spill] sm:$0xff] %v6678_v49  ;;  %v3779_v63 = vsub.f32 1.0, %v3651_v4  ;;  %v2116_v7 = vadd.f32 -1.4531521, %v1988_v44  ;;  %v3411_v32 = vmul.f32 1.442695, %v3271_v15  ;;  %5547 = vpow2.f32 %v3409_v61 }
 0x15b   : > { %v2501_v12 = vmul.f32 %v6649_v13, %v2373_v48  ;;  %v6686_v28 = vsel %vm1223_vm12, 1.0, %v9641_v53  ;;  %v6690_v8 = vsel %vm1225_vm13, 1.0, %v9641_v53  ;;  %v1608_v54 = vmul.f32 0.3275911, %v1480_v22 }
 0x15c   : > { %v6692_v26 = vpop.eup %5539  ;;  %v2244_v43 = vmul.f32 %v6670_v60, %v2116_v7  ;;  %v3415_v62 = vmul.f32 1.442695, %v3273_v45  ;;  %v1098_v56 = vmul.f32 0.70710677, %v813_v42  ;;  %v3907_v40 = vmul.f32 %v3779_v63, %v6573_v52  ;;  %v6704_v45 = vpop.f32.mrb[17].mxu1 }
 0x15d   : > { %v2629_v0 = vadd.f32 -0.28449672, %v2501_v12  ;;  %v1990_v20 = vmul.f32 1.0614054, %v6692_v26  ;;  %vm1224_vm14 = vcmp.ge.f32.partialorder %v1096_v36, 0.0  ;;  %v1736_v24 = vadd.f32 1.0, %v1608_v54 }
 0x15e   : > { %v2372_v1 = vadd.f32 1.4214138, %v2244_v43  ;;  %5549 = vpow2.f32 %v3411_v32  ;;  %v6698_v14 = vmul.f32 0.5, %v620_v11  ;;  %v3144_v47 = vsub.f32 0.0, %v1480_v22 }
 0x15f   : > { %v2757_v15 = vmul.f32 %v6649_v13, %v2629_v0  ;;  %v2118_v31 = vadd.f32 -1.4531521, %v1990_v20  ;;  %5551 = vrcp.f32 %v1736_v24  ;;  %v6702_v61 = vadd.f32 %v9652_v35, %v6381_v16 }
 0x160   : > { %v2500_v4 = vmul.f32 %v6670_v60, %v2372_v1  ;;  %v6708_v36 = vsel %vm1224_vm14, 1.0, %v9641_v53  ;;  %v1482_v48 = vand.u32 2147483647, %v1098_v56  ;;  %v4035_v11 = vadd.f32 1.0, %v3907_v40 }
 0x161   : > { %v2885_v52 = vadd.f32 0.2548296, %v2757_v15  ;;  %v6710_v44 = vpop.eup %5541  ;;  %v2246_v63 = vmul.f32 %v6692_v26, %v2118_v31  ;;  %5553 = vpow2.f32 %v3415_v62  ;;  %v6713_v12 = vmul.f32 0.5, %v813_v42 }
 0x162   : > { %v6715_v7 = vpop.eup %5543  ;;  %v2628_v54 = vadd.f32 -0.28449672, %v2500_v4  ;;  %v1991_v0 = vmul.f32 1.0614054, %v6710_v44  ;;  %v1610_v43 = vmul.f32 0.3275911, %v1482_v48  ;;  %v3272_v1 = vmul.f32 %v3144_v47, %v1480_v22 }
 0x163   : > { %v3013_v32 = vmul.f32 %v6649_v13, %v2885_v52  ;;  %v5546_v20 = vpop.eup %5545  ;;  %v2374_v24 = vadd.f32 1.4214138, %v2246_v63  ;;  %v1993_v15 = vmul.f32 1.0614054, %v6715_v7  ;;  %v6721_v40 = vmul.f32 0.70710677, %v6702_v61 }
 0x164   : > { %v2756_v42 = vmul.f32 %v6670_v60, %v2628_v54  ;;  %v2119_v62 = vadd.f32 -1.4531521, %v1991_v0  ;;  %v1738_v35 = vadd.f32 1.0, %v1610_v43  ;;  %v5548_v50 = vpop.eup %5547  ;;  %vm1226_vm15 = vcmp.ge.f32.partialorder %v1098_v56, 0.0  ;;  %v9653_v54 = vld [vmem:[#allocation17_spill] sm:$0xff] }
 0x165   : > { %v3653_v31 = vmul.f32 %v5538_v33, %v3013_v32  ;;  %v2502_v13 = vmul.f32 %v6692_v26, %v2374_v24  ;;  %v2121_v52 = vadd.f32 -1.4531521, %v1993_v15  ;;  %v3146_v4 = vsub.f32 0.0, %v1482_v48  ;;  %v6735_v15 = vpop.f32.mrb[18].mxu0 }
 0x166   : > { %v2884_v5 = vadd.f32 0.2548296, %v2756_v42  ;;  %v2247_v63 = vmul.f32 %v6710_v44, %v2119_v62  ;;  %5555 = vrcp.f32 %v1738_v35  ;;  %v3413_v9 = vmul.f32 1.442695, %v3272_v1 }
 0x167   : > { %v3781_v23 = vsub.f32 1.0, %v3653_v31  ;;  %v2630_v22 = vadd.f32 -0.28449672, %v2502_v13  ;;  %v2249_v47 = vmul.f32 %v6715_v7, %v2121_v52  ;;  %v1483_v33 = vand.u32 2147483647, %v6721_v40 }
 0x168   : > { %v5550_v32 = vpop.eup %5549  ;;  %v6729_v0 = vmul.f32 %v4035_v11, %v9653_v54  ;;  %v3012_v43 = vmul.f32 %v6670_v60, %v2884_v5  ;;  %v2375_v24 = vadd.f32 1.4214138, %v2247_v63  ;;  %v6733_v56 = vsel %vm1226_vm15, 1.0, %v9641_v53 }
 0x169   : > { %v6737_v31 = vpop.eup %5551  ;;  %v2758_v42 = vmul.f32 %v6692_v26, %v2630_v22  ;;  %v2377_v62 = vadd.f32 1.4214138, %v2249_v47  ;;  %v3274_v1 = vmul.f32 %v3146_v4, %v1482_v48  ;;  %v1611_v35 = vmul.f32 0.3275911, %v1483_v33  ;;  %v9655_v48 = vld [vmem:[#allocation6_spill] sm:$0xff] }
 0x16a   : > { %9654 = vst [vmem:[#allocation5_spill] sm:$0xff] %v6729_v0  ;;  %v3909_v13 = vmul.f32 %v3781_v23, %v6638_v59  ;;  %v3652_v52 = vmul.f32 %v5546_v20, %v3012_v43  ;;  %v2503_v11 = vmul.f32 %v6710_v44, %v2375_v24  ;;  %v1992_v5 = vmul.f32 1.0614054, %v6737_v31 }
 0x16b   : > { %v5554_v60 = vpop.eup %5553  ;;  %v2886_v63 = vadd.f32 0.2548296, %v2758_v42  ;;  %v2505_v54 = vmul.f32 %v6715_v7, %v2377_v62  ;;  %v1739_v0 = vadd.f32 1.0, %v1611_v35  ;;  %v3147_v29 = vsub.f32 0.0, %v1483_v33  ;;  %v6750_v42 = vpop.f32.mrb[18].mxu1 }
 0x16c   : > { %v2631_v51 = vadd.f32 -0.28449672, %v2503_v11  ;;  %v2120_v49 = vadd.f32 -1.4531521, %v1992_v5  ;;  %vm1227_vm0 = vcmp.ge.f32.partialorder %v6721_v40, 0.0  ;;  %v817_v4 = vadd.f32 %v9655_v48, %v6383_v17 }
 0x16d   : > { %v3780_v22 = vsub.f32 1.0, %v3652_v52  ;;  %v3014_v23 = vmul.f32 %v6692_v26, %v2886_v63  ;;  %v2633_v59 = vadd.f32 -0.28449672, %v2505_v54  ;;  %5557 = vrcp.f32 %v1739_v0 }
 0x16e   : > { %v2759_v20 = vmul.f32 %v6710_v44, %v2631_v51  ;;  %v2248_v47 = vmul.f32 %v6737_v31, %v2120_v49  ;;  %v3417_v43 = vmul.f32 1.442695, %v3274_v1  ;;  %v3275_v24 = vmul.f32 %v3147_v29, %v1483_v33 }
 0x16f   : > { %v4037_v62 = vadd.f32 1.0, %v3909_v13  ;;  %v3654_v35 = vmul.f32 %v5548_v50, %v3014_v23  ;;  %v2761_v11 = vmul.f32 %v6715_v7, %v2633_v59  ;;  %v6754_v5 = vmul.f32 0.5, %v6702_v61 }
 0x170   : > { %v6756_v52 = vpop.eup %5555  ;;  %v2887_v26 = vadd.f32 0.2548296, %v2759_v20  ;;  %v2376_v63 = vadd.f32 1.4214138, %v2248_v47  ;;  %5559 = vpow2.f32 %v3413_v9  ;;  %v1101_v0 = vmul.f32 0.70710677, %v817_v4 }
 0x171   : > { %v3908_v51 = vmul.f32 %v3780_v22, %v6641_v38  ;;  %v2889_v49 = vadd.f32 0.2548296, %v2761_v11  ;;  %v1994_v29 = vmul.f32 1.0614054, %v6756_v52  ;;  %v6763_v50 = vsel %vm1227_vm0, 1.0, %v9641_v53  ;;  %v9656_v38 = vld [vmem:[#allocation7_spill] sm:$0xff] }
 0x172   : > { %v3015_v33 = vmul.f32 %v6710_v44, %v2887_v26  ;;  %v2504_v61 = vmul.f32 %v6737_v31, %v2376_v63  ;;  %5561 = vpow2.f32 %v3417_v43  ;;  %v3419_v1 = vmul.f32 1.442695, %v3275_v24  ;;  %v6773_v20 = vpop.f32.mrb[19].mxu0 }
 0x173   : > { %v3782_v13 = vsub.f32 1.0, %v3654_v35  ;;  %v3017_v9 = vmul.f32 %v6715_v7, %v2889_v49  ;;  %v2122_v54 = vadd.f32 -1.4531521, %v1994_v29  ;;  %v626_v48 = vadd.f32 %v9656_v38, %v6385_v18 }
 0x174   : > { %v6771_v22 = vmul.f32 %v4037_v62, %v6603_v10  ;;  %v3655_v23 = vmul.f32 %v5550_v32, %v3015_v33  ;;  %v2632_v40 = vadd.f32 -0.28449672, %v2504_v61  ;;  %v1485_v59 = vand.u32 2147483647, %v1101_v0 }
 0x175   : > { %v4036_v44 = vadd.f32 1.0, %v3908_v51  ;;  %v3657_v47 = vmul.f32 %v5554_v60, %v3017_v9  ;;  %v2250_v43 = vmul.f32 %v6756_v52, %v2122_v54  ;;  %v6776_v24 = vmul.f32 0.5, %v817_v4 }
 0x176   : > { %9657 = vst [vmem:[#allocation17_spill] sm:$0xff] %v6771_v22  ;;  %v3783_v35 = vsub.f32 1.0, %v3655_v23  ;;  %v2760_v7 = vmul.f32 %v6737_v31, %v2632_v40  ;;  %v1613_v11 = vmul.f32 0.3275911, %v1485_v59  ;;  %v3149_v26 = vsub.f32 0.0, %v1485_v59 }
 0x177   : > { %v6779_v63 = vpop.eup %5557  ;;  %v3910_v10 = vmul.f32 %v3782_v13, %v6652_v37  ;;  %v3785_v32 = vsub.f32 1.0, %v3657_v47  ;;  %v2378_v62 = vadd.f32 1.4214138, %v2250_v43  ;;  %v1100_v49 = vmul.f32 0.70710677, %v626_v48  ;;  %v6787_v13 = vpop.f32.mrb[19].mxu1 }
 0x178   : > { %v2888_v29 = vadd.f32 0.2548296, %v2760_v7  ;;  %v1995_v51 = vmul.f32 1.0614054, %v6779_v63  ;;  %5563 = vpow2.f32 %v3419_v1  ;;  %v1741_v60 = vadd.f32 1.0, %v1613_v11 }
 0x179   : > { %v3911_v4 = vmul.f32 %v3783_v35, %v6686_v28  ;;  %v2506_v33 = vmul.f32 %v6756_v52, %v2378_v62  ;;  %vm1229_vm1 = vcmp.ge.f32.partialorder %v1101_v0, 0.0  ;;  %v3277_v61 = vmul.f32 %v3149_v26, %v1485_v59  ;;  %v9659_v28 = vld [vmem:[#allocation8_spill] sm:$0xff] }
 0x17a   : > { %v5560_v9 = vpop.eup %5559  ;;  %v3913_v54 = vmul.f32 %v3785_v32, %v6690_v8  ;;  %v3016_v38 = vmul.f32 %v6737_v31, %v2888_v29  ;;  %v2123_v37 = vadd.f32 -1.4531521, %v1995_v51  ;;  %5565 = vrcp.f32 %v1741_v60 }
 0x17b   : > { %v6790_v23 = vmul.f32 %v4036_v44, %v6620_v27  ;;  %v4038_v1 = vadd.f32 1.0, %v3910_v10  ;;  %v2634_v40 = vadd.f32 -0.28449672, %v2506_v33  ;;  %v819_v47 = vadd.f32 %v9659_v28, %v6387_v19 }
 0x17c   : > { %v5562_v43 = vpop.eup %5561  ;;  %v3656_v0 = vmul.f32 %v5560_v9, %v3016_v38  ;;  %v2251_v59 = vmul.f32 %v6779_v63, %v2123_v37  ;;  %v6796_v8 = vsel %vm1229_vm1, 1.0, %v9641_v53  ;;  %v1484_v31 = vand.u32 2147483647, %v1100_v49 }
 0x17d   : > { %9658 = vst [vmem:[#allocation6_spill] sm:$0xff] %v6790_v23  ;;  %v2762_v35 = vmul.f32 %v6756_v52, %v2634_v40  ;;  %v3423_v7 = vmul.f32 1.442695, %v3277_v61  ;;  %v6799_v11 = vmul.f32 0.5, %v626_v48  ;;  %vm1228_vm2 = vcmp.ge.f32.partialorder %v1100_v49, 0.0  ;;  %v9661_v48 = vld [vmem:[#allocation9_spill] sm:$0xff] }
 0x17e   : > { %v4039_v27 = vadd.f32 1.0, %v3911_v4  ;;  %v4041_v44 = vadd.f32 1.0, %v3913_v54  ;;  %v2379_v26 = vadd.f32 1.4214138, %v2251_v59  ;;  %v1612_v10 = vmul.f32 0.3275911, %v1484_v31 }
 0x17f   : > { %v6802_v32 = vmul.f32 %v4038_v1, %v6646_v57  ;;  %v3784_v62 = vsub.f32 1.0, %v3656_v0  ;;  %v2890_v29 = vadd.f32 0.2548296, %v2762_v35  ;;  %v1102_v51 = vmul.f32 0.70710677, %v819_v47 }
 0x180   : > { %v2507_v60 = vmul.f32 %v6779_v63, %v2379_v26  ;;  %v6806_v33 = vsel %vm1228_vm2, 1.0, %v9641_v53  ;;  %v1740_v9 = vadd.f32 1.0, %v1612_v10  ;;  %v628_v61 = vadd.f32 %v9661_v48, %v6381_v16 }
 0x181   : > { %9660 = vst [vmem:[#allocation7_spill] sm:$0xff] %v6802_v32  ;;  %v3018_v49 = vmul.f32 %v6756_v52, %v2890_v29  ;;  %5567 = vpow2.f32 %v3423_v7  ;;  %v3148_v4 = vsub.f32 0.0, %v1484_v31  ;;  %v1486_v54 = vand.u32 2147483647, %v1102_v51 }
 0x182   : > { %v5564_v38 = vpop.eup %5563  ;;  %v6812_v57 = vmul.f32 %v4039_v27, %v6654_v2  ;;  %v6815_v37 = vmul.f32 %v4041_v44, %v6681_v41  ;;  %v2635_v1 = vadd.f32 -0.28449672, %v2507_v60  ;;  %5569 = vrcp.f32 %v1740_v9  ;;  %v9664_v2 = vld [vmem:[#allocation10_spill] sm:$0xff]  ;;  %v6826_v60 = vpop.f32.mrb[20].mxu0 }
 0x183   : > { %v3912_v40 = vmul.f32 %v3784_v62, %v6708_v36  ;;  %v3658_v28 = vmul.f32 %v5562_v43, %v3018_v49  ;;  %v1614_v0 = vmul.f32 0.3275911, %v1486_v54  ;;  %v3150_v59 = vsub.f32 0.0, %v1486_v54 }
 0x184   : > { %9662 = vst [vmem:[#allocation8_spill] sm:$0xff] %v6812_v57  ;;  %9663 = vst [vmem:[#allocation9_spill] sm:$0xff] %v6815_v37  ;;  %v6818_v35 = vpop.eup %5565  ;;  %v2763_v52 = vmul.f32 %v6779_v63, %v2635_v1  ;;  %v6821_v7 = vmul.f32 0.5, %v819_v47  ;;  %v1103_v26 = vmul.f32 0.70710677, %v628_v61  ;;  %v821_v27 = vadd.f32 %v9664_v2, %v6383_v17  ;;  %v6832_v37 = vpop.f32.mrb[20].mxu1 }
 0x185   : > { %v3786_v10 = vsub.f32 1.0, %v3658_v28  ;;  %v1997_v41 = vmul.f32 1.0614054, %v6818_v35  ;;  %v3276_v44 = vmul.f32 %v3148_v4, %v1484_v31  ;;  %v1742_v29 = vadd.f32 1.0, %v1614_v0 }
 0x186   : > { %v2891_v36 = vadd.f32 0.2548296, %v2763_v52  ;;  %vm1230_vm3 = vcmp.ge.f32.partialorder %v1102_v51, 0.0  ;;  %v6828_v43 = vmul.f32 0.5, %v628_v61  ;;  %v1487_v62 = vand.u32 2147483647, %v1103_v26 }
 0x187   : > { %v4040_v9 = vadd.f32 1.0, %v3912_v40  ;;  %v2125_v48 = vadd.f32 -1.4531521, %v1997_v41  ;;  %5571 = vrcp.f32 %v1742_v29  ;;  %v3278_v47 = vmul.f32 %v3150_v59, %v1486_v54  ;;  %v9665_v54 = vld [vmem:[#allocation11_spill] sm:$0xff] }
 0x188   : > { %v3914_v49 = vmul.f32 %v3786_v10, %v6733_v56  ;;  %v3019_v1 = vmul.f32 %v6779_v63, %v2891_v36  ;;  %v1615_v28 = vmul.f32 0.3275911, %v1487_v62  ;;  %v3151_v2 = vsub.f32 0.0, %v1487_v62 }
 0x189   : > { %v2253_v31 = vmul.f32 %v6818_v35, %v2125_v48  ;;  %v3421_v4 = vmul.f32 1.442695, %v3276_v44  ;;  %v6836_v51 = vsel %vm1230_vm3, 1.0, %v9641_v53  ;;  %v1105_v61 = vmul.f32 0.70710677, %v821_v27 }
 0x18a   : > { %v3659_v0 = vmul.f32 %v5564_v38, %v3019_v1  ;;  %v1743_v40 = vadd.f32 1.0, %v1615_v28  ;;  %v3279_v52 = vmul.f32 %v3151_v2, %v1487_v62  ;;  %v630_v59 = vadd.f32 %v9665_v54, %v6385_v18  ;;  %v6849_v54 = vpop.f32.mrb[21].mxu0 }
 0x18b   : > { %v5568_v56 = vpop.eup %5567  ;;  %v2381_v10 = vadd.f32 1.4214138, %v2253_v31  ;;  %vm1231_vm4 = vcmp.ge.f32.partialorder %v1103_v26, 0.0  ;;  %v6840_v63 = vmul.f32 0.5, %v821_v27  ;;  %v1489_v41 = vand.u32 2147483647, %v1105_v61 }
 0x18c   : > { %v6842_v29 = vpop.eup %5569  ;;  %v4042_v36 = vadd.f32 1.0, %v3914_v49  ;;  %v3425_v44 = vmul.f32 1.442695, %v3278_v47  ;;  %5573 = vrcp.f32 %v1743_v40  ;;  %vm1233_vm5 = vcmp.ge.f32.partialorder %v1105_v61, 0.0  ;;  %9667 = vst [vmem:[#allocation11_spill] sm:$0xff] %v6849_v54  ;;  %v5493_v49 = vld [vmem:[%s9610_s3 + $0x78] sm:$0xff]  }
 0x18d   : > { %v3787_v48 = vsub.f32 1.0, %v3659_v0  ;;  %v2509_v38 = vmul.f32 %v6818_v35, %v2381_v10  ;;  %v1996_v62 = vmul.f32 1.0614054, %v6842_v29  ;;  %v1617_v1 = vmul.f32 0.3275911, %v1489_v41  ;;  %5148 = vmatprep.subr.bf16.mxu0 %v5493_v49 }
 0x18e   : > { %v6847_v28 = vmul.f32 %v4040_v9, %v6698_v14  ;;  %v3427_v2 = vmul.f32 1.442695, %v3279_v52  ;;  %v3153_v31 = vsub.f32 0.0, %v1489_v41  ;;  %v1104_v27 = vmul.f32 0.70710677, %v630_v59  ;;  %v9668_v9 = vld [vmem:[#allocation12_spill] sm:$0xff] }
 0x18f   : > { %v2637_v22 = vadd.f32 -0.28449672, %v2509_v38  ;;  %v2124_v57 = vadd.f32 -1.4531521, %v1996_v62  ;;  %5575 = vpow2.f32 %v3421_v4  ;;  %v1745_v47 = vadd.f32 1.0, %v1617_v1 }
 0x190   : > { %9666 = vst [vmem:[#allocation10_spill] sm:$0xff] %v6847_v28  ;;  %5577 = vpow2.f32 %v3425_v44  ;;  %v6856_v0 = vsel %vm1231_vm4, 1.0, %v9641_v53  ;;  %v1488_v14 = vand.u32 2147483647, %v1104_v27  ;;  %v823_v40 = vadd.f32 %v9668_v9, %v6387_v19 }
 0x191   : > { %v6860_v52 = vpop.eup %5571  ;;  %v3915_v10 = vmul.f32 %v3787_v48, %v6763_v50  ;;  %v2765_v4 = vmul.f32 %v6818_v35, %v2637_v22  ;;  %v2252_v38 = vmul.f32 %v6842_v29, %v2124_v57  ;;  %5579 = vrcp.f32 %v1745_v47 }
 0x192   : > { %v6866_v44 = vmul.f32 %v4042_v36, %v6713_v12  ;;  %v1998_v26 = vmul.f32 1.0614054, %v6860_v52  ;;  %v6871_v62 = vsel %vm1233_vm5, 1.0, %v9641_v53  ;;  %v1616_v1 = vmul.f32 0.3275911, %v1488_v14 }
 0x193   : > { %v2893_v9 = vadd.f32 0.2548296, %v2765_v4  ;;  %v2380_v32 = vadd.f32 1.4214138, %v2252_v38  ;;  %5581 = vpow2.f32 %v3427_v2  ;;  %v3281_v50 = vmul.f32 %v3153_v31, %v1489_v41 }
 0x194   : > { %9669 = vst [vmem:[#allocation12_spill] sm:$0xff] %v6866_v44  ;;  %v2126_v48 = vadd.f32 -1.4531521, %v1998_v26  ;;  %v1744_v22 = vadd.f32 1.0, %v1616_v1  ;;  %v3152_v28 = vsub.f32 0.0, %v1488_v14  ;;  %v4043_v47 = vadd.f32 1.0, %v3915_v10 }
 0x195   : > { %v1106_v57 = vmul.f32 0.70710677, %v823_v40  ;;  %v3021_v49 = vmul.f32 %v6818_v35, %v2893_v9  ;;  %v2508_v12 = vmul.f32 %v6842_v29, %v2380_v32  ;;  %v6875_v36 = vmul.f32 0.5, %v630_v59  ;;  %v6877_v44 = vpop.f32.mrb[21].mxu1  ;;  %v9671_v10 = vld [vmem:[#allocation13_spill] sm:$0xff] }
 0x196   : > { %9670 = vst [vmem:[#allocation26_spill] sm:$0xff] %v6877_v44  ;;  %v6879_v61 = vpop.eup %5573  ;;  %v2254_v4 = vmul.f32 %v6860_v52, %v2126_v48  ;;  %vm1232_vm6 = vcmp.ge.f32.partialorder %v1104_v27, 0.0  ;;  %5583 = vrcp.f32 %v1744_v22  ;;  %v634_v35 = vadd.f32 %v9671_v10, %v6381_v16 }
 0x197   : > { %v1490_v41 = vand.u32 2147483647, %v1106_v57  ;;  %v3661_v2 = vmul.f32 %v5568_v56, %v3021_v49  ;;  %v2636_v31 = vadd.f32 -0.28449672, %v2508_v12  ;;  %v1999_v38 = vmul.f32 1.0614054, %v6879_v61 }
 0x198   : > { %v2382_v26 = vadd.f32 1.4214138, %v2254_v4  ;;  %v3431_v32 = vmul.f32 1.442695, %v3281_v50  ;;  %v3280_v59 = vmul.f32 %v3152_v28, %v1488_v14  ;;  %v6886_v23 = vmul.f32 %v4043_v47, %v6754_v5  ;;  %v5494_v56 = vld [vmem:[%s9610_s3 + $0x38] sm:$0xff]  }
 0x199   : > { %v1618_v1 = vmul.f32 0.3275911, %v1490_v41  ;;  %v5576_v9 = vpop.eup %5575  ;;  %v2764_v48 = vmul.f32 %v6842_v29, %v2636_v31  ;;  %v2127_v27 = vadd.f32 -1.4531521, %v1999_v38  ;;  %v6890_v22 = vsel %vm1232_vm6, 1.0, %v9641_v53  ;;  %5149 = vmatpush3.bf16.msra.mxu0 %v5494_v56  ;;  %v6908_v56 = vpop.f32.mrb[22].mxu0 }
 0x19a   : > { %9672 = vst [vmem:[#allocation13_spill] sm:$0xff] %v6886_v23  ;;  %v5578_v49 = vpop.eup %5577  ;;  %v2510_v12 = vmul.f32 %v6860_v52, %v2382_v26  ;;  %vm1234_vm7 = vcmp.ge.f32.partialorder %v1106_v57, 0.0  ;;  %v3154_v14 = vsub.f32 0.0, %v1490_v41  ;;  %v3789_v5 = vsub.f32 1.0, %v3661_v2  ;;  %9673 = vst [vmem:[#allocation27_spill] sm:$0xff] %v6908_v56 }
 0x19b   : > { %v1746_v28 = vadd.f32 1.0, %v1618_v1  ;;  %v6896_v50 = vpop.eup %5579  ;;  %v2892_v47 = vadd.f32 0.2548296, %v2764_v48  ;;  %v2255_v4 = vmul.f32 %v6879_v61, %v2127_v27  ;;  %v1107_v31 = vmul.f32 0.70710677, %v634_v35 }
 0x19c   : > { %v2638_v38 = vadd.f32 -0.28449672, %v2510_v12  ;;  %v2001_v10 = vmul.f32 1.0614054, %v6896_v50  ;;  %v3429_v23 = vmul.f32 1.442695, %v3280_v59  ;;  %v3282_v27 = vmul.f32 %v3154_v14, %v1490_v41 }
 0x19d   : > { %5585 = vrcp.f32 %v1746_v28  ;;  %v5582_v39 = vpop.eup %5581  ;;  %v3020_v21 = vmul.f32 %v6842_v29, %v2892_v47  ;;  %v2383_v26 = vadd.f32 1.4214138, %v2255_v4  ;;  %v6901_v1 = vmul.f32 0.5, %v823_v40  ;;  %v9674_v14 = vld [vmem:[#allocation14_spill] sm:$0xff] }
 0x19e   : > { %5587 = vpow2.f32 %v3431_v32  ;;  %v2766_v58 = vmul.f32 %v6860_v52, %v2638_v38  ;;  %v2129_v2 = vadd.f32 -1.4531521, %v2001_v10  ;;  %v6906_v48 = vsel %vm1234_vm7, 1.0, %v9641_v53 }
 0x19f   : > { %v3917_v59 = vmul.f32 %v3789_v5, %v6796_v8  ;;  %v3660_v12 = vmul.f32 %v5576_v9, %v3020_v21  ;;  %v2511_v28 = vmul.f32 %v6879_v61, %v2383_v26  ;;  %v1491_v29 = vand.u32 2147483647, %v1107_v31 }
 0x1a0   : > { %v6912_v47 = vpop.eup %5583  ;;  %v2894_v40 = vadd.f32 0.2548296, %v2766_v58  ;;  %v2257_v32 = vmul.f32 %v6896_v50, %v2129_v2  ;;  %5589 = vpow2.f32 %v3429_v23  ;;  %v6915_v4 = vmul.f32 0.5, %v634_v35  ;;  %v6922_v23 = vpop.f32.mrb[22].mxu1 }
 0x1a1   : > { %v3788_v57 = vsub.f32 1.0, %v3660_v12  ;;  %v2639_v38 = vadd.f32 -0.28449672, %v2511_v28  ;;  %v2000_v41 = vmul.f32 1.0614054, %v6912_v47  ;;  %v827_v10 = vadd.f32 %v9674_v14, %v6383_v17 }
 0x1a2   : > { %v3022_v21 = vmul.f32 %v6860_v52, %v2894_v40  ;;  %v2385_v8 = vadd.f32 1.4214138, %v2257_v32  ;;  %v1619_v9 = vmul.f32 0.3275911, %v1491_v29  ;;  %v3155_v5 = vsub.f32 0.0, %v1491_v29 }
 0x1a3   : > { %v4045_v26 = vadd.f32 1.0, %v3917_v59  ;;  %v2767_v58 = vmul.f32 %v6879_v61, %v2639_v38  ;;  %v2128_v56 = vadd.f32 -1.4531521, %v2000_v41  ;;  %v3433_v2 = vmul.f32 1.442695, %v3282_v27  ;;  %v9675_v27 = vld [vmem:[#allocation15_spill] sm:$0xff] }
 0x1a4   : > { %v3916_v35 = vmul.f32 %v3788_v57, %v6806_v33  ;;  %v3662_v12 = vmul.f32 %v5578_v49, %v3022_v21  ;;  %v2513_v28 = vmul.f32 %v6896_v50, %v2385_v8  ;;  %v1747_v44 = vadd.f32 1.0, %v1619_v9  ;;  %v5495_v33 = vld [vmem:[%s9610_s3 + $0xf8] sm:$0xff]  }
 0x1a5   : > { %v2895_v54 = vadd.f32 0.2548296, %v2767_v58  ;;  %v2256_v14 = vmul.f32 %v6912_v47, %v2128_v56  ;;  %vm1235_vm8 = vcmp.ge.f32.partialorder %v1107_v31, 0.0  ;;  %v6927_v52 = vmul.f32 0.70710677, %v827_v10  ;;  %5260 = vmatprep.subr.bf16.mxu1 %v5495_v33  ;;  %v6952_v33 = vpop.f32.mrb[23].mxu0 }
 0x1a6   : > { %v2641_v59 = vadd.f32 -0.28449672, %v2513_v28  ;;  %5591 = vrcp.f32 %v1747_v44  ;;  %v3283_v32 = vmul.f32 %v3155_v5, %v1491_v29  ;;  %v6933_v38 = vadd.f32 %v9675_v27, %v6385_v18 }
 0x1a7   : > { %v6929_v40 = vpop.eup %5585  ;;  %v3023_v57 = vmul.f32 %v6879_v61, %v2895_v54  ;;  %v2384_v56 = vadd.f32 1.4214138, %v2256_v14  ;;  %5593 = vpow2.f32 %v3433_v2  ;;  %v4044_v21 = vadd.f32 1.0, %v3916_v35 }
 0x1a8   : > { %v5588_v49 = vpop.eup %5587  ;;  %v2002_v41 = vmul.f32 1.0614054, %v6929_v40  ;;  %v3790_v8 = vsub.f32 1.0, %v3662_v12  ;;  %v2769_v44 = vmul.f32 %v6896_v50, %v2641_v59  ;;  %v6943_v29 = vsel %vm1235_vm8, 1.0, %v9641_v53 }
 0x1a9   : > { %v3663_v9 = vmul.f32 %v5582_v39, %v3023_v57  ;;  %v2512_v5 = vmul.f32 %v6912_v47, %v2384_v56  ;;  %v1493_v28 = vand.u32 2147483647, %v6927_v52  ;;  %v6948_v61 = vmul.f32 %v4045_v26, %v6776_v24 }
 0x1aa   : > { %v2130_v58 = vadd.f32 -1.4531521, %v2002_v41  ;;  %v5590_v54 = vpop.eup %5589  ;;  %v2897_v2 = vadd.f32 0.2548296, %v2769_v44  ;;  %v3435_v35 = vmul.f32 1.442695, %v3283_v32  ;;  %v3918_v24 = vmul.f32 %v3790_v8, %v6836_v51 }
 0x1ab   : > { %9676 = vst [vmem:[#allocation14_spill] sm:$0xff] %v6948_v61  ;;  %v1108_v12 = vmul.f32 0.70710677, %v6933_v38  ;;  %v3791_v14 = vsub.f32 1.0, %v3663_v9  ;;  %v2640_v59 = vadd.f32 -0.28449672, %v2512_v5 }
 0x1ac   : > { %v2258_v31 = vmul.f32 %v6929_v40, %v2130_v58  ;;  %v1621_v27 = vmul.f32 0.3275911, %v1493_v28  ;;  %v3025_v39 = vmul.f32 %v6896_v50, %v2897_v2  ;;  %v6955_v57 = vmul.f32 0.5, %v827_v10 }
 0x1ad   : > { %vm1237_vm9 = vcmp.ge.f32.partialorder %v6927_v52, 0.0  ;;  %v3157_v56 = vsub.f32 0.0, %v1493_v28  ;;  %v2768_v26 = vmul.f32 %v6912_v47, %v2640_v59  ;;  %v3919_v44 = vmul.f32 %v3791_v14, %v6856_v0  ;;  %v6969_v14 = vpop.f32.mrb[23].mxu1 }
 0x1ae   : > { %v2386_v32 = vadd.f32 1.4214138, %v2258_v31  ;;  %v1749_v41 = vadd.f32 1.0, %v1621_v27  ;;  %v3665_v9 = vmul.f32 %v5588_v49, %v3025_v39  ;;  %5595 = vpow2.f32 %v3435_v35 }
 0x1af   : > { %v1492_v5 = vand.u32 2147483647, %v1108_v12  ;;  %v6962_v58 = vmul.f32 %v4044_v21, %v6799_v11  ;;  %v2896_v50 = vadd.f32 0.2548296, %v2768_v26  ;;  %v3285_v51 = vmul.f32 %v3157_v56, %v1493_v28  ;;  %v9678_v56 = vld [vmem:[#allocation16_spill] sm:$0xff] }
 0x1b0   : > { %v2514_v10 = vmul.f32 %v6929_v40, %v2386_v32  ;;  %5597 = vrcp.f32 %v1749_v41  ;;  %v6965_v2 = vpop.eup %5591  ;;  %v3793_v61 = vsub.f32 1.0, %v3665_v9  ;;  %v4046_v27 = vadd.f32 1.0, %v3918_v24 }
 0x1b1   : > { %9677 = vst [vmem:[#allocation15_spill] sm:$0xff] %v6962_v58  ;;  %v1620_v8 = vmul.f32 0.3275911, %v1492_v5  ;;  %v3156_v59 = vsub.f32 0.0, %v1492_v5  ;;  %v5594_v31 = vpop.eup %5593  ;;  %v3024_v0 = vmul.f32 %v6912_v47, %v2896_v50  ;;  %v2003_v35 = vmul.f32 1.0614054, %v6965_v2 }
 0x1b2   : > { %v2642_v49 = vadd.f32 -0.28449672, %v2514_v10  ;;  %v4047_v11 = vadd.f32 1.0, %v3919_v44  ;;  %v3921_v21 = vmul.f32 %v3793_v61, %v6871_v62  ;;  %vm1236_vm10 = vcmp.ge.f32.partialorder %v1108_v12, 0.0  ;;  %v5496_v47 = vld [vmem:[%s9610_s3 + $0xb8] sm:$0xff]  }
 0x1b3   : > { %v1748_v39 = vadd.f32 1.0, %v1620_v8  ;;  %v2131_v32 = vadd.f32 -1.4531521, %v2003_v35  ;;  %v3284_v28 = vmul.f32 %v3156_v59, %v1492_v5  ;;  %v829_v41 = vadd.f32 %v9678_v56, %v6387_v19  ;;  %5261 = vmatpush3.bf16.msra.mxu1 %v5496_v47 }
 0x1b4   : > { %v2770_v26 = vmul.f32 %v6929_v40, %v2642_v49  ;;  %v3664_v24 = vmul.f32 %v5590_v54, %v3024_v0  ;;  %v3439_v9 = vmul.f32 1.442695, %v3285_v51  ;;  %v638_v44 = vadd.f32 %v6546_v25, %v6381_v16 }
 0x1b5   : > { %5599 = vrcp.f32 %v1748_v39  ;;  %v4049_v62 = vadd.f32 1.0, %v3921_v21  ;;  %v2259_v50 = vmul.f32 %v6965_v2, %v2131_v32  ;;  %v6984_v5 = vsel %vm1237_vm9, 1.0, %v9641_v53 }
 0x1b6   : > { %v2898_v61 = vadd.f32 0.2548296, %v2770_v26  ;;  %v6987_v10 = vmul.f32 %v4046_v27, %v6821_v7  ;;  %v6990_v54 = vmul.f32 0.5, %v6933_v38  ;;  %v6994_v51 = vsel %vm1236_vm10, 1.0, %v9641_v53 }
 0x1b7   : > { %v1110_v25 = vmul.f32 0.70710677, %v829_v41  ;;  %v6997_v8 = vmul.f32 %v4047_v11, %v6828_v43  ;;  %v2387_v52 = vadd.f32 1.4214138, %v2259_v50  ;;  %v3437_v0 = vmul.f32 1.442695, %v3284_v28 }
 0x1b8   : > { %9679 = vst [vmem:[#allocation16_spill] sm:$0xff] %v6987_v10  ;;  %v3026_v59 = vmul.f32 %v6929_v40, %v2898_v61  ;;  %v5596_v49 = vpop.eup %5595  ;;  %v3792_v35 = vsub.f32 1.0, %v3664_v24  ;;  %5601 = vpow2.f32 %v3439_v9  ;;  %v1111_v27 = vmul.f32 0.70710677, %v638_v44  ;;  %v7013_v24 = vpop.f32.mrb[24].mxu0 }
 0x1b9   : > { %9680 = vst [vmem:[#allocation28_spill] sm:$0xff] %v6997_v8  ;;  %v1494_v7 = vand.u32 2147483647, %v1110_v25  ;;  %v7003_v38 = vmul.f32 %v4049_v62, %v6840_v63  ;;  %v2515_v39 = vmul.f32 %v6965_v2, %v2387_v52  ;;  %v7006_v26 = vmul.f32 0.5, %v829_v41  ;;  %v7020_v52 = vpop.f32.mrb[24].mxu1 }
 0x1ba   : > { %v7000_v21 = vpop.eup %5597  ;;  %v3666_v12 = vmul.f32 %v5594_v31, %v3026_v59  ;;  %v831_v32 = vadd.f32 %v6555_v46, %v6383_v17  ;;  %5603 = vpow2.f32 %v3437_v0  ;;  %v7011_v47 = vmul.f32 0.5, %v638_v44 }
 0x1bb   : > { %9681 = vst [vmem:[#allocation29_spill] sm:$0xff] %v7003_v38  ;;  %v2005_v43 = vmul.f32 1.0614054, %v7000_v21  ;;  %v1622_v40 = vmul.f32 0.3275911, %v1494_v7  ;;  %v3158_v11 = vsub.f32 0.0, %v1494_v7  ;;  %v3920_v63 = vmul.f32 %v3792_v35, %v6890_v22 }
 0x1bc   : > { %v3794_v28 = vsub.f32 1.0, %v3666_v12  ;;  %v2643_v56 = vadd.f32 -0.28449672, %v2515_v39  ;;  %v1495_v41 = vand.u32 2147483647, %v1111_v27  ;;  %vm1238_vm11 = vcmp.ge.f32.partialorder %v1110_v25, 0.0 }
 0x1bd   : > { %v2133_v31 = vadd.f32 -1.4531521, %v2005_v43  ;;  %v1750_v9 = vadd.f32 1.0, %v1622_v40  ;;  %v3286_v61 = vmul.f32 %v3158_v11, %v1494_v7  ;;  %vm1239_vm12 = vcmp.ge.f32.partialorder %v1111_v27, 0.0 }
 0x1be   : > { %v2771_v62 = vmul.f32 %v6965_v2, %v2643_v56  ;;  %v1623_v59 = vmul.f32 0.3275911, %v1495_v41  ;;  %v1113_v44 = vmul.f32 0.70710677, %v831_v32  ;;  %v3922_v0 = vmul.f32 %v3794_v28, %v6906_v48 }
 0x1bf   : > { %v7017_v50 = vpop.eup %5599  ;;  %v2261_v46 = vmul.f32 %v7000_v21, %v2133_v31  ;;  %5605 = vrcp.f32 %v1750_v9  ;;  %v3159_v12 = vsub.f32 0.0, %v1495_v41  ;;  %v4048_v39 = vadd.f32 1.0, %v3920_v63 }
 0x1c0   : > { %v2899_v22 = vadd.f32 0.2548296, %v2771_v62  ;;  %v2004_v35 = vmul.f32 1.0614054, %v7017_v50  ;;  %v1751_v40 = vadd.f32 1.0, %v1623_v59  ;;  %v640_v7 = vadd.f32 %v6584_v6, %v6385_v18 }
 0x1c1   : > { %v2389_v43 = vadd.f32 1.4214138, %v2261_v46  ;;  %v7029_v31 = vsel %vm1238_vm11, 1.0, %v9641_v53  ;;  %v3287_v9 = vmul.f32 %v3159_v12, %v1495_v41  ;;  %v7034_v28 = vsel %vm1239_vm12, 1.0, %v9641_v53  ;;  %v7039_v41 = vpop.f32.mrb[25].mxu0 }
 0x1c2   : > { %v3027_v11 = vmul.f32 %v6965_v2, %v2899_v22  ;;  %v2132_v56 = vadd.f32 -1.4531521, %v2004_v35  ;;  %v5602_v38 = vpop.eup %5601  ;;  %5607 = vrcp.f32 %v1751_v40  ;;  %v1497_v63 = vand.u32 2147483647, %v1113_v44 }
 0x1c3   : > { %v2517_v48 = vmul.f32 %v7000_v21, %v2389_v43  ;;  %v4050_v62 = vadd.f32 1.0, %v3922_v0  ;;  %v3441_v46 = vmul.f32 1.442695, %v3286_v61  ;;  %v7037_v2 = vmul.f32 0.5, %v831_v32 }
 0x1c4   : > { %v2260_v6 = vmul.f32 %v7017_v50, %v2132_v56  ;;  %v3667_v59 = vmul.f32 %v5596_v49, %v3027_v11  ;;  %vm1241_vm13 = vcmp.ge.f32.partialorder %v1113_v44, 0.0  ;;  %v1625_v22 = vmul.f32 0.3275911, %v1497_v63  ;;  %v5604_v35 = vpop.eup %5603  ;;  %v7064_v44 = vpop.f32.mrb[25].mxu1 }
 0x1c5   : > { %v2645_v25 = vadd.f32 -0.28449672, %v2517_v48  ;;  %v7042_v12 = vmul.f32 %v4048_v39, %v6875_v36  ;;  %v3443_v43 = vmul.f32 1.442695, %v3287_v9  ;;  %v1112_v40 = vmul.f32 0.70710677, %v640_v7 }
 0x1c6   : > { %v2388_v27 = vadd.f32 1.4214138, %v2260_v6  ;;  %v1753_v8 = vadd.f32 1.0, %v1625_v22  ;;  %v3161_v56 = vsub.f32 0.0, %v1497_v63  ;;  %v833_v32 = vadd.f32 %v6597_v3, %v6387_v19  ;;  %9684 = vst [vmem:[#allocation32_spill] sm:$0xff] %v7064_v44 }
 0x1c7   : > { %9682 = vst [vmem:[#allocation30_spill] sm:$0xff] %v7042_v12  ;;  %v2773_v0 = vmul.f32 %v7000_v21, %v2645_v25  ;;  %v7048_v49 = vmul.f32 %v4050_v62, %v6901_v1  ;;  %5609 = vpow2.f32 %v3441_v46  ;;  %v1496_v11 = vand.u32 2147483647, %v1112_v40 }
 0x1c8   : > { %v2516_v61 = vmul.f32 %v7017_v50, %v2388_v27  ;;  %v3795_v36 = vsub.f32 1.0, %v3667_v59  ;;  %v7055_v9 = vsel %vm1241_vm13, 1.0, %v9641_v53  ;;  %5611 = vrcp.f32 %v1753_v8 }
 0x1c9   : > { %9683 = vst [vmem:[#allocation31_spill] sm:$0xff] %v7048_v49  ;;  %v7051_v48 = vpop.eup %5605  ;;  %v2901_v39 = vadd.f32 0.2548296, %v2773_v0  ;;  %5613 = vpow2.f32 %v3443_v43  ;;  %v7058_v3 = vmul.f32 0.5, %v640_v7  ;;  %v3289_v62 = vmul.f32 %v3161_v56, %v1497_v63 }
 0x1ca   : > { %v2644_v6 = vadd.f32 -0.28449672, %v2516_v61  ;;  %v2006_v25 = vmul.f32 1.0614054, %v7051_v48  ;;  %v1624_v46 = vmul.f32 0.3275911, %v1496_v11  ;;  %v3923_v61 = vmul.f32 %v3795_v36, %v6943_v29 }
 0x1cb   : > { %v3029_v1 = vmul.f32 %v7000_v21, %v2901_v39  ;;  %v1114_v22 = vmul.f32 0.70710677, %v833_v32  ;;  %v3160_v0 = vsub.f32 0.0, %v1496_v11  ;;  %v7062_v49 = vmul.f32 0.5, %v833_v32 }
 0x1cc   : > { %v2772_v27 = vmul.f32 %v7017_v50, %v2644_v6  ;;  %v2134_v59 = vadd.f32 -1.4531521, %v2006_v25  ;;  %v7066_v8 = vpop.eup %5607  ;;  %v1752_v7 = vadd.f32 1.0, %v1624_v46  ;;  %vm1240_vm14 = vcmp.ge.f32.partialorder %v1112_v40, 0.0 }
 0x1cd   : > { %v3669_v43 = vmul.f32 %v5602_v38, %v3029_v1  ;;  %v1498_v10 = vand.u32 2147483647, %v1114_v22  ;;  %v2007_v63 = vmul.f32 1.0614054, %v7066_v8  ;;  %v3447_v39 = vmul.f32 1.442695, %v3289_v62 }
 0x1ce   : > { %v2900_v12 = vadd.f32 0.2548296, %v2772_v27  ;;  %v2262_v21 = vmul.f32 %v7051_v48, %v2134_v59  ;;  %5615 = vrcp.f32 %v1752_v7  ;;  %v3288_v44 = vmul.f32 %v3160_v0, %v1496_v11 }
 0x1cf   : > { %v3797_v56 = vsub.f32 1.0, %v3669_v43  ;;  %v1626_v32 = vmul.f32 0.3275911, %v1498_v10  ;;  %v2135_v58 = vadd.f32 -1.4531521, %v2007_v63  ;;  %vm1242_vm15 = vcmp.ge.f32.partialorder %v1114_v22, 0.0 }
 0x1d0   : > { %v3028_v6 = vmul.f32 %v7017_v50, %v2900_v12  ;;  %v2390_v25 = vadd.f32 1.4214138, %v2262_v21  ;;  %v3162_v38 = vsub.f32 0.0, %v1498_v10  ;;  %v644_v36 = vadd.f32 %v6644_v55, %v6381_v16 }
 0x1d1   : > { %v1754_v29 = vadd.f32 1.0, %v1626_v32  ;;  %v5610_v1 = vpop.eup %5609  ;;  %v3925_v46 = vmul.f32 %v3797_v56, %v6984_v5  ;;  %v2263_v62 = vmul.f32 %v7066_v8, %v2135_v58  ;;  %v4051_v50 = vadd.f32 1.0, %v3923_v61  ;;  %v7092_v32 = vpop.f32.mrb[26].mxu0 }
 0x1d2   : > { %v3668_v27 = vmul.f32 %v5604_v35, %v3028_v6  ;;  %v2518_v59 = vmul.f32 %v7051_v48, %v2390_v25  ;;  %v7077_v43 = vpop.eup %5611  ;;  %v7081_v12 = vsel %vm1240_vm14, 1.0, %v9641_v53  ;;  %v3290_v11 = vmul.f32 %v3162_v38, %v1498_v10 }
 0x1d3   : > { %5617 = vrcp.f32 %v1754_v29  ;;  %v5614_v0 = vpop.eup %5613  ;;  %v2391_v55 = vadd.f32 1.4214138, %v2263_v62  ;;  %v3445_v21 = vmul.f32 1.442695, %v3288_v44  ;;  %v837_v5 = vadd.f32 %v6660_v34, %v6383_v17 }
 0x1d4   : > { %v2646_v7 = vadd.f32 -0.28449672, %v2518_v59  ;;  %v2009_v35 = vmul.f32 1.0614054, %v7077_v43  ;;  %5619 = vpow2.f32 %v3447_v39  ;;  %v7088_v58 = vsel %vm1242_vm15, 1.0, %v9641_v53 }
 0x1d5   : > { %v1115_v61 = vmul.f32 0.70710677, %v644_v36  ;;  %v4053_v40 = vadd.f32 1.0, %v3925_v46  ;;  %v3796_v63 = vsub.f32 1.0, %v3668_v27  ;;  %v2519_v10 = vmul.f32 %v7066_v8, %v2391_v55  ;;  %v7108_v55 = vpop.f32.mrb[26].mxu1 }
 0x1d6   : > { %v2774_v56 = vmul.f32 %v7051_v48, %v2646_v7  ;;  %v7095_v44 = vmul.f32 %v4051_v50, %v6915_v4  ;;  %v2137_v34 = vadd.f32 -1.4531521, %v2009_v35  ;;  %v3449_v6 = vmul.f32 1.442695, %v3290_v11  ;;  %9686 = vst [vmem:[#allocation34_spill] sm:$0xff] %v7108_v55  ;;  %v7125_v55 = vpop.f32.mrb[27].mxu0 }
 0x1d7   : > { %v1499_v25 = vand.u32 2147483647, %v1115_v61  ;;  %v2647_v29 = vadd.f32 -0.28449672, %v2519_v10  ;;  %5621 = vpow2.f32 %v3445_v21  ;;  %v1117_v22 = vmul.f32 0.70710677, %v837_v5 }
 0x1d8   : > { %9685 = vst [vmem:[#allocation33_spill] sm:$0xff] %v7095_v44  ;;  %v2902_v39 = vadd.f32 0.2548296, %v2774_v56  ;;  %v7097_v38 = vpop.eup %5615  ;;  %v2265_v46 = vmul.f32 %v7077_v43, %v2137_v34  ;;  %v7100_v27 = vmul.f32 0.5, %v644_v36  ;;  %v7102_v62 = vmul.f32 0.5, %v837_v5 }
 0x1d9   : > { %v1627_v59 = vmul.f32 0.3275911, %v1499_v25  ;;  %v3924_v7 = vmul.f32 %v3796_v63, %v6994_v51  ;;  %v2775_v50 = vmul.f32 %v7066_v8, %v2647_v29  ;;  %v2008_v11 = vmul.f32 1.0614054, %v7097_v38 }
 0x1da   : > { %v3030_v4 = vmul.f32 %v7051_v48, %v2902_v39  ;;  %v2393_v21 = vadd.f32 1.4214138, %v2265_v46  ;;  %5623 = vpow2.f32 %v3449_v6  ;;  %v3163_v56 = vsub.f32 0.0, %v1499_v25 }
 0x1db   : > { %v1755_v35 = vadd.f32 1.0, %v1627_v59  ;;  %v2903_v36 = vadd.f32 0.2548296, %v2775_v50  ;;  %v2136_v34 = vadd.f32 -1.4531521, %v2008_v11  ;;  %v7113_v51 = vmul.f32 %v4053_v40, %v6955_v57 }
 0x1dc   : > { %v3670_v10 = vmul.f32 %v5610_v1, %v3030_v4  ;;  %v1501_v44 = vand.u32 2147483647, %v1117_v22  ;;  %v2521_v48 = vmul.f32 %v7077_v43, %v2393_v21  ;;  %vm1243_vm0 = vcmp.ge.f32.partialorder %v1115_v61, 0.0 }
 0x1dd   : > { %v7110_v5 = vpop.eup %5617  ;;  %9687 = vst [vmem:[#allocation35_spill] sm:$0xff] %v7113_v51  ;;  %5625 = vrcp.f32 %v1755_v35  ;;  %v3031_v39 = vmul.f32 %v7066_v8, %v2903_v36  ;;  %v2264_v6 = vmul.f32 %v7097_v38, %v2136_v34  ;;  %v4052_v46 = vadd.f32 1.0, %v3924_v7 }
 0x1de   : > { %v3798_v63 = vsub.f32 1.0, %v3670_v10  ;;  %v2010_v29 = vmul.f32 1.0614054, %v7110_v5  ;;  %v5620_v1 = vpop.eup %5619  ;;  %v2649_v59 = vadd.f32 -0.28449672, %v2521_v48  ;;  %v646_v50 = vadd.f32 %v6675_v30, %v6385_v18 }
 0x1df   : > { %v1629_v4 = vmul.f32 0.3275911, %v1501_v44  ;;  %v3671_v57 = vmul.f32 %v5614_v0, %v3031_v39  ;;  %v2392_v40 = vadd.f32 1.4214138, %v2264_v6  ;;  %v3291_v21 = vmul.f32 %v3163_v56, %v1499_v25 }
 0x1e0   : > { %v2138_v11 = vadd.f32 -1.4531521, %v2010_v29  ;;  %v2777_v35 = vmul.f32 %v7077_v43, %v2649_v59  ;;  %vm1245_vm1 = vcmp.ge.f32.partialorder %v1117_v22, 0.0  ;;  %v3165_v8 = vsub.f32 0.0, %v1501_v44  ;;  %v7146_v22 = vpop.f32.mrb[27].mxu1 }
 0x1e1   : > { %v1757_v10 = vadd.f32 1.0, %v1629_v4  ;;  %v5622_v36 = vpop.eup %5621  ;;  %v3926_v34 = vmul.f32 %v3798_v63, %v7029_v31  ;;  %v3799_v51 = vsub.f32 1.0, %v3671_v57  ;;  %v2520_v7 = vmul.f32 %v7097_v38, %v2392_v40 }
 0x1e2   : > { %v2266_v48 = vmul.f32 %v7110_v5, %v2138_v11  ;;  %v2905_v30 = vadd.f32 0.2548296, %v2777_v35  ;;  %v7129_v0 = vsel %vm1243_vm0, 1.0, %v9641_v53  ;;  %v1116_v25 = vmul.f32 0.70710677, %v646_v50 }
 0x1e3   : > { %5627 = vrcp.f32 %v1757_v10  ;;  %v7132_v56 = vmul.f32 %v4052_v46, %v6990_v54  ;;  %v2648_v39 = vadd.f32 -0.28449672, %v2520_v7  ;;  %v3451_v31 = vmul.f32 1.442695, %v3291_v21 }
 0x1e4   : > { %v2394_v6 = vadd.f32 1.4214138, %v2266_v48  ;;  %v5624_v63 = vpop.eup %5623  ;;  %v3033_v29 = vmul.f32 %v7077_v43, %v2905_v30  ;;  %v7137_v59 = vsel %vm1245_vm1, 1.0, %v9641_v53  ;;  %v3293_v4 = vmul.f32 %v3165_v8, %v1501_v44 }
 0x1e5   : > { %9688 = vst [vmem:[#allocation36_spill] sm:$0xff] %v7132_v56  ;;  %v1500_v57 = vand.u32 2147483647, %v1116_v25  ;;  %v4054_v61 = vadd.f32 1.0, %v3926_v34  ;;  %v3927_v40 = vmul.f32 %v3799_v51, %v7034_v28  ;;  %v2776_v11 = vmul.f32 %v7097_v38, %v2648_v39 }
 0x1e6   : > { %v2522_v54 = vmul.f32 %v7110_v5, %v2394_v6  ;;  %v3673_v35 = vmul.f32 %v5620_v1, %v3033_v29  ;;  %v839_v43 = vadd.f32 %v6704_v45, %v6387_v19  ;;  %5629 = vpow2.f32 %v3451_v31 }
 0x1e7   : > { %v7142_v46 = vpop.eup %5625  ;;  %v1628_v21 = vmul.f32 0.3275911, %v1500_v57  ;;  %v3164_v10 = vsub.f32 0.0, %v1500_v57  ;;  %v2904_v7 = vadd.f32 0.2548296, %v2776_v11  ;;  %v7149_v51 = vmul.f32 0.5, %v646_v50 }
 0x1e8   : > { %v2650_v44 = vadd.f32 -0.28449672, %v2522_v54  ;;  %v2011_v8 = vmul.f32 1.0614054, %v7142_v46  ;;  %v3455_v28 = vmul.f32 1.442695, %v3293_v4  ;;  %v7154_v45 = vmul.f32 %v4054_v61, %v7006_v26 }
 0x1e9   : > { %vm1244_vm2 = vcmp.ge.f32.partialorder %v1116_v25, 0.0  ;;  %v1756_v34 = vadd.f32 1.0, %v1628_v21  ;;  %v3032_v48 = vmul.f32 %v7097_v38, %v2904_v7  ;;  %v1118_v39 = vmul.f32 0.70710677, %v839_v43 }
 0x1ea   : > { %v2778_v1 = vmul.f32 %v7110_v5, %v2650_v44  ;;  %v2139_v30 = vadd.f32 -1.4531521, %v2011_v8  ;;  %9689 = vst [vmem:[#allocation37_spill] sm:$0xff] %v7154_v45  ;;  %v4055_v6 = vadd.f32 1.0, %v3927_v40  ;;  %v3801_v29 = vsub.f32 1.0, %v3673_v35 }
 0x1eb   : > { %5631 = vrcp.f32 %v1756_v34  ;;  %v3672_v11 = vmul.f32 %v5622_v36, %v3032_v48  ;;  %v3292_v50 = vmul.f32 %v3164_v10, %v1500_v57  ;;  %v7161_v38 = vsel %vm1244_vm2, 1.0, %v9641_v53 }
 0x1ec   : > { %v2906_v54 = vadd.f32 0.2548296, %v2778_v1  ;;  %v2267_v31 = vmul.f32 %v7142_v46, %v2139_v30  ;;  %5633 = vpow2.f32 %v3455_v28  ;;  %v1502_v21 = vand.u32 2147483647, %v1118_v39 }
 0x1ed   : > { %v7157_v4 = vpop.eup %5627  ;;  %v648_v26 = vadd.f32 %v6735_v15, %v6381_v16  ;;  %v3800_v61 = vsub.f32 1.0, %v3672_v11  ;;  %v7168_v7 = vmul.f32 %v4055_v6, %v7011_v47  ;;  %v3929_v57 = vmul.f32 %v3801_v29, %v7055_v9 }
 0x1ee   : > { %v3034_v40 = vmul.f32 %v7110_v5, %v2906_v54  ;;  %v2395_v35 = vadd.f32 1.4214138, %v2267_v31  ;;  %v2013_v36 = vmul.f32 1.0614054, %v7157_v4  ;;  %v1630_v10 = vmul.f32 0.3275911, %v1502_v21 }
 0x1ef   : > { %9690 = vst [vmem:[#allocation38_spill] sm:$0xff] %v7168_v7  ;;  %v3166_v44 = vsub.f32 0.0, %v1502_v21  ;;  %v3453_v28 = vmul.f32 1.442695, %v3292_v50  ;;  %vm1246_vm3 = vcmp.ge.f32.partialorder %v1118_v39, 0.0  ;;  %v3928_v15 = vmul.f32 %v3800_v61, %v7081_v12 }
 0x1f0   : > { %v2523_v25 = vmul.f32 %v7142_v46, %v2395_v35  ;;  %v2141_v8 = vadd.f32 -1.4531521, %v2013_v36  ;;  %v3674_v34 = vmul.f32 %v5624_v63, %v3034_v40  ;;  %v1758_v48 = vadd.f32 1.0, %v1630_v10  ;;  %v5630_v1 = vpop.eup %5629 }
 0x1f1   : > { %v1119_v5 = vmul.f32 0.70710677, %v648_v26  ;;  %v7174_v47 = vmul.f32 0.5, %v839_v43  ;;  %v3294_v6 = vmul.f32 %v3166_v44, %v1502_v21  ;;  %v4057_v9 = vadd.f32 1.0, %v3929_v57 }
 0x1f2   : > { %v2651_v30 = vadd.f32 -0.28449672, %v2523_v25  ;;  %v2269_v11 = vmul.f32 %v7157_v4, %v2141_v8  ;;  %5635 = vrcp.f32 %v1758_v48  ;;  %v841_v54 = vadd.f32 %v6750_v42, %v6383_v17  ;;  %v7195_v48 = vpop.f32.mrb[28].mxu1 }
 0x1f3   : > { %v1503_v29 = vand.u32 2147483647, %v1119_v5  ;;  %5637 = vpow2.f32 %v3453_v28  ;;  %v7181_v12 = vsel %vm1246_vm3, 1.0, %v9641_v53  ;;  %v4056_v61 = vadd.f32 1.0, %v3928_v15 }
 0x1f4   : > { %v2779_v31 = vmul.f32 %v7142_v46, %v2651_v30  ;;  %v2397_v50 = vadd.f32 1.4214138, %v2269_v11  ;;  %v3802_v43 = vsub.f32 1.0, %v3674_v34  ;;  %v7185_v40 = vmul.f32 0.5, %v648_v26  ;;  %v7193_v34 = vpop.f32.mrb[28].mxu0 }
 0x1f5   : > { %v7183_v63 = vpop.eup %5631  ;;  %v1631_v21 = vmul.f32 0.3275911, %v1503_v29  ;;  %v3457_v57 = vmul.f32 1.442695, %v3294_v6  ;;  %vm1247_vm4 = vcmp.ge.f32.partialorder %v1119_v5, 0.0  ;;  %v3167_v25 = vsub.f32 0.0, %v1503_v29 }
 0x1f6   : > { %v2907_v35 = vadd.f32 0.2548296, %v2779_v31  ;;  %v2525_v36 = vmul.f32 %v7157_v4, %v2397_v50  ;;  %v2012_v42 = vmul.f32 1.0614054, %v7183_v63  ;;  %v5634_v10 = vpop.eup %5633  ;;  %v1121_v39 = vmul.f32 0.70710677, %v841_v54 }
 0x1f7   : > { %v1759_v44 = vadd.f32 1.0, %v1631_v21  ;;  %v7190_v8 = vmul.f32 %v4057_v9, %v7037_v2  ;;  %v7198_v30 = vmul.f32 %v4056_v61, %v7058_v3  ;;  %v3930_v11 = vmul.f32 %v3802_v43, %v7088_v58 }
 0x1f8   : > { %v3035_v28 = vmul.f32 %v7142_v46, %v2907_v35  ;;  %v2653_v15 = vadd.f32 -0.28449672, %v2525_v36  ;;  %v2140_v26 = vadd.f32 -1.4531521, %v2012_v42  ;;  %v1505_v6 = vand.u32 2147483647, %v1121_v39 }
 0x1f9   : > { %9691 = vst [vmem:[#allocation39_spill] sm:$0xff] %v7190_v8  ;;  %9692 = vst [vmem:[#allocation40_spill] sm:$0xff] %v7198_v30  ;;  %5639 = vrcp.f32 %v1759_v44  ;;  %v7205_v46 = vsel %vm1247_vm4, 1.0, %v9641_v53  ;;  %v650_v3 = vadd.f32 %v6773_v20, %v6385_v18  ;;  %v3295_v43 = vmul.f32 %v3167_v25, %v1503_v29 }
 0x1fa   : > { %v3675_v31 = vmul.f32 %v5630_v1, %v3035_v28  ;;  %v2781_v50 = vmul.f32 %v7157_v4, %v2653_v15  ;;  %v2268_v2 = vmul.f32 %v7183_v63, %v2140_v26  ;;  %5641 = vpow2.f32 %v3457_v57  ;;  %v7213_v28 = vpop.f32.mrb[29].mxu0 }
 0x1fb   : > { %v1633_v9 = vmul.f32 0.3275911, %v1505_v6  ;;  %v3169_v21 = vsub.f32 0.0, %v1505_v6  ;;  %v4058_v1 = vadd.f32 1.0, %v3930_v11  ;;  %v7211_v42 = vmul.f32 0.5, %v841_v54 }
 0x1fc   : > { %v3803_v61 = vsub.f32 1.0, %v3675_v31  ;;  %v2909_v35 = vadd.f32 0.2548296, %v2781_v50  ;;  %v2396_v58 = vadd.f32 1.4214138, %v2268_v2  ;;  %v7209_v36 = vpop.eup %5635  ;;  %v843_v54 = vadd.f32 %v6787_v13, %v6387_v19 }
 0x1fd   : > { %v1761_v44 = vadd.f32 1.0, %v1633_v9  ;;  %v1120_v57 = vmul.f32 0.70710677, %v650_v3  ;;  %v5638_v5 = vpop.eup %5637  ;;  %v2014_v20 = vmul.f32 1.0614054, %v7209_v36  ;;  %v3297_v31 = vmul.f32 %v3169_v21, %v1505_v6 }
 0x1fe   : > { %v3037_v15 = vmul.f32 %v7157_v4, %v2909_v35  ;;  %v2524_v26 = vmul.f32 %v7183_v63, %v2396_v58  ;;  %v3931_v50 = vmul.f32 %v3803_v61, %v7129_v0  ;;  %v3459_v9 = vmul.f32 1.442695, %v3295_v43 }
 0x1ff   : > { %5643 = vrcp.f32 %v1761_v44  ;;  %v1504_v29 = vand.u32 2147483647, %v1120_v57  ;;  %v2142_v2 = vadd.f32 -1.4531521, %v2014_v20  ;;  %v7222_v8 = vmul.f32 %v4058_v1, %v7062_v49 }
 0x200   : > { %v3677_v25 = vmul.f32 %v5634_v10, %v3037_v15  ;;  %v2652_v11 = vadd.f32 -0.28449672, %v2524_v26  ;;  %vm1249_vm5 = vcmp.ge.f32.partialorder %v1121_v39, 0.0  ;;  %v3463_v0 = vmul.f32 1.442695, %v3297_v31 }
 0x201   : > { %9693 = vst [vmem:[#allocation41_spill] sm:$0xff] %v7222_v8  ;;  %v1632_v4 = vmul.f32 0.3275911, %v1504_v29  ;;  %v3168_v35 = vsub.f32 0.0, %v1504_v29  ;;  %v2270_v6 = vmul.f32 %v7209_v36, %v2142_v2  ;;  %vm1248_vm6 = vcmp.ge.f32.partialorder %v1120_v57, 0.0 }
 0x202   : > { %v2780_v58 = vmul.f32 %v7183_v63, %v2652_v11  ;;  %v4059_v61 = vadd.f32 1.0, %v3931_v50  ;;  %v3805_v13 = vsub.f32 1.0, %v3677_v25  ;;  %v1122_v44 = vmul.f32 0.70710677, %v843_v54  ;;  %v7233_v11 = vpop.f32.mrb[29].mxu1 }
 0x203   : > { %v7226_v21 = vpop.eup %5639  ;;  %v1760_v10 = vadd.f32 1.0, %v1632_v4  ;;  %v2398_v26 = vadd.f32 1.4214138, %v2270_v6  ;;  %5645 = vpow2.f32 %v3459_v9  ;;  %v7231_v1 = vsel %vm1249_vm5, 1.0, %v9641_v53 }
 0x204   : > { %v5642_v15 = vpop.eup %5641  ;;  %v2908_v43 = vadd.f32 0.2548296, %v2780_v58  ;;  %v2015_v49 = vmul.f32 1.0614054, %v7226_v21  ;;  %v3296_v20 = vmul.f32 %v3168_v35, %v1504_v29  ;;  %v1506_v31 = vand.u32 2147483647, %v1122_v44 }
 0x205   : > { %5647 = vrcp.f32 %v1760_v10  ;;  %v2526_v25 = vmul.f32 %v7209_v36, %v2398_v26  ;;  %v7237_v4 = vmul.f32 0.5, %v650_v3  ;;  %v7241_v9 = vsel %vm1248_vm6, 1.0, %v9641_v53 }
 0x206   : > { %v3036_v50 = vmul.f32 %v7183_v63, %v2908_v43  ;;  %v2143_v2 = vadd.f32 -1.4531521, %v2015_v49  ;;  %5649 = vpow2.f32 %v3463_v0  ;;  %v1634_v39 = vmul.f32 0.3275911, %v1506_v31 }
 0x207   : > { %v3170_v58 = vsub.f32 0.0, %v1506_v31  ;;  %v7244_v6 = vmul.f32 %v4059_v61, %v7100_v27  ;;  %v3933_v29 = vmul.f32 %v3805_v13, %v7137_v59  ;;  %v2654_v35 = vadd.f32 -0.28449672, %v2526_v25  ;;  %v7256_v13 = vpop.f32.mrb[30].mxu0 }
 0x208   : > { %v2271_v63 = vmul.f32 %v7226_v21, %v2143_v2  ;;  %v3676_v43 = vmul.f32 %v5638_v5, %v3036_v50  ;;  %v3461_v3 = vmul.f32 1.442695, %v3296_v20  ;;  %v1762_v26 = vadd.f32 1.0, %v1634_v39 }
 0x209   : > { %9694 = vst [vmem:[#allocation42_spill] sm:$0xff] %v7244_v6  ;;  %v7248_v10 = vpop.eup %5643  ;;  %v654_v57 = vadd.f32 %v6826_v60, %v6381_v16  ;;  %v2782_v0 = vmul.f32 %v7209_v36, %v2654_v35  ;;  %v3298_v27 = vmul.f32 %v3170_v58, %v1506_v31  ;;  %vm1250_vm7 = vcmp.ge.f32.partialorder %v1122_v44, 0.0 }
 0x20a   : > { %v2399_v49 = vadd.f32 1.4214138, %v2271_v63  ;;  %v2017_v7 = vmul.f32 1.0614054, %v7248_v10  ;;  %5651 = vrcp.f32 %v1762_v26  ;;  %v847_v61 = vadd.f32 %v6832_v37, %v6383_v17 }
 0x20b   : > { %v1123_v59 = vmul.f32 0.70710677, %v654_v57  ;;  %v4061_v5 = vadd.f32 1.0, %v3933_v29  ;;  %v2910_v20 = vadd.f32 0.2548296, %v2782_v0  ;;  %v3804_v60 = vsub.f32 1.0, %v3676_v43 }
 0x20c   : > { %v2527_v50 = vmul.f32 %v7226_v21, %v2399_v49  ;;  %v2145_v25 = vadd.f32 -1.4531521, %v2017_v7  ;;  %5653 = vpow2.f32 %v3461_v3  ;;  %v7259_v2 = vmul.f32 0.5, %v843_v54 }
 0x20d   : > { %v1507_v39 = vand.u32 2147483647, %v1123_v59  ;;  %v5646_v35 = vpop.eup %5645  ;;  %v3038_v31 = vmul.f32 %v7209_v36, %v2910_v20  ;;  %v3465_v26 = vmul.f32 1.442695, %v3298_v27  ;;  %v7267_v29 = vsel %vm1250_vm7, 1.0, %v9641_v53  ;;  %v7273_v20 = vpop.f32.mrb[30].mxu1 }
 0x20e   : > { %v2655_v58 = vadd.f32 -0.28449672, %v2527_v50  ;;  %v2273_v63 = vmul.f32 %v7248_v10, %v2145_v25  ;;  %v1125_v43 = vmul.f32 0.70710677, %v847_v61  ;;  %v7270_v54 = vmul.f32 %v4061_v5, %v7102_v62 }
 0x20f   : > { %v7263_v37 = vpop.eup %5647  ;;  %v1635_v0 = vmul.f32 0.3275911, %v1507_v39  ;;  %v3171_v7 = vsub.f32 0.0, %v1507_v39  ;;  %v3678_v3 = vmul.f32 %v5642_v15, %v3038_v31  ;;  %v3932_v27 = vmul.f32 %v3804_v60, %v7161_v38 }
 0x210   : > { %9695 = vst [vmem:[#allocation43_spill] sm:$0xff] %v7270_v54  ;;  %v2783_v49 = vmul.f32 %v7226_v21, %v2655_v58  ;;  %v2401_v36 = vadd.f32 1.4214138, %v2273_v63  ;;  %v5650_v50 = vpop.eup %5649  ;;  %v2016_v25 = vmul.f32 1.0614054, %v7263_v37  ;;  %v7277_v44 = vmul.f32 0.5, %v654_v57 }
 0x211   : > { %v1763_v6 = vadd.f32 1.0, %v1635_v0  ;;  %5655 = vpow2.f32 %v3465_v26  ;;  %vm1251_vm8 = vcmp.ge.f32.partialorder %v1123_v59, 0.0  ;;  %v3299_v15 = vmul.f32 %v3171_v7, %v1507_v39 }
 0x212   : > { %v2911_v8 = vadd.f32 0.2548296, %v2783_v49  ;;  %v2529_v45 = vmul.f32 %v7248_v10, %v2401_v36  ;;  %v2144_v62 = vadd.f32 -1.4531521, %v2016_v25  ;;  %v1509_v5 = vand.u32 2147483647, %v1125_v43 }
 0x213   : > { %5657 = vrcp.f32 %v1763_v6  ;;  %v3806_v31 = vsub.f32 1.0, %v3678_v3  ;;  %v7281_v54 = vmul.f32 0.5, %v847_v61  ;;  %v4060_v57 = vadd.f32 1.0, %v3932_v27  ;;  %v9696_v49 = vld [vmem:[#allocation11_spill] sm:$0xff] }
 0x214   : > { %v3039_v58 = vmul.f32 %v7226_v21, %v2911_v8  ;;  %v2657_v63 = vadd.f32 -0.28449672, %v2529_v45  ;;  %v7283_v38 = vpop.eup %5651  ;;  %v2272_v60 = vmul.f32 %v7263_v37, %v2144_v62  ;;  %v1637_v0 = vmul.f32 0.3275911, %v1509_v5 }
 0x215   : > { %v656_v26 = vadd.f32 %v9696_v49, %v6385_v18  ;;  %v2018_v39 = vmul.f32 1.0614054, %v7283_v38  ;;  %v7292_v8 = vsel %vm1251_vm8, 1.0, %v9641_v53  ;;  %v3467_v61 = vmul.f32 1.442695, %v3299_v15  ;;  %v7295_v49 = vpop.f32.mrb[31].mxu0 }
 0x216   : > { %v3679_v36 = vmul.f32 %v5646_v35, %v3039_v58  ;;  %v2785_v6 = vmul.f32 %v7248_v10, %v2657_v63  ;;  %v5654_v45 = vpop.eup %5653  ;;  %v2400_v21 = vadd.f32 1.4214138, %v2272_v60  ;;  %vm1253_vm9 = vcmp.ge.f32.partialorder %v1125_v43, 0.0  ;;  %9697 = vst [vmem:[#allocation11_spill] sm:$0xff] %v7295_v49 }
 0x217   : > { %v1765_v7 = vadd.f32 1.0, %v1637_v0  ;;  %v3934_v3 = vmul.f32 %v3806_v31, %v7181_v12  ;;  %v2146_v25 = vadd.f32 -1.4531521, %v2018_v39  ;;  %v3173_v62 = vsub.f32 0.0, %v1509_v5  ;;  %v9699_v0 = vld [vmem:[#allocation26_spill] sm:$0xff] }
 0x218   : > { %v2913_v27 = vadd.f32 0.2548296, %v2785_v6  ;;  %v3807_v35 = vsub.f32 1.0, %v3679_v36  ;;  %v2528_v58 = vmul.f32 %v7263_v37, %v2400_v21  ;;  %v1124_v63 = vmul.f32 0.70710677, %v656_v26 }
 0x219   : > { %5659 = vrcp.f32 %v1765_v7  ;;  %v7299_v59 = vmul.f32 %v4060_v57, %v7149_v51  ;;  %v2274_v43 = vmul.f32 %v7283_v38, %v2146_v25  ;;  %v7304_v15 = vsel %vm1253_vm9, 1.0, %v9641_v53 }
 0x21a   : > { %v3041_v60 = vmul.f32 %v7248_v10, %v2913_v27  ;;  %v2656_v12 = vadd.f32 -0.28449672, %v2528_v58  ;;  %5661 = vpow2.f32 %v3467_v61  ;;  %v1508_v31 = vand.u32 2147483647, %v1124_v63 }
 0x21b   : > { %9698 = vst [vmem:[#allocation44_spill] sm:$0xff] %v7299_v59  ;;  %v849_v36 = vadd.f32 %v9699_v0, %v6387_v19  ;;  %v5656_v6 = vpop.eup %5655  ;;  %v4062_v39 = vadd.f32 1.0, %v3934_v3  ;;  %v2402_v7 = vadd.f32 1.4214138, %v2274_v43  ;;  %v3301_v30 = vmul.f32 %v3173_v62, %v1509_v5  ;;  %v7316_v59 = vpop.f32.mrb[31].mxu1 }
 0x21c   : > { %v3681_v21 = vmul.f32 %v5650_v50, %v3041_v60  ;;  %v3935_v10 = vmul.f32 %v3807_v35, %v7205_v46  ;;  %v2784_v57 = vmul.f32 %v7263_v37, %v2656_v12  ;;  %v7312_v27 = vmul.f32 0.5, %v656_v26 }
 0x21d   : > { %v7308_v51 = vpop.eup %5657  ;;  %v1636_v25 = vmul.f32 0.3275911, %v1508_v31  ;;  %v2530_v61 = vmul.f32 %v7283_v38, %v2402_v7  ;;  %vm1252_vm10 = vcmp.ge.f32.partialorder %v1124_v63, 0.0  ;;  %v3172_v0 = vsub.f32 0.0, %v1508_v31  ;;  %v9701_v7 = vld [vmem:[#allocation27_spill] sm:$0xff] }
 0x21e   : > { %v2019_v58 = vmul.f32 1.0614054, %v7308_v51  ;;  %v3809_v50 = vsub.f32 1.0, %v3681_v21  ;;  %v2912_v3 = vadd.f32 0.2548296, %v2784_v57  ;;  %v7319_v60 = vmul.f32 %v4062_v39, %v7174_v47 }
 0x21f   : > { %v1764_v5 = vadd.f32 1.0, %v1636_v25  ;;  %v1126_v62 = vmul.f32 0.70710677, %v849_v36  ;;  %v2658_v46 = vadd.f32 -0.28449672, %v2530_v61  ;;  %v4063_v43 = vadd.f32 1.0, %v3935_v10 }
 0x220   : > { %9700 = vst [vmem:[#allocation26_spill] sm:$0xff] %v7319_v60  ;;  %v2147_v35 = vadd.f32 -1.4531521, %v2019_v58  ;;  %v3471_v26 = vmul.f32 1.442695, %v3301_v30  ;;  %v3040_v12 = vmul.f32 %v7263_v37, %v2912_v3  ;;  %v658_v56 = vadd.f32 %v9701_v7, %v6381_v16 }
 0x221   : > { %5663 = vrcp.f32 %v1764_v5  ;;  %v2786_v49 = vmul.f32 %v7283_v38, %v2658_v46  ;;  %v7328_v57 = vsel %vm1252_vm10, 1.0, %v9641_v53  ;;  %v3300_v47 = vmul.f32 %v3172_v0, %v1508_v31 }
 0x222   : > { %v2275_v21 = vmul.f32 %v7308_v51, %v2147_v35  ;;  %v3937_v30 = vmul.f32 %v3809_v50, %v7231_v1  ;;  %v3680_v10 = vmul.f32 %v5654_v45, %v3040_v12  ;;  %vm1254_vm11 = vcmp.ge.f32.partialorder %v1126_v62, 0.0 }
 0x223   : > { %v7330_v39 = vpop.eup %5659  ;;  %v1510_v37 = vand.u32 2147483647, %v1126_v62  ;;  %v2914_v25 = vadd.f32 0.2548296, %v2786_v49  ;;  %5665 = vpow2.f32 %v3471_v26  ;;  %v7334_v46 = vmul.f32 0.5, %v849_v36 }
 0x224   : > { %v2403_v61 = vadd.f32 1.4214138, %v2275_v21  ;;  %v2021_v58 = vmul.f32 1.0614054, %v7330_v39  ;;  %v5662_v3 = vpop.eup %5661  ;;  %v3808_v5 = vsub.f32 1.0, %v3680_v10  ;;  %v7339_v45 = vmul.f32 %v4063_v43, %v7185_v40 }
 0x225   : > { %v1638_v63 = vmul.f32 0.3275911, %v1510_v37  ;;  %v1127_v35 = vmul.f32 0.70710677, %v658_v56  ;;  %v3042_v31 = vmul.f32 %v7283_v38, %v2914_v25  ;;  %v3469_v1 = vmul.f32 1.442695, %v3300_v47 }
 0x226   : > { %v2531_v0 = vmul.f32 %v7308_v51, %v2403_v61  ;;  %v2149_v7 = vadd.f32 -1.4531521, %v2021_v58  ;;  %9702 = vst [vmem:[#allocation27_spill] sm:$0xff] %v7339_v45  ;;  %v4065_v49 = vadd.f32 1.0, %v3937_v30  ;;  %v7343_v50 = vsel %vm1254_vm11, 1.0, %v9641_v53 }
 0x227   : > { %v1766_v26 = vadd.f32 1.0, %v1638_v63  ;;  %v3682_v12 = vmul.f32 %v5656_v6, %v3042_v31  ;;  %v3174_v10 = vsub.f32 0.0, %v1510_v37  ;;  %v3936_v38 = vmul.f32 %v3808_v5, %v7241_v9 }
 0x228   : > { %v2659_v36 = vadd.f32 -0.28449672, %v2531_v0  ;;  %v2277_v21 = vmul.f32 %v7330_v39, %v2149_v7  ;;  %v1511_v25 = vand.u32 2147483647, %v1127_v35  ;;  %v851_v47 = vadd.f32 %v6922_v23, %v6383_v17 }
 0x229   : > { %5667 = vrcp.f32 %v1766_v26  ;;  %vm1255_vm12 = vcmp.ge.f32.partialorder %v1127_v35, 0.0  ;;  %v7353_v6 = vmul.f32 %v4065_v49, %v7211_v42  ;;  %v3810_v30 = vsub.f32 1.0, %v3682_v12  ;;  %v7363_v12 = vpop.f32.mrb[32].mxu0 }
 0x22a   : > { %v2787_v40 = vmul.f32 %v7308_v51, %v2659_v36  ;;  %v2405_v43 = vadd.f32 1.4214138, %v2277_v21  ;;  %5669 = vpow2.f32 %v3469_v1  ;;  %v7355_v61 = vmul.f32 0.5, %v658_v56 }
 0x22b   : > { %v7350_v62 = vpop.eup %5663  ;;  %9703 = vst [vmem:[#allocation45_spill] sm:$0xff] %v7353_v6  ;;  %v1639_v58 = vmul.f32 0.3275911, %v1511_v25  ;;  %v3302_v23 = vmul.f32 %v3174_v10, %v1510_v37  ;;  %v4064_v31 = vadd.f32 1.0, %v3936_v38  ;;  %v7360_v0 = vsel %vm1255_vm12, 1.0, %v9641_v53  ;;  %v7368_v10 = vpop.f32.mrb[32].mxu1 }
 0x22c   : > { %v2915_v9 = vadd.f32 0.2548296, %v2787_v40  ;;  %v2533_v5 = vmul.f32 %v7330_v39, %v2405_v43  ;;  %v2020_v63 = vmul.f32 1.0614054, %v7350_v62  ;;  %v1129_v7 = vmul.f32 0.70710677, %v851_v47 }
 0x22d   : > { %v1767_v35 = vadd.f32 1.0, %v1639_v58  ;;  %v5666_v1 = vpop.eup %5665  ;;  %v3175_v56 = vsub.f32 0.0, %v1511_v25  ;;  %v3938_v36 = vmul.f32 %v3810_v30, %v7267_v29  ;;  %v660_v37 = vadd.f32 %v6952_v33, %v6385_v18 }
 0x22e   : > { %v3043_v42 = vmul.f32 %v7308_v51, %v2915_v9  ;;  %v2661_v49 = vadd.f32 -0.28449672, %v2533_v5  ;;  %v2148_v26 = vadd.f32 -1.4531521, %v2020_v63  ;;  %v1513_v21 = vand.u32 2147483647, %v1129_v7 }
 0x22f   : > { %5671 = vrcp.f32 %v1767_v35  ;;  %v3473_v51 = vmul.f32 1.442695, %v3302_v23  ;;  %v7373_v58 = vmul.f32 %v4064_v31, %v7237_v4  ;;  %v7375_v9 = vmul.f32 0.5, %v851_v47 }
 0x230   : > { %v3683_v38 = vmul.f32 %v5662_v3, %v3043_v42  ;;  %v2789_v40 = vmul.f32 %v7330_v39, %v2661_v49  ;;  %v2276_v43 = vmul.f32 %v7350_v62, %v2148_v26  ;;  %v1641_v5 = vmul.f32 0.3275911, %v1513_v21 }
 0x231   : > { %9704 = vst [vmem:[#allocation46_spill] sm:$0xff] %v7373_v58  ;;  %v3177_v29 = vsub.f32 0.0, %v1513_v21  ;;  %v3303_v6 = vmul.f32 %v3175_v56, %v1511_v25  ;;  %v4066_v45 = vadd.f32 1.0, %v3938_v36  ;;  %vm1257_vm13 = vcmp.ge.f32.partialorder %v1129_v7, 0.0 }
 0x232   : > { %v3811_v30 = vsub.f32 1.0, %v3683_v38  ;;  %v2917_v63 = vadd.f32 0.2548296, %v2789_v40  ;;  %v2404_v35 = vadd.f32 1.4214138, %v2276_v43  ;;  %v1769_v3 = vadd.f32 1.0, %v1641_v5 }
 0x233   : > { %v7377_v33 = vpop.eup %5667  ;;  %v1128_v42 = vmul.f32 0.70710677, %v660_v37  ;;  %v3305_v31 = vmul.f32 %v3177_v29, %v1513_v21  ;;  %v853_v25 = vadd.f32 %v6969_v14, %v6387_v19  ;;  %v3475_v40 = vmul.f32 1.442695, %v3303_v6 }
 0x234   : > { %v5670_v49 = vpop.eup %5669  ;;  %v3045_v23 = vmul.f32 %v7330_v39, %v2917_v63  ;;  %v2532_v4 = vmul.f32 %v7350_v62, %v2404_v35  ;;  %v2022_v47 = vmul.f32 1.0614054, %v7377_v33  ;;  %v3939_v26 = vmul.f32 %v3811_v30, %v7292_v8 }
 0x235   : > { %5673 = vrcp.f32 %v1769_v3  ;;  %v1512_v38 = vand.u32 2147483647, %v1128_v42  ;;  %v7386_v43 = vmul.f32 %v4066_v45, %v7259_v2  ;;  %v7392_v8 = vsel %vm1257_vm13, 1.0, %v9641_v53 }
 0x236   : > { %v2660_v56 = vadd.f32 -0.28449672, %v2532_v4  ;;  %v2150_v36 = vadd.f32 -1.4531521, %v2022_v47  ;;  %5675 = vpow2.f32 %v3473_v51  ;;  %v3685_v39 = vmul.f32 %v5666_v1, %v3045_v23 }
 0x237   : > { %9705 = vst [vmem:[#allocation47_spill] sm:$0xff] %v7386_v43  ;;  %v1640_v5 = vmul.f32 0.3275911, %v1512_v38  ;;  %v3176_v63 = vsub.f32 0.0, %v1512_v38  ;;  %v3479_v29 = vmul.f32 1.442695, %v3305_v31  ;;  %5677 = vpow2.f32 %v3475_v40 }
 0x238   : > { %v2788_v35 = vmul.f32 %v7350_v62, %v2660_v56  ;;  %v2278_v21 = vmul.f32 %v7377_v33, %v2150_v36  ;;  %v4067_v30 = vadd.f32 1.0, %v3939_v26  ;;  %vm1256_vm14 = vcmp.ge.f32.partialorder %v1128_v42, 0.0 }
 0x239   : > { %v7394_v14 = vpop.eup %5671  ;;  %v1768_v6 = vadd.f32 1.0, %v1640_v5  ;;  %v1130_v51 = vmul.f32 0.70710677, %v853_v25  ;;  %v3813_v3 = vsub.f32 1.0, %v3685_v39  ;;  %v3304_v23 = vmul.f32 %v3176_v63, %v1512_v38 }
 0x23a   : > { %v2916_v2 = vadd.f32 0.2548296, %v2788_v35  ;;  %v2406_v45 = vadd.f32 1.4214138, %v2278_v21  ;;  %v2023_v1 = vmul.f32 1.0614054, %v7394_v14  ;;  %v7406_v40 = vmul.f32 %v4067_v30, %v7277_v44 }
 0x23b   : > { %5679 = vrcp.f32 %v1768_v6  ;;  %v1514_v4 = vand.u32 2147483647, %v1130_v51  ;;  %v7399_v56 = vmul.f32 0.5, %v660_v37  ;;  %v7403_v26 = vsel %vm1256_vm14, 1.0, %v9641_v53 }
 0x23c   : > { %v3044_v7 = vmul.f32 %v7350_v62, %v2916_v2  ;;  %v2534_v47 = vmul.f32 %v7377_v33, %v2406_v45  ;;  %v2151_v31 = vadd.f32 -1.4531521, %v2023_v1  ;;  %5681 = vpow2.f32 %v3479_v29  ;;  %9706 = vst [vmem:[#allocation48_spill] sm:$0xff] %v7406_v40  ;;  %v7420_v1 = vpop.f32.mrb[33].mxu1 }
 0x23d   : > { %v1642_v36 = vmul.f32 0.3275911, %v1514_v4  ;;  %v3178_v5 = vsub.f32 0.0, %v1514_v4  ;;  %v3941_v35 = vmul.f32 %v3813_v3, %v7304_v15  ;;  %v3477_v37 = vmul.f32 1.442695, %v3304_v23 }
 0x23e   : > { %v3684_v39 = vmul.f32 %v5670_v49, %v3044_v7  ;;  %v2662_v38 = vadd.f32 -0.28449672, %v2534_v47  ;;  %v2279_v63 = vmul.f32 %v7394_v14, %v2151_v31  ;;  %v664_v42 = vadd.f32 %v7013_v24, %v6381_v16  ;;  %v7416_v49 = vpop.f32.mrb[33].mxu0 }
 0x23f   : > { %v7409_v62 = vpop.eup %5673  ;;  %v1770_v21 = vadd.f32 1.0, %v1642_v36  ;;  %v3306_v30 = vmul.f32 %v3178_v5, %v1514_v4  ;;  %vm1258_vm15 = vcmp.ge.f32.partialorder %v1130_v51, 0.0  ;;  %v857_v15 = vadd.f32 %v7020_v52, %v6383_v17  ;;  %v7423_v47 = vpop.f32.mrb[34].mxu0 }
 0x240   : > { %v5676_v29 = vpop.eup %5675  ;;  %v2790_v6 = vmul.f32 %v7377_v33, %v2662_v38  ;;  %v2407_v2 = vadd.f32 1.4214138, %v2279_v63  ;;  %v2025_v44 = vmul.f32 1.0614054, %v7409_v62  ;;  %v1131_v45 = vmul.f32 0.70710677, %v664_v42 }
 0x241   : > { %5683 = vrcp.f32 %v1770_v21  ;;  %v3812_v3 = vsub.f32 1.0, %v3684_v39  ;;  %v4069_v31 = vadd.f32 1.0, %v3941_v35  ;;  %v7425_v4 = vmul.f32 0.5, %v853_v25  ;;  %v5678_v5 = vpop.eup %5677 }
 0x242   : > { %v2918_v23 = vadd.f32 0.2548296, %v2790_v6  ;;  %v2535_v24 = vmul.f32 %v7394_v14, %v2407_v2  ;;  %v2153_v7 = vadd.f32 -1.4531521, %v2025_v44  ;;  %5685 = vpow2.f32 %v3477_v37 }
 0x243   : > { %v1515_v36 = vand.u32 2147483647, %v1131_v45  ;;  %v3481_v21 = vmul.f32 1.442695, %v3306_v30  ;;  %v7433_v39 = vsel %vm1258_vm15, 1.0, %v9641_v53  ;;  %v3940_v25 = vmul.f32 %v3812_v3, %v7328_v57 }
 0x244   : > { %v3046_v38 = vmul.f32 %v7377_v33, %v2918_v23  ;;  %v2663_v63 = vadd.f32 -0.28449672, %v2535_v24  ;;  %v2281_v52 = vmul.f32 %v7409_v62, %v2153_v7  ;;  %v1133_v35 = vmul.f32 0.70710677, %v857_v15  ;;  %v7443_v7 = vpop.f32.mrb[34].mxu1 }
 0x245   : > { %v7429_v40 = vpop.eup %5679  ;;  %v1643_v6 = vmul.f32 0.3275911, %v1515_v36  ;;  %v3179_v2 = vsub.f32 0.0, %v1515_v36  ;;  %v7438_v23 = vmul.f32 %v4069_v31, %v7281_v54  ;;  %v7441_v24 = vmul.f32 0.5, %v664_v42  ;;  %9708 = vst [vmem:[#allocation50_spill] sm:$0xff] %v7443_v7 }
 0x246   : > { %v3686_v37 = vmul.f32 %v5676_v29, %v3046_v38  ;;  %v2791_v44 = vmul.f32 %v7394_v14, %v2663_v63  ;;  %v2409_v43 = vadd.f32 1.4214138, %v2281_v52  ;;  %v5682_v33 = vpop.eup %5681  ;;  %v2024_v30 = vmul.f32 1.0614054, %v7429_v40 }
 0x247   : > { %9707 = vst [vmem:[#allocation49_spill] sm:$0xff] %v7438_v23  ;;  %v1771_v51 = vadd.f32 1.0, %v1643_v6  ;;  %vm1259_vm0 = vcmp.ge.f32.partialorder %v1131_v45, 0.0  ;;  %v7446_v57 = vmul.f32 0.5, %v857_v15  ;;  %v3307_v3 = vmul.f32 %v3179_v2, %v1515_v36 }
 0x248   : > { %v2919_v60 = vadd.f32 0.2548296, %v2791_v44  ;;  %v2537_v58 = vmul.f32 %v7409_v62, %v2409_v43  ;;  %v2152_v29 = vadd.f32 -1.4531521, %v2024_v30  ;;  %v1517_v38 = vand.u32 2147483647, %v1133_v35 }
 0x249   : > { %5687 = vrcp.f32 %v1771_v51  ;;  %v4068_v63 = vadd.f32 1.0, %v3940_v25  ;;  %v3814_v54 = vsub.f32 1.0, %v3686_v37  ;;  %v7453_v44 = vsel %vm1259_vm0, 1.0, %v9641_v53  ;;  %v7459_v37 = vpop.f32.mrb[35].mxu0 }
 0x24a   : > { %v3047_v31 = vmul.f32 %v7394_v14, %v2919_v60  ;;  %v2665_v52 = vadd.f32 -0.28449672, %v2537_v58  ;;  %v2280_v6 = vmul.f32 %v7429_v40, %v2152_v29  ;;  %v1645_v43 = vmul.f32 0.3275911, %v1517_v38 }
 0x24b   : > { %v7449_v42 = vpop.eup %5683  ;;  %v666_v45 = vadd.f32 %v7039_v41, %v6385_v18  ;;  %vm1261_vm1 = vcmp.ge.f32.partialorder %v1133_v35, 0.0  ;;  %5689 = vpow2.f32 %v3481_v21  ;;  %v3483_v58 = vmul.f32 1.442695, %v3307_v3 }
 0x24c   : > { %v3687_v15 = vmul.f32 %v5678_v5, %v3047_v31  ;;  %v2793_v36 = vmul.f32 %v7409_v62, %v2665_v52  ;;  %v2026_v2 = vmul.f32 1.0614054, %v7449_v42  ;;  %v5686_v25 = vpop.eup %5685  ;;  %v2408_v60 = vadd.f32 1.4214138, %v2280_v6  ;;  %v9710_v6 = vld [vmem:[#allocation32_spill] sm:$0xff] }
 0x24d   : > { %v1773_v14 = vadd.f32 1.0, %v1645_v43  ;;  %v3942_v30 = vmul.f32 %v3814_v54, %v7343_v50  ;;  %v3181_v23 = vsub.f32 0.0, %v1517_v38  ;;  %v1132_v5 = vmul.f32 0.70710677, %v666_v45 }
 0x24e   : > { %v2921_v51 = vadd.f32 0.2548296, %v2793_v36  ;;  %v2154_v29 = vadd.f32 -1.4531521, %v2026_v2  ;;  %v3815_v7 = vsub.f32 1.0, %v3687_v15  ;;  %v2536_v41 = vmul.f32 %v7429_v40, %v2408_v60 }
 0x24f   : > { %5691 = vrcp.f32 %v1773_v14  ;;  %v7464_v31 = vmul.f32 %v4068_v63, %v7312_v27  ;;  %v7470_v3 = vsel %vm1261_vm1, 1.0, %v9641_v53  ;;  %v1516_v54 = vand.u32 2147483647, %v1132_v5 }
 0x250   : > { %v3049_v52 = vmul.f32 %v7409_v62, %v2921_v51  ;;  %v2282_v21 = vmul.f32 %v7449_v42, %v2154_v29  ;;  %v2664_v50 = vadd.f32 -0.28449672, %v2536_v41  ;;  %5693 = vpow2.f32 %v3483_v58  ;;  %v7482_v41 = vpop.f32.mrb[35].mxu1 }
 0x251   : > { %9709 = vst [vmem:[#allocation51_spill] sm:$0xff] %v7464_v31  ;;  %v859_v43 = vadd.f32 %v9710_v6, %v6387_v19  ;;  %v4070_v15 = vadd.f32 1.0, %v3942_v30  ;;  %v3309_v60 = vmul.f32 %v3181_v23, %v1517_v38  ;;  %v3943_v62 = vmul.f32 %v3815_v7, %v7360_v0 }
 0x252   : > { %v3689_v36 = vmul.f32 %v5682_v33, %v3049_v52  ;;  %v2410_v2 = vadd.f32 1.4214138, %v2282_v21  ;;  %v2792_v63 = vmul.f32 %v7429_v40, %v2664_v50  ;;  %v7478_v14 = vmul.f32 0.5, %v666_v45 }
 0x253   : > { %v7474_v27 = vpop.eup %5687  ;;  %v1644_v35 = vmul.f32 0.3275911, %v1516_v54  ;;  %vm1260_vm2 = vcmp.ge.f32.partialorder %v1132_v5, 0.0  ;;  %v3180_v29 = vsub.f32 0.0, %v1516_v54  ;;  %v1134_v38 = vmul.f32 0.70710677, %v859_v43 }
 0x254   : > { %v2538_v51 = vmul.f32 %v7449_v42, %v2410_v2  ;;  %v2027_v58 = vmul.f32 1.0614054, %v7474_v27  ;;  %v3817_v33 = vsub.f32 1.0, %v3689_v36  ;;  %v2920_v30 = vadd.f32 0.2548296, %v2792_v63 }
 0x255   : > { %v1772_v23 = vadd.f32 1.0, %v1644_v35  ;;  %v7485_v52 = vmul.f32 %v4070_v15, %v7334_v46  ;;  %v3487_v45 = vmul.f32 1.442695, %v3309_v60  ;;  %v5690_v21 = vpop.eup %5689  ;;  %v4071_v50 = vadd.f32 1.0, %v3943_v62 }
 0x256   : > { %v2666_v0 = vadd.f32 -0.28449672, %v2538_v51  ;;  %v2155_v7 = vadd.f32 -1.4531521, %v2027_v58  ;;  %v3048_v6 = vmul.f32 %v7429_v40, %v2920_v30  ;;  %v668_v2 = vadd.f32 %v7092_v32, %v6381_v16 }
 0x257   : > { %9711 = vst [vmem:[#allocation32_spill] sm:$0xff] %v7485_v52  ;;  %5695 = vrcp.f32 %v1772_v23  ;;  %v7494_v63 = vsel %vm1260_vm2, 1.0, %v9641_v53  ;;  %v3308_v46 = vmul.f32 %v3180_v29, %v1516_v54  ;;  %v3945_v60 = vmul.f32 %v3817_v33, %v7392_v8 }
 0x258   : > { %v2794_v31 = vmul.f32 %v7449_v42, %v2666_v0  ;;  %v2283_v36 = vmul.f32 %v7474_v27, %v2155_v7  ;;  %v3688_v62 = vmul.f32 %v5686_v25, %v3048_v6  ;;  %v7499_v35 = vmul.f32 0.5, %v859_v43 }
 0x259   : > { %v7496_v15 = vpop.eup %5691  ;;  %v1518_v40 = vand.u32 2147483647, %v1134_v38  ;;  %5697 = vpow2.f32 %v3487_v45  ;;  %vm1262_vm3 = vcmp.ge.f32.partialorder %v1134_v38, 0.0  ;;  %v1135_v0 = vmul.f32 0.70710677, %v668_v2 }
 0x25a   : > { %v2922_v51 = vadd.f32 0.2548296, %v2794_v31  ;;  %v2411_v58 = vadd.f32 1.4214138, %v2283_v36  ;;  %v2029_v32 = vmul.f32 1.0614054, %v7496_v15  ;;  %v5694_v30 = vpop.eup %5693  ;;  %v7505_v25 = vmul.f32 %v4071_v50, %v7355_v61 }
 0x25b   : > { %v1646_v23 = vmul.f32 0.3275911, %v1518_v40  ;;  %v3182_v5 = vsub.f32 0.0, %v1518_v40  ;;  %v3485_v8 = vmul.f32 1.442695, %v3308_v46  ;;  %v4073_v43 = vadd.f32 1.0, %v3945_v60 }
 0x25c   : > { %v3050_v54 = vmul.f32 %v7449_v42, %v2922_v51  ;;  %v2539_v29 = vmul.f32 %v7474_v27, %v2411_v58  ;;  %v2157_v7 = vadd.f32 -1.4531521, %v2029_v32  ;;  %9712 = vst [vmem:[#allocation52_spill] sm:$0xff] %v7505_v25  ;;  %v3816_v31 = vsub.f32 1.0, %v3688_v62  ;;  %v9713_v51 = vld [vmem:[#allocation34_spill] sm:$0xff] }
 0x25d   : > { %v1774_v33 = vadd.f32 1.0, %v1646_v23  ;;  %v7509_v38 = vsel %vm1262_vm3, 1.0, %v9641_v53  ;;  %v3310_v52 = vmul.f32 %v3182_v5, %v1518_v40  ;;  %v1519_v42 = vand.u32 2147483647, %v1135_v0 }
 0x25e   : > { %v3690_v6 = vmul.f32 %v5690_v21, %v3050_v54  ;;  %v2667_v36 = vadd.f32 -0.28449672, %v2539_v29  ;;  %v2285_v45 = vmul.f32 %v7496_v15, %v2157_v7  ;;  %v861_v58 = vadd.f32 %v9713_v51, %v6383_v17 }
 0x25f   : > { %5699 = vrcp.f32 %v1774_v33  ;;  %v7517_v21 = vmul.f32 %v4073_v43, %v7375_v9  ;;  %v3944_v62 = vmul.f32 %v3816_v31, %v7403_v26  ;;  %v7520_v32 = vmul.f32 0.5, %v668_v2  ;;  %v7526_v2 = vpop.f32.mrb[36].mxu0 }
 0x260   : > { %v3818_v46 = vsub.f32 1.0, %v3690_v6  ;;  %v2795_v61 = vmul.f32 %v7474_v27, %v2667_v36  ;;  %v2413_v50 = vadd.f32 1.4214138, %v2285_v45  ;;  %5701 = vpow2.f32 %v3485_v8 }
 0x261   : > { %v7514_v60 = vpop.eup %5695  ;;  %9714 = vst [vmem:[#allocation34_spill] sm:$0xff] %v7517_v21  ;;  %v1647_v23 = vmul.f32 0.3275911, %v1519_v42  ;;  %vm1263_vm4 = vcmp.ge.f32.partialorder %v1135_v0, 0.0  ;;  %v3489_v29 = vmul.f32 1.442695, %v3310_v52  ;;  %v670_v52 = vadd.f32 %v7125_v55, %v6385_v18 }
 0x262   : > { %v2923_v40 = vadd.f32 0.2548296, %v2795_v61  ;;  %v2541_v5 = vmul.f32 %v7496_v15, %v2413_v50  ;;  %v2028_v54 = vmul.f32 1.0614054, %v7514_v60  ;;  %v3183_v33 = vsub.f32 0.0, %v1519_v42  ;;  %v7533_v0 = vpop.f32.mrb[36].mxu1 }
 0x263   : > { %v1775_v7 = vadd.f32 1.0, %v1647_v23  ;;  %v1137_v8 = vmul.f32 0.70710677, %v861_v58  ;;  %v5698_v6 = vpop.eup %5697  ;;  %v3946_v36 = vmul.f32 %v3818_v46, %v7433_v39  ;;  %v7529_v31 = vsel %vm1263_vm4, 1.0, %v9641_v53  ;;  %9715 = vst [vmem:[#allocation53_spill] sm:$0xff] %v7533_v0 }
 0x264   : > { %v3051_v9 = vmul.f32 %v7474_v27, %v2923_v40  ;;  %v2669_v43 = vadd.f32 -0.28449672, %v2541_v5  ;;  %v2156_v26 = vadd.f32 -1.4531521, %v2028_v54  ;;  %v4072_v51 = vadd.f32 1.0, %v3944_v62 }
 0x265   : > { %5703 = vrcp.f32 %v1775_v7  ;;  %v1521_v45 = vand.u32 2147483647, %v1137_v8  ;;  %v7537_v46 = vmul.f32 0.5, %v861_v58  ;;  %v4074_v40 = vadd.f32 1.0, %v3946_v36 }
 0x266   : > { %v3691_v61 = vmul.f32 %v5694_v30, %v3051_v9  ;;  %v2797_v39 = vmul.f32 %v7496_v15, %v2669_v43  ;;  %v2284_v27 = vmul.f32 %v7514_v60, %v2156_v26  ;;  %5705 = vpow2.f32 %v3489_v29 }
 0x267   : > { %v1649_v50 = vmul.f32 0.3275911, %v1521_v45  ;;  %v3185_v23 = vsub.f32 0.0, %v1521_v45  ;;  %v3311_v7 = vmul.f32 %v3183_v33, %v1519_v42  ;;  %vm1265_vm5 = vcmp.ge.f32.partialorder %v1137_v8, 0.0 }
 0x268   : > { %v2925_v5 = vadd.f32 0.2548296, %v2797_v39  ;;  %v2412_v54 = vadd.f32 1.4214138, %v2284_v27  ;;  %v3819_v55 = vsub.f32 1.0, %v3691_v61  ;;  %v7545_v26 = vmul.f32 %v4072_v51, %v7399_v56 }
 0x269   : > { %v7539_v21 = vpop.eup %5699  ;;  %v1777_v25 = vadd.f32 1.0, %v1649_v50  ;;  %v1136_v62 = vmul.f32 0.70710677, %v670_v52  ;;  %v3313_v29 = vmul.f32 %v3185_v23, %v1521_v45  ;;  %v7549_v42 = vadd.f32 %v7146_v22, %v6387_v19 }
 0x26a   : > { %v5702_v30 = vpop.eup %5701  ;;  %v3053_v9 = vmul.f32 %v7496_v15, %v2925_v5  ;;  %v2540_v43 = vmul.f32 %v7514_v60, %v2412_v54  ;;  %v2030_v58 = vmul.f32 1.0614054, %v7539_v21  ;;  %9716 = vst [vmem:[#allocation54_spill] sm:$0xff] %v7545_v26  ;;  %v3491_v27 = vmul.f32 1.442695, %v3311_v7 }
 0x26b   : > { %5707 = vrcp.f32 %v1777_v25  ;;  %v1520_v36 = vand.u32 2147483647, %v1136_v62  ;;  %v7552_v15 = vmul.f32 %v4074_v40, %v7425_v4  ;;  %v7556_v50 = vsel %vm1265_vm5, 1.0, %v9641_v53 }
 0x26c   : > { %v3693_v33 = vmul.f32 %v5698_v6, %v3053_v9  ;;  %v2668_v61 = vadd.f32 -0.28449672, %v2540_v43  ;;  %v2158_v39 = vadd.f32 -1.4531521, %v2030_v58  ;;  %v3947_v25 = vmul.f32 %v3819_v55, %v7453_v44 }
 0x26d   : > { %9717 = vst [vmem:[#allocation55_spill] sm:$0xff] %v7552_v15  ;;  %v1648_v45 = vmul.f32 0.3275911, %v1520_v36  ;;  %v3184_v56 = vsub.f32 0.0, %v1520_v36  ;;  %v3495_v23 = vmul.f32 1.442695, %v3313_v29  ;;  %5709 = vpow2.f32 %v3491_v27 }
 0x26e   : > { %v2796_v51 = vmul.f32 %v7514_v60, %v2668_v61  ;;  %v2286_v22 = vmul.f32 %v7539_v21, %v2158_v39  ;;  %v3821_v5 = vsub.f32 1.0, %v3693_v33  ;;  %vm1264_vm6 = vcmp.ge.f32.partialorder %v1136_v62, 0.0 }
 0x26f   : > { %v7561_v6 = vpop.eup %5703  ;;  %v1776_v54 = vadd.f32 1.0, %v1648_v45  ;;  %v1138_v4 = vmul.f32 0.70710677, %v7549_v42  ;;  %v7565_v43 = vmul.f32 0.5, %v670_v52  ;;  %v3312_v44 = vmul.f32 %v3184_v56, %v1520_v36 }
 0x270   : > { %v2924_v40 = vadd.f32 0.2548296, %v2796_v51  ;;  %v2414_v8 = vadd.f32 1.4214138, %v2286_v22  ;;  %v2031_v7 = vmul.f32 1.0614054, %v7561_v6  ;;  %v5706_v9 = vpop.eup %5705  ;;  %v3949_v27 = vmul.f32 %v3821_v5, %v7470_v3 }
 0x271   : > { %5711 = vrcp.f32 %v1776_v54  ;;  %v1522_v55 = vand.u32 2147483647, %v1138_v4  ;;  %v4075_v58 = vadd.f32 1.0, %v3947_v25  ;;  %v7571_v39 = vsel %vm1264_vm6, 1.0, %v9641_v53  ;;  %v9718_v54 = vld [vmem:[#allocation21_spill] sm:$0xff] }
 0x272   : > { %v3052_v29 = vmul.f32 %v7514_v60, %v2924_v40  ;;  %v2542_v33 = vmul.f32 %v7539_v21, %v2414_v8  ;;  %v2159_v61 = vadd.f32 -1.4531521, %v2031_v7  ;;  %5713 = vpow2.f32 %v3495_v23  ;;  %v9719_v40 = vld [vmem:[#allocation24_spill] sm:$0xff]  ;;  %v9720_v23 = vld [vmem:[#allocation22_spill] sm:$0xff]  ;;  %v9721_v7 = vld [vmem:[#allocation25_spill] sm:$0xff] }
 0x273   : > { %v1650_v45 = vmul.f32 0.3275911, %v1522_v55  ;;  %v3186_v51 = vsub.f32 0.0, %v1522_v55  ;;  %v3493_v25 = vmul.f32 1.442695, %v3312_v44  ;;  %v4284_v8 = vpack.c.bf16 %v9719_v40, %v9718_v54 }
 0x274   : > { %v3692_v52 = vmul.f32 %v5702_v30, %v3052_v29  ;;  %v2670_v22 = vadd.f32 -0.28449672, %v2542_v33  ;;  %v2287_v36 = vmul.f32 %v7561_v6, %v2159_v61  ;;  %v4286_v62 = vpack.c.bf16 %v9721_v7, %v9720_v23  ;;  %v7583_v30 = vpop.f32.mrb[37].mxu0  ;;  %v7587_v29 = vpop.f32.mrb[37].mxu1 }
 0x275   : > { %v7575_v56 = vpop.eup %5707  ;;  %v1778_v60 = vadd.f32 1.0, %v1650_v45  ;;  %v3314_v3 = vmul.f32 %v3186_v51, %v1522_v55  ;;  %vm1266_vm7 = vcmp.ge.f32.partialorder %v1138_v4, 0.0  ;;  %4642 = vmatprep.mubr.bf16.mxu0 %v4284_v8  ;;  %v674_v44 = vadd.f32 %v7193_v34, %v6381_v16  ;;  %v9722_v55 = vld [vmem:[#allocation20_spill] sm:$0xff]  ;;  %v9723_v51 = vld [vmem:[#allocation18_spill] sm:$0xff] }
 0x276   : > { %v2798_v15 = vmul.f32 %v7539_v21, %v2670_v22  ;;  %v2415_v26 = vadd.f32 1.4214138, %v2287_v36  ;;  %v2033_v0 = vmul.f32 1.0614054, %v7575_v56  ;;  %v3820_v5 = vsub.f32 1.0, %v3692_v52  ;;  %4803 = vmatprep.mubr.bf16.mxu1 %v4286_v62  ;;  %v9725_v52 = vld [vmem:[#allocation23_spill] sm:$0xff] }
 0x277   : > { %5715 = vrcp.f32 %v1778_v60  ;;  %v867_v22 = vadd.f32 %v7195_v48, %v6383_v17  ;;  %v9724_v36 = vpack.c.bf16 %v9722_v55, %v9723_v51  ;;  %v9726_v60 = vld [vmem:[#allocation19_spill] sm:$0xff]  ;;  %v7599_v40 = vmul.f32 %v4075_v58, %v7441_v24  ;;  %v5710_v48 = vpop.eup %5709 }
 0x278   : > { %v2926_v33 = vadd.f32 0.2548296, %v2798_v15  ;;  %v2543_v61 = vmul.f32 %v7561_v6, %v2415_v26  ;;  %v2161_v45 = vadd.f32 -1.4531521, %v2033_v0  ;;  %v9727_v54 = vpack.c.bf16 %v9725_v52, %v9726_v60  ;;  %v7606_v0 = vpop.f32.mrb[38].mxu0  ;;  %v7626_v52 = vpop.f32.mrb[38].mxu1 }
 0x279   : > { %4643 = vmatmul.mubr.bf16.vlgmr.msra.gmra.mrb[64].mxu0 %v9724_v36  ;;  %9728 = vst [vmem:[#allocation21_spill] sm:$0xff] %v7599_v40  ;;  %v4077_v34 = vadd.f32 1.0, %v3949_v27  ;;  %v7602_v15 = vmul.f32 0.5, %v7549_v42  ;;  %v7604_v26 = vmul.f32 0.70710677, %v674_v44  ;;  %v3948_v24 = vmul.f32 %v3820_v5, %v7494_v63 }
 0x27a   : > { %4804 = vmatmul.mubr.bf16.vlgmr.msra.gmra.mrb[64].mxu1 %v9727_v54  ;;  %v3054_v8 = vmul.f32 %v7539_v21, %v2926_v33  ;;  %v2671_v23 = vadd.f32 -0.28449672, %v2543_v61  ;;  %v2289_v7 = vmul.f32 %v7575_v56, %v2161_v45  ;;  %v3497_v62 = vmul.f32 1.442695, %v3314_v3 }
 0x27b   : > { %v7610_v55 = vpop.eup %5711  ;;  %5717 = vpow2.f32 %v3493_v25  ;;  %v7615_v42 = vsel %vm1266_vm7, 1.0, %v9641_v53  ;;  %v1523_v58 = vand.u32 2147483647, %v7604_v26  ;;  %v1141_v21 = vmul.f32 0.70710677, %v867_v22 }
 0x27c   : > { %v3694_v27 = vmul.f32 %v5706_v9, %v3054_v8  ;;  %v2799_v51 = vmul.f32 %v7561_v6, %v2671_v23  ;;  %v2417_v36 = vadd.f32 1.4214138, %v2289_v7  ;;  %v5714_v33 = vpop.eup %5713  ;;  %v7620_v61 = vmul.f32 %v4077_v34, %v7446_v57 }
 0x27d   : > { %v2032_v3 = vmul.f32 1.0614054, %v7610_v55  ;;  %v1651_v45 = vmul.f32 0.3275911, %v1523_v58  ;;  %v3187_v63 = vsub.f32 0.0, %v1523_v58  ;;  %5719 = vpow2.f32 %v3497_v62 }
 0x27e   : > { %9729 = vst [vmem:[#allocation24_spill] sm:$0xff] %v7620_v61  ;;  %v2927_v25 = vadd.f32 0.2548296, %v2799_v51  ;;  %v2545_v4 = vmul.f32 %v7575_v56, %v2417_v36  ;;  %v7624_v5 = vmul.f32 0.5, %v674_v44  ;;  %v3822_v9 = vsub.f32 1.0, %v3694_v27 }
 0x27f   : > { %v2160_v60 = vadd.f32 -1.4531521, %v2032_v3  ;;  %v1779_v54 = vadd.f32 1.0, %v1651_v45  ;;  %v7628_v8 = vmul.f32 0.5, %v867_v22  ;;  %v4076_v23 = vadd.f32 1.0, %v3948_v24 }
 0x280   : > { %v3055_v57 = vmul.f32 %v7561_v6, %v2927_v25  ;;  %v2673_v34 = vadd.f32 -0.28449672, %v2545_v4  ;;  %v1525_v7 = vand.u32 2147483647, %v1141_v21  ;;  %v3315_v62 = vmul.f32 %v3187_v63, %v1523_v58 }
 0x281   : > { %v7631_v61 = vpop.eup %5715  ;;  %v2288_v51 = vmul.f32 %v7610_v55, %v2160_v60  ;;  %5721 = vrcp.f32 %v1779_v54  ;;  %v676_v44 = vadd.f32 %v7213_v28, %v6385_v18  ;;  %vm1267_vm8 = vcmp.ge.f32.partialorder %v7604_v26, 0.0 }
 0x282   : > { %v3695_v36 = vmul.f32 %v5710_v48, %v3055_v57  ;;  %v2801_v27 = vmul.f32 %v7575_v56, %v2673_v34  ;;  %v2034_v22 = vmul.f32 1.0614054, %v7631_v61  ;;  %v3950_v6 = vmul.f32 %v3822_v9, %v7509_v38  ;;  %v7645_v9 = vpop.f32.mrb[39].mxu0 }
 0x283   : > { %v2416_v24 = vadd.f32 1.4214138, %v2288_v51  ;;  %v1653_v3 = vmul.f32 0.3275911, %v1525_v7  ;;  %v3189_v45 = vsub.f32 0.0, %v1525_v7  ;;  %vm1269_vm9 = vcmp.ge.f32.partialorder %v1141_v21, 0.0 }
 0x284   : > { %v3823_v25 = vsub.f32 1.0, %v3695_v36  ;;  %v2929_v4 = vadd.f32 0.2548296, %v2801_v27  ;;  %v2162_v60 = vadd.f32 -1.4531521, %v2034_v22  ;;  %v869_v38 = vadd.f32 %v7233_v11, %v6387_v19 }
 0x285   : > { %v5718_v58 = vpop.eup %5717  ;;  %v2544_v63 = vmul.f32 %v7610_v55, %v2416_v24  ;;  %v3499_v28 = vmul.f32 1.442695, %v3315_v62  ;;  %v1781_v48 = vadd.f32 1.0, %v1653_v3  ;;  %v1140_v54 = vmul.f32 0.70710677, %v676_v44 }
 0x286   : > { %v3057_v57 = vmul.f32 %v7575_v56, %v2929_v4  ;;  %v2290_v34 = vmul.f32 %v7631_v61, %v2162_v60  ;;  %v3317_v40 = vmul.f32 %v3189_v45, %v1525_v7  ;;  %v7648_v51 = vmul.f32 %v4076_v23, %v7478_v14 }
 0x287   : > { %v4078_v36 = vadd.f32 1.0, %v3950_v6  ;;  %v2672_v27 = vadd.f32 -0.28449672, %v2544_v63  ;;  %5723 = vrcp.f32 %v1781_v48  ;;  %v5720_v22 = vpop.eup %5719  ;;  %v3951_v62 = vmul.f32 %v3823_v25, %v7529_v31  ;;  %v7669_v63 = vpop.f32.mrb[39].mxu1 }
 0x288   : > { %9730 = vst [vmem:[#allocation22_spill] sm:$0xff] %v7648_v51  ;;  %v3697_v24 = vmul.f32 %v5714_v33, %v3057_v57  ;;  %v2418_v3 = vadd.f32 1.4214138, %v2290_v34  ;;  %v7654_v56 = vsel %vm1267_vm8, 1.0, %v9641_v53  ;;  %v7659_v7 = vsel %vm1269_vm9, 1.0, %v9641_v53 }
 0x289   : > { %v2800_v11 = vmul.f32 %v7610_v55, %v2672_v27  ;;  %v7661_v14 = vmul.f32 0.5, %v676_v44  ;;  %v1524_v23 = vand.u32 2147483647, %v1140_v54  ;;  %5725 = vpow2.f32 %v3499_v28 }
 0x28a   : > { %v2546_v6 = vmul.f32 %v7631_v61, %v2418_v3  ;;  %v3503_v31 = vmul.f32 1.442695, %v3317_v40  ;;  %v1142_v33 = vmul.f32 0.70710677, %v869_v38  ;;  %v7667_v26 = vmul.f32 %v4078_v36, %v7499_v35 }
 0x28b   : > { %v7664_v45 = vpop.eup %5721  ;;  %v3825_v25 = vsub.f32 1.0, %v3697_v24  ;;  %v2928_v4 = vadd.f32 0.2548296, %v2800_v11  ;;  %v1652_v60 = vmul.f32 0.3275911, %v1524_v23  ;;  %v4079_v21 = vadd.f32 1.0, %v3951_v62 }
 0x28c   : > { %9731 = vst [vmem:[#allocation25_spill] sm:$0xff] %v7667_v26  ;;  %v2674_v48 = vadd.f32 -0.28449672, %v2546_v6  ;;  %v2035_v44 = vmul.f32 1.0614054, %v7664_v45  ;;  %vm1268_vm10 = vcmp.ge.f32.partialorder %v1140_v54, 0.0  ;;  %v678_v34 = vadd.f32 %v7256_v13, %v6381_v16 }
 0x28d   : > { %v3056_v57 = vmul.f32 %v7610_v55, %v2928_v4  ;;  %v1780_v28 = vadd.f32 1.0, %v1652_v60  ;;  %v3188_v40 = vsub.f32 0.0, %v1524_v23  ;;  %5727 = vpow2.f32 %v3503_v31 }
 0x28e   : > { %v2802_v35 = vmul.f32 %v7631_v61, %v2674_v48  ;;  %v2163_v36 = vadd.f32 -1.4531521, %v2035_v44  ;;  %v1526_v27 = vand.u32 2147483647, %v1142_v33  ;;  %v3953_v24 = vmul.f32 %v3825_v25, %v7556_v50 }
 0x28f   : > { %v3696_v3 = vmul.f32 %v5718_v58, %v3056_v57  ;;  %v7678_v62 = vsel %vm1268_vm10, 1.0, %v9641_v53  ;;  %5729 = vrcp.f32 %v1780_v28  ;;  %vm1270_vm11 = vcmp.ge.f32.partialorder %v1142_v33, 0.0 }
 0x290   : > { %v2930_v54 = vadd.f32 0.2548296, %v2802_v35  ;;  %v2291_v55 = vmul.f32 %v7664_v45, %v2163_v36  ;;  %v1654_v11 = vmul.f32 0.3275911, %v1526_v27  ;;  %v3316_v4 = vmul.f32 %v3188_v40, %v1524_v23 }
 0x291   : > { %v7681_v6 = vpop.eup %5723  ;;  %v3824_v13 = vsub.f32 1.0, %v3696_v3  ;;  %v3190_v60 = vsub.f32 0.0, %v1526_v27  ;;  %v1143_v48 = vmul.f32 0.70710677, %v678_v34  ;;  %v4081_v25 = vadd.f32 1.0, %v3953_v24 }
 0x292   : > { %v3058_v31 = vmul.f32 %v7631_v61, %v2930_v54  ;;  %v2419_v44 = vadd.f32 1.4214138, %v2291_v55  ;;  %v2037_v50 = vmul.f32 1.0614054, %v7681_v6  ;;  %v1782_v58 = vadd.f32 1.0, %v1654_v11 }
 0x293   : > { %v3952_v57 = vmul.f32 %v3824_v13, %v7571_v39  ;;  %v7686_v28 = vmul.f32 0.5, %v869_v38  ;;  %v1527_v35 = vand.u32 2147483647, %v1143_v48  ;;  %v5726_v36 = vpop.eup %5725  ;;  %v7690_v23 = vmul.f32 %v4079_v21, %v7520_v32 }
 0x294   : > { %v3698_v26 = vmul.f32 %v5720_v22, %v3058_v31  ;;  %v2547_v51 = vmul.f32 %v7664_v45, %v2419_v44  ;;  %v2165_v3 = vadd.f32 -1.4531521, %v2037_v50  ;;  %5731 = vrcp.f32 %v1782_v58  ;;  %v9734_v50 = vld [vmem:[#allocation11_spill] sm:$0xff] }
 0x295   : > { %9732 = vst [vmem:[#allocation20_spill] sm:$0xff] %v7690_v23  ;;  %v7694_v61 = vsel %vm1270_vm11, 1.0, %v9641_v53  ;;  %v3318_v40 = vmul.f32 %v3190_v60, %v1526_v27  ;;  %v1655_v24 = vmul.f32 0.3275911, %v1527_v35  ;;  %v3501_v38 = vmul.f32 1.442695, %v3316_v4 }
 0x296   : > { %v2675_v54 = vadd.f32 -0.28449672, %v2547_v51  ;;  %v2293_v39 = vmul.f32 %v7681_v6, %v2165_v3  ;;  %v7697_v55 = vmul.f32 0.5, %v678_v34  ;;  %v7700_v22 = vmul.f32 %v4081_v25, %v7537_v46 }
 0x297   : > { %v3826_v11 = vsub.f32 1.0, %v3698_v26  ;;  %v1783_v13 = vadd.f32 1.0, %v1655_v24  ;;  %v871_v32 = vadd.f32 %v7273_v20, %v6383_v17  ;;  %v5728_v21 = vpop.eup %5727  ;;  %v4080_v33 = vadd.f32 1.0, %v3952_v57 }
 0x298   : > { %9733 = vst [vmem:[#allocation18_spill] sm:$0xff] %v7700_v22  ;;  %v2803_v31 = vmul.f32 %v7664_v45, %v2675_v54  ;;  %v2421_v27 = vadd.f32 1.4214138, %v2293_v39  ;;  %vm1271_vm12 = vcmp.ge.f32.partialorder %v1143_v48, 0.0  ;;  %v3505_v60 = vmul.f32 1.442695, %v3318_v40 }
 0x299   : > { %v7705_v51 = vpop.eup %5729  ;;  %5733 = vrcp.f32 %v1783_v13  ;;  %v3191_v34 = vsub.f32 0.0, %v1527_v35  ;;  %v1145_v4 = vmul.f32 0.70710677, %v871_v32  ;;  %v680_v20 = vadd.f32 %v9734_v50, %v6385_v18  ;;  %v7719_v54 = vpop.f32.mrb[40].mxu0 }
 0x29a   : > { %v2931_v44 = vadd.f32 0.2548296, %v2803_v31  ;;  %v2549_v46 = vmul.f32 %v7681_v6, %v2421_v27  ;;  %v2036_v26 = vmul.f32 1.0614054, %v7705_v51  ;;  %v3954_v58 = vmul.f32 %v3826_v11, %v7615_v42  ;;  %v7721_v39 = vpop.f32.mrb[40].mxu1 }
 0x29b   : > { %5735 = vpow2.f32 %v3501_v38  ;;  %v7713_v25 = vsel %vm1271_vm12, 1.0, %v9641_v53  ;;  %v1529_v48 = vand.u32 2147483647, %v1145_v4  ;;  %v7716_v57 = vmul.f32 %v4080_v33, %v7565_v43  ;;  %9736 = vst [vmem:[#allocation19_spill] sm:$0xff] %v7721_v39 }
 0x29c   : > { %v3059_v3 = vmul.f32 %v7664_v45, %v2931_v44  ;;  %v2677_v40 = vadd.f32 -0.28449672, %v2549_v46  ;;  %v2164_v24 = vadd.f32 -1.4531521, %v2036_v26  ;;  %5737 = vpow2.f32 %v3505_v60 }
 0x29d   : > { %9735 = vst [vmem:[#allocation23_spill] sm:$0xff] %v7716_v57  ;;  %v3319_v13 = vmul.f32 %v3191_v34, %v1527_v35  ;;  %v1657_v31 = vmul.f32 0.3275911, %v1529_v48  ;;  %v3193_v42 = vsub.f32 0.0, %v1529_v48  ;;  %v1144_v33 = vmul.f32 0.70710677, %v680_v20 }
 0x29e   : > { %v7723_v38 = vpop.eup %5731  ;;  %v3699_v11 = vmul.f32 %v5726_v36, %v3059_v3  ;;  %v2805_v27 = vmul.f32 %v7681_v6, %v2677_v40  ;;  %v2292_v43 = vmul.f32 %v7705_v51, %v2164_v24  ;;  %v4082_v50 = vadd.f32 1.0, %v3954_v58 }
 0x29f   : > { %v2038_v45 = vmul.f32 1.0614054, %v7723_v38  ;;  %v1785_v44 = vadd.f32 1.0, %v1657_v31  ;;  %v3321_v46 = vmul.f32 %v3193_v42, %v1529_v48  ;;  %v7728_v23 = vmul.f32 0.5, %v871_v32 }
 0x2a0   : > { %v2933_v26 = vadd.f32 0.2548296, %v2805_v27  ;;  %v2420_v22 = vadd.f32 1.4214138, %v2292_v43  ;;  %v7732_v35 = vadd.f32 %v7316_v59, %v6387_v19  ;;  %v3507_v36 = vmul.f32 1.442695, %v3319_v13 }
 0x2a1   : > { %v2166_v60 = vadd.f32 -1.4531521, %v2038_v45  ;;  %vm1273_vm13 = vcmp.ge.f32.partialorder %v1145_v4, 0.0  ;;  %5739 = vrcp.f32 %v1785_v44  ;;  %v3827_v34 = vsub.f32 1.0, %v3699_v11 }
 0x2a2   : > { %v3061_v3 = vmul.f32 %v7681_v6, %v2933_v26  ;;  %v2548_v58 = vmul.f32 %v7705_v51, %v2420_v22  ;;  %v1528_v40 = vand.u32 2147483647, %v1144_v33  ;;  %v7739_v48 = vmul.f32 %v4082_v50, %v7602_v15 }
 0x2a3   : > { %v7736_v24 = vpop.eup %5733  ;;  %v2294_v32 = vmul.f32 %v7723_v38, %v2166_v60  ;;  %v3511_v31 = vmul.f32 1.442695, %v3321_v46  ;;  %v7742_v59 = vmul.f32 0.5, %v680_v20  ;;  %v1146_v11 = vmul.f32 0.70710677, %v7732_v35 }
 0x2a4   : > { %9737 = vst [vmem:[#allocation11_spill] sm:$0xff] %v7739_v48  ;;  %v3701_v42 = vmul.f32 %v5728_v21, %v3061_v3  ;;  %v2676_v13 = vadd.f32 -0.28449672, %v2548_v58  ;;  %v2039_v27 = vmul.f32 1.0614054, %v7736_v24  ;;  %5741 = vpow2.f32 %v3507_v36  ;;  %v9741_v48 = vld [vmem:[#allocation12_spill] sm:$0xff] }
 0x2a5   : > { %v5736_v6 = vpop.eup %5735  ;;  %v2422_v43 = vadd.f32 1.4214138, %v2294_v32  ;;  %v7748_v22 = vsel %vm1273_vm13, 1.0, %v9641_v53  ;;  %v1656_v15 = vmul.f32 0.3275911, %v1528_v40  ;;  %v3955_v50 = vmul.f32 %v3827_v34, %v7654_v56  ;;  %v9738_v56 = vld [vmem:[#allocation6_spill] sm:$0xff] }
 0x2a6   : > { %v2804_v45 = vmul.f32 %v7705_v51, %v2676_v13  ;;  %v2167_v20 = vadd.f32 -1.4531521, %v2039_v27  ;;  %vm1272_vm14 = vcmp.ge.f32.partialorder %v1144_v33, 0.0  ;;  %v5738_v21 = vpop.eup %5737  ;;  %5743 = vpow2.f32 %v3511_v31  ;;  %v9739_v34 = vld [vmem:[#allocation10_spill] sm:$0xff] }
 0x2a7   : > { %v2550_v44 = vmul.f32 %v7723_v38, %v2422_v43  ;;  %v1784_v46 = vadd.f32 1.0, %v1656_v15  ;;  %v3192_v26 = vsub.f32 0.0, %v1528_v40  ;;  %v3829_v60 = vsub.f32 1.0, %v3701_v42 }
 0x2a8   : > { %v2932_v3 = vadd.f32 0.2548296, %v2804_v45  ;;  %v2295_v36 = vmul.f32 %v7736_v24, %v2167_v20  ;;  %v1530_v4 = vand.u32 2147483647, %v1146_v11  ;;  %v7755_v32 = vsel %vm1272_vm14, 1.0, %v9641_v53 }
 0x2a9   : > { %v2678_v58 = vadd.f32 -0.28449672, %v2550_v44  ;;  %5745 = vrcp.f32 %v1784_v46  ;;  %v4288_v13 = vpack.c.bf16 %v9739_v34, %v9738_v56  ;;  %v4083_v33 = vadd.f32 1.0, %v3955_v50  ;;  %v9740_v44 = vld [vmem:[#allocation7_spill] sm:$0xff] }
 0x2aa   : > { %v3060_v27 = vmul.f32 %v7705_v51, %v2932_v3  ;;  %v2423_v43 = vadd.f32 1.4214138, %v2295_v36  ;;  %v1658_v31 = vmul.f32 0.3275911, %v1530_v4  ;;  %v3320_v45 = vmul.f32 %v3192_v26, %v1528_v40 }
 0x2ab   : > { %v7760_v15 = vpop.eup %5739  ;;  %v2806_v42 = vmul.f32 %v7723_v38, %v2678_v58  ;;  %v3194_v20 = vsub.f32 0.0, %v1530_v4  ;;  %4650 = vmatprep.mubr.bf16.mxu0 %v4288_v13  ;;  %v4290_v57 = vpack.c.bf16 %v9741_v48, %v9740_v44  ;;  %v3957_v46 = vmul.f32 %v3829_v60, %v7659_v7 }
 0x2ac   : > { %v3700_v39 = vmul.f32 %v5736_v6, %v3060_v27  ;;  %v2551_v56 = vmul.f32 %v7736_v24, %v2423_v43  ;;  %v2041_v50 = vmul.f32 1.0614054, %v7760_v15  ;;  %v1786_v3 = vadd.f32 1.0, %v1658_v31  ;;  %v7781_v43 = vpop.f32.mrb[41].mxu1 }
 0x2ad   : > { %v2934_v51 = vadd.f32 0.2548296, %v2806_v42  ;;  %v3322_v36 = vmul.f32 %v3194_v20, %v1530_v4  ;;  %4811 = vmatprep.mubr.bf16.mxu1 %v4290_v57  ;;  %v684_v58 = vadd.f32 %v7363_v12, %v6381_v16  ;;  %vm1274_vm15 = vcmp.ge.f32.partialorder %v1146_v11, 0.0  ;;  %v7779_v12 = vpop.f32.mrb[41].mxu0 }
 0x2ae   : > { %v2679_v40 = vadd.f32 -0.28449672, %v2551_v56  ;;  %v2169_v26 = vadd.f32 -1.4531521, %v2041_v50  ;;  %v7772_v48 = vadd.f32 %v7368_v10, %v6383_v17  ;;  %v5742_v7 = vpop.eup %5741  ;;  %v3828_v6 = vsub.f32 1.0, %v3700_v39 }
 0x2af   : > { %v3062_v60 = vmul.f32 %v7723_v38, %v2934_v51  ;;  %v3509_v34 = vmul.f32 1.442695, %v3320_v45  ;;  %5747 = vrcp.f32 %v1786_v3  ;;  %v4085_v13 = vadd.f32 1.0, %v3957_v46  ;;  %v7790_v45 = vpop.f32.mrb[42].mxu0 }
 0x2b0   : > { %v2807_v4 = vmul.f32 %v7736_v24, %v2679_v40  ;;  %v2297_v57 = vmul.f32 %v7760_v15, %v2169_v26  ;;  %v7777_v27 = vmul.f32 0.70710677, %v684_v58  ;;  %v5744_v31 = vpop.eup %5743  ;;  %v7784_v42 = vmul.f32 0.5, %v7732_v35 }
 0x2b1   : > { %v3702_v10 = vmul.f32 %v5738_v21, %v3062_v60  ;;  %v7788_v39 = vsel %vm1274_vm15, 1.0, %v9641_v53  ;;  %v3513_v38 = vmul.f32 1.442695, %v3322_v36  ;;  %v7793_v20 = vmul.f32 %v4083_v33, %v7624_v5  ;;  %v7808_v36 = vpop.f32.mrb[42].mxu1 }
 0x2b2   : > { %v2935_v44 = vadd.f32 0.2548296, %v2807_v4  ;;  %v2425_v46 = vadd.f32 1.4214138, %v2297_v57  ;;  %v7796_v56 = vmul.f32 0.70710677, %v7772_v48  ;;  %v3956_v35 = vmul.f32 %v3828_v6, %v7678_v62 }
 0x2b3   : > { %9742 = vst [vmem:[#allocation6_spill] sm:$0xff] %v7793_v20  ;;  %v7798_v50 = vpop.eup %5745  ;;  %v3830_v21 = vsub.f32 1.0, %v3702_v10  ;;  %5749 = vpow2.f32 %v3509_v34  ;;  %v1531_v11 = vand.u32 2147483647, %v7777_v27  ;;  %v7803_v51 = vmul.f32 %v4085_v13, %v7628_v8  ;;  %v9744_v57 = vld [vmem:[#allocation5_spill] sm:$0xff]  ;;  %v9745_v10 = vld [vmem:[#allocation8_spill] sm:$0xff] }
 0x2b4   : > { %v3063_v3 = vmul.f32 %v7736_v24, %v2935_v44  ;;  %v2553_v5 = vmul.f32 %v7760_v15, %v2425_v46  ;;  %v2040_v33 = vmul.f32 1.0614054, %v7798_v50  ;;  %5751 = vpow2.f32 %v3513_v38 }
 0x2b5   : > { %9743 = vst [vmem:[#allocation10_spill] sm:$0xff] %v7803_v51  ;;  %v7810_v40 = vmul.f32 0.5, %v684_v58  ;;  %v1659_v26 = vmul.f32 0.3275911, %v1531_v11  ;;  %v3195_v62 = vsub.f32 0.0, %v1531_v11  ;;  %v4084_v8 = vadd.f32 1.0, %v3956_v35 }
 0x2b6   : > { %v3703_v6 = vmul.f32 %v5742_v7, %v3063_v3  ;;  %v2681_v60 = vadd.f32 -0.28449672, %v2553_v5  ;;  %v2168_v34 = vadd.f32 -1.4531521, %v2040_v33  ;;  %v1533_v4 = vand.u32 2147483647, %v7796_v56 }
 0x2b7   : > { %v3958_v13 = vmul.f32 %v3830_v21, %v7694_v61  ;;  %v1787_v24 = vadd.f32 1.0, %v1659_v26  ;;  %v4287_v44 = vpack.c.bf16 %v9745_v10, %v9744_v57  ;;  %vm1275_vm0 = vcmp.ge.f32.partialorder %v7777_v27, 0.0 }
 0x2b8   : > { %v3831_v46 = vsub.f32 1.0, %v3703_v6  ;;  %v2809_v51 = vmul.f32 %v7760_v15, %v2681_v60  ;;  %v2296_v58 = vmul.f32 %v7798_v50, %v2168_v34  ;;  %v1661_v38 = vmul.f32 0.3275911, %v1533_v4  ;;  %v9746_v6 = vld [vmem:[#allocation17_spill] sm:$0xff] }
 0x2b9   : > { %v7818_v20 = vpop.eup %5747  ;;  %5753 = vrcp.f32 %v1787_v24  ;;  %v3323_v7 = vmul.f32 %v3195_v62, %v1531_v11  ;;  %v3197_v3 = vsub.f32 0.0, %v1533_v4  ;;  %4651 = vmatmul.mubr.bf16.gmra.mrb[68].mxu0 %v4287_v44  ;;  %vm1277_vm1 = vcmp.ge.f32.partialorder %v7796_v56, 0.0  ;;  %v9747_v60 = vld [vmem:[#allocation9_spill] sm:$0xff] }
 0x2ba   : > { %v3959_v61 = vmul.f32 %v3831_v46, %v7713_v25  ;;  %v2937_v35 = vadd.f32 0.2548296, %v2809_v51  ;;  %v2424_v21 = vadd.f32 1.4214138, %v2296_v58  ;;  %v2042_v5 = vmul.f32 1.0614054, %v7818_v20 }
 0x2bb   : > { %v1789_v33 = vadd.f32 1.0, %v1661_v38  ;;  %v3325_v26 = vmul.f32 %v3197_v3, %v1533_v4  ;;  %v4289_v34 = vpack.c.bf16 %v9747_v60, %v9746_v6  ;;  %v4086_v57 = vadd.f32 1.0, %v3958_v13  ;;  %v7832_v4 = vpop.f32.mrb[43].mxu0 }
 0x2bc   : > { %v3065_v10 = vmul.f32 %v7760_v15, %v2937_v35  ;;  %v2552_v11 = vmul.f32 %v7798_v50, %v2424_v21  ;;  %v2170_v62 = vadd.f32 -1.4531521, %v2042_v5  ;;  %v3515_v44 = vmul.f32 1.442695, %v3323_v7 }
 0x2bd   : > { %v5750_v24 = vpop.eup %5749  ;;  %5755 = vrcp.f32 %v1789_v33  ;;  %4812 = vmatmul.mubr.bf16.gmra.mrb[68].mxu1 %v4289_v34  ;;  %v686_v25 = vadd.f32 %v7416_v49, %v6385_v18  ;;  %v879_v51 = vadd.f32 %v7420_v1, %v6387_v19  ;;  %v4087_v46 = vadd.f32 1.0, %v3959_v61 }
 0x2be   : > { %v3705_v58 = vmul.f32 %v5744_v31, %v3065_v10  ;;  %v2680_v13 = vadd.f32 -0.28449672, %v2552_v11  ;;  %v2298_v15 = vmul.f32 %v7818_v20, %v2170_v62  ;;  %v5752_v38 = vpop.eup %5751  ;;  %v7838_v7 = vsel %vm1275_vm0, 1.0, %v9641_v53 }
 0x2bf   : > { %v7841_v3 = vmul.f32 0.5, %v7772_v48  ;;  %v3519_v49 = vmul.f32 1.442695, %v3325_v26  ;;  %v1148_v35 = vmul.f32 0.70710677, %v686_v25  ;;  %v7844_v1 = vmul.f32 %v4084_v8, %v7661_v14  ;;  %v7859_v8 = vpop.f32.mrb[43].mxu1 }
 0x2c0   : > { %v2808_v61 = vmul.f32 %v7798_v50, %v2680_v13  ;;  %v2426_v31 = vadd.f32 1.4214138, %v2298_v15  ;;  %v1150_v21 = vmul.f32 0.70710677, %v879_v51  ;;  %v7848_v5 = vmul.f32 %v4086_v57, %v7686_v28 }
 0x2c1   : > { %9748 = vst [vmem:[#allocation7_spill] sm:$0xff] %v7844_v1  ;;  %v3833_v33 = vsub.f32 1.0, %v3705_v58  ;;  %v7853_v27 = vsel %vm1277_vm1, 1.0, %v9641_v53  ;;  %v1532_v48 = vand.u32 2147483647, %v1148_v35  ;;  %v7856_v26 = vmul.f32 %v4087_v46, %v7697_v55 }
 0x2c2   : > { %9749 = vst [vmem:[#allocation12_spill] sm:$0xff] %v7848_v5  ;;  %v2936_v6 = vadd.f32 0.2548296, %v2808_v61  ;;  %v2554_v14 = vmul.f32 %v7818_v20, %v2426_v31  ;;  %5757 = vpow2.f32 %v3515_v44  ;;  %v1534_v57 = vand.u32 2147483647, %v1150_v21 }
 0x2c3   : > { %9750 = vst [vmem:[#allocation5_spill] sm:$0xff] %v7856_v26  ;;  %v7861_v60 = vpop.eup %5753  ;;  %5759 = vpow2.f32 %v3519_v49  ;;  %v1660_v28 = vmul.f32 0.3275911, %v1532_v48  ;;  %v3196_v34 = vsub.f32 0.0, %v1532_v48  ;;  %v688_v55 = vadd.f32 %v7423_v47, %v6381_v16 }
 0x2c4   : > { %v3064_v56 = vmul.f32 %v7798_v50, %v2936_v6  ;;  %v2682_v10 = vadd.f32 -0.28449672, %v2554_v14  ;;  %v2043_v11 = vmul.f32 1.0614054, %v7861_v60  ;;  %v3961_v62 = vmul.f32 %v3833_v33, %v7748_v22 }
 0x2c5   : > { %v1788_v46 = vadd.f32 1.0, %v1660_v28  ;;  %v3324_v44 = vmul.f32 %v3196_v34, %v1532_v48  ;;  %v1662_v58 = vmul.f32 0.3275911, %v1534_v57  ;;  %v7869_v61 = vmul.f32 0.5, %v686_v25 }
 0x2c6   : > { %v3704_v13 = vmul.f32 %v5750_v24, %v3064_v56  ;;  %v2810_v15 = vmul.f32 %v7818_v20, %v2682_v10  ;;  %v2171_v49 = vadd.f32 -1.4531521, %v2043_v11  ;;  %v7873_v50 = vmul.f32 0.5, %v879_v51  ;;  %v9751_v11 = vld [vmem:[#allocation50_spill] sm:$0xff] }
 0x2c7   : > { %v7871_v31 = vpop.eup %5755  ;;  %5761 = vrcp.f32 %v1788_v46  ;;  %v1790_v6 = vadd.f32 1.0, %v1662_v58  ;;  %v3198_v14 = vsub.f32 0.0, %v1534_v57  ;;  %vm1276_vm2 = vcmp.ge.f32.partialorder %v1148_v35, 0.0 }
 0x2c8   : > { %v2938_v26 = vadd.f32 0.2548296, %v2810_v15  ;;  %v2299_v47 = vmul.f32 %v7861_v60, %v2171_v49  ;;  %v2045_v22 = vmul.f32 1.0614054, %v7871_v31  ;;  %v4089_v33 = vadd.f32 1.0, %v3961_v62 }
 0x2c9   : > { %v3517_v24 = vmul.f32 1.442695, %v3324_v44  ;;  %vm1278_vm3 = vcmp.ge.f32.partialorder %v1150_v21, 0.0  ;;  %v1151_v48 = vmul.f32 0.70710677, %v688_v55  ;;  %v3832_v28 = vsub.f32 1.0, %v3704_v13 }
 0x2ca   : > { %v3066_v25 = vmul.f32 %v7818_v20, %v2938_v26  ;;  %v2427_v34 = vadd.f32 1.4214138, %v2299_v47  ;;  %v2173_v56 = vadd.f32 -1.4531521, %v2045_v22  ;;  %5763 = vrcp.f32 %v1790_v6 }
 0x2cb   : > { %v3326_v51 = vmul.f32 %v3198_v14, %v1534_v57  ;;  %v1535_v10 = vand.u32 2147483647, %v1151_v48  ;;  %v881_v46 = vadd.f32 %v9751_v11, %v6383_v17  ;;  %v7884_v44 = vsel %vm1276_vm2, 1.0, %v9641_v53 }
 0x2cc   : > { %v5758_v58 = vpop.eup %5757  ;;  %v3706_v15 = vmul.f32 %v5752_v38, %v3066_v25  ;;  %v2555_v49 = vmul.f32 %v7861_v60, %v2427_v34  ;;  %v2301_v62 = vmul.f32 %v7871_v31, %v2173_v56  ;;  %v7889_v20 = vmul.f32 %v4089_v33, %v7728_v23 }
 0x2cd   : > { %v7886_v13 = vpop.eup %5759  ;;  %v7893_v26 = vsel %vm1278_vm3, 1.0, %v9641_v53  ;;  %v1663_v57 = vmul.f32 0.3275911, %v1535_v10  ;;  %v3199_v6 = vsub.f32 0.0, %v1535_v10  ;;  %v3960_v38 = vmul.f32 %v3832_v28, %v7755_v32 }
 0x2ce   : > { %9752 = vst [vmem:[#allocation8_spill] sm:$0xff] %v7889_v20  ;;  %v2683_v14 = vadd.f32 -0.28449672, %v2555_v49  ;;  %v2429_v47 = vadd.f32 1.4214138, %v2301_v62  ;;  %5765 = vpow2.f32 %v3517_v24  ;;  %vm1279_vm4 = vcmp.ge.f32.partialorder %v1151_v48, 0.0 }
 0x2cf   : > { %v3521_v22 = vmul.f32 1.442695, %v3326_v51  ;;  %v1791_v35 = vadd.f32 1.0, %v1663_v57  ;;  %v1153_v25 = vmul.f32 0.70710677, %v881_v46  ;;  %v3834_v34 = vsub.f32 1.0, %v3706_v15 }
 0x2d0   : > { %v2811_v56 = vmul.f32 %v7861_v60, %v2683_v14  ;;  %v2557_v23 = vmul.f32 %v7871_v31, %v2429_v47  ;;  %v3327_v33 = vmul.f32 %v3199_v6, %v1535_v10  ;;  %v7900_v11 = vmul.f32 0.5, %v688_v55  ;;  %v7908_v62 = vpop.f32.mrb[44].mxu0 }
 0x2d1   : > { %v7898_v21 = vpop.eup %5761  ;;  %5767 = vrcp.f32 %v1791_v35  ;;  %v1537_v20 = vand.u32 2147483647, %v1153_v25  ;;  %v690_v32 = vadd.f32 %v7459_v37, %v6385_v18  ;;  %v4088_v24 = vadd.f32 1.0, %v3960_v38  ;;  %9753 = vst [vmem:[#allocation17_spill] sm:$0xff] %v7908_v62  ;;  %v7913_v38 = vpop.f32.mrb[44].mxu1 }
 0x2d2   : > { %v2939_v28 = vadd.f32 0.2548296, %v2811_v56  ;;  %v2685_v48 = vadd.f32 -0.28449672, %v2557_v23  ;;  %v7905_v51 = vsel %vm1279_vm4, 1.0, %v9641_v53  ;;  %5769 = vpow2.f32 %v3521_v22  ;;  %9754 = vst [vmem:[#allocation9_spill] sm:$0xff] %v7913_v38 }
 0x2d3   : > { %v2044_v15 = vmul.f32 1.0614054, %v7898_v21  ;;  %v1665_v49 = vmul.f32 0.3275911, %v1537_v20  ;;  %v3201_v10 = vsub.f32 0.0, %v1537_v20  ;;  %v3962_v55 = vmul.f32 %v3834_v34, %v7788_v39 }
 0x2d4   : > { %v3067_v57 = vmul.f32 %v7861_v60, %v2939_v28  ;;  %v2813_v6 = vmul.f32 %v7871_v31, %v2685_v48  ;;  %v3523_v37 = vmul.f32 1.442695, %v3327_v33  ;;  %v7915_v14 = vpop.eup %5763  ;;  %vm1281_vm5 = vcmp.ge.f32.partialorder %v1153_v25, 0.0 }
 0x2d5   : > { %v2172_v47 = vadd.f32 -1.4531521, %v2044_v15  ;;  %v1793_v35 = vadd.f32 1.0, %v1665_v49  ;;  %v1152_v56 = vmul.f32 0.70710677, %v690_v32  ;;  %v3329_v1 = vmul.f32 %v3201_v10, %v1537_v20 }
 0x2d6   : > { %v3707_v22 = vmul.f32 %v5758_v58, %v3067_v57  ;;  %v2941_v23 = vadd.f32 0.2548296, %v2813_v6  ;;  %v2046_v5 = vmul.f32 1.0614054, %v7915_v14  ;;  %v7919_v39 = vmul.f32 %v4088_v24, %v7742_v59  ;;  %v9757_v6 = vld [vmem:[#allocation30_spill] sm:$0xff] }
 0x2d7   : > { %v2300_v60 = vmul.f32 %v7898_v21, %v2172_v47  ;;  %v7922_v34 = vmul.f32 0.5, %v881_v46  ;;  %5771 = vrcp.f32 %v1793_v35  ;;  %v4090_v28 = vadd.f32 1.0, %v3962_v55 }
 0x2d8   : > { %9755 = vst [vmem:[#allocation50_spill] sm:$0xff] %v7919_v39  ;;  %v5766_v33 = vpop.eup %5765  ;;  %v3069_v48 = vmul.f32 %v7871_v31, %v2941_v23  ;;  %v2174_v15 = vadd.f32 -1.4531521, %v2046_v5  ;;  %v883_v58 = vadd.f32 %v7482_v41, %v6387_v19  ;;  %v3835_v49 = vsub.f32 1.0, %v3707_v22  ;;  %v9756_v41 = vld [vmem:[#allocation15_spill] sm:$0xff] }
 0x2d9   : > { %v2428_v57 = vadd.f32 1.4214138, %v2300_v60  ;;  %v7929_v20 = vsel %vm1281_vm5, 1.0, %v9641_v53  ;;  %v1536_v59 = vand.u32 2147483647, %v1152_v56  ;;  %5773 = vpow2.f32 %v3523_v37 }
 0x2da   : > { %v2302_v24 = vmul.f32 %v7915_v14, %v2174_v15  ;;  %v3527_v46 = vmul.f32 1.442695, %v3329_v1  ;;  %vm1280_vm6 = vcmp.ge.f32.partialorder %v1152_v56, 0.0  ;;  %v3709_v31 = vmul.f32 %v7886_v13, %v3069_v48 }
 0x2db   : > { %v7932_v10 = vpop.eup %5767  ;;  %v2556_v5 = vmul.f32 %v7898_v21, %v2428_v57  ;;  %v1664_v55 = vmul.f32 0.3275911, %v1536_v59  ;;  %v4292_v47 = vpack.c.bf16 %v9757_v6, %v9756_v41  ;;  %v7939_v25 = vmul.f32 %v4090_v28, %v7784_v42 }
 0x2dc   : > { %v2430_v35 = vadd.f32 1.4214138, %v2302_v24  ;;  %v2047_v22 = vmul.f32 1.0614054, %v7932_v10  ;;  %v1154_v23 = vmul.f32 0.70710677, %v883_v58  ;;  %v5770_v37 = vpop.eup %5769  ;;  %v3963_v1 = vmul.f32 %v3835_v49, %v7838_v7 }
 0x2dd   : > { %9758 = vst [vmem:[#allocation15_spill] sm:$0xff] %v7939_v25  ;;  %v2684_v60 = vadd.f32 -0.28449672, %v2556_v5  ;;  %v7943_v15 = vmul.f32 0.5, %v690_v32  ;;  %v1792_v13 = vadd.f32 1.0, %v1664_v55  ;;  %4658 = vmatprep.mubr.bf16.mxu0 %v4292_v47  ;;  %5775 = vpow2.f32 %v3527_v46  ;;  %v9759_v46 = vld [vmem:[#allocation16_spill] sm:$0xff] }
 0x2de   : > { %v2558_v48 = vmul.f32 %v7915_v14, %v2430_v35  ;;  %v2175_v57 = vadd.f32 -1.4531521, %v2047_v22  ;;  %v3200_v41 = vsub.f32 0.0, %v1536_v59  ;;  %v3837_v6 = vsub.f32 1.0, %v3709_v31  ;;  %v9760_v35 = vld [vmem:[#allocation31_spill] sm:$0xff] }
 0x2df   : > { %v2812_v42 = vmul.f32 %v7898_v21, %v2684_v60  ;;  %v7949_v28 = vsel %vm1280_vm6, 1.0, %v9641_v53  ;;  %5777 = vrcp.f32 %v1792_v13  ;;  %v7952_v32 = vmul.f32 0.5, %v883_v58 }
 0x2e0   : > { %v2686_v24 = vadd.f32 -0.28449672, %v2558_v48  ;;  %v2303_v7 = vmul.f32 %v7932_v10, %v2175_v57  ;;  %v1538_v49 = vand.u32 2147483647, %v1154_v23  ;;  %v4091_v55 = vadd.f32 1.0, %v3963_v1 }
 0x2e1   : > { %v7954_v5 = vpop.eup %5771  ;;  %v2940_v47 = vadd.f32 0.2548296, %v2812_v42  ;;  %v4294_v31 = vpack.c.bf16 %v9760_v35, %v9759_v46  ;;  %v694_v22 = vadd.f32 %v7526_v2, %v6381_v16  ;;  %v3328_v48 = vmul.f32 %v3200_v41, %v1536_v59  ;;  %v7970_v41 = vpop.f32.mrb[45].mxu0 }
 0x2e2   : > { %v2814_v56 = vmul.f32 %v7915_v14, %v2686_v24  ;;  %v2431_v60 = vadd.f32 1.4214138, %v2303_v7  ;;  %v2049_v13 = vmul.f32 1.0614054, %v7954_v5  ;;  %v3965_v58 = vmul.f32 %v3837_v6, %v7853_v27  ;;  %v7972_v6 = vpop.f32.mrb[45].mxu1 }
 0x2e3   : > { %v3068_v57 = vmul.f32 %v7898_v21, %v2940_v47  ;;  %v1666_v25 = vmul.f32 0.3275911, %v1538_v49  ;;  %v3202_v39 = vsub.f32 0.0, %v1538_v49  ;;  %4819 = vmatprep.mubr.bf16.mxu1 %v4294_v31  ;;  %v5774_v1 = vpop.eup %5773  ;;  %v1155_v38 = vmul.f32 0.70710677, %v694_v22 }
 0x2e4   : > { %v2942_v42 = vadd.f32 0.2548296, %v2814_v56  ;;  %v2559_v46 = vmul.f32 %v7932_v10, %v2431_v60  ;;  %v2177_v35 = vadd.f32 -1.4531521, %v2049_v13  ;;  %vm1282_vm7 = vcmp.ge.f32.partialorder %v1154_v23, 0.0 }
 0x2e5   : > { %v3708_v2 = vmul.f32 %v5766_v33, %v3068_v57  ;;  %v1794_v24 = vadd.f32 1.0, %v1666_v25  ;;  %v3330_v7 = vmul.f32 %v3202_v39, %v1538_v49  ;;  %v7966_v62 = vmul.f32 %v4091_v55, %v7810_v40  ;;  %v9762_v33 = vld [vmem:[#allocation53_spill] sm:$0xff]  ;;  %v7979_v55 = vpop.f32.mrb[46].mxu0 }
 0x2e6   : > { %v3070_v27 = vmul.f32 %v7915_v14, %v2942_v42  ;;  %v2687_v59 = vadd.f32 -0.28449672, %v2559_v46  ;;  %v2305_v21 = vmul.f32 %v7954_v5, %v2177_v35  ;;  %v4093_v47 = vadd.f32 1.0, %v3965_v58 }
 0x2e7   : > { %9761 = vst [vmem:[#allocation30_spill] sm:$0xff] %v7966_v62  ;;  %v3525_v31 = vmul.f32 1.442695, %v3328_v48  ;;  %5779 = vrcp.f32 %v1794_v24  ;;  %v7976_v56 = vadd.f32 %v9762_v33, %v6383_v17  ;;  %v5776_v39 = vpop.eup %5775  ;;  %v1539_v14 = vand.u32 2147483647, %v1155_v38 }
 0x2e8   : > { %v3710_v25 = vmul.f32 %v5770_v37, %v3070_v27  ;;  %v2815_v40 = vmul.f32 %v7932_v10, %v2687_v59  ;;  %v2433_v49 = vadd.f32 1.4214138, %v2305_v21  ;;  %v3836_v13 = vsub.f32 1.0, %v3708_v2 }
 0x2e9   : > { %v7981_v60 = vpop.eup %5777  ;;  %v7985_v58 = vsel %vm1282_vm7, 1.0, %v9641_v53  ;;  %v3529_v48 = vmul.f32 1.442695, %v3330_v7  ;;  %vm1283_vm8 = vcmp.ge.f32.partialorder %v1155_v38, 0.0  ;;  %5781 = vpow2.f32 %v3525_v31  ;;  %v7994_v7 = vpop.f32.mrb[46].mxu1 }
 0x2ea   : > { %v3838_v57 = vsub.f32 1.0, %v3710_v25  ;;  %v2943_v42 = vadd.f32 0.2548296, %v2815_v40  ;;  %v2561_v46 = vmul.f32 %v7954_v5, %v2433_v49  ;;  %v2048_v37 = vmul.f32 1.0614054, %v7981_v60  ;;  %9764 = vst [vmem:[#allocation31_spill] sm:$0xff] %v7994_v7 }
 0x2eb   : > { %v1667_v35 = vmul.f32 0.3275911, %v1539_v14  ;;  %v3203_v24 = vsub.f32 0.0, %v1539_v14  ;;  %v1157_v27 = vmul.f32 0.70710677, %v7976_v56  ;;  %v7991_v59 = vmul.f32 %v4093_v47, %v7841_v3 }
 0x2ec   : > { %v3071_v23 = vmul.f32 %v7932_v10, %v2943_v42  ;;  %v2689_v2 = vadd.f32 -0.28449672, %v2561_v46  ;;  %v2176_v21 = vadd.f32 -1.4531521, %v2048_v37  ;;  %v3964_v33 = vmul.f32 %v3836_v13, %v7884_v44  ;;  %v9765_v46 = vld [vmem:[#allocation13_spill] sm:$0xff]  ;;  %v9766_v37 = vld [vmem:[#allocation28_spill] sm:$0xff] }
 0x2ed   : > { %9763 = vst [vmem:[#allocation16_spill] sm:$0xff] %v7991_v59  ;;  %v7997_v25 = vmul.f32 0.5, %v694_v22  ;;  %v8001_v31 = vsel %vm1283_vm8, 1.0, %v9641_v53  ;;  %v1795_v40 = vadd.f32 1.0, %v1667_v35  ;;  %v3966_v49 = vmul.f32 %v3838_v57, %v7893_v26  ;;  %v9768_v57 = vld [vmem:[#allocation29_spill] sm:$0xff] }
 0x2ee   : > { %v3711_v62 = vmul.f32 %v5774_v1, %v3071_v23  ;;  %v2817_v3 = vmul.f32 %v7954_v5, %v2689_v2  ;;  %v2304_v10 = vmul.f32 %v7981_v60, %v2176_v21  ;;  %v3331_v47 = vmul.f32 %v3203_v24, %v1539_v14  ;;  %v9767_v1 = vld [vmem:[#allocation14_spill] sm:$0xff] }
 0x2ef   : > { %5783 = vrcp.f32 %v1795_v40  ;;  %v1541_v42 = vand.u32 2147483647, %v1157_v27  ;;  %v4291_v44 = vpack.c.bf16 %v9766_v37, %v9765_v46  ;;  %v4092_v35 = vadd.f32 1.0, %v3964_v33  ;;  %v8018_v37 = vpop.f32.mrb[47].mxu0 }
 0x2f0   : > { %v3839_v22 = vsub.f32 1.0, %v3711_v62  ;;  %v2945_v13 = vadd.f32 0.2548296, %v2817_v3  ;;  %v2432_v59 = vadd.f32 1.4214138, %v2304_v10  ;;  %5785 = vpow2.f32 %v3529_v48 }
 0x2f1   : > { %v8008_v38 = vpop.eup %5779  ;;  %v1669_v7 = vmul.f32 0.3275911, %v1541_v42  ;;  %v3205_v26 = vsub.f32 0.0, %v1541_v42  ;;  %4659 = vmatmul.mubr.bf16.gmra.mrb[72].mxu0 %v4291_v44  ;;  %v4293_v23 = vpack.c.bf16 %v9768_v57, %v9767_v1  ;;  %vm1285_vm9 = vcmp.ge.f32.partialorder %v1157_v27, 0.0  ;;  %v8037_v57 = vpop.f32.mrb[47].mxu1 }
 0x2f2   : > { %v3073_v2 = vmul.f32 %v7954_v5, %v2945_v13  ;;  %v2560_v14 = vmul.f32 %v7981_v60, %v2432_v59  ;;  %v2050_v24 = vmul.f32 1.0614054, %v8008_v38  ;;  %v4094_v62 = vadd.f32 1.0, %v3966_v49 }
 0x2f3   : > { %v3531_v21 = vmul.f32 1.442695, %v3331_v47  ;;  %v1797_v40 = vadd.f32 1.0, %v1669_v7  ;;  %4820 = vmatmul.mubr.bf16.gmra.mrb[72].mxu1 %v4293_v23  ;;  %v696_v48 = vadd.f32 %v7583_v30, %v6385_v18  ;;  %v3967_v33 = vmul.f32 %v3839_v22, %v7905_v51  ;;  %v5782_v5 = vpop.eup %5781 }
 0x2f4   : > { %v3713_v3 = vmul.f32 %v5776_v39, %v3073_v2  ;;  %v2688_v10 = vadd.f32 -0.28449672, %v2560_v14  ;;  %v2178_v46 = vadd.f32 -1.4531521, %v2050_v24  ;;  %v3333_v59 = vmul.f32 %v3205_v26, %v1541_v42 }
 0x2f5   : > { %5787 = vrcp.f32 %v1797_v40  ;;  %v1156_v44 = vmul.f32 0.70710677, %v696_v48  ;;  %v889_v49 = vadd.f32 %v7587_v29, %v6387_v19  ;;  %v8025_v30 = vmul.f32 0.5, %v7976_v56 }
 0x2f6   : > { %v3841_v47 = vsub.f32 1.0, %v3713_v3  ;;  %v2816_v7 = vmul.f32 %v7981_v60, %v2688_v10  ;;  %v2306_v13 = vmul.f32 %v8008_v38, %v2178_v46  ;;  %v8028_v51 = vmul.f32 %v4092_v35, %v7869_v61 }
 0x2f7   : > { %v8031_v39 = vmul.f32 %v4094_v62, %v7873_v50  ;;  %v8035_v42 = vsel %vm1285_vm9, 1.0, %v9641_v53  ;;  %v1540_v22 = vand.u32 2147483647, %v1156_v44  ;;  %v4095_v29 = vadd.f32 1.0, %v3967_v33 }
 0x2f8   : > { %9769 = vst [vmem:[#allocation53_spill] sm:$0xff] %v8028_v51  ;;  %v2944_v26 = vadd.f32 0.2548296, %v2816_v7  ;;  %v2434_v1 = vadd.f32 1.4214138, %v2306_v13  ;;  %5789 = vpow2.f32 %v3531_v21  ;;  %v3969_v56 = vmul.f32 %v3841_v47, %v7929_v20 }
 0x2f9   : > { %9770 = vst [vmem:[#allocation13_spill] sm:$0xff] %v8031_v39  ;;  %v8039_v23 = vpop.eup %5783  ;;  %v3535_v61 = vmul.f32 1.442695, %v3333_v59  ;;  %v1668_v35 = vmul.f32 0.3275911, %v1540_v22  ;;  %v3204_v62 = vsub.f32 0.0, %v1540_v22  ;;  %v698_v3 = vadd.f32 %v7606_v0, %v6381_v16 }
 0x2fa   : > { %v1158_v2 = vmul.f32 0.70710677, %v889_v49  ;;  %v5786_v50 = vpop.eup %5785  ;;  %v3072_v14 = vmul.f32 %v7981_v60, %v2944_v26  ;;  %v2562_v27 = vmul.f32 %v8008_v38, %v2434_v1  ;;  %v2051_v24 = vmul.f32 1.0614054, %v8039_v23 }
 0x2fb   : > { %v8045_v40 = vmul.f32 0.5, %v696_v48  ;;  %v1796_v21 = vadd.f32 1.0, %v1668_v35  ;;  %v8050_v20 = vmul.f32 %v4095_v29, %v7900_v11  ;;  %vm1284_vm10 = vcmp.ge.f32.partialorder %v1156_v44, 0.0 }
 0x2fc   : > { %v1542_v33 = vand.u32 2147483647, %v1158_v2  ;;  %v3712_v10 = vmul.f32 %v5782_v5, %v3072_v14  ;;  %v2690_v46 = vadd.f32 -0.28449672, %v2562_v27  ;;  %v2179_v59 = vadd.f32 -1.4531521, %v2051_v24 }
 0x2fd   : > { %9771 = vst [vmem:[#allocation28_spill] sm:$0xff] %v8050_v20  ;;  %5791 = vrcp.f32 %v1796_v21  ;;  %v8052_v60 = vmul.f32 0.5, %v889_v49  ;;  %v4097_v7 = vadd.f32 1.0, %v3969_v56  ;;  %v3332_v26 = vmul.f32 %v3204_v62, %v1540_v22 }
 0x2fe   : > { %v1670_v47 = vmul.f32 0.3275911, %v1542_v33  ;;  %v2818_v48 = vmul.f32 %v8008_v38, %v2690_v46  ;;  %v2307_v13 = vmul.f32 %v8039_v23, %v2179_v59  ;;  %v3840_v0 = vsub.f32 1.0, %v3712_v10 }
 0x2ff   : > { %v8056_v1 = vpop.eup %5787  ;;  %v3206_v11 = vsub.f32 0.0, %v1542_v33  ;;  %v1159_v29 = vmul.f32 0.70710677, %v698_v3  ;;  %5793 = vpow2.f32 %v3535_v61  ;;  %v8061_v49 = vsel %vm1284_vm10, 1.0, %v9641_v53 }
 0x300   : > { %v1798_v35 = vadd.f32 1.0, %v1670_v47  ;;  %v2946_v5 = vadd.f32 0.2548296, %v2818_v48  ;;  %v2435_v14 = vadd.f32 1.4214138, %v2307_v13  ;;  %vm1286_vm11 = vcmp.ge.f32.partialorder %v1158_v2, 0.0 }
 0x301   : > { %v2053_v27 = vmul.f32 1.0614054, %v8056_v1  ;;  %v1543_v56 = vand.u32 2147483647, %v1159_v29  ;;  %v8064_v22 = vmul.f32 %v4097_v7, %v7922_v34  ;;  %v3968_v46 = vmul.f32 %v3840_v0, %v7949_v28 }
 0x302   : > { %5795 = vrcp.f32 %v1798_v35  ;;  %v5790_v24 = vpop.eup %5789  ;;  %v3074_v62 = vmul.f32 %v8008_v38, %v2946_v5  ;;  %v2563_v21 = vmul.f32 %v8039_v23, %v2435_v14  ;;  %v3533_v59 = vmul.f32 1.442695, %v3332_v26 }
 0x303   : > { %9772 = vst [vmem:[#allocation14_spill] sm:$0xff] %v8064_v22  ;;  %v2181_v10 = vadd.f32 -1.4531521, %v2053_v27  ;;  %v1671_v61 = vmul.f32 0.3275911, %v1543_v56  ;;  %v3207_v47 = vsub.f32 0.0, %v1543_v56  ;;  %v3334_v13 = vmul.f32 %v3206_v11, %v1542_v33 }
 0x304   : > { %v2691_v44 = vadd.f32 -0.28449672, %v2563_v21  ;;  %v8071_v2 = vsel %vm1286_vm11, 1.0, %v9641_v53  ;;  %v3714_v35 = vmul.f32 %v5786_v50, %v3074_v62  ;;  %v8073_v34 = vmul.f32 0.5, %v698_v3 }
 0x305   : > { %v2309_v48 = vmul.f32 %v8056_v1, %v2181_v10  ;;  %v1799_v7 = vadd.f32 1.0, %v1671_v61  ;;  %v891_v38 = vadd.f32 %v7626_v52, %v6383_v17  ;;  %vm1287_vm12 = vcmp.ge.f32.partialorder %v1159_v29, 0.0  ;;  %v8089_v10 = vpop.f32.mrb[48].mxu1 }
 0x306   : > { %v2819_v5 = vmul.f32 %v8039_v23, %v2691_v44  ;;  %v3335_v26 = vmul.f32 %v3207_v47, %v1543_v56  ;;  %v4096_v14 = vadd.f32 1.0, %v3968_v46  ;;  %v700_v33 = vadd.f32 %v7645_v9, %v6385_v18  ;;  %v8087_v56 = vpop.f32.mrb[48].mxu0 }
 0x307   : > { %v2437_v28 = vadd.f32 1.4214138, %v2309_v48  ;;  %v8078_v0 = vpop.eup %5791  ;;  %5797 = vrcp.f32 %v1799_v7  ;;  %v1161_v27 = vmul.f32 0.70710677, %v891_v38  ;;  %v3537_v62 = vmul.f32 1.442695, %v3334_v13 }
 0x308   : > { %v2947_v50 = vadd.f32 0.2548296, %v2819_v5  ;;  %v2052_v11 = vmul.f32 1.0614054, %v8078_v0  ;;  %v3842_v52 = vsub.f32 1.0, %v3714_v35  ;;  %5799 = vpow2.f32 %v3533_v59 }
 0x309   : > { %v2565_v3 = vmul.f32 %v8056_v1, %v2437_v28  ;;  %v8085_v21 = vsel %vm1287_vm12, 1.0, %v9641_v53  ;;  %v1545_v29 = vand.u32 2147483647, %v1161_v27  ;;  %v5794_v46 = vpop.eup %5793  ;;  %v3539_v44 = vmul.f32 1.442695, %v3335_v26 }
 0x30a   : > { %v3075_v61 = vmul.f32 %v8039_v23, %v2947_v50  ;;  %v2180_v47 = vadd.f32 -1.4531521, %v2052_v11  ;;  %v8095_v13 = vmul.f32 %v4096_v14, %v7943_v15  ;;  %v1160_v7 = vmul.f32 0.70710677, %v700_v33 }
 0x30b   : > { %v2693_v9 = vadd.f32 -0.28449672, %v2565_v3  ;;  %v1673_v59 = vmul.f32 0.3275911, %v1545_v29  ;;  %v3209_v35 = vsub.f32 0.0, %v1545_v29  ;;  %5801 = vpow2.f32 %v3537_v62 }
 0x30c   : > { %v8092_v48 = vpop.eup %5795  ;;  %9773 = vst [vmem:[#allocation29_spill] sm:$0xff] %v8095_v13  ;;  %v3715_v5 = vmul.f32 %v5790_v24, %v3075_v61  ;;  %v2308_v22 = vmul.f32 %v8078_v0, %v2180_v47  ;;  %v3970_v20 = vmul.f32 %v3842_v52, %v7985_v58  ;;  %v8101_v50 = vmul.f32 0.5, %v891_v38 }
 0x30d   : > { %v2821_v28 = vmul.f32 %v8056_v1, %v2693_v9  ;;  %v2054_v23 = vmul.f32 1.0614054, %v8092_v48  ;;  %v1801_v26 = vadd.f32 1.0, %v1673_v59  ;;  %5803 = vpow2.f32 %v3539_v44 }
 0x30e   : > { %v2436_v11 = vadd.f32 1.4214138, %v2308_v22  ;;  %vm1289_vm13 = vcmp.ge.f32.partialorder %v1161_v27, 0.0  ;;  %v3337_v14 = vmul.f32 %v3209_v35, %v1545_v29  ;;  %v1544_v24 = vand.u32 2147483647, %v1160_v7 }
 0x30f   : > { %v2949_v3 = vadd.f32 0.2548296, %v2821_v28  ;;  %v2182_v15 = vadd.f32 -1.4531521, %v2054_v23  ;;  %5805 = vrcp.f32 %v1801_v26  ;;  %v3843_v61 = vsub.f32 1.0, %v3715_v5 }
 0x310   : > { %v2564_v62 = vmul.f32 %v8078_v0, %v2436_v11  ;;  %v8105_v47 = vmul.f32 0.5, %v700_v33  ;;  %v4098_v38 = vadd.f32 1.0, %v3970_v20  ;;  %v1672_v59 = vmul.f32 0.3275911, %v1544_v24 }
 0x311   : > { %v3077_v9 = vmul.f32 %v8056_v1, %v2949_v3  ;;  %v8107_v58 = vpop.eup %5797  ;;  %v2310_v52 = vmul.f32 %v8092_v48, %v2182_v15  ;;  %v893_v22 = vadd.f32 %v7669_v63, %v6387_v19  ;;  %v8115_v1 = vsel %vm1289_vm13, 1.0, %v9641_v53 }
 0x312   : > { %v2692_v28 = vadd.f32 -0.28449672, %v2564_v62  ;;  %v2055_v29 = vmul.f32 1.0614054, %v8107_v58  ;;  %v5800_v35 = vpop.eup %5799  ;;  %v3543_v5 = vmul.f32 1.442695, %v3337_v14  ;;  %v3971_v20 = vmul.f32 %v3843_v61, %v8001_v31 }
 0x313   : > { %v3717_v44 = vmul.f32 %v5794_v46, %v3077_v9  ;;  %v2438_v33 = vadd.f32 1.4214138, %v2310_v52  ;;  %vm1288_vm14 = vcmp.ge.f32.partialorder %v1160_v7, 0.0  ;;  %v1800_v23 = vadd.f32 1.0, %v1672_v59  ;;  %v9775_v52 = vld [vmem:[#allocation36_spill] sm:$0xff] }
 0x314   : > { %v2820_v26 = vmul.f32 %v8078_v0, %v2692_v28  ;;  %v2183_v3 = vadd.f32 -1.4531521, %v2055_v29  ;;  %v3208_v11 = vsub.f32 0.0, %v1544_v24  ;;  %v8120_v63 = vmul.f32 %v4098_v38, %v7952_v32  ;;  %v9776_v59 = vld [vmem:[#allocation40_spill] sm:$0xff] }
 0x315   : > { %v2566_v46 = vmul.f32 %v8092_v48, %v2438_v33  ;;  %5807 = vrcp.f32 %v1800_v23  ;;  %v8123_v27 = vmul.f32 0.70710677, %v893_v22  ;;  %v5802_v15 = vpop.eup %5801  ;;  %v3845_v9 = vsub.f32 1.0, %v3717_v44 }
 0x316   : > { %9774 = vst [vmem:[#allocation56_spill] sm:$0xff] %v8120_v63  ;;  %v2948_v62 = vadd.f32 0.2548296, %v2820_v26  ;;  %v2311_v14 = vmul.f32 %v8107_v58, %v2183_v3  ;;  %v4296_v31 = vpack.c.bf16 %v9776_v59, %v9775_v52  ;;  %5809 = vpow2.f32 %v3543_v5  ;;  %v9777_v5 = vld [vmem:[#allocation37_spill] sm:$0xff] }
 0x317   : > { %v2694_v61 = vadd.f32 -0.28449672, %v2566_v46  ;;  %v8130_v28 = vsel %vm1288_vm14, 1.0, %v9641_v53  ;;  %v1546_v32 = vand.u32 2147483647, %v8123_v27  ;;  %v5804_v38 = vpop.eup %5803  ;;  %v4099_v29 = vadd.f32 1.0, %v3971_v20 }
 0x318   : > { %v3076_v33 = vmul.f32 %v8078_v0, %v2948_v62  ;;  %v2439_v23 = vadd.f32 1.4214138, %v2311_v14  ;;  %v3336_v44 = vmul.f32 %v3208_v11, %v1544_v24  ;;  %4666 = vmatprep.mubr.bf16.mxu0 %v4296_v31  ;;  %v9778_v59 = vld [vmem:[#allocation41_spill] sm:$0xff]  ;;  %v3973_v63 = vmul.f32 %v3845_v9, %v8035_v42  ;;  %v8144_v14 = vpop.f32.mrb[49].mxu0  ;;  %v8146_v31 = vpop.f32.mrb[49].mxu1  ;;  %v9779_v42 = vld [vmem:[#allocation19_spill] sm:$0xff] }
 0x319   : > { %v8134_v26 = vpop.eup %5805  ;;  %v2822_v3 = vmul.f32 %v8092_v48, %v2694_v61  ;;  %v1674_v52 = vmul.f32 0.3275911, %v1546_v32  ;;  %v3210_v46 = vsub.f32 0.0, %v1546_v32  ;;  %v4298_v7 = vpack.c.bf16 %v9778_v59, %v9777_v5 }
 0x31a   : > { %v3716_v39 = vmul.f32 %v5800_v35, %v3076_v33  ;;  %v2567_v13 = vmul.f32 %v8107_v58, %v2439_v23  ;;  %v2057_v20 = vmul.f32 1.0614054, %v8134_v26  ;;  %v704_v11 = vadd.f32 %v7719_v54, %v6381_v16 }
 0x31b   : > { %v2950_v0 = vadd.f32 0.2548296, %v2822_v3  ;;  %v1802_v62 = vadd.f32 1.0, %v1674_v52  ;;  %v3338_v24 = vmul.f32 %v3210_v46, %v1546_v32  ;;  %4827 = vmatprep.mubr.bf16.mxu1 %v4298_v7  ;;  %v3541_v59 = vmul.f32 1.442695, %v3336_v44  ;;  %v8155_v32 = vpop.f32.mrb[50].mxu0 }
 0x31c   : > { %v2695_v61 = vadd.f32 -0.28449672, %v2567_v13  ;;  %v2185_v5 = vadd.f32 -1.4531521, %v2057_v20  ;;  %v8150_v35 = vadd.f32 %v9779_v42, %v6383_v17  ;;  %v3844_v9 = vsub.f32 1.0, %v3716_v39 }
 0x31d   : > { %v3078_v33 = vmul.f32 %v8092_v48, %v2950_v0  ;;  %v8153_v23 = vmul.f32 0.5, %v893_v22  ;;  %5811 = vrcp.f32 %v1802_v62  ;;  %v4101_v54 = vadd.f32 1.0, %v3973_v63 }
 0x31e   : > { %v2823_v3 = vmul.f32 %v8107_v58, %v2695_v61  ;;  %v2313_v52 = vmul.f32 %v8134_v26, %v2185_v5  ;;  %v8159_v13 = vmul.f32 0.70710677, %v704_v11  ;;  %v8164_v46 = vmul.f32 %v4099_v29, %v7997_v25 }
 0x31f   : > { %v8161_v44 = vpop.eup %5807  ;;  %v3718_v39 = vmul.f32 %v5802_v15, %v3078_v33  ;;  %vm1290_vm15 = vcmp.ge.f32.partialorder %v8123_v27, 0.0  ;;  %v3545_v48 = vmul.f32 1.442695, %v3338_v24  ;;  %5813 = vpow2.f32 %v3541_v59 }
 0x320   : > { %9780 = vst [vmem:[#allocation36_spill] sm:$0xff] %v8164_v46  ;;  %v2951_v22 = vadd.f32 0.2548296, %v2823_v3  ;;  %v2441_v7 = vadd.f32 1.4214138, %v2313_v52  ;;  %v5810_v20 = vpop.eup %5809  ;;  %v3972_v0 = vmul.f32 %v3844_v9, %v8061_v49  ;;  %v8174_v25 = vmul.f32 %v4101_v54, %v8025_v30  ;;  %v8184_v52 = vpop.f32.mrb[50].mxu1 }
 0x321   : > { %v8168_v63 = vmul.f32 0.70710677, %v8150_v35  ;;  %v3846_v62 = vsub.f32 1.0, %v3718_v39  ;;  %v2056_v61 = vmul.f32 1.0614054, %v8161_v44  ;;  %v8179_v29 = vsel %vm1290_vm15, 1.0, %v9641_v53 }
 0x322   : > { %v1547_v5 = vand.u32 2147483647, %v8159_v13  ;;  %9781 = vst [vmem:[#allocation40_spill] sm:$0xff] %v8174_v25  ;;  %v3079_v27 = vmul.f32 %v8107_v58, %v2951_v22  ;;  %v2569_v15 = vmul.f32 %v8134_v26, %v2441_v7  ;;  %v8181_v59 = vmul.f32 0.5, %v704_v11 }
 0x323   : > { %v2184_v24 = vadd.f32 -1.4531521, %v2056_v61  ;;  %5815 = vpow2.f32 %v3545_v48  ;;  %v1549_v3 = vand.u32 2147483647, %v8168_v63  ;;  %v4100_v30 = vadd.f32 1.0, %v3972_v0 }
 0x324   : > { %v1675_v42 = vmul.f32 0.3275911, %v1547_v5  ;;  %v3211_v49 = vsub.f32 0.0, %v1547_v5  ;;  %v3719_v9 = vmul.f32 %v5804_v38, %v3079_v27  ;;  %v2697_v33 = vadd.f32 -0.28449672, %v2569_v15 }
 0x325   : > { %v3974_v58 = vmul.f32 %v3846_v62, %v8071_v2  ;;  %v2312_v54 = vmul.f32 %v8161_v44, %v2184_v24  ;;  %v1677_v11 = vmul.f32 0.3275911, %v1549_v3  ;;  %v3213_v61 = vsub.f32 0.0, %v1549_v3 }
 0x326   : > { %v1803_v39 = vadd.f32 1.0, %v1675_v42  ;;  %v3847_v22 = vsub.f32 1.0, %v3719_v9  ;;  %v2825_v7 = vmul.f32 %v8134_v26, %v2697_v33  ;;  %vm1291_vm0 = vcmp.ge.f32.partialorder %v8159_v13, 0.0  ;;  %v9782_v42 = vld [vmem:[#allocation33_spill] sm:$0xff]  ;;  %v9783_v9 = vld [vmem:[#allocation38_spill] sm:$0xff] }
 0x327   : > { %v8189_v25 = vpop.eup %5811  ;;  %v2440_v38 = vadd.f32 1.4214138, %v2312_v54  ;;  %v3339_v48 = vmul.f32 %v3211_v49, %v1547_v5  ;;  %v1805_v62 = vadd.f32 1.0, %v1677_v11  ;;  %vm1293_vm1 = vcmp.ge.f32.partialorder %v8168_v63, 0.0  ;;  %v9784_v49 = vld [vmem:[#allocation35_spill] sm:$0xff] }
 0x328   : > { %5817 = vrcp.f32 %v1803_v39  ;;  %v3975_v27 = vmul.f32 %v3847_v22, %v8085_v21  ;;  %v2953_v0 = vadd.f32 0.2548296, %v2825_v7  ;;  %v2058_v2 = vmul.f32 1.0614054, %v8189_v25  ;;  %v9785_v22 = vld [vmem:[#allocation39_spill] sm:$0xff] }
 0x329   : > { %v2568_v15 = vmul.f32 %v8161_v44, %v2440_v38  ;;  %v3341_v24 = vmul.f32 %v3213_v61, %v1549_v3  ;;  %v4295_v33 = vpack.c.bf16 %v9783_v9, %v9782_v42  ;;  %v5814_v46 = vpop.eup %5813  ;;  %v4102_v54 = vadd.f32 1.0, %v3974_v58  ;;  %v8203_v38 = vpop.f32.mrb[51].mxu0 }
 0x32a   : > { %v3081_v51 = vmul.f32 %v8134_v26, %v2953_v0  ;;  %v2186_v39 = vadd.f32 -1.4531521, %v2058_v2  ;;  %5819 = vrcp.f32 %v1805_v62  ;;  %v3547_v21 = vmul.f32 1.442695, %v3339_v48 }
 0x32b   : > { %v2696_v5 = vadd.f32 -0.28449672, %v2568_v15  ;;  %4667 = vmatmul.mubr.bf16.gmra.mrb[76].mxu0 %v4295_v33  ;;  %v4297_v7 = vpack.c.bf16 %v9785_v22, %v9784_v49  ;;  %v706_v11 = vadd.f32 %v7779_v12, %v6385_v18  ;;  %v4103_v3 = vadd.f32 1.0, %v3975_v27 }
 0x32c   : > { %v2314_v61 = vmul.f32 %v8189_v25, %v2186_v39  ;;  %v3551_v42 = vmul.f32 1.442695, %v3341_v24  ;;  %v899_v26 = vadd.f32 %v7781_v43, %v6387_v19  ;;  %v8212_v48 = vsel %vm1291_vm0, 1.0, %v9641_v53 }
 0x32d   : > { %v2824_v58 = vmul.f32 %v8161_v44, %v2696_v5  ;;  %v8215_v0 = vmul.f32 0.5, %v8150_v35  ;;  %4828 = vmatmul.mubr.bf16.gmra.mrb[76].mxu1 %v4297_v7  ;;  %v1164_v12 = vmul.f32 0.70710677, %v706_v11  ;;  %v5816_v2 = vpop.eup %5815  ;;  %v8218_v27 = vmul.f32 %v4100_v30, %v8045_v40 }
 0x32e   : > { %v3721_v62 = vmul.f32 %v5810_v20, %v3081_v51  ;;  %v2442_v15 = vadd.f32 1.4214138, %v2314_v61  ;;  %v8223_v43 = vsel %vm1293_vm1, 1.0, %v9641_v53  ;;  %5821 = vpow2.f32 %v3547_v21  ;;  %v8232_v51 = vpop.f32.mrb[51].mxu1 }
 0x32f   : > { %9786 = vst [vmem:[#allocation37_spill] sm:$0xff] %v8218_v27  ;;  %v2952_v24 = vadd.f32 0.2548296, %v2824_v58  ;;  %v1548_v13 = vand.u32 2147483647, %v1164_v12  ;;  %v8226_v35 = vmul.f32 %v4102_v54, %v8052_v60  ;;  %v8229_v33 = vmul.f32 %v4103_v3, %v8073_v34 }
 0x330   : > { %v1166_v9 = vmul.f32 0.70710677, %v899_v26  ;;  %v2570_v40 = vmul.f32 %v8189_v25, %v2442_v15  ;;  %5823 = vpow2.f32 %v3551_v42  ;;  %v708_v5 = vadd.f32 %v7790_v45, %v6381_v16 }
 0x331   : > { %9787 = vst [vmem:[#allocation41_spill] sm:$0xff] %v8226_v35  ;;  %9788 = vst [vmem:[#allocation19_spill] sm:$0xff] %v8229_v33  ;;  %v3080_v63 = vmul.f32 %v8161_v44, %v2952_v24  ;;  %v1676_v30 = vmul.f32 0.3275911, %v1548_v13  ;;  %v3212_v39 = vsub.f32 0.0, %v1548_v13  ;;  %v3849_v21 = vsub.f32 1.0, %v3721_v62 }
 0x332   : > { %v8234_v20 = vpop.eup %5817  ;;  %v2698_v60 = vadd.f32 -0.28449672, %v2570_v40  ;;  %v8240_v34 = vmul.f32 0.5, %v706_v11  ;;  %v1550_v3 = vand.u32 2147483647, %v1166_v9  ;;  %vm1292_vm2 = vcmp.ge.f32.partialorder %v1164_v12, 0.0 }
 0x333   : > { %v2059_v54 = vmul.f32 1.0614054, %v8234_v20  ;;  %v3720_v49 = vmul.f32 %v5814_v46, %v3080_v63  ;;  %v1804_v22 = vadd.f32 1.0, %v1676_v30  ;;  %v3340_v7 = vmul.f32 %v3212_v39, %v1548_v13 }
 0x334   : > { %v8242_v61 = vpop.eup %5819  ;;  %v2826_v42 = vmul.f32 %v8189_v25, %v2698_v60  ;;  %v8245_v58 = vmul.f32 0.5, %v899_v26  ;;  %v1167_v62 = vmul.f32 0.70710677, %v708_v5  ;;  %v1678_v46 = vmul.f32 0.3275911, %v1550_v3 }
 0x335   : > { %v2187_v44 = vadd.f32 -1.4531521, %v2059_v54  ;;  %v3848_v15 = vsub.f32 1.0, %v3720_v49  ;;  %v2061_v45 = vmul.f32 1.0614054, %v8242_v61  ;;  %5825 = vrcp.f32 %v1804_v22 }
 0x336   : > { %v2954_v24 = vadd.f32 0.2548296, %v2826_v42  ;;  %v3214_v40 = vsub.f32 0.0, %v1550_v3  ;;  %v3977_v13 = vmul.f32 %v3849_v21, %v8115_v1  ;;  %v3549_v30 = vmul.f32 1.442695, %v3340_v7 }
 0x337   : > { %v2315_v11 = vmul.f32 %v8234_v20, %v2187_v44  ;;  %v2189_v63 = vadd.f32 -1.4531521, %v2061_v45  ;;  %vm1294_vm3 = vcmp.ge.f32.partialorder %v1166_v9, 0.0  ;;  %v8253_v26 = vsel %vm1292_vm2, 1.0, %v9641_v53 }
 0x338   : > { %v3082_v39 = vmul.f32 %v8189_v25, %v2954_v24  ;;  %v1806_v54 = vadd.f32 1.0, %v1678_v46  ;;  %v5822_v49 = vpop.eup %5821  ;;  %v3976_v22 = vmul.f32 %v3848_v15, %v8130_v28  ;;  %v3342_v44 = vmul.f32 %v3214_v40, %v1550_v3 }
 0x339   : > { %v2443_v60 = vadd.f32 1.4214138, %v2315_v11  ;;  %v2317_v42 = vmul.f32 %v8242_v61, %v2189_v63  ;;  %v1551_v33 = vand.u32 2147483647, %v1167_v62  ;;  %v8259_v9 = vsel %vm1294_vm3, 1.0, %v9641_v53 }
 0x33a   : > { %v5824_v35 = vpop.eup %5823  ;;  %v3722_v1 = vmul.f32 %v5816_v2, %v3082_v39  ;;  %5827 = vrcp.f32 %v1806_v54  ;;  %v4105_v25 = vadd.f32 1.0, %v3977_v13  ;;  %vm1295_vm4 = vcmp.ge.f32.partialorder %v1167_v62, 0.0 }
 0x33b   : > { %v2571_v21 = vmul.f32 %v8234_v20, %v2443_v60  ;;  %v2445_v12 = vadd.f32 1.4214138, %v2317_v42  ;;  %5829 = vpow2.f32 %v3549_v30  ;;  %v1679_v7 = vmul.f32 0.3275911, %v1551_v33 }
 0x33c   : > { %v3215_v24 = vsub.f32 0.0, %v1551_v33  ;;  %v901_v28 = vadd.f32 %v7808_v36, %v6383_v17  ;;  %v4104_v3 = vadd.f32 1.0, %v3976_v22  ;;  %v3553_v2 = vmul.f32 1.442695, %v3342_v44 }
 0x33d   : > { %v2699_v45 = vadd.f32 -0.28449672, %v2571_v21  ;;  %v2573_v15 = vmul.f32 %v8242_v61, %v2445_v12  ;;  %v1807_v11 = vadd.f32 1.0, %v1679_v7  ;;  %v3850_v46 = vsub.f32 1.0, %v3722_v1  ;;  %v8283_v21 = vpop.f32.mrb[52].mxu0 }
 0x33e   : > { %v1169_v63 = vmul.f32 0.70710677, %v901_v28  ;;  %v710_v13 = vadd.f32 %v7832_v4, %v6385_v18  ;;  %v8270_v39 = vmul.f32 %v4105_v25, %v8101_v50  ;;  %v8272_v54 = vmul.f32 0.5, %v708_v5  ;;  %v8285_v5 = vpop.f32.mrb[52].mxu1 }
 0x33f   : > { %v2827_v40 = vmul.f32 %v8234_v20, %v2699_v45  ;;  %v8267_v30 = vpop.eup %5825  ;;  %v2701_v60 = vadd.f32 -0.28449672, %v2573_v15  ;;  %5831 = vrcp.f32 %v1807_v11  ;;  %v8277_v42 = vsel %vm1295_vm4, 1.0, %v9641_v53 }
 0x340   : > { %9789 = vst [vmem:[#allocation33_spill] sm:$0xff] %v8270_v39  ;;  %v2060_v22 = vmul.f32 1.0614054, %v8267_v30  ;;  %v3343_v44 = vmul.f32 %v3215_v24, %v1551_v33  ;;  %v8280_v1 = vmul.f32 %v4104_v3, %v8105_v47  ;;  %5833 = vpow2.f32 %v3553_v2 }
 0x341   : > { %v2955_v36 = vadd.f32 0.2548296, %v2827_v40  ;;  %v2829_v4 = vmul.f32 %v8242_v61, %v2701_v60  ;;  %v1553_v50 = vand.u32 2147483647, %v1169_v63  ;;  %v3978_v25 = vmul.f32 %v3850_v46, %v8179_v29 }
 0x342   : > { %9790 = vst [vmem:[#allocation38_spill] sm:$0xff] %v8280_v1  ;;  %v2188_v7 = vadd.f32 -1.4531521, %v2060_v22  ;;  %v1168_v62 = vmul.f32 0.70710677, %v710_v13  ;;  %v8289_v15 = vmul.f32 0.5, %v901_v28  ;;  %v903_v22 = vadd.f32 %v7859_v8, %v6387_v19 }
 0x343   : > { %v3083_v12 = vmul.f32 %v8234_v20, %v2955_v36  ;;  %v2957_v45 = vadd.f32 0.2548296, %v2829_v4  ;;  %v1681_v33 = vmul.f32 0.3275911, %v1553_v50  ;;  %v3217_v47 = vsub.f32 0.0, %v1553_v50 }
 0x344   : > { %v8291_v24 = vpop.eup %5827  ;;  %v2316_v2 = vmul.f32 %v8267_v30, %v2188_v7  ;;  %v3555_v11 = vmul.f32 1.442695, %v3343_v44  ;;  %v1552_v40 = vand.u32 2147483647, %v1168_v62  ;;  %vm1297_vm5 = vcmp.ge.f32.partialorder %v1169_v63, 0.0 }
 0x345   : > { %v3723_v3 = vmul.f32 %v5822_v49, %v3083_v12  ;;  %v5830_v60 = vpop.eup %5829  ;;  %v3085_v39 = vmul.f32 %v8242_v61, %v2957_v45  ;;  %v2062_v29 = vmul.f32 1.0614054, %v8291_v24  ;;  %v1809_v20 = vadd.f32 1.0, %v1681_v33 }
 0x346   : > { %v3345_v46 = vmul.f32 %v3217_v47, %v1553_v50  ;;  %v2444_v36 = vadd.f32 1.4214138, %v2316_v2  ;;  %v1680_v28 = vmul.f32 0.3275911, %v1552_v40  ;;  %v4106_v12 = vadd.f32 1.0, %v3978_v25 }
 0x347   : > { %v3851_v4 = vsub.f32 1.0, %v3723_v3  ;;  %v3725_v1 = vmul.f32 %v5824_v35, %v3085_v39  ;;  %v2190_v49 = vadd.f32 -1.4531521, %v2062_v29  ;;  %5835 = vrcp.f32 %v1809_v20  ;;  %v9792_v20 = vld [vmem:[#allocation44_spill] sm:$0xff] }
 0x348   : > { %v2572_v44 = vmul.f32 %v8267_v30, %v2444_v36  ;;  %v8299_v7 = vmul.f32 0.5, %v710_v13  ;;  %v1808_v61 = vadd.f32 1.0, %v1680_v28  ;;  %5837 = vpow2.f32 %v3555_v11 }
 0x349   : > { %v8301_v45 = vpop.eup %5831  ;;  %v2318_v50 = vmul.f32 %v8291_v24, %v2190_v49  ;;  %v8305_v63 = vsel %vm1297_vm5, 1.0, %v9641_v53  ;;  %v3559_v33 = vmul.f32 1.442695, %v3345_v46  ;;  %vm1296_vm6 = vcmp.ge.f32.partialorder %v1168_v62, 0.0  ;;  %v9793_v46 = vld [vmem:[#allocation46_spill] sm:$0xff] }
 0x34a   : > { %v2700_v8 = vadd.f32 -0.28449672, %v2572_v44  ;;  %v2063_v35 = vmul.f32 1.0614054, %v8301_v45  ;;  %5839 = vrcp.f32 %v1808_v61  ;;  %v5834_v39 = vpop.eup %5833  ;;  %v3979_v25 = vmul.f32 %v3851_v4, %v8212_v48 }
 0x34b   : > { %v3853_v13 = vsub.f32 1.0, %v3725_v1  ;;  %v2446_v47 = vadd.f32 1.4214138, %v2318_v50  ;;  %v8309_v3 = vmul.f32 0.70710677, %v903_v22  ;;  %v8312_v2 = vmul.f32 %v4106_v12, %v8153_v23  ;;  %v9794_v50 = vld [vmem:[#allocation26_spill] sm:$0xff] }
 0x34c   : > { %v2828_v11 = vmul.f32 %v8267_v30, %v2700_v8  ;;  %v2191_v29 = vadd.f32 -1.4531521, %v2063_v35  ;;  %v4300_v36 = vpack.c.bf16 %v9793_v46, %v9792_v20  ;;  %5841 = vpow2.f32 %v3559_v33  ;;  %v9795_v8 = vld [vmem:[#allocation47_spill] sm:$0xff] }
 0x34d   : > { %9791 = vst [vmem:[#allocation35_spill] sm:$0xff] %v8312_v2  ;;  %v2574_v28 = vmul.f32 %v8291_v24, %v2446_v47  ;;  %v8319_v62 = vsel %vm1296_vm6, 1.0, %v9641_v53  ;;  %v3216_v48 = vsub.f32 0.0, %v1552_v40  ;;  %v8322_v49 = vmul.f32 0.5, %v903_v22 }
 0x34e   : > { %v2956_v1 = vadd.f32 0.2548296, %v2828_v11  ;;  %v2319_v4 = vmul.f32 %v8301_v45, %v2191_v29  ;;  %v1554_v23 = vand.u32 2147483647, %v8309_v3  ;;  %4674 = vmatprep.mubr.bf16.mxu0 %v4300_v36  ;;  %v4107_v12 = vadd.f32 1.0, %v3979_v25  ;;  %v8329_v11 = vpop.f32.mrb[53].mxu0 }
 0x34f   : > { %v3981_v44 = vmul.f32 %v3853_v13, %v8223_v43  ;;  %v2702_v61 = vadd.f32 -0.28449672, %v2574_v28  ;;  %v4302_v35 = vpack.c.bf16 %v9795_v8, %v9794_v50  ;;  %9796 = vst [vmem:[#allocation39_spill] sm:$0xff] %v8329_v11  ;;  %v3344_v2 = vmul.f32 %v3216_v48, %v1552_v40  ;;  %v9797_v25 = vld [vmem:[#allocation17_spill] sm:$0xff]  ;;  %v9798_v13 = vld [vmem:[#allocation42_spill] sm:$0xff]  ;;  %v9799_v36 = vld [vmem:[#allocation27_spill] sm:$0xff] }
 0x350   : > { %v3084_v33 = vmul.f32 %v8267_v30, %v2956_v1  ;;  %v2447_v47 = vadd.f32 1.4214138, %v2319_v4  ;;  %v1682_v20 = vmul.f32 0.3275911, %v1554_v23  ;;  %v3218_v46 = vsub.f32 0.0, %v1554_v23  ;;  %v8338_v50 = vpop.f32.mrb[53].mxu1 }
 0x351   : > { %v8331_v29 = vpop.eup %5835  ;;  %v2830_v22 = vmul.f32 %v8291_v24, %v2702_v61  ;;  %4835 = vmatprep.mubr.bf16.mxu1 %v4302_v35  ;;  %v714_v43 = vadd.f32 %v9797_v25, %v6381_v16  ;;  %v4299_v28 = vpack.c.bf16 %v9799_v36, %v9798_v13  ;;  %v8343_v11 = vmul.f32 %v4107_v12, %v8181_v59 }
 0x352   : > { %v3724_v30 = vmul.f32 %v5830_v60, %v3084_v33  ;;  %v2575_v1 = vmul.f32 %v8301_v45, %v2447_v47  ;;  %v2065_v4 = vmul.f32 1.0614054, %v8331_v29  ;;  %v1810_v8 = vadd.f32 1.0, %v1682_v20  ;;  %v5838_v27 = vpop.eup %5837  ;;  %v8350_v20 = vpop.f32.mrb[54].mxu0 }
 0x353   : > { %9800 = vst [vmem:[#allocation44_spill] sm:$0xff] %v8343_v11  ;;  %v2958_v40 = vadd.f32 0.2548296, %v2830_v22  ;;  %v3346_v48 = vmul.f32 %v3218_v46, %v1554_v23  ;;  %v1171_v61 = vmul.f32 0.70710677, %v714_v43  ;;  %4675 = vmatmul.mubr.bf16.gmra.mrb[80].mxu0 %v4299_v28  ;;  %v4109_v25 = vadd.f32 1.0, %v3981_v44 }
 0x354   : > { %v8345_v35 = vpop.eup %5839  ;;  %v2703_v13 = vadd.f32 -0.28449672, %v2575_v1  ;;  %v2193_v36 = vadd.f32 -1.4531521, %v2065_v4  ;;  %5843 = vrcp.f32 %v1810_v8  ;;  %v3557_v47 = vmul.f32 1.442695, %v3344_v2 }
 0x355   : > { %v3086_v60 = vmul.f32 %v8291_v24, %v2958_v40  ;;  %v2064_v33 = vmul.f32 1.0614054, %v8345_v35  ;;  %vm1298_vm7 = vcmp.ge.f32.partialorder %v8309_v3, 0.0  ;;  %9801 = vst [vmem:[#allocation46_spill] sm:$0xff] %v8350_v20  ;;  %v3852_v59 = vsub.f32 1.0, %v3724_v30  ;;  %v9802_v46 = vld [vmem:[#allocation9_spill] sm:$0xff] }
 0x356   : > { %v2831_v23 = vmul.f32 %v8301_v45, %v2703_v13  ;;  %v2321_v12 = vmul.f32 %v8331_v29, %v2193_v36  ;;  %v907_v44 = vadd.f32 %v9802_v46, %v6383_v17  ;;  %v5842_v22 = vpop.eup %5841  ;;  %v3561_v4 = vmul.f32 1.442695, %v3346_v48  ;;  %v9806_v20 = vld [vmem:[#allocation45_spill] sm:$0xff] }
 0x357   : > { %v3726_v28 = vmul.f32 %v5834_v39, %v3086_v60  ;;  %v2192_v1 = vadd.f32 -1.4531521, %v2064_v33  ;;  %v1555_v24 = vand.u32 2147483647, %v1171_v61  ;;  %v8357_v8 = vmul.f32 %v4109_v25, %v8215_v0  ;;  %v8365_v60 = vpop.f32.mrb[54].mxu1 }
 0x358   : > { %v2959_v2 = vadd.f32 0.2548296, %v2831_v23  ;;  %v2449_v3 = vadd.f32 1.4214138, %v2321_v12  ;;  %v8360_v40 = vsel %vm1298_vm7, 1.0, %v9641_v53  ;;  %5845 = vpow2.f32 %v3557_v47  ;;  %9804 = vst [vmem:[#allocation47_spill] sm:$0xff] %v8365_v60 }
 0x359   : > { %9803 = vst [vmem:[#allocation26_spill] sm:$0xff] %v8357_v8  ;;  %v2320_v30 = vmul.f32 %v8345_v35, %v2192_v1  ;;  %vm1299_vm8 = vcmp.ge.f32.partialorder %v1171_v61, 0.0  ;;  %v1683_v13 = vmul.f32 0.3275911, %v1555_v24  ;;  %v3854_v36 = vsub.f32 1.0, %v3726_v28  ;;  %v9805_v60 = vld [vmem:[#allocation43_spill] sm:$0xff] }
 0x35a   : > { %v3087_v46 = vmul.f32 %v8301_v45, %v2959_v2  ;;  %v2577_v39 = vmul.f32 %v8331_v29, %v2449_v3  ;;  %v1173_v48 = vmul.f32 0.70710677, %v907_v44  ;;  %v3980_v0 = vmul.f32 %v3852_v59, %v8253_v26 }
 0x35b   : > { %v2448_v25 = vadd.f32 1.4214138, %v2320_v30  ;;  %5847 = vpow2.f32 %v3561_v4  ;;  %v1811_v33 = vadd.f32 1.0, %v1683_v13  ;;  %v3219_v8 = vsub.f32 0.0, %v1555_v24 }
 0x35c   : > { %v3727_v23 = vmul.f32 %v5838_v27, %v3087_v46  ;;  %v2705_v12 = vadd.f32 -0.28449672, %v2577_v39  ;;  %v1557_v1 = vand.u32 2147483647, %v1173_v48  ;;  %v8369_v11 = vmul.f32 0.5, %v714_v43 }
 0x35d   : > { %v2576_v47 = vmul.f32 %v8345_v35, %v2448_v25  ;;  %v8373_v45 = vsel %vm1299_vm8, 1.0, %v9641_v53  ;;  %5849 = vrcp.f32 %v1811_v33  ;;  %v3982_v26 = vmul.f32 %v3854_v36, %v8259_v9 }
 0x35e   : > { %v8375_v28 = vpop.eup %5843  ;;  %v3855_v59 = vsub.f32 1.0, %v3727_v23  ;;  %v2833_v4 = vmul.f32 %v8331_v29, %v2705_v12  ;;  %v1685_v27 = vmul.f32 0.3275911, %v1557_v1  ;;  %v4108_v2 = vadd.f32 1.0, %v3980_v0 }
 0x35f   : > { %v2704_v3 = vadd.f32 -0.28449672, %v2576_v47  ;;  %v2066_v30 = vmul.f32 1.0614054, %v8375_v28  ;;  %v8380_v13 = vmul.f32 0.5, %v907_v44  ;;  %v3347_v46 = vmul.f32 %v3219_v8, %v1555_v24  ;;  %v8389_v44 = vpop.f32.mrb[55].mxu0 }
 0x360   : > { %v2961_v43 = vadd.f32 0.2548296, %v2833_v4  ;;  %v1813_v61 = vadd.f32 1.0, %v1685_v27  ;;  %v3221_v39 = vsub.f32 0.0, %v1557_v1  ;;  %v4301_v9 = vpack.c.bf16 %v9806_v20, %v9805_v60 }
 0x361   : > { %v2832_v25 = vmul.f32 %v8345_v35, %v2704_v3  ;;  %v2194_v33 = vadd.f32 -1.4531521, %v2066_v30  ;;  %v716_v36 = vadd.f32 %v7970_v41, %v6385_v18  ;;  %v4110_v23 = vadd.f32 1.0, %v3982_v26 }
 0x362   : > { %v3983_v0 = vmul.f32 %v3855_v59, %v8277_v42  ;;  %v3089_v12 = vmul.f32 %v8331_v29, %v2961_v43  ;;  %5851 = vrcp.f32 %v1813_v61  ;;  %v5846_v24 = vpop.eup %5845  ;;  %vm1301_vm9 = vcmp.ge.f32.partialorder %v1173_v48, 0.0  ;;  %4836 = vmatmul.mubr.bf16.gmra.mrb[80].mxu1 %v4301_v9 }
 0x363   : > { %v2960_v8 = vadd.f32 0.2548296, %v2832_v25  ;;  %v2322_v47 = vmul.f32 %v8375_v28, %v2194_v33  ;;  %v1172_v4 = vmul.f32 0.70710677, %v716_v36  ;;  %v3563_v20 = vmul.f32 1.442695, %v3347_v46 }
 0x364   : > { %v3729_v27 = vmul.f32 %v5842_v22, %v3089_v12  ;;  %v3349_v60 = vmul.f32 %v3221_v39, %v1557_v1  ;;  %v909_v41 = vadd.f32 %v7972_v6, %v6387_v19  ;;  %v8395_v42 = vmul.f32 %v4108_v2, %v8240_v34  ;;  %v8407_v2 = vpop.f32.mrb[55].mxu1 }
 0x365   : > { %v5848_v26 = vpop.eup %5847  ;;  %v3088_v29 = vmul.f32 %v8345_v35, %v2960_v8  ;;  %v2450_v59 = vadd.f32 1.4214138, %v2322_v47  ;;  %v1556_v3 = vand.u32 2147483647, %v1172_v4  ;;  %v8399_v30 = vmul.f32 %v4110_v23, %v8245_v58 }
 0x366   : > { %9807 = vst [vmem:[#allocation17_spill] sm:$0xff] %v8395_v42  ;;  %v4111_v48 = vadd.f32 1.0, %v3983_v0  ;;  %v3857_v43 = vsub.f32 1.0, %v3729_v27  ;;  %v8402_v22 = vsel %vm1301_vm9, 1.0, %v9641_v53  ;;  %5853 = vpow2.f32 %v3563_v20 }
 0x367   : > { %9808 = vst [vmem:[#allocation42_spill] sm:$0xff] %v8399_v30  ;;  %v8404_v1 = vpop.eup %5849  ;;  %v3728_v46 = vmul.f32 %v5846_v24, %v3088_v29  ;;  %v2578_v6 = vmul.f32 %v8375_v28, %v2450_v59  ;;  %v1684_v61 = vmul.f32 0.3275911, %v1556_v3  ;;  %v3220_v34 = vsub.f32 0.0, %v1556_v3 }
 0x368   : > { %v2067_v35 = vmul.f32 1.0614054, %v8404_v1  ;;  %v3567_v39 = vmul.f32 1.442695, %v3349_v60  ;;  %v1174_v58 = vmul.f32 0.70710677, %v909_v41  ;;  %v3985_v25 = vmul.f32 %v3857_v43, %v8305_v63 }
 0x369   : > { %v2706_v33 = vadd.f32 -0.28449672, %v2578_v6  ;;  %v8411_v9 = vmul.f32 0.5, %v716_v36  ;;  %v1812_v23 = vadd.f32 1.0, %v1684_v61  ;;  %v8414_v0 = vmul.f32 %v4111_v48, %v8272_v54 }
 0x36a   : > { %v3856_v12 = vsub.f32 1.0, %v3728_v46  ;;  %v2195_v24 = vadd.f32 -1.4531521, %v2067_v35  ;;  %v1558_v8 = vand.u32 2147483647, %v1174_v58  ;;  %v3348_v27 = vmul.f32 %v3220_v34, %v1556_v3 }
 0x36b   : > { %9809 = vst [vmem:[#allocation27_spill] sm:$0xff] %v8414_v0  ;;  %v2834_v47 = vmul.f32 %v8375_v28, %v2706_v33  ;;  %5855 = vrcp.f32 %v1812_v23  ;;  %v718_v20 = vadd.f32 %v7979_v55, %v6381_v16  ;;  %vm1300_vm10 = vcmp.ge.f32.partialorder %v1172_v4, 0.0 }
 0x36c   : > { %v8419_v60 = vpop.eup %5851  ;;  %v2323_v63 = vmul.f32 %v8404_v1, %v2195_v24  ;;  %5857 = vpow2.f32 %v3567_v39  ;;  %v1686_v36 = vmul.f32 0.3275911, %v1558_v8  ;;  %v4113_v29 = vadd.f32 1.0, %v3985_v25  ;;  %v9810_v39 = vld [vmem:[#allocation31_spill] sm:$0xff] }
 0x36d   : > { %v2962_v54 = vadd.f32 0.2548296, %v2834_v47  ;;  %v2069_v59 = vmul.f32 1.0614054, %v8419_v60  ;;  %vm1302_vm11 = vcmp.ge.f32.partialorder %v1174_v58, 0.0  ;;  %v3984_v48 = vmul.f32 %v3856_v12, %v8319_v62 }
 0x36e   : > { %v2451_v43 = vadd.f32 1.4214138, %v2323_v63  ;;  %v1814_v46 = vadd.f32 1.0, %v1686_v36  ;;  %v3222_v3 = vsub.f32 0.0, %v1558_v8  ;;  %v3565_v61 = vmul.f32 1.442695, %v3348_v27 }
 0x36f   : > { %v3090_v6 = vmul.f32 %v8375_v28, %v2962_v54  ;;  %v2197_v55 = vadd.f32 -1.4531521, %v2069_v59  ;;  %v1175_v34 = vmul.f32 0.70710677, %v718_v20  ;;  %v8427_v4 = vsel %vm1300_vm10, 1.0, %v9641_v53 }
 0x370   : > { %v2579_v35 = vmul.f32 %v8404_v1, %v2451_v43  ;;  %5859 = vrcp.f32 %v1814_v46  ;;  %v911_v25 = vadd.f32 %v9810_v39, %v6383_v17  ;;  %v8432_v62 = vmul.f32 0.5, %v909_v41  ;;  %v5854_v24 = vpop.eup %5853 }
 0x371   : > { %v2325_v33 = vmul.f32 %v8419_v60, %v2197_v55  ;;  %v3350_v23 = vmul.f32 %v3222_v3, %v1558_v8  ;;  %v1559_v12 = vand.u32 2147483647, %v1175_v34  ;;  %v8435_v28 = vmul.f32 %v4113_v29, %v8289_v15  ;;  %v8447_v3 = vpop.f32.mrb[56].mxu0 }
 0x372   : > { %v4112_v47 = vadd.f32 1.0, %v3984_v48  ;;  %v2707_v27 = vadd.f32 -0.28449672, %v2579_v35  ;;  %v8439_v63 = vsel %vm1302_vm11, 1.0, %v9641_v53  ;;  %v3730_v36 = vmul.f32 %v5848_v26, %v3090_v6 }
 0x373   : > { %9811 = vst [vmem:[#allocation9_spill] sm:$0xff] %v8435_v28  ;;  %v2453_v54 = vadd.f32 1.4214138, %v2325_v33  ;;  %5861 = vpow2.f32 %v3565_v61  ;;  %v1687_v59 = vmul.f32 0.3275911, %v1559_v12  ;;  %vm1303_vm12 = vcmp.ge.f32.partialorder %v1175_v34, 0.0 }
 0x374   : > { %v2835_v43 = vmul.f32 %v8404_v1, %v2707_v27  ;;  %v3223_v41 = vsub.f32 0.0, %v1559_v12  ;;  %v1177_v8 = vmul.f32 0.70710677, %v911_v25  ;;  %v3569_v29 = vmul.f32 1.442695, %v3350_v23  ;;  %v8459_v27 = vpop.f32.mrb[56].mxu1 }
 0x375   : > { %v8442_v46 = vpop.eup %5855  ;;  %v2581_v15 = vmul.f32 %v8419_v60, %v2453_v54  ;;  %v1815_v48 = vadd.f32 1.0, %v1687_v59  ;;  %v720_v58 = vadd.f32 %v8018_v37, %v6385_v18  ;;  %v8450_v6 = vmul.f32 %v4112_v47, %v8299_v7 }
 0x376   : > { %v5858_v26 = vpop.eup %5857  ;;  %v2963_v55 = vadd.f32 0.2548296, %v2835_v43  ;;  %v2068_v61 = vmul.f32 1.0614054, %v8442_v46  ;;  %v8453_v35 = vmul.f32 0.5, %v718_v20  ;;  %v3858_v39 = vsub.f32 1.0, %v3730_v36 }
 0x377   : > { %9812 = vst [vmem:[#allocation43_spill] sm:$0xff] %v8450_v6  ;;  %v2709_v33 = vadd.f32 -0.28449672, %v2581_v15  ;;  %v8457_v23 = vsel %vm1303_vm12, 1.0, %v9641_v53  ;;  %5863 = vrcp.f32 %v1815_v48  ;;  %v3351_v59 = vmul.f32 %v3223_v41, %v1559_v12 }
 0x378   : > { %v3091_v37 = vmul.f32 %v8404_v1, %v2963_v55  ;;  %v2196_v54 = vadd.f32 -1.4531521, %v2068_v61  ;;  %v1561_v7 = vand.u32 2147483647, %v1177_v8  ;;  %5865 = vpow2.f32 %v3569_v29 }
 0x379   : > { %v2837_v47 = vmul.f32 %v8419_v60, %v2709_v33  ;;  %v8463_v43 = vmul.f32 0.5, %v911_v25  ;;  %v1176_v20 = vmul.f32 0.70710677, %v720_v58  ;;  %v3986_v0 = vmul.f32 %v3858_v39, %v8360_v40 }
 0x37a   : > { %v8465_v36 = vpop.eup %5859  ;;  %v3731_v15 = vmul.f32 %v5854_v24, %v3091_v37  ;;  %v2324_v34 = vmul.f32 %v8442_v46, %v2196_v54  ;;  %v1689_v28 = vmul.f32 0.3275911, %v1561_v7  ;;  %v3225_v48 = vsub.f32 0.0, %v1561_v7 }
 0x37b   : > { %v2965_v30 = vadd.f32 0.2548296, %v2837_v47  ;;  %v2070_v1 = vmul.f32 1.0614054, %v8465_v36  ;;  %vm1305_vm13 = vcmp.ge.f32.partialorder %v1177_v8, 0.0  ;;  %v8472_v54 = vmul.f32 0.5, %v720_v58 }
 0x37c   : > { %v3859_v12 = vsub.f32 1.0, %v3731_v15  ;;  %v2452_v41 = vadd.f32 1.4214138, %v2324_v34  ;;  %v3571_v55 = vmul.f32 1.442695, %v3351_v59  ;;  %v1817_v29 = vadd.f32 1.0, %v1689_v28 }
 0x37d   : > { %v5862_v25 = vpop.eup %5861  ;;  %v3093_v61 = vmul.f32 %v8419_v60, %v2965_v30  ;;  %v2198_v33 = vadd.f32 -1.4531521, %v2070_v1  ;;  %v3353_v6 = vmul.f32 %v3225_v48, %v1561_v7  ;;  %v1560_v24 = vand.u32 2147483647, %v1176_v20 }
 0x37e   : > { %v2580_v37 = vmul.f32 %v8442_v46, %v2452_v41  ;;  %5867 = vrcp.f32 %v1817_v29  ;;  %v913_v40 = vadd.f32 %v8037_v57, %v6387_v19  ;;  %v3987_v39 = vmul.f32 %v3859_v12, %v8373_v45 }
 0x37f   : > { %v2326_v47 = vmul.f32 %v8465_v36, %v2198_v33  ;;  %v1688_v59 = vmul.f32 0.3275911, %v1560_v24  ;;  %v3224_v28 = vsub.f32 0.0, %v1560_v24  ;;  %v4114_v15 = vadd.f32 1.0, %v3986_v0 }
 0x380   : > { %v3733_v34 = vmul.f32 %v5858_v26, %v3093_v61  ;;  %v2708_v30 = vadd.f32 -0.28449672, %v2580_v37  ;;  %v8480_v60 = vsel %vm1305_vm13, 1.0, %v9641_v53  ;;  %5869 = vpow2.f32 %v3571_v55  ;;  %v9813_v37 = vld [vmem:[#allocation51_spill] sm:$0xff] }
 0x381   : > { %v8482_v7 = vpop.eup %5863  ;;  %v2454_v58 = vadd.f32 1.4214138, %v2326_v47  ;;  %v3575_v48 = vmul.f32 1.442695, %v3353_v6  ;;  %v1816_v1 = vadd.f32 1.0, %v1688_v59  ;;  %vm1304_vm14 = vcmp.ge.f32.partialorder %v1176_v20, 0.0 }
 0x382   : > { %v2836_v57 = vmul.f32 %v8442_v46, %v2708_v30  ;;  %v2071_v45 = vmul.f32 1.0614054, %v8482_v7  ;;  %v1178_v12 = vmul.f32 0.70710677, %v913_v40  ;;  %v5866_v41 = vpop.eup %5865  ;;  %v4115_v0 = vadd.f32 1.0, %v3987_v39  ;;  %v9814_v47 = vld [vmem:[#allocation54_spill] sm:$0xff] }
 0x383   : > { %v2582_v26 = vmul.f32 %v8465_v36, %v2454_v58  ;;  %5871 = vrcp.f32 %v1816_v1  ;;  %v3352_v8 = vmul.f32 %v3224_v28, %v1560_v24  ;;  %v3861_v29 = vsub.f32 1.0, %v3733_v34  ;;  %v9816_v24 = vld [vmem:[#allocation32_spill] sm:$0xff]  ;;  %v9817_v28 = vld [vmem:[#allocation55_spill] sm:$0xff] }
 0x384   : > { %v2964_v61 = vadd.f32 0.2548296, %v2836_v57  ;;  %v2199_v33 = vadd.f32 -1.4531521, %v2071_v45  ;;  %v4304_v55 = vpack.c.bf16 %v9814_v47, %v9813_v37  ;;  %v8490_v6 = vmul.f32 %v4114_v15, %v8322_v49 }
 0x385   : > { %v2710_v59 = vadd.f32 -0.28449672, %v2582_v26  ;;  %5873 = vpow2.f32 %v3575_v48  ;;  %v8493_v20 = vsel %vm1304_vm14, 1.0, %v9641_v53  ;;  %v1562_v58 = vand.u32 2147483647, %v1178_v12 }
 0x386   : > { %9815 = vst [vmem:[#allocation45_spill] sm:$0xff] %v8490_v6  ;;  %v3092_v39 = vmul.f32 %v8442_v46, %v2964_v61  ;;  %v2327_v30 = vmul.f32 %v8482_v7, %v2199_v33  ;;  %4682 = vmatprep.mubr.bf16.mxu0 %v4304_v55  ;;  %v4306_v34 = vpack.c.bf16 %v9817_v28, %v9816_v24  ;;  %v3573_v57 = vmul.f32 1.442695, %v3352_v8 }
 0x387   : > { %v2838_v1 = vmul.f32 %v8465_v36, %v2710_v59  ;;  %v8500_v45 = vmul.f32 0.5, %v913_v40  ;;  %v724_v49 = vadd.f32 %v8087_v56, %v6381_v16  ;;  %v8507_v48 = vmul.f32 %v4115_v0, %v8369_v11  ;;  %v8514_v59 = vpop.f32.mrb[57].mxu0  ;;  %v8516_v11 = vpop.f32.mrb[57].mxu1 }
 0x388   : > { %v8504_v15 = vpop.eup %5867  ;;  %v3989_v46 = vmul.f32 %v3861_v29, %v8402_v22  ;;  %v2455_v26 = vadd.f32 1.4214138, %v2327_v30  ;;  %v1690_v61 = vmul.f32 0.3275911, %v1562_v58  ;;  %4843 = vmatprep.mubr.bf16.mxu1 %v4306_v34  ;;  %v3732_v33 = vmul.f32 %v5862_v25, %v3092_v39  ;;  %v8524_v24 = vpop.f32.mrb[58].mxu0 }
 0x389   : > { %9818 = vst [vmem:[#allocation31_spill] sm:$0xff] %v8507_v48  ;;  %v2966_v37 = vadd.f32 0.2548296, %v2838_v1  ;;  %v2073_v47 = vmul.f32 1.0614054, %v8504_v15  ;;  %vm1306_vm15 = vcmp.ge.f32.partialorder %v1178_v12, 0.0  ;;  %v917_v56 = vadd.f32 %v8089_v10, %v6383_v17 }
 0x38a   : > { %v2583_v40 = vmul.f32 %v8482_v7, %v2455_v26  ;;  %v1818_v8 = vadd.f32 1.0, %v1690_v61  ;;  %v3226_v55 = vsub.f32 0.0, %v1562_v58  ;;  %v5870_v22 = vpop.eup %5869  ;;  %5875 = vpow2.f32 %v3573_v57  ;;  %v8539_v6 = vpop.f32.mrb[58].mxu1 }
 0x38b   : > { %v3094_v0 = vmul.f32 %v8465_v36, %v2966_v37  ;;  %v2201_v29 = vadd.f32 -1.4531521, %v2073_v47  ;;  %v8519_v25 = vmul.f32 0.70710677, %v724_v49  ;;  %v4117_v39 = vadd.f32 1.0, %v3989_v46  ;;  %9820 = vst [vmem:[#allocation54_spill] sm:$0xff] %v8539_v6 }
 0x38c   : > { %v2711_v12 = vadd.f32 -0.28449672, %v2583_v40  ;;  %v8522_v30 = vsel %vm1306_vm15, 1.0, %v9641_v53  ;;  %5877 = vrcp.f32 %v1818_v8  ;;  %v3860_v28 = vsub.f32 1.0, %v3732_v33 }
 0x38d   : > { %v8526_v10 = vpop.eup %5871  ;;  %v3734_v34 = vmul.f32 %v5866_v41, %v3094_v0  ;;  %v2329_v1 = vmul.f32 %v8504_v15, %v2201_v29  ;;  %v1563_v36 = vand.u32 2147483647, %v8519_v25  ;;  %v3354_v46 = vmul.f32 %v3226_v55, %v1562_v58 }
 0x38e   : > { %v2839_v57 = vmul.f32 %v8482_v7, %v2711_v12  ;;  %v2072_v26 = vmul.f32 1.0614054, %v8526_v10  ;;  %v8532_v61 = vmul.f32 0.70710677, %v917_v56  ;;  %v8534_v8 = vmul.f32 0.5, %v724_v49 }
 0x38f   : > { %v5874_v37 = vpop.eup %5873  ;;  %v3862_v47 = vsub.f32 1.0, %v3734_v34  ;;  %v2457_v40 = vadd.f32 1.4214138, %v2329_v1  ;;  %v1691_v48 = vmul.f32 0.3275911, %v1563_v36  ;;  %v8537_v33 = vmul.f32 %v4117_v39, %v8380_v13 }
 0x390   : > { %v2967_v41 = vadd.f32 0.2548296, %v2839_v57  ;;  %v2200_v0 = vadd.f32 -1.4531521, %v2072_v26  ;;  %v3227_v29 = vsub.f32 0.0, %v1563_v36  ;;  %v3988_v12 = vmul.f32 %v3860_v28, %v8427_v4 }
 0x391   : > { %9819 = vst [vmem:[#allocation51_spill] sm:$0xff] %v8537_v33  ;;  %v2585_v58 = vmul.f32 %v8504_v15, %v2457_v40  ;;  %v1819_v55 = vadd.f32 1.0, %v1691_v48  ;;  %v8543_v42 = vmul.f32 0.5, %v917_v56  ;;  %v3990_v34 = vmul.f32 %v3862_v47, %v8439_v63  ;;  %v9821_v40 = vld [vmem:[#allocation48_spill] sm:$0xff] }
 0x392   : > { %v3095_v49 = vmul.f32 %v8482_v7, %v2967_v41  ;;  %v2328_v1 = vmul.f32 %v8526_v10, %v2200_v0  ;;  %v3577_v13 = vmul.f32 1.442695, %v3354_v46  ;;  %vm1307_vm0 = vcmp.ge.f32.partialorder %v8519_v25, 0.0  ;;  %v9822_v48 = vld [vmem:[#allocation52_spill] sm:$0xff] }
 0x393   : > { %v2713_v39 = vadd.f32 -0.28449672, %v2585_v58  ;;  %5879 = vrcp.f32 %v1819_v55  ;;  %v1565_v57 = vand.u32 2147483647, %v8532_v61  ;;  %v3355_v28 = vmul.f32 %v3227_v29, %v1563_v36  ;;  %v9824_v58 = vld [vmem:[#allocation34_spill] sm:$0xff] }
 0x394   : > { %v3735_v26 = vmul.f32 %v5870_v22, %v3095_v49  ;;  %v2456_v4 = vadd.f32 1.4214138, %v2328_v1  ;;  %v4303_v56 = vpack.c.bf16 %v9822_v48, %v9821_v40  ;;  %v5876_v33 = vpop.eup %5875  ;;  %v4116_v6 = vadd.f32 1.0, %v3988_v12  ;;  %v9823_v22 = vld [vmem:[#allocation49_spill] sm:$0xff]  ;;  %v8562_v48 = vpop.f32.mrb[59].mxu0 }
 0x395   : > { %v2841_v63 = vmul.f32 %v8504_v15, %v2713_v39  ;;  %v1693_v7 = vmul.f32 0.3275911, %v1565_v57  ;;  %v3229_v47 = vsub.f32 0.0, %v1565_v57  ;;  %v4118_v46 = vadd.f32 1.0, %v3990_v34 }
 0x396   : > { %v8553_v41 = vpop.eup %5877  ;;  %v2584_v0 = vmul.f32 %v8526_v10, %v2456_v4  ;;  %vm1309_vm1 = vcmp.ge.f32.partialorder %v8532_v61, 0.0  ;;  %4683 = vmatmul.mubr.bf16.gmra.mrb[84].mxu0 %v4303_v56  ;;  %v4305_v36 = vpack.c.bf16 %v9824_v58, %v9823_v22  ;;  %v3863_v29 = vsub.f32 1.0, %v3735_v26 }
 0x397   : > { %v2969_v55 = vadd.f32 0.2548296, %v2841_v63  ;;  %v2074_v49 = vmul.f32 1.0614054, %v8553_v41  ;;  %v1821_v12 = vadd.f32 1.0, %v1693_v7  ;;  %v3357_v40 = vmul.f32 %v3229_v47, %v1565_v57 }
 0x398   : > { %v2712_v1 = vadd.f32 -0.28449672, %v2584_v0  ;;  %v3579_v39 = vmul.f32 1.442695, %v3355_v28  ;;  %4844 = vmatmul.mubr.bf16.gmra.mrb[84].mxu1 %v4305_v36  ;;  %v726_v34 = vadd.f32 %v8144_v14, %v6385_v18  ;;  %v919_v26 = vadd.f32 %v8146_v31, %v6387_v19 }
 0x399   : > { %v3097_v4 = vmul.f32 %v8504_v15, %v2969_v55  ;;  %v2202_v56 = vadd.f32 -1.4531521, %v2074_v49  ;;  %5881 = vrcp.f32 %v1821_v12  ;;  %v8571_v57 = vsel %vm1307_vm0, 1.0, %v9641_v53 }
 0x39a   : > { %v2840_v63 = vmul.f32 %v8526_v10, %v2712_v1  ;;  %5883 = vpow2.f32 %v3577_v13  ;;  %v1180_v28 = vmul.f32 0.70710677, %v726_v34  ;;  %v8574_v14 = vmul.f32 %v4116_v6, %v8411_v9 }
 0x39b   : > { %v3991_v7 = vmul.f32 %v3863_v29, %v8457_v23  ;;  %v3737_v15 = vmul.f32 %v5874_v37, %v3097_v4  ;;  %v2330_v47 = vmul.f32 %v8553_v41, %v2202_v56  ;;  %v8579_v0 = vmul.f32 %v4118_v46, %v8432_v62  ;;  %v8590_v46 = vpop.f32.mrb[59].mxu1 }
 0x39c   : > { %9825 = vst [vmem:[#allocation32_spill] sm:$0xff] %v8574_v14  ;;  %v2968_v31 = vadd.f32 0.2548296, %v2840_v63  ;;  %v8584_v13 = vsel %vm1309_vm1, 1.0, %v9641_v53  ;;  %v1564_v25 = vand.u32 2147483647, %v1180_v28  ;;  %5885 = vpow2.f32 %v3579_v39 }
 0x39d   : > { %9826 = vst [vmem:[#allocation55_spill] sm:$0xff] %v8579_v0  ;;  %v8586_v22 = vpop.eup %5879  ;;  %v2458_v58 = vadd.f32 1.4214138, %v2330_v47  ;;  %v3583_v9 = vmul.f32 1.442695, %v3357_v40  ;;  %v3865_v23 = vsub.f32 1.0, %v3737_v15 }
 0x39e   : > { %v1182_v6 = vmul.f32 0.70710677, %v919_v26  ;;  %v3096_v37 = vmul.f32 %v8526_v10, %v2968_v31  ;;  %v2075_v36 = vmul.f32 1.0614054, %v8586_v22  ;;  %v1692_v62 = vmul.f32 0.3275911, %v1564_v25 }
 0x39f   : > { %v4119_v29 = vadd.f32 1.0, %v3991_v7  ;;  %v2586_v61 = vmul.f32 %v8553_v41, %v2458_v58  ;;  %v3228_v55 = vsub.f32 0.0, %v1564_v25  ;;  %v8593_v4 = vmul.f32 0.5, %v726_v34 }
 0x3a0   : > { %v1566_v49 = vand.u32 2147483647, %v1182_v6  ;;  %v3736_v12 = vmul.f32 %v5876_v33, %v3096_v37  ;;  %v2203_v1 = vadd.f32 -1.4531521, %v2075_v36  ;;  %v1820_v39 = vadd.f32 1.0, %v1692_v62 }
 0x3a1   : > { %v2714_v40 = vadd.f32 -0.28449672, %v2586_v61  ;;  %5887 = vpow2.f32 %v3583_v9  ;;  %v8595_v56 = vmul.f32 0.5, %v919_v26  ;;  %v3993_v63 = vmul.f32 %v3865_v23, %v8480_v60 }
 0x3a2   : > { %v1694_v10 = vmul.f32 0.3275911, %v1566_v49  ;;  %v3864_v15 = vsub.f32 1.0, %v3736_v12  ;;  %v2331_v47 = vmul.f32 %v8586_v22, %v2203_v1  ;;  %5889 = vrcp.f32 %v1820_v39 }
 0x3a3   : > { %v8599_v7 = vpop.eup %5881  ;;  %v2842_v31 = vmul.f32 %v8553_v41, %v2714_v40  ;;  %vm1308_vm2 = vcmp.ge.f32.partialorder %v1180_v28, 0.0  ;;  %v3356_v33 = vmul.f32 %v3228_v55, %v1564_v25  ;;  %vm1310_vm3 = vcmp.ge.f32.partialorder %v1182_v6, 0.0 }
 0x3a4   : > { %v1822_v34 = vadd.f32 1.0, %v1694_v10  ;;  %v5884_v58 = vpop.eup %5883  ;;  %v2459_v37 = vadd.f32 1.4214138, %v2331_v47  ;;  %v2077_v9 = vmul.f32 1.0614054, %v8599_v7  ;;  %v3230_v26 = vsub.f32 0.0, %v1566_v49 }
 0x3a5   : > { %v3992_v36 = vmul.f32 %v3864_v15, %v8493_v20  ;;  %v2970_v60 = vadd.f32 0.2548296, %v2842_v31  ;;  %v728_v23 = vadd.f32 %v8155_v32, %v6381_v16  ;;  %v4121_v62 = vadd.f32 1.0, %v3993_v63 }
 0x3a6   : > { %5891 = vrcp.f32 %v1822_v34  ;;  %v2587_v61 = vmul.f32 %v8586_v22, %v2459_v37  ;;  %v2205_v12 = vadd.f32 -1.4531521, %v2077_v9  ;;  %v921_v25 = vadd.f32 %v8184_v52, %v6383_v17  ;;  %v5886_v55 = vpop.eup %5885 }
 0x3a7   : > { %v8610_v1 = vmul.f32 %v4119_v29, %v8453_v35  ;;  %v3098_v39 = vmul.f32 %v8553_v41, %v2970_v60  ;;  %v3581_v40 = vmul.f32 1.442695, %v3356_v33  ;;  %v8613_v20 = vmul.f32 0.70710677, %v728_v23 }
 0x3a8   : > { %v2715_v10 = vadd.f32 -0.28449672, %v2587_v61  ;;  %v2333_v15 = vmul.f32 %v8599_v7, %v2205_v12  ;;  %v8618_v32 = vsel %vm1308_vm2, 1.0, %v9641_v53  ;;  %v3358_v63 = vmul.f32 %v3230_v26, %v1566_v49 }
 0x3a9   : > { %9827 = vst [vmem:[#allocation48_spill] sm:$0xff] %v8610_v1  ;;  %v4120_v47 = vadd.f32 1.0, %v3992_v36  ;;  %v3738_v31 = vmul.f32 %v5884_v58, %v3098_v39  ;;  %v8622_v52 = vsel %vm1310_vm3, 1.0, %v9641_v53  ;;  %v1567_v35 = vand.u32 2147483647, %v8613_v20 }
 0x3aa   : > { %v8626_v41 = vmul.f32 %v4121_v62, %v8463_v43  ;;  %v2843_v29 = vmul.f32 %v8586_v22, %v2715_v10  ;;  %v2461_v33 = vadd.f32 1.4214138, %v2333_v15  ;;  %v1185_v34 = vmul.f32 0.70710677, %v921_v25 }
 0x3ab   : > { %v5888_v37 = vpop.eup %5887  ;;  %v3866_v28 = vsub.f32 1.0, %v3738_v31  ;;  %5893 = vpow2.f32 %v3581_v40  ;;  %v1695_v9 = vmul.f32 0.3275911, %v1567_v35  ;;  %v3231_v49 = vsub.f32 0.0, %v1567_v35 }
 0x3ac   : > { %9828 = vst [vmem:[#allocation52_spill] sm:$0xff] %v8626_v41  ;;  %v8629_v26 = vpop.eup %5889  ;;  %v2971_v58 = vadd.f32 0.2548296, %v2843_v29  ;;  %v2589_v6 = vmul.f32 %v8599_v7, %v2461_v33  ;;  %v3585_v36 = vmul.f32 1.442695, %v3358_v63  ;;  %v8633_v61 = vmul.f32 %v4120_v47, %v8472_v54  ;;  %v8644_v47 = vpop.f32.mrb[60].mxu0 }
 0x3ad   : > { %v1569_v60 = vand.u32 2147483647, %v1185_v34  ;;  %v2076_v43 = vmul.f32 1.0614054, %v8629_v26  ;;  %v8636_v62 = vmul.f32 0.5, %v728_v23  ;;  %v1823_v12 = vadd.f32 1.0, %v1695_v9 }
 0x3ae   : > { %9829 = vst [vmem:[#allocation49_spill] sm:$0xff] %v8633_v61  ;;  %v3099_v39 = vmul.f32 %v8586_v22, %v2971_v58  ;;  %v2717_v40 = vadd.f32 -0.28449672, %v2589_v6  ;;  %v730_v15 = vadd.f32 %v8203_v38, %v6385_v18  ;;  %v3994_v63 = vmul.f32 %v3866_v28, %v8522_v30  ;;  %v8648_v58 = vpop.f32.mrb[60].mxu1 }
 0x3af   : > { %v1697_v10 = vmul.f32 0.3275911, %v1569_v60  ;;  %v2204_v29 = vadd.f32 -1.4531521, %v2076_v43  ;;  %5895 = vrcp.f32 %v1823_v12  ;;  %v3359_v54 = vmul.f32 %v3231_v49, %v1567_v35 }
 0x3b0   : > { %v8641_v31 = vpop.eup %5891  ;;  %v3739_v33 = vmul.f32 %v5886_v55, %v3099_v39  ;;  %v2845_v23 = vmul.f32 %v8599_v7, %v2717_v40  ;;  %vm1311_vm4 = vcmp.ge.f32.partialorder %v8613_v20, 0.0  ;;  %v8652_v38 = vmul.f32 0.5, %v921_v25 }
 0x3b1   : > { %v2078_v9 = vmul.f32 1.0614054, %v8641_v31  ;;  %v1825_v22 = vadd.f32 1.0, %v1697_v10  ;;  %v2332_v6 = vmul.f32 %v8629_v26, %v2204_v29  ;;  %v3233_v30 = vsub.f32 0.0, %v1569_v60 }
 0x3b2   : > { %v2973_v28 = vadd.f32 0.2548296, %v2845_v23  ;;  %vm1313_vm5 = vcmp.ge.f32.partialorder %v1185_v34, 0.0  ;;  %v4122_v35 = vadd.f32 1.0, %v3994_v63  ;;  %v3867_v55 = vsub.f32 1.0, %v3739_v33 }
 0x3b3   : > { %v2206_v43 = vadd.f32 -1.4531521, %v2078_v9  ;;  %5897 = vrcp.f32 %v1825_v22  ;;  %v2460_v49 = vadd.f32 1.4214138, %v2332_v6  ;;  %v1184_v12 = vmul.f32 0.70710677, %v730_v15 }
 0x3b4   : > { %v3101_v39 = vmul.f32 %v8599_v7, %v2973_v28  ;;  %v3587_v10 = vmul.f32 1.442695, %v3359_v54  ;;  %v3361_v41 = vmul.f32 %v3233_v30, %v1569_v60  ;;  %5899 = vpow2.f32 %v3585_v36 }
 0x3b5   : > { %v2334_v40 = vmul.f32 %v8641_v31, %v2206_v43  ;;  %v5894_v29 = vpop.eup %5893  ;;  %v2588_v1 = vmul.f32 %v8629_v26, %v2460_v49  ;;  %v1568_v25 = vand.u32 2147483647, %v1184_v12  ;;  %v8659_v23 = vadd.f32 %v8232_v51, %v6387_v19 }
 0x3b6   : > { %v3741_v9 = vmul.f32 %v5888_v37, %v3101_v39  ;;  %v8664_v33 = vsel %vm1311_vm4, 1.0, %v9641_v53  ;;  %v8668_v7 = vsel %vm1313_vm5, 1.0, %v9641_v53  ;;  %v8671_v60 = vmul.f32 %v4122_v35, %v8500_v45 }
 0x3b7   : > { %v2462_v63 = vadd.f32 1.4214138, %v2334_v40  ;;  %v3995_v36 = vmul.f32 %v3867_v55, %v8571_v57  ;;  %v2716_v54 = vadd.f32 -0.28449672, %v2588_v1  ;;  %v1696_v22 = vmul.f32 0.3275911, %v1568_v25 }
 0x3b8   : > { %9830 = vst [vmem:[#allocation34_spill] sm:$0xff] %v8671_v60  ;;  %5901 = vpow2.f32 %v3587_v10  ;;  %v3591_v37 = vmul.f32 1.442695, %v3361_v41  ;;  %vm1312_vm6 = vcmp.ge.f32.partialorder %v1184_v12, 0.0  ;;  %v3232_v34 = vsub.f32 0.0, %v1568_v25  ;;  %v9831_v57 = vld [vmem:[#allocation22_spill] sm:$0xff] }
 0x3b9   : > { %v2590_v51 = vmul.f32 %v8641_v31, %v2462_v63  ;;  %v8675_v6 = vpop.eup %5895  ;;  %v2844_v20 = vmul.f32 %v8629_v26, %v2716_v54  ;;  %v1824_v30 = vadd.f32 1.0, %v1696_v22  ;;  %v1186_v28 = vmul.f32 0.70710677, %v8659_v23  ;;  %v9832_v1 = vld [vmem:[#allocation23_spill] sm:$0xff] }
 0x3ba   : > { %v3869_v43 = vsub.f32 1.0, %v3741_v9  ;;  %v2079_v35 = vmul.f32 1.0614054, %v8675_v6  ;;  %v4308_v55 = vpack.c.bf16 %v9832_v1, %v9831_v57  ;;  %v4123_v49 = vadd.f32 1.0, %v3995_v36  ;;  %v9833_v57 = vld [vmem:[#allocation25_spill] sm:$0xff] }
 0x3bb   : > { %v2718_v45 = vadd.f32 -0.28449672, %v2590_v51  ;;  %v2972_v39 = vadd.f32 0.2548296, %v2844_v20  ;;  %v8682_v40 = vmul.f32 0.5, %v730_v15  ;;  %5903 = vrcp.f32 %v1824_v30 }
 0x3bc   : > { %v2207_v63 = vadd.f32 -1.4531521, %v2079_v35  ;;  %5905 = vpow2.f32 %v3591_v37  ;;  %v8689_v9 = vsel %vm1312_vm6, 1.0, %v9641_v53  ;;  %4690 = vmatprep.mubr.bf16.mxu0 %v4308_v55  ;;  %v3360_v36 = vmul.f32 %v3232_v34, %v1568_v25  ;;  %v8703_v34 = vpop.f32.mrb[61].mxu0 }
 0x3bd   : > { %v8684_v41 = vpop.eup %5897  ;;  %v2846_v10 = vmul.f32 %v8641_v31, %v2718_v45  ;;  %v3100_v54 = vmul.f32 %v8629_v26, %v2972_v39  ;;  %v1570_v51 = vand.u32 2147483647, %v1186_v28  ;;  %v3997_v15 = vmul.f32 %v3869_v43, %v8584_v13  ;;  %v9834_v45 = vld [vmem:[#allocation11_spill] sm:$0xff]  ;;  %v8705_v43 = vpop.f32.mrb[61].mxu1 }
 0x3be   : > { %v2081_v22 = vmul.f32 1.0614054, %v8684_v41  ;;  %v2335_v30 = vmul.f32 %v8675_v6, %v2207_v63  ;;  %v4310_v35 = vpack.c.bf16 %v9834_v45, %v9833_v57  ;;  %v5900_v37 = vpop.eup %5899  ;;  %v8698_v55 = vmul.f32 %v4123_v49, %v8534_v8 }
 0x3bf   : > { %v2974_v20 = vadd.f32 0.2548296, %v2846_v10  ;;  %v3740_v1 = vmul.f32 %v5894_v29, %v3100_v54  ;;  %v1698_v60 = vmul.f32 0.3275911, %v1570_v51  ;;  %v3234_v0 = vsub.f32 0.0, %v1570_v51 }
 0x3c0   : > { %v2209_v12 = vadd.f32 -1.4531521, %v2081_v22  ;;  %9835 = vst [vmem:[#allocation22_spill] sm:$0xff] %v8698_v55  ;;  %v2463_v25 = vadd.f32 1.4214138, %v2335_v30  ;;  %4851 = vmatprep.mubr.bf16.mxu1 %v4310_v35  ;;  %v734_v13 = vadd.f32 %v8283_v21, %v6381_v16  ;;  %vm1314_vm7 = vcmp.ge.f32.partialorder %v1186_v28, 0.0 }
 0x3c1   : > { %v3102_v26 = vmul.f32 %v8641_v31, %v2974_v20  ;;  %v3868_v39 = vsub.f32 1.0, %v3740_v1  ;;  %v3589_v10 = vmul.f32 1.442695, %v3360_v36  ;;  %v1826_v63 = vadd.f32 1.0, %v1698_v60  ;;  %v8709_v21 = vpop.f32.mrb[62].mxu0  ;;  %v9838_v55 = vld [vmem:[#allocation20_spill] sm:$0xff] }
 0x3c2   : > { %v2337_v29 = vmul.f32 %v8684_v41, %v2209_v12  ;;  %v5902_v54 = vpop.eup %5901  ;;  %v2591_v8 = vmul.f32 %v8675_v6, %v2463_v25  ;;  %v1187_v31 = vmul.f32 0.70710677, %v734_v13  ;;  %v4125_v49 = vadd.f32 1.0, %v3997_v15 }
 0x3c3   : > { %v3742_v22 = vmul.f32 %v5900_v37, %v3102_v26  ;;  %5907 = vrcp.f32 %v1826_v63  ;;  %v3362_v30 = vmul.f32 %v3234_v0, %v1570_v51  ;;  %v3996_v57 = vmul.f32 %v3868_v39, %v8618_v32 }
 0x3c4   : > { %v2465_v20 = vadd.f32 1.4214138, %v2337_v29  ;;  %v2719_v45 = vadd.f32 -0.28449672, %v2591_v8  ;;  %v8713_v35 = vmul.f32 0.5, %v8659_v23  ;;  %v8719_v28 = vsel %vm1314_vm7, 1.0, %v9641_v53 }
 0x3c5   : > { %v1571_v36 = vand.u32 2147483647, %v1187_v31  ;;  %v8715_v60 = vpop.eup %5903  ;;  %v3870_v37 = vsub.f32 1.0, %v3742_v22  ;;  %v927_v0 = vadd.f32 %v8285_v5, %v6383_v17  ;;  %5909 = vpow2.f32 %v3589_v10  ;;  %v8732_v10 = vpop.f32.mrb[62].mxu1 }
 0x3c6   : > { %v2593_v1 = vmul.f32 %v8684_v41, %v2465_v20  ;;  %v5906_v51 = vpop.eup %5905  ;;  %v2847_v15 = vmul.f32 %v8675_v6, %v2719_v45  ;;  %v2080_v32 = vmul.f32 1.0614054, %v8715_v60  ;;  %v8726_v12 = vmul.f32 %v4125_v49, %v8543_v42  ;;  %v9837_v45 = vld [vmem:[#allocation21_spill] sm:$0xff] }
 0x3c7   : > { %v1699_v23 = vmul.f32 0.3275911, %v1571_v36  ;;  %v3593_v25 = vmul.f32 1.442695, %v3362_v30  ;;  %vm1315_vm8 = vcmp.ge.f32.partialorder %v1187_v31, 0.0  ;;  %v4124_v39 = vadd.f32 1.0, %v3996_v57 }
 0x3c8   : > { %9836 = vst [vmem:[#allocation23_spill] sm:$0xff] %v8726_v12  ;;  %v2721_v26 = vadd.f32 -0.28449672, %v2593_v1  ;;  %v2975_v29 = vadd.f32 0.2548296, %v2847_v15  ;;  %v3998_v8 = vmul.f32 %v3870_v37, %v8622_v52  ;;  %v4307_v61 = vpack.c.bf16 %v9838_v55, %v9837_v45  ;;  %v9839_v52 = vld [vmem:[#allocation24_spill] sm:$0xff] }
 0x3c9   : > { %v2208_v63 = vadd.f32 -1.4531521, %v2080_v32  ;;  %v1827_v22 = vadd.f32 1.0, %v1699_v23  ;;  %v1189_v20 = vmul.f32 0.70710677, %v927_v0  ;;  %v8736_v30 = vmul.f32 0.5, %v734_v13 }
 0x3ca   : > { %v2849_v5 = vmul.f32 %v8684_v41, %v2721_v26  ;;  %v3103_v42 = vmul.f32 %v8675_v6, %v2975_v29  ;;  %v3235_v1 = vsub.f32 0.0, %v1571_v36  ;;  %4691 = vmatmul.mubr.bf16.gmra.mrb[88].mxu0 %v4307_v61  ;;  %v9840_v37 = vld [vmem:[#allocation18_spill] sm:$0xff]  ;;  %v8742_v55 = vsel %vm1315_vm8, 1.0, %v9641_v53  ;;  %v9842_v61 = vld [vmem:[#allocation39_spill] sm:$0xff] }
 0x3cb   : > { %v2336_v49 = vmul.f32 %v8715_v60, %v2208_v63  ;;  %5911 = vrcp.f32 %v1827_v22  ;;  %v4309_v15 = vpack.c.bf16 %v9840_v37, %v9839_v52  ;;  %v1573_v26 = vand.u32 2147483647, %v1189_v20 }
 0x3cc   : > { %v2977_v57 = vadd.f32 0.2548296, %v2849_v5  ;;  %5913 = vpow2.f32 %v3593_v25  ;;  %v3743_v32 = vmul.f32 %v5902_v54, %v3103_v42  ;;  %v8747_v13 = vmul.f32 %v4124_v39, %v8593_v4 }
 0x3cd   : > { %v2464_v23 = vadd.f32 1.4214138, %v2336_v49  ;;  %v8744_v6 = vpop.eup %5907  ;;  %v4126_v29 = vadd.f32 1.0, %v3998_v8  ;;  %4852 = vmatmul.mubr.bf16.gmra.mrb[88].mxu1 %v4309_v15  ;;  %v736_v63 = vadd.f32 %v9842_v61, %v6385_v18  ;;  %v1701_v5 = vmul.f32 0.3275911, %v1573_v26  ;;  %v8757_v61 = vpop.f32.mrb[63].mxu0 }
 0x3ce   : > { %9841 = vst [vmem:[#allocation25_spill] sm:$0xff] %v8747_v13  ;;  %v3105_v25 = vmul.f32 %v8684_v41, %v2977_v57  ;;  %v3871_v22 = vsub.f32 1.0, %v3743_v32  ;;  %v2082_v31 = vmul.f32 1.0614054, %v8744_v6  ;;  %v3363_v42 = vmul.f32 %v3235_v1, %v1571_v36  ;;  %v8761_v1 = vpop.f32.mrb[63].mxu1 }
 0x3cf   : > { %v2592_v54 = vmul.f32 %v8715_v60, %v2464_v23  ;;  %v3237_v49 = vsub.f32 0.0, %v1573_v26  ;;  %v1188_v52 = vmul.f32 0.70710677, %v736_v63  ;;  %v5910_v37 = vpop.eup %5909  ;;  %v8754_v8 = vmul.f32 0.5, %v927_v0  ;;  %9843 = vst [vmem:[#allocation11_spill] sm:$0xff] %v8761_v1 }
 0x3d0   : > { %v3745_v45 = vmul.f32 %v5906_v51, %v3105_v25  ;;  %v2210_v39 = vadd.f32 -1.4531521, %v2082_v31  ;;  %v1829_v41 = vadd.f32 1.0, %v1701_v5  ;;  %v3999_v57 = vmul.f32 %v3871_v22, %v8664_v33 }
 0x3d1   : > { %v2720_v4 = vadd.f32 -0.28449672, %v2592_v54  ;;  %vm1317_vm9 = vcmp.ge.f32.partialorder %v1189_v20, 0.0  ;;  %v1572_v32 = vand.u32 2147483647, %v1188_v52  ;;  %v3365_v36 = vmul.f32 %v3237_v49, %v1573_v26 }
 0x3d2   : > { %v3873_v15 = vsub.f32 1.0, %v3745_v45  ;;  %v2338_v51 = vmul.f32 %v8744_v6, %v2210_v39  ;;  %5915 = vrcp.f32 %v1829_v41  ;;  %v8764_v25 = vmul.f32 %v4126_v29, %v8595_v56 }
 0x3d3   : > { %v2848_v23 = vmul.f32 %v8715_v60, %v2720_v4  ;;  %v3595_v0 = vmul.f32 1.442695, %v3363_v42  ;;  %v1700_v54 = vmul.f32 0.3275911, %v1572_v32  ;;  %v929_v33 = vadd.f32 %v8338_v50, %v6387_v19 }
 0x3d4   : > { %9844 = vst [vmem:[#allocation21_spill] sm:$0xff] %v8764_v25  ;;  %v2466_v31 = vadd.f32 1.4214138, %v2338_v51  ;;  %v8771_v5 = vsel %vm1317_vm9, 1.0, %v9641_v53  ;;  %v3236_v45 = vsub.f32 0.0, %v1572_v32  ;;  %v4127_v26 = vadd.f32 1.0, %v3999_v57 }
 0x3d5   : > { %v8768_v20 = vpop.eup %5911  ;;  %v2976_v22 = vadd.f32 0.2548296, %v2848_v23  ;;  %vm1316_vm10 = vcmp.ge.f32.partialorder %v1188_v52, 0.0  ;;  %v1828_v56 = vadd.f32 1.0, %v1700_v54  ;;  %v4001_v29 = vmul.f32 %v3873_v15, %v8668_v7  ;;  %v9845_v57 = vld [vmem:[#allocation46_spill] sm:$0xff] }
 0x3d6   : > { %v5914_v4 = vpop.eup %5913  ;;  %v2083_v49 = vmul.f32 1.0614054, %v8768_v20  ;;  %v2594_v50 = vmul.f32 %v8744_v6, %v2466_v31  ;;  %v3599_v39 = vmul.f32 1.442695, %v3365_v36  ;;  %v3364_v23 = vmul.f32 %v3236_v45, %v1572_v32 }
 0x3d7   : > { %v3104_v42 = vmul.f32 %v8715_v60, %v2976_v22  ;;  %5917 = vrcp.f32 %v1828_v56  ;;  %v1190_v51 = vmul.f32 0.70710677, %v929_v33  ;;  %v738_v13 = vadd.f32 %v9845_v57, %v6381_v16 }
 0x3d8   : > { %v2211_v41 = vadd.f32 -1.4531521, %v2083_v49  ;;  %v2722_v25 = vadd.f32 -0.28449672, %v2594_v50  ;;  %5919 = vpow2.f32 %v3595_v0  ;;  %v8780_v54 = vmul.f32 0.5, %v736_v63 }
 0x3d9   : > { %v3744_v12 = vmul.f32 %v5910_v37, %v3104_v42  ;;  %v8784_v7 = vsel %vm1316_vm10, 1.0, %v9641_v53  ;;  %v1574_v60 = vand.u32 2147483647, %v1190_v51  ;;  %v8787_v15 = vmul.f32 %v4127_v26, %v8636_v62 }
 0x3da   : > { %v2339_v14 = vmul.f32 %v8768_v20, %v2211_v41  ;;  %v4129_v32 = vadd.f32 1.0, %v4001_v29  ;;  %v2850_v37 = vmul.f32 %v8744_v6, %v2722_v25  ;;  %5921 = vpow2.f32 %v3599_v39  ;;  %v9847_v29 = vld [vmem:[#allocation47_spill] sm:$0xff] }
 0x3db   : > { %9846 = vst [vmem:[#allocation20_spill] sm:$0xff] %v8787_v15  ;;  %v3872_v36 = vsub.f32 1.0, %v3744_v12  ;;  %v3597_v22 = vmul.f32 1.442695, %v3364_v23  ;;  %v1702_v31 = vmul.f32 0.3275911, %v1574_v60  ;;  %v931_v50 = vadd.f32 %v9847_v29, %v6383_v17 }
 0x3dc   : > { %v2467_v0 = vadd.f32 1.4214138, %v2339_v14  ;;  %v8790_v45 = vpop.eup %5915  ;;  %v2978_v63 = vadd.f32 0.2548296, %v2850_v37  ;;  %vm1318_vm11 = vcmp.ge.f32.partialorder %v1190_v51, 0.0  ;;  %v3238_v49 = vsub.f32 0.0, %v1574_v60 }
 0x3dd   : > { %v1191_v52 = vmul.f32 0.70710677, %v738_v13  ;;  %v4000_v56 = vmul.f32 %v3872_v36, %v8689_v9  ;;  %v2085_v62 = vmul.f32 1.0614054, %v8790_v45  ;;  %v1830_v26 = vadd.f32 1.0, %v1702_v31 }
 0x3de   : > { %v2595_v42 = vmul.f32 %v8768_v20, %v2467_v0  ;;  %v3106_v12 = vmul.f32 %v8744_v6, %v2978_v63  ;;  %v8796_v25 = vmul.f32 0.5, %v929_v33  ;;  %v8801_v39 = vmul.f32 %v4129_v32, %v8652_v38 }
 0x3df   : > { %v1575_v14 = vand.u32 2147483647, %v1191_v52  ;;  %v2213_v23 = vadd.f32 -1.4531521, %v2085_v62  ;;  %5923 = vrcp.f32 %v1830_v26  ;;  %v8805_v9 = vsel %vm1318_vm11, 1.0, %v9641_v53 }
 0x3e0   : > { %9848 = vst [vmem:[#allocation24_spill] sm:$0xff] %v8801_v39  ;;  %v2723_v41 = vadd.f32 -0.28449672, %v2595_v42  ;;  %5925 = vpow2.f32 %v3597_v22  ;;  %v3366_v57 = vmul.f32 %v3238_v49, %v1574_v60  ;;  %v4128_v33 = vadd.f32 1.0, %v4000_v56 }
 0x3e1   : > { %v1703_v36 = vmul.f32 0.3275911, %v1575_v14  ;;  %v8807_v6 = vpop.eup %5917  ;;  %v3746_v37 = vmul.f32 %v5914_v4, %v3106_v12  ;;  %v2341_v31 = vmul.f32 %v8790_v45, %v2213_v23  ;;  %vm1319_vm12 = vcmp.ge.f32.partialorder %v1191_v52, 0.0 }
 0x3e2   : > { %v2851_v0 = vmul.f32 %v8768_v20, %v2723_v41  ;;  %v5920_v38 = vpop.eup %5919  ;;  %v2084_v32 = vmul.f32 1.0614054, %v8807_v6  ;;  %v1193_v22 = vmul.f32 0.70710677, %v931_v50  ;;  %v3239_v62 = vsub.f32 0.0, %v1575_v14 }
 0x3e3   : > { %v1831_v63 = vadd.f32 1.0, %v1703_v36  ;;  %v2469_v51 = vadd.f32 1.4214138, %v2341_v31  ;;  %v740_v60 = vadd.f32 %v8389_v44, %v6385_v18  ;;  %v3601_v26 = vmul.f32 1.442695, %v3366_v57 }
 0x3e4   : > { %v2979_v42 = vadd.f32 0.2548296, %v2851_v0  ;;  %v2212_v49 = vadd.f32 -1.4531521, %v2084_v32  ;;  %v8814_v56 = vmul.f32 0.5, %v738_v13  ;;  %v5922_v4 = vpop.eup %5921  ;;  %v3874_v12 = vsub.f32 1.0, %v3746_v37 }
 0x3e5   : > { %5927 = vrcp.f32 %v1831_v63  ;;  %v2597_v41 = vmul.f32 %v8790_v45, %v2469_v51  ;;  %v8818_v23 = vmul.f32 0.5, %v931_v50  ;;  %v8821_v36 = vmul.f32 %v4128_v33, %v8682_v40 }
 0x3e6   : > { %v3107_v29 = vmul.f32 %v8768_v20, %v2979_v42  ;;  %v2340_v0 = vmul.f32 %v8807_v6, %v2212_v49  ;;  %v8826_v44 = vsel %vm1319_vm12, 1.0, %v9641_v53  ;;  %v1577_v13 = vand.u32 2147483647, %v1193_v22 }
 0x3e7   : > { %9849 = vst [vmem:[#allocation18_spill] sm:$0xff] %v8821_v36  ;;  %v2725_v31 = vadd.f32 -0.28449672, %v2597_v41  ;;  %v3367_v32 = vmul.f32 %v3239_v62, %v1575_v14  ;;  %v1192_v37 = vmul.f32 0.70710677, %v740_v60  ;;  %5929 = vpow2.f32 %v3601_v26 }
 0x3e8   : > { %v3747_v57 = vmul.f32 %v5920_v38, %v3107_v29  ;;  %v2468_v63 = vadd.f32 1.4214138, %v2340_v0  ;;  %v1705_v20 = vmul.f32 0.3275911, %v1577_v13  ;;  %v3241_v42 = vsub.f32 0.0, %v1577_v13 }
 0x3e9   : > { %v8828_v50 = vpop.eup %5923  ;;  %v4002_v40 = vmul.f32 %v3874_v12, %v8719_v28  ;;  %v2853_v33 = vmul.f32 %v8790_v45, %v2725_v31  ;;  %vm1321_vm13 = vcmp.ge.f32.partialorder %v1193_v22, 0.0  ;;  %v1576_v51 = vand.u32 2147483647, %v1192_v37 }
 0x3ea   : > { %v5926_v52 = vpop.eup %5925  ;;  %v3875_v49 = vsub.f32 1.0, %v3747_v57  ;;  %v2596_v39 = vmul.f32 %v8807_v6, %v2468_v63  ;;  %v2086_v38 = vmul.f32 1.0614054, %v8828_v50  ;;  %v1833_v14 = vadd.f32 1.0, %v1705_v20 }
 0x3eb   : > { %v2981_v62 = vadd.f32 0.2548296, %v2853_v33  ;;  %v3603_v29 = vmul.f32 1.442695, %v3367_v32  ;;  %v3369_v26 = vmul.f32 %v3241_v42, %v1577_v13  ;;  %v1704_v41 = vmul.f32 0.3275911, %v1576_v51 }
 0x3ec   : > { %v2724_v0 = vadd.f32 -0.28449672, %v2596_v39  ;;  %v2214_v15 = vadd.f32 -1.4531521, %v2086_v38  ;;  %v8835_v36 = vsel %vm1321_vm13, 1.0, %v9641_v53  ;;  %5931 = vrcp.f32 %v1833_v14 }
 0x3ed   : > { %v4130_v28 = vadd.f32 1.0, %v4002_v40  ;;  %v3109_v22 = vmul.f32 %v8790_v45, %v2981_v62  ;;  %v8838_v12 = vmul.f32 0.5, %v740_v60  ;;  %v1832_v57 = vadd.f32 1.0, %v1704_v41 }
 0x3ee   : > { %v4003_v63 = vmul.f32 %v3875_v49, %v8742_v55  ;;  %v2852_v32 = vmul.f32 %v8807_v6, %v2724_v0  ;;  %v2342_v13 = vmul.f32 %v8828_v50, %v2214_v15  ;;  %v933_v39 = vadd.f32 %v8407_v2, %v6387_v19  ;;  %v9850_v55 = vld [vmem:[#allocation7_spill] sm:$0xff]  ;;  %v9851_v49 = vld [vmem:[#allocation50_spill] sm:$0xff] }
 0x3ef   : > { %v8840_v31 = vpop.eup %5927  ;;  %v3749_v20 = vmul.f32 %v5922_v4, %v3109_v22  ;;  %v3607_v40 = vmul.f32 1.442695, %v3369_v26  ;;  %5933 = vrcp.f32 %v1832_v57  ;;  %vm1320_vm14 = vcmp.ge.f32.partialorder %v1192_v37, 0.0  ;;  %v9852_v4 = vld [vmem:[#allocation12_spill] sm:$0xff]  ;;  %v9853_v22 = vld [vmem:[#allocation15_spill] sm:$0xff] }
 0x3f0   : > { %v2087_v42 = vmul.f32 1.0614054, %v8840_v31  ;;  %v2980_v45 = vadd.f32 0.2548296, %v2852_v32  ;;  %v2470_v60 = vadd.f32 1.4214138, %v2342_v13  ;;  %v4312_v41 = vpack.c.bf16 %v9851_v49, %v9850_v55 }
 0x3f1   : > { %v3240_v33 = vsub.f32 0.0, %v1576_v51  ;;  %v3877_v38 = vsub.f32 1.0, %v3749_v20  ;;  %v1194_v62 = vmul.f32 0.70710677, %v933_v39  ;;  %v5930_v0 = vpop.eup %5929  ;;  %v4131_v15 = vadd.f32 1.0, %v4003_v63 }
 0x3f2   : > { %v2215_v14 = vadd.f32 -1.4531521, %v2087_v42  ;;  %v3108_v1 = vmul.f32 %v8807_v6, %v2980_v45  ;;  %v2598_v2 = vmul.f32 %v8828_v50, %v2470_v60  ;;  %v4314_v26 = vpack.c.bf16 %v9853_v22, %v9852_v4  ;;  %4698 = vmatprep.mubr.bf16.mxu0 %v4312_v41 }
 0x3f3   : > { %v8855_v57 = vmul.f32 %v4130_v28, %v8713_v35  ;;  %5935 = vpow2.f32 %v3603_v29  ;;  %v1578_v13 = vand.u32 2147483647, %v1194_v62  ;;  %v4005_v20 = vmul.f32 %v3877_v38, %v8771_v5 }
 0x3f4   : > { %v2343_v32 = vmul.f32 %v8840_v31, %v2215_v14  ;;  %v3748_v42 = vmul.f32 %v5926_v52, %v3108_v1  ;;  %v2726_v55 = vadd.f32 -0.28449672, %v2598_v2  ;;  %v3368_v63 = vmul.f32 %v3240_v33, %v1576_v51  ;;  %4859 = vmatprep.mubr.bf16.mxu1 %v4314_v26 }
 0x3f5   : > { %5937 = vpow2.f32 %v3607_v40  ;;  %v8861_v45 = vsel %vm1320_vm14, 1.0, %v9641_v53  ;;  %v1706_v60 = vmul.f32 0.3275911, %v1578_v13  ;;  %v8866_v28 = vmul.f32 %v4131_v15, %v8736_v30 }
 0x3f6   : > { %v2471_v6 = vadd.f32 1.4214138, %v2343_v32  ;;  %v8863_v35 = vpop.eup %5931  ;;  %v3876_v29 = vsub.f32 1.0, %v3748_v42  ;;  %v2854_v14 = vmul.f32 %v8828_v50, %v2726_v55  ;;  %v744_v1 = vadd.f32 %v8447_v3, %v6381_v16 }
 0x3f7   : > { %v2089_v51 = vmul.f32 1.0614054, %v8863_v35  ;;  %v1834_v52 = vadd.f32 1.0, %v1706_v60  ;;  %v3242_v37 = vsub.f32 0.0, %v1578_v13  ;;  %v4133_v40 = vadd.f32 1.0, %v4005_v20 }
 0x3f8   : > { %v2599_v5 = vmul.f32 %v8840_v31, %v2471_v6  ;;  %v2982_v33 = vadd.f32 0.2548296, %v2854_v14  ;;  %v3605_v38 = vmul.f32 1.442695, %v3368_v63  ;;  %vm1322_vm15 = vcmp.ge.f32.partialorder %v1194_v62, 0.0 }
 0x3f9   : > { %v8873_v49 = vpop.eup %5933  ;;  %v2217_v41 = vadd.f32 -1.4531521, %v2089_v51  ;;  %5939 = vrcp.f32 %v1834_v52  ;;  %v1195_v15 = vmul.f32 0.70710677, %v744_v1  ;;  %v4004_v2 = vmul.f32 %v3876_v29, %v8784_v7 }
 0x3fa   : > { %v2727_v30 = vadd.f32 -0.28449672, %v2599_v5  ;;  %v3110_v3 = vmul.f32 %v8828_v50, %v2982_v33  ;;  %v2088_v4 = vmul.f32 1.0614054, %v8873_v49  ;;  %v8880_v22 = vadd.f32 %v8459_v27, %v6383_v17 }
 0x3fb   : > { %v2345_v32 = vmul.f32 %v8863_v35, %v2217_v41  ;;  %v3370_v20 = vmul.f32 %v3242_v37, %v1578_v13  ;;  %v1579_v42 = vand.u32 2147483647, %v1195_v15  ;;  %5941 = vpow2.f32 %v3605_v38 }
 0x3fc   : > { %v2855_v26 = vmul.f32 %v8840_v31, %v2727_v30  ;;  %v2216_v55 = vadd.f32 -1.4531521, %v2088_v4  ;;  %v8884_v63 = vmul.f32 0.5, %v933_v39  ;;  %v8888_v7 = vsel %vm1322_vm15, 1.0, %v9641_v53 }
 0x3fd   : > { %v5936_v50 = vpop.eup %5935  ;;  %v8891_v6 = vmul.f32 %v4133_v40, %v8754_v8  ;;  %v3750_v27 = vmul.f32 %v5930_v0, %v3110_v3  ;;  %v2473_v29 = vadd.f32 1.4214138, %v2345_v32  ;;  %v4132_v14 = vadd.f32 1.0, %v4004_v2  ;;  %v9854_v0 = vld [vmem:[#allocation6_spill] sm:$0xff]  ;;  %v9855_v40 = vld [vmem:[#allocation5_spill] sm:$0xff] }
 0x3fe   : > { %v2983_v60 = vadd.f32 0.2548296, %v2855_v26  ;;  %v2344_v5 = vmul.f32 %v8873_v49, %v2216_v55  ;;  %v1707_v13 = vmul.f32 0.3275911, %v1579_v42  ;;  %v3243_v51 = vsub.f32 0.0, %v1579_v42 }
 0x3ff   : > { %v5938_v52 = vpop.eup %5937  ;;  %v2601_v37 = vmul.f32 %v8863_v35, %v2473_v29  ;;  %v3609_v62 = vmul.f32 1.442695, %v3370_v20  ;;  %v1197_v33 = vmul.f32 0.70710677, %v8880_v22  ;;  %v8897_v30 = vmul.f32 0.5, %v744_v1 }
 0x400   : > { %v3111_v39 = vmul.f32 %v8840_v31, %v2983_v60  ;;  %v2472_v38 = vadd.f32 1.4214138, %v2344_v5  ;;  %v1835_v8 = vadd.f32 1.0, %v1707_v13  ;;  %v4311_v41 = vpack.c.bf16 %v9855_v40, %v9854_v0 }
 0x401   : > { %v3878_v2 = vsub.f32 1.0, %v3750_v27  ;;  %v2729_v4 = vadd.f32 -0.28449672, %v2601_v37  ;;  %vm1323_vm0 = vcmp.ge.f32.partialorder %v1195_v15, 0.0  ;;  %v8902_v26 = vmul.f32 %v4132_v14, %v8780_v54  ;;  %v9856_v54 = vld [vmem:[#allocation10_spill] sm:$0xff]  ;;  %v9857_v27 = vld [vmem:[#allocation8_spill] sm:$0xff] }
 0x402   : > { %v3751_v3 = vmul.f32 %v5936_v50, %v3111_v39  ;;  %v2600_v31 = vmul.f32 %v8873_v49, %v2472_v38  ;;  %5943 = vrcp.f32 %v1835_v8  ;;  %v3371_v32 = vmul.f32 %v3243_v51, %v1579_v42  ;;  %4699 = vmatmul.mubr.bf16.gmra.mrb[92].mxu0 %v4311_v41 }
 0x403   : > { %v8905_v20 = vpop.eup %5939  ;;  %v2857_v55 = vmul.f32 %v8863_v35, %v2729_v4  ;;  %5945 = vpow2.f32 %v3609_v62  ;;  %v1581_v60 = vand.u32 2147483647, %v1197_v33  ;;  %v8910_v15 = vsel %vm1323_vm0, 1.0, %v9641_v53 }
 0x404   : > { %v3879_v1 = vsub.f32 1.0, %v3751_v3  ;;  %v2728_v29 = vadd.f32 -0.28449672, %v2600_v31  ;;  %v2090_v50 = vmul.f32 1.0614054, %v8905_v20  ;;  %v4313_v14 = vpack.c.bf16 %v9857_v27, %v9856_v54 }
 0x405   : > { %v4006_v5 = vmul.f32 %v3878_v2, %v8805_v9  ;;  %v2985_v42 = vadd.f32 0.2548296, %v2857_v55  ;;  %v1709_v13 = vmul.f32 0.3275911, %v1581_v60  ;;  %v3245_v51 = vsub.f32 0.0, %v1581_v60  ;;  %v5942_v39 = vpop.eup %5941 }
 0x406   : > { %v2856_v37 = vmul.f32 %v8873_v49, %v2728_v29  ;;  %v2218_v38 = vadd.f32 -1.4531521, %v2090_v50  ;;  %v3611_v62 = vmul.f32 1.442695, %v3371_v32  ;;  %4860 = vmatmul.mubr.bf16.gmra.mrb[92].mxu1 %v4313_v14  ;;  %v746_v8 = vadd.f32 %v8514_v59, %v6385_v18 }
 0x407   : > { %v4007_v0 = vmul.f32 %v3879_v1, %v8826_v44  ;;  %v3113_v40 = vmul.f32 %v8863_v35, %v2985_v42  ;;  %vm1325_vm1 = vcmp.ge.f32.partialorder %v1197_v33, 0.0  ;;  %v1837_v41 = vadd.f32 1.0, %v1709_v13 }
 0x408   : > { %v2984_v3 = vadd.f32 0.2548296, %v2856_v37  ;;  %v2346_v9 = vmul.f32 %v8905_v20, %v2218_v38  ;;  %v3373_v2 = vmul.f32 %v3245_v51, %v1581_v60  ;;  %v1196_v4 = vmul.f32 0.70710677, %v746_v8 }
 0x409   : > { %v4134_v31 = vadd.f32 1.0, %v4006_v5  ;;  %v3753_v55 = vmul.f32 %v5938_v52, %v3113_v40  ;;  %5947 = vrcp.f32 %v1837_v41  ;;  %v939_v32 = vadd.f32 %v8516_v11, %v6387_v19 }
 0x40a   : > { %v3112_v29 = vmul.f32 %v8873_v49, %v2984_v3  ;;  %v2474_v59 = vadd.f32 1.4214138, %v2346_v9  ;;  %v8925_v44 = vmul.f32 0.5, %v8880_v22  ;;  %v1580_v35 = vand.u32 2147483647, %v1196_v4 }
 0x40b   : > { %v4135_v1 = vadd.f32 1.0, %v4007_v0  ;;  %v3881_v50 = vsub.f32 1.0, %v3753_v55  ;;  %5949 = vpow2.f32 %v3611_v62  ;;  %v8929_v60 = vsel %vm1325_vm1, 1.0, %v9641_v53 }
 0x40c   : > { %v8931_v54 = vpop.eup %5943  ;;  %v3752_v52 = vmul.f32 %v5942_v39, %v3112_v29  ;;  %v2602_v27 = vmul.f32 %v8905_v20, %v2474_v59  ;;  %v3615_v11 = vmul.f32 1.442695, %v3373_v2  ;;  %v1708_v14 = vmul.f32 0.3275911, %v1580_v35 }
 0x40d   : > { %v5946_v49 = vpop.eup %5945  ;;  %v8935_v5 = vmul.f32 %v4134_v31, %v8796_v25  ;;  %v2091_v22 = vmul.f32 1.0614054, %v8931_v54  ;;  %vm1324_vm2 = vcmp.ge.f32.partialorder %v1196_v4, 0.0  ;;  %v1198_v42 = vmul.f32 0.70710677, %v939_v32 }
 0x40e   : > { %v4009_v13 = vmul.f32 %v3881_v50, %v8835_v36  ;;  %v2730_v33 = vadd.f32 -0.28449672, %v2602_v27  ;;  %v1836_v51 = vadd.f32 1.0, %v1708_v14  ;;  %v3244_v37 = vsub.f32 0.0, %v1580_v35  ;;  %v8959_v27 = vpop.f32.mrb[64].mxu0 }
 0x40f   : > { %v2219_v38 = vadd.f32 -1.4531521, %v2091_v22  ;;  %v8939_v62 = vmul.f32 0.5, %v746_v8  ;;  %v1582_v39 = vand.u32 2147483647, %v1198_v42  ;;  %v748_v0 = vadd.f32 %v8524_v24, %v6381_v16  ;;  %9858 = vst [vmem:[#allocation39_spill] sm:$0xff] %v8959_v27 }
 0x410   : > { %v8944_v40 = vmul.f32 %v4135_v1, %v8814_v56  ;;  %v3880_v25 = vsub.f32 1.0, %v3752_v52  ;;  %v2858_v41 = vmul.f32 %v8905_v20, %v2730_v33  ;;  %5951 = vrcp.f32 %v1836_v51 }
 0x411   : > { %v2347_v3 = vmul.f32 %v8931_v54, %v2219_v38  ;;  %5953 = vpow2.f32 %v3615_v11  ;;  %v8950_v36 = vsel %vm1324_vm2, 1.0, %v9641_v53  ;;  %v1710_v8 = vmul.f32 0.3275911, %v1582_v39  ;;  %v8961_v11 = vpop.f32.mrb[64].mxu1 }
 0x412   : > { %v4137_v9 = vadd.f32 1.0, %v4009_v13  ;;  %v2986_v2 = vadd.f32 0.2548296, %v2858_v41  ;;  %v3372_v31 = vmul.f32 %v3244_v37, %v1580_v35  ;;  %v3246_v55 = vsub.f32 0.0, %v1582_v39  ;;  %9859 = vst [vmem:[#allocation46_spill] sm:$0xff] %v8961_v11  ;;  %v8964_v13 = vpop.f32.mrb[65].mxu0 }
 0x413   : > { %v8952_v24 = vpop.eup %5947  ;;  %v2475_v56 = vadd.f32 1.4214138, %v2347_v3  ;;  %v8954_v29 = vmul.f32 0.5, %v939_v32  ;;  %v1838_v59 = vadd.f32 1.0, %v1710_v8  ;;  %v1199_v1 = vmul.f32 0.70710677, %v748_v0 }
 0x414   : > { %v4008_v50 = vmul.f32 %v3880_v25, %v8861_v45  ;;  %v3114_v52 = vmul.f32 %v8905_v20, %v2986_v2  ;;  %v2093_v4 = vmul.f32 1.0614054, %v8952_v24  ;;  %vm1326_vm3 = vcmp.ge.f32.partialorder %v1198_v42, 0.0  ;;  %9860 = vst [vmem:[#allocation47_spill] sm:$0xff] %v8964_v13  ;;  %v8966_v33 = vpop.f32.mrb[65].mxu1  ;;  %v9863_v41 = vld [vmem:[#allocation54_spill] sm:$0xff] }
 0x415   : > { %v5950_v35 = vpop.eup %5949  ;;  %v2603_v14 = vmul.f32 %v8931_v54, %v2475_v56  ;;  %5955 = vrcp.f32 %v1838_v59  ;;  %v3374_v22 = vmul.f32 %v3246_v55, %v1582_v39  ;;  %v1583_v32 = vand.u32 2147483647, %v1199_v1  ;;  %9861 = vst [vmem:[#allocation7_spill] sm:$0xff] %v8966_v33  ;;  %v8979_v55 = vpop.f32.mrb[66].mxu0 }
 0x416   : > { %v8969_v45 = vmul.f32 %v4137_v9, %v8818_v23  ;;  %v3754_v20 = vmul.f32 %v5946_v49, %v3114_v52  ;;  %v2221_v51 = vadd.f32 -1.4531521, %v2093_v4  ;;  %v3613_v42 = vmul.f32 1.442695, %v3372_v31  ;;  %9864 = vst [vmem:[#allocation12_spill] sm:$0xff] %v8979_v55  ;;  %v8981_v23 = vpop.f32.mrb[66].mxu1 }
 0x417   : > { %v2731_v37 = vadd.f32 -0.28449672, %v2603_v14  ;;  %v8972_v38 = vsel %vm1326_vm3, 1.0, %v9641_v53  ;;  %v1711_v25 = vmul.f32 0.3275911, %v1583_v32  ;;  %v941_v3 = vadd.f32 %v9863_v41, %v6383_v17  ;;  %9865 = vst [vmem:[#allocation15_spill] sm:$0xff] %v8981_v23 }
 0x418   : > { %9862 = vst [vmem:[#allocation50_spill] sm:$0xff] %v8969_v45  ;;  %v4136_v39 = vadd.f32 1.0, %v4008_v50  ;;  %v2349_v8 = vmul.f32 %v8952_v24, %v2221_v51  ;;  %v8977_v2 = vmul.f32 0.5, %v748_v0  ;;  %vm1327_vm4 = vcmp.ge.f32.partialorder %v1199_v1, 0.0  ;;  %v8986_v59 = vpop.f32.mrb[67].mxu0  ;;  %v8988_v52 = vpop.f32.mrb[67].mxu1 }
 0x419   : > { %v2859_v49 = vmul.f32 %v8931_v54, %v2731_v37  ;;  %v8984_v9 = vmul.f32 1.442695, %v3374_v22  ;;  %v1839_v31 = vadd.f32 1.0, %v1711_v25  ;;  %v3247_v56 = vsub.f32 0.0, %v1583_v32  ;;  %9866 = vst [vmem:[#allocation6_spill] sm:$0xff] %v8986_v59  ;;  %9867 = vst [vmem:[#allocation5_spill] sm:$0xff] %v8988_v52 }
 0x41a   : > { %v8990_v50 = vpop.eup %5951  ;;  %v3882_v4 = vsub.f32 1.0, %v3754_v20  ;;  %v2477_v0 = vadd.f32 1.4214138, %v2349_v8  ;;  %5957 = vpow2.f32 %v3613_v42  ;;  %v1201_v14 = vmul.f32 0.70710677, %v941_v3  ;;  %v8992_v51 = vpop.f32.mrb[68].mxu0 }
 0x41b   : > { %9868 = vst [vmem:[#allocation10_spill] sm:$0xff] %v8992_v51  ;;  %v5954_v41 = vpop.eup %5953  ;;  %v2987_v23 = vadd.f32 0.2548296, %v2859_v49  ;;  %v2092_v37 = vmul.f32 1.0614054, %v8990_v50  ;;  %5959 = vrcp.f32 %v1839_v31  ;;  %v750_v22 = vadd.f32 %v8562_v48, %v6385_v18  ;;  %v9005_v8 = vpop.f32.mrb[68].mxu1 }
 0x41c   : > { %v8998_v25 = vmul.f32 %v4136_v39, %v8838_v12  ;;  %v2605_v52 = vmul.f32 %v8952_v24, %v2477_v0  ;;  %v9003_v20 = vsel %vm1327_vm4, 1.0, %v9641_v53  ;;  %v1585_v42 = vand.u32 2147483647, %v1201_v14  ;;  %9869 = vst [vmem:[#allocation8_spill] sm:$0xff] %v9005_v8  ;;  %v9007_v51 = vpop.f32.mrb[69].mxu0  ;;  %v9012_v48 = vpop.f32.mrb[69].mxu1 }
 0x41d   : > { %9870 = vst [vmem:[#allocation54_spill] sm:$0xff] %v9007_v51  ;;  %v3115_v49 = vmul.f32 %v8931_v54, %v2987_v23  ;;  %v2220_v31 = vadd.f32 -1.4531521, %v2092_v37  ;;  %v3375_v59 = vmul.f32 %v3247_v56, %v1583_v32  ;;  %v9010_v55 = vmul.f32 0.5, %v941_v3  ;;  %9871 = vst [vmem:[#allocation57_spill] sm:$0xff] %v9012_v48  ;;  %v9014_v12 = vpop.f32.mrb[70].mxu0 }
 0x41e   : > { %9872 = vst [vmem:[#allocation58_spill] sm:$0xff] %v9014_v12  ;;  %v4010_v39 = vmul.f32 %v3882_v4, %v8888_v7  ;;  %v2733_v1 = vadd.f32 -0.28449672, %v2605_v52  ;;  %v1713_v0 = vmul.f32 0.3275911, %v1585_v42  ;;  %v3249_v33 = vsub.f32 0.0, %v1585_v42 }
 0x41f   : > { %v9017_v11 = vpop.f32.mrb[70].mxu1  ;;  %v9019_v8 = vpop.eup %5955  ;;  %v2348_v51 = vmul.f32 %v8990_v50, %v2220_v31  ;;  %vm1329_vm5 = vcmp.ge.f32.partialorder %v1201_v14, 0.0  ;;  %v9022_v54 = vmul.f32 0.5, %v750_v22  ;;  %v1200_v32 = vmul.f32 0.70710677, %v750_v22 }
 0x420   : > { %9873 = vst [vmem:[#allocation59_spill] sm:$0xff] %v9017_v11  ;;  %v9024_v3 = vpop.f32.mrb[71].mxu0  ;;  %v9026_v23 = vpop.f32.mrb[71].mxu1  ;;  %v3755_v56 = vmul.f32 %v5950_v35, %v3115_v49  ;;  %v2861_v7 = vmul.f32 %v8952_v24, %v2733_v1  ;;  %v2094_v52 = vmul.f32 1.0614054, %v9019_v8  ;;  %v1841_v4 = vadd.f32 1.0, %v1713_v0 }
 0x421   : > { %9874 = vst [vmem:[#allocation60_spill] sm:$0xff] %v9026_v23  ;;  %v9030_v37 = vpop.f32.mrb[72].mxu0  ;;  %v9032_v11 = vpop.f32.mrb[72].mxu1  ;;  %v2476_v12 = vadd.f32 1.4214138, %v2348_v51  ;;  %v3377_v48 = vmul.f32 %v3249_v33, %v1585_v42  ;;  %v4138_v27 = vadd.f32 1.0, %v4010_v39  ;;  %v9041_v1 = vadd.f32 %v8590_v46, %v6387_v19 }
 0x422   : > { %9875 = vst [vmem:[#allocation61_spill] sm:$0xff] %v9030_v37  ;;  %9876 = vst [vmem:[#allocation62_spill] sm:$0xff] %v9032_v11  ;;  %v3619_v31 = vmul.f32 1.442695, %v3375_v59  ;;  %v1584_v13 = vand.u32 2147483647, %v1200_v32  ;;  %5961 = vrcp.f32 %v1841_v4 }
 0x423   : > { %v2989_v22 = vadd.f32 0.2548296, %v2861_v7  ;;  %v2222_v45 = vadd.f32 -1.4531521, %v2094_v52  ;;  %v2604_v23 = vmul.f32 %v8990_v50, %v2476_v12  ;;  %v9037_v35 = vsel %vm1329_vm5, 1.0, %v9641_v53  ;;  %v9043_v0 = vpop.f32.mrb[73].mxu0 }
 0x424   : > { %v1712_v49 = vmul.f32 0.3275911, %v1584_v13  ;;  %9877 = vst [vmem:[#allocation63_spill] sm:$0xff] %v9043_v0  ;;  %v9045_v59 = vpop.f32.mrb[73].mxu1  ;;  %v5958_v33 = vpop.eup %5957  ;;  %v3883_v51 = vsub.f32 1.0, %v3755_v56  ;;  %vm1328_vm6 = vcmp.ge.f32.partialorder %v1200_v32, 0.0  ;;  %5963 = vpow2.f32 %v8984_v9 }
 0x425   : > { %9878 = vst [vmem:[#allocation64_spill] sm:$0xff] %v9045_v59  ;;  %v3117_v42 = vmul.f32 %v8952_v24, %v2989_v22  ;;  %v2350_v39 = vmul.f32 %v9019_v8, %v2222_v45  ;;  %v9049_v12 = vpop.f32.mrb[74].mxu0  ;;  %v9051_v14 = vpop.f32.mrb[74].mxu1  ;;  %v2732_v52 = vadd.f32 -0.28449672, %v2604_v23  ;;  %5965 = vpow2.f32 %v3619_v31 }
 0x426   : > { %9879 = vst [vmem:[#allocation65_spill] sm:$0xff] %v9049_v12  ;;  %9880 = vst [vmem:[#allocation66_spill] sm:$0xff] %v9051_v14  ;;  %v9053_v7 = vpop.eup %5959  ;;  %v3623_v46 = vmul.f32 1.442695, %v3377_v48  ;;  %v1840_v4 = vadd.f32 1.0, %v1712_v49  ;;  %v9056_v11 = vpop.f32.mrb[75].mxu0  ;;  %v4011_v31 = vmul.f32 %v3883_v51, %v8910_v15 }
 0x427   : > { %9881 = vst [vmem:[#allocation67_spill] sm:$0xff] %v9056_v11  ;;  %v3757_v59 = vmul.f32 %v5954_v41, %v3117_v42  ;;  %v2478_v56 = vadd.f32 1.4214138, %v2350_v39  ;;  %v2095_v24 = vmul.f32 1.0614054, %v9053_v7  ;;  %v9059_v45 = vpop.f32.mrb[75].mxu1  ;;  %v2860_v14 = vmul.f32 %v8990_v50, %v2732_v52 }
 0x428   : > { %9882 = vst [vmem:[#allocation68_spill] sm:$0xff] %v9059_v45  ;;  %v9061_v22 = vpop.f32.mrb[76].mxu0  ;;  %5967 = vrcp.f32 %v1840_v4  ;;  %v3248_v12 = vsub.f32 0.0, %v1584_v13  ;;  %v9065_v23 = vmul.f32 0.70710677, %v9041_v1  ;;  %v9067_v9 = vpop.f32.mrb[76].mxu1  ;;  %v9072_v41 = vmul.f32 %v4138_v27, %v8884_v63 }
 0x429   : > { %9883 = vst [vmem:[#allocation69_spill] sm:$0xff] %v9061_v22  ;;  %9884 = vst [vmem:[#allocation70_spill] sm:$0xff] %v9067_v9  ;;  %v9069_v48 = vpop.f32.mrb[77].mxu0  ;;  %v2606_v49 = vmul.f32 %v9019_v8, %v2478_v56  ;;  %v2223_v42 = vadd.f32 -1.4531521, %v2095_v24  ;;  %v9076_v39 = vpop.f32.mrb[77].mxu1  ;;  %5969 = vpow2.f32 %v3623_v46 }
 0x42a   : > { %9885 = vst [vmem:[#allocation71_spill] sm:$0xff] %v9069_v48  ;;  %9886 = vst [vmem:[#allocation72_spill] sm:$0xff] %v9076_v39  ;;  %v3885_v52 = vsub.f32 1.0, %v3757_v59  ;;  %v2988_v4 = vadd.f32 0.2548296, %v2860_v14  ;;  %v9887_v45 = vld [vmem:[#allocation53_spill] sm:$0xff]  ;;  %v3376_v14 = vmul.f32 %v3248_v12, %v1584_v13 }
 0x42b   : > { %v1586_v22 = vand.u32 2147483647, %v9065_v23  ;;  %v9888_v11 = vld [vmem:[#allocation29_spill] sm:$0xff]  ;;  %v9081_v9 = vpop.f32.mrb[78].mxu0  ;;  %v2734_v48 = vadd.f32 -0.28449672, %v2606_v49  ;;  %v2351_v63 = vmul.f32 %v9053_v7, %v2223_v42 }
 0x42c   : > { %v4316_v0 = vpack.c.bf16 %v9888_v11, %v9887_v45  ;;  %9889 = vst [vmem:[#allocation53_spill] sm:$0xff] %v9081_v9  ;;  %v9086_v15 = vsel %vm1328_vm6, 1.0, %v9641_v53  ;;  %v9088_v27 = vpop.f32.mrb[78].mxu1  ;;  %v9090_v51 = vpop.f32.mrb[79].mxu0  ;;  %v3116_v59 = vmul.f32 %v8990_v50, %v2988_v4  ;;  %v4139_v46 = vadd.f32 1.0, %v4011_v31  ;;  %v9894_v9 = vld [vmem:[#allocation13_spill] sm:$0xff] }
 0x42d   : > { %9890 = vst [vmem:[#allocation29_spill] sm:$0xff] %v9088_v27  ;;  %9891 = vst [vmem:[#allocation73_spill] sm:$0xff] %v9090_v51  ;;  %v1714_v56 = vmul.f32 0.3275911, %v1586_v22  ;;  %v3250_v24 = vsub.f32 0.0, %v1586_v22  ;;  %v9093_v11 = vpop.f32.mrb[79].mxu1  ;;  %v9097_v49 = vpop.eup %5961  ;;  %v2862_v32 = vmul.f32 %v9019_v8, %v2734_v48  ;;  %v4013_v13 = vmul.f32 %v3885_v52, %v8929_v60 }
 0x42e   : > { %4706 = vmatprep.mubr.bf16.mxu0 %v4316_v0  ;;  %9892 = vst [vmem:[#allocation74_spill] sm:$0xff] %v9093_v11  ;;  %v9095_v45 = vpop.f32.mrb[80].mxu0  ;;  %v2479_v42 = vadd.f32 1.4214138, %v2351_v63  ;;  %v9895_v27 = vld [vmem:[#allocation56_spill] sm:$0xff]  ;;  %v3756_v50 = vmul.f32 %v5958_v33, %v3116_v59  ;;  %v754_v48 = vadd.f32 %v8644_v47, %v6381_v16  ;;  %v9114_v60 = vmul.f32 0.5, %v9041_v1 }
 0x42f   : > { %9893 = vst [vmem:[#allocation75_spill] sm:$0xff] %v9095_v45  ;;  %v4318_v39 = vpack.c.bf16 %v9895_v27, %v9894_v9  ;;  %v9102_v51 = vpop.f32.mrb[81].mxu0  ;;  %v2097_v0 = vmul.f32 1.0614054, %v9097_v49  ;;  %v1842_v12 = vadd.f32 1.0, %v1714_v56  ;;  %v3378_v31 = vmul.f32 %v3250_v24, %v1586_v22  ;;  %v5964_v9 = vpop.eup %5963 }
 0x430   : > { %9896 = vst [vmem:[#allocation13_spill] sm:$0xff] %v9102_v51  ;;  %v9106_v4 = vpop.f32.mrb[82].mxu0  ;;  %v2990_v45 = vadd.f32 0.2548296, %v2862_v32  ;;  %v2607_v11 = vmul.f32 %v9053_v7, %v2479_v42  ;;  %v3621_v51 = vmul.f32 1.442695, %v3376_v14  ;;  %v5966_v33 = vpop.eup %5965  ;;  %v9117_v52 = vmul.f32 %v4139_v46, %v8897_v30 }
 0x431   : > { %9897 = vst [vmem:[#allocation56_spill] sm:$0xff] %v9106_v4  ;;  %4867 = vmatprep.mubr.bf16.mxu1 %v4318_v39  ;;  %v9111_v63 = vpop.f32.mrb[83].mxu0  ;;  %v2225_v27 = vadd.f32 -1.4531521, %v2097_v0  ;;  %5971 = vrcp.f32 %v1842_v12  ;;  %v1203_v39 = vmul.f32 0.70710677, %v754_v48 }
 0x432   : > { %9898 = vst [vmem:[#allocation76_spill] sm:$0xff] %v9111_v63  ;;  %9899 = vst [vmem:[#allocation77_spill] sm:$0xff] %v9117_v52  ;;  %v3118_v59 = vmul.f32 %v9019_v8, %v2990_v45  ;;  %v2735_v22 = vadd.f32 -0.28449672, %v2607_v11  ;;  %v9120_v56 = vpop.eup %5967  ;;  %v4141_v47 = vadd.f32 1.0, %v4013_v13  ;;  %v3884_v24 = vsub.f32 1.0, %v3756_v50 }
 0x433   : > { %v2353_v32 = vmul.f32 %v9097_v49, %v2225_v27  ;;  %vm1330_vm7 = vcmp.ge.f32.partialorder %v9065_v23, 0.0  ;;  %v2096_v42 = vmul.f32 1.0614054, %v9120_v56  ;;  %v3625_v0 = vmul.f32 1.442695, %v3378_v31  ;;  %v5970_v11 = vpop.eup %5969  ;;  %v9902_v63 = vld [vmem:[#allocation28_spill] sm:$0xff] }
 0x434   : > { %v3758_v14 = vmul.f32 %v5964_v9, %v3118_v59  ;;  %v2863_v1 = vmul.f32 %v9053_v7, %v2735_v22  ;;  %5973 = vpow2.f32 %v3621_v51  ;;  %v1587_v46 = vand.u32 2147483647, %v1203_v39  ;;  %v9949_v52 = vld [vmem:[#allocation12_spill] sm:$0xff] }
 0x435   : > { %v2481_v30 = vadd.f32 1.4214138, %v2353_v32  ;;  %v947_v8 = vadd.f32 %v8648_v58, %v6383_v17  ;;  %v2224_v50 = vadd.f32 -1.4531521, %v2096_v42  ;;  %v9129_v12 = vsel %vm1330_vm7, 1.0, %v9641_v53  ;;  %v9138_v22 = vpop.f32.mrb[80].mxu1 }
 0x436   : > { %v3886_v45 = vsub.f32 1.0, %v3758_v14  ;;  %v2991_v13 = vadd.f32 0.2548296, %v2863_v1  ;;  %v9132_v23 = vmul.f32 %v4141_v47, %v8925_v44  ;;  %v1715_v27 = vmul.f32 0.3275911, %v1587_v46  ;;  %v9901_v42 = vld [vmem:[#allocation30_spill] sm:$0xff] }
 0x437   : > { %v2609_v9 = vmul.f32 %v9097_v49, %v2481_v30  ;;  %v3251_v31 = vsub.f32 0.0, %v1587_v46  ;;  %v4012_v51 = vmul.f32 %v3884_v24, %v8950_v36  ;;  %v2352_v58 = vmul.f32 %v9120_v56, %v2224_v50  ;;  %v9142_v47 = vpop.f32.mrb[81].mxu1 }
 0x438   : > { %9900 = vst [vmem:[#allocation78_spill] sm:$0xff] %v9132_v23  ;;  %v3119_v59 = vmul.f32 %v9053_v7, %v2991_v13  ;;  %5975 = vpow2.f32 %v3625_v0  ;;  %v1843_v14 = vadd.f32 1.0, %v1715_v27  ;;  %v1205_v1 = vmul.f32 0.70710677, %v947_v8  ;;  %v9145_v36 = vpop.f32.mrb[82].mxu1  ;;  %v9951_v23 = vld [vmem:[#allocation15_spill] sm:$0xff] }
 0x439   : > { %v2737_v32 = vadd.f32 -0.28449672, %v2609_v9  ;;  %v4315_v44 = vpack.c.bf16 %v9902_v63, %v9901_v42  ;;  %v4014_v30 = vmul.f32 %v3886_v45, %v8972_v38  ;;  %v2480_v37 = vadd.f32 1.4214138, %v2352_v58  ;;  %v9152_v50 = vpop.f32.mrb[83].mxu1  ;;  %v9905_v58 = vld [vmem:[#allocation14_spill] sm:$0xff] }
 0x43a   : > { %v3759_v4 = vmul.f32 %v5966_v33, %v3119_v59  ;;  %vm1331_vm8 = vcmp.ge.f32.partialorder %v1203_v39, 0.0  ;;  %v9150_v0 = vmul.f32 0.5, %v754_v48  ;;  %5977 = vrcp.f32 %v1843_v14  ;;  %9903 = vst [vmem:[#allocation30_spill] sm:$0xff] %v9152_v50  ;;  %v9904_v59 = vld [vmem:[#allocation16_spill] sm:$0xff] }
 0x43b   : > { %v9147_v7 = vpop.eup %5971  ;;  %v2865_v24 = vmul.f32 %v9097_v49, %v2737_v32  ;;  %v3379_v13 = vmul.f32 %v3251_v31, %v1587_v46  ;;  %4707 = vmatmul.mubr.bf16.gmra.mrb[96].mxu0 %v4315_v44  ;;  %v4140_v63 = vadd.f32 1.0, %v4012_v51  ;;  %v2608_v38 = vmul.f32 %v9120_v56, %v2480_v37 }
 0x43c   : > { %v3887_v9 = vsub.f32 1.0, %v3759_v4  ;;  %v2098_v33 = vmul.f32 1.0614054, %v9147_v7  ;;  %v9157_v45 = vsel %vm1331_vm8, 1.0, %v9641_v53  ;;  %v1589_v27 = vand.u32 2147483647, %v1205_v1 }
 0x43d   : > { %v2993_v39 = vadd.f32 0.2548296, %v2865_v24  ;;  %v4317_v48 = vpack.c.bf16 %v9905_v58, %v9904_v59  ;;  %v4142_v32 = vadd.f32 1.0, %v4014_v30  ;;  %v2736_v14 = vadd.f32 -0.28449672, %v2608_v38 }
 0x43e   : > { %v2226_v46 = vadd.f32 -1.4531521, %v2098_v33  ;;  %v756_v31 = vadd.f32 %v8703_v34, %v6385_v18  ;;  %v5974_v51 = vpop.eup %5973  ;;  %v3627_v37 = vmul.f32 1.442695, %v3379_v13  ;;  %vm1333_vm9 = vcmp.ge.f32.partialorder %v1205_v1, 0.0 }
 0x43f   : > { %v3121_v4 = vmul.f32 %v9097_v49, %v2993_v39  ;;  %v1717_v42 = vmul.f32 0.3275911, %v1589_v27  ;;  %4868 = vmatmul.mubr.bf16.gmra.mrb[96].mxu1 %v4317_v48  ;;  %v4015_v44 = vmul.f32 %v3887_v9, %v9003_v20  ;;  %v2864_v24 = vmul.f32 %v9120_v56, %v2736_v14 }
 0x440   : > { %v2354_v50 = vmul.f32 %v9147_v7, %v2226_v46  ;;  %v3253_v59 = vsub.f32 0.0, %v1589_v27  ;;  %v1204_v33 = vmul.f32 0.70710677, %v756_v31  ;;  %v9169_v34 = vadd.f32 %v8705_v43, %v6387_v19 }
 0x441   : > { %v3761_v30 = vmul.f32 %v5970_v11, %v3121_v4  ;;  %v1845_v38 = vadd.f32 1.0, %v1717_v42  ;;  %v9172_v49 = vmul.f32 %v4140_v63, %v8939_v62  ;;  %v2992_v13 = vadd.f32 0.2548296, %v2864_v24 }
 0x442   : > { %9906 = vst [vmem:[#allocation28_spill] sm:$0xff] %v9169_v34  ;;  %v5976_v58 = vpop.eup %5975  ;;  %v2482_v39 = vadd.f32 1.4214138, %v2354_v50  ;;  %v9174_v48 = vmul.f32 0.5, %v947_v8  ;;  %v9177_v20 = vmul.f32 %v4142_v32, %v8954_v29  ;;  %v9181_v11 = vsel %vm1333_vm9, 1.0, %v9641_v53 }
 0x443   : > { %v3889_v9 = vsub.f32 1.0, %v3761_v30  ;;  %5979 = vrcp.f32 %v1845_v38  ;;  %v3120_v43 = vmul.f32 %v9120_v56, %v2992_v13  ;;  %v1588_v62 = vand.u32 2147483647, %v1204_v33 }
 0x444   : > { %v2610_v14 = vmul.f32 %v9147_v7, %v2482_v39  ;;  %5981 = vpow2.f32 %v3627_v37  ;;  %v9185_v63 = vpop.eup %5977  ;;  %v4143_v50 = vadd.f32 1.0, %v4015_v44  ;;  %v3381_v8 = vmul.f32 %v3253_v59, %v1589_v27 }
 0x445   : > { %vm1332_vm10 = vcmp.ge.f32.partialorder %v1204_v33, 0.0  ;;  %v1206_v29 = vmul.f32 0.70710677, %v9169_v34  ;;  %v3760_v32 = vmul.f32 %v5974_v51, %v3120_v43  ;;  %v2099_v1 = vmul.f32 1.0614054, %v9185_v63 }
 0x446   : > { %v2738_v46 = vadd.f32 -0.28449672, %v2610_v14  ;;  %v1716_v4 = vmul.f32 0.3275911, %v1588_v62  ;;  %v4017_v42 = vmul.f32 %v3889_v9, %v9037_v35  ;;  %v3252_v24 = vsub.f32 0.0, %v1588_v62 }
 0x447   : > { %v1590_v56 = vand.u32 2147483647, %v1206_v29  ;;  %v758_v37 = vadd.f32 %v8709_v21, %v6381_v16  ;;  %v3888_v30 = vsub.f32 1.0, %v3760_v32  ;;  %v2227_v44 = vadd.f32 -1.4531521, %v2099_v1 }
 0x448   : > { %v2866_v38 = vmul.f32 %v9147_v7, %v2738_v46  ;;  %v1844_v27 = vadd.f32 1.0, %v1716_v4  ;;  %v3631_v59 = vmul.f32 1.442695, %v3381_v8  ;;  %v9193_v13 = vmul.f32 0.5, %v756_v31 }
 0x449   : > { %v3380_v51 = vmul.f32 %v3252_v24, %v1588_v62  ;;  %v1718_v39 = vmul.f32 0.3275911, %v1590_v56  ;;  %v9196_v43 = vmul.f32 %v4143_v50, %v8977_v2  ;;  %v2355_v35 = vmul.f32 %v9185_v63, %v2227_v44 }
 0x44a   : > { %v2994_v14 = vadd.f32 0.2548296, %v2866_v38  ;;  %5983 = vrcp.f32 %v1844_v27  ;;  %v4016_v9 = vmul.f32 %v3888_v30, %v9086_v15  ;;  %v9202_v16 = vsel %vm1332_vm10, 1.0, %v9641_v53 }
 0x44b   : > { %9907 = vst [vmem:[#allocation16_spill] sm:$0xff] %v9196_v43  ;;  %v1846_v21 = vadd.f32 1.0, %v1718_v39  ;;  %v3254_v32 = vsub.f32 0.0, %v1590_v56  ;;  %v4145_v8 = vadd.f32 1.0, %v4017_v42  ;;  %v2483_v62 = vadd.f32 1.4214138, %v2355_v35 }
 0x44c   : > { %v3122_v31 = vmul.f32 %v9147_v7, %v2994_v14  ;;  %v1207_v46 = vmul.f32 0.70710677, %v758_v37  ;;  %5985 = vpow2.f32 %v3631_v59  ;;  %v3629_v2 = vmul.f32 1.442695, %v3380_v51  ;;  %v9950_v43 = vld [vmem:[#allocation6_spill] sm:$0xff] }
 0x44d   : > { %v9205_v1 = vpop.eup %5979  ;;  %vm1334_vm11 = vcmp.ge.f32.partialorder %v1206_v29, 0.0  ;;  %v3382_v50 = vmul.f32 %v3254_v32, %v1590_v56  ;;  %v2611_v15 = vmul.f32 %v9185_v63, %v2483_v62  ;;  %v951_v30 = vadd.f32 %v8732_v10, %v6383_v17 }
 0x44e   : > { %v5982_v4 = vpop.eup %5981  ;;  %v3762_v24 = vmul.f32 %v5976_v58, %v3122_v31  ;;  %v2101_v33 = vmul.f32 1.0614054, %v9205_v1  ;;  %v4144_v42 = vadd.f32 1.0, %v4016_v9  ;;  %5987 = vrcp.f32 %v1846_v21 }
 0x44f   : > { %v1591_v7 = vand.u32 2147483647, %v1207_v46  ;;  %v760_v38 = vadd.f32 %v8757_v61, %v6385_v18  ;;  %v9214_v44 = vmul.f32 %v4145_v8, %v9010_v55  ;;  %v2739_v27 = vadd.f32 -0.28449672, %v2611_v15 }
 0x450   : > { %v2229_v56 = vadd.f32 -1.4531521, %v2101_v33  ;;  %v3633_v59 = vmul.f32 1.442695, %v3382_v50  ;;  %v3890_v58 = vsub.f32 1.0, %v3762_v24  ;;  %v9218_v51 = vsel %vm1334_vm11, 1.0, %v9641_v53 }
 0x451   : > { %9908 = vst [vmem:[#allocation14_spill] sm:$0xff] %v9214_v44  ;;  %v9220_v39 = vmul.f32 0.5, %v758_v37  ;;  %v1719_v17 = vmul.f32 0.3275911, %v1591_v7  ;;  %v2867_v10 = vmul.f32 %v9185_v63, %v2739_v27  ;;  %vm1335_vm12 = vcmp.ge.f32.partialorder %v1207_v46, 0.0  ;;  %v9952_v44 = vld [vmem:[#allocation5_spill] sm:$0xff] }
 0x452   : > { %v2357_v14 = vmul.f32 %v9205_v1, %v2229_v56  ;;  %v1209_v18 = vmul.f32 0.70710677, %v951_v30  ;;  %5989 = vpow2.f32 %v3629_v2  ;;  %v3255_v55 = vsub.f32 0.0, %v1591_v7 }
 0x453   : > { %v1847_v61 = vadd.f32 1.0, %v1719_v17  ;;  %v9224_v35 = vmul.f32 0.70710677, %v760_v38  ;;  %v9229_v29 = vmul.f32 %v4144_v42, %v9022_v54  ;;  %v2995_v21 = vadd.f32 0.2548296, %v2867_v10 }
 0x454   : > { %v9226_v9 = vpop.eup %5983  ;;  %v2485_v37 = vadd.f32 1.4214138, %v2357_v14  ;;  %5991 = vpow2.f32 %v3633_v59  ;;  %v4018_v32 = vmul.f32 %v3890_v58, %v9129_v12  ;;  %v9234_v31 = vsel %vm1335_vm12, 1.0, %v9641_v53 }
 0x455   : > { %v2100_v8 = vmul.f32 1.0614054, %v9226_v9  ;;  %5993 = vrcp.f32 %v1847_v61  ;;  %v3123_v62 = vmul.f32 %v9185_v63, %v2995_v21  ;;  %v9238_v2 = vmul.f32 0.5, %v951_v30 }
 0x456   : > { %v2613_v46 = vmul.f32 %v9205_v1, %v2485_v37  ;;  %v1593_v50 = vand.u32 2147483647, %v1209_v18  ;;  %v5986_v54 = vpop.eup %5985  ;;  %v3383_v15 = vmul.f32 %v3255_v55, %v1591_v7  ;;  %v9240_v33 = vmul.f32 0.5, %v760_v38 }
 0x457   : > { %v2228_v24 = vadd.f32 -1.4531521, %v2100_v8  ;;  %v1592_v12 = vand.u32 2147483647, %v9224_v35  ;;  %v3763_v42 = vmul.f32 %v5982_v4, %v3123_v62  ;;  %v4146_v17 = vadd.f32 1.0, %v4018_v32 }
 0x458   : > { %v2741_v27 = vadd.f32 -0.28449672, %v2613_v46  ;;  %v1721_v56 = vmul.f32 0.3275911, %v1593_v50  ;;  %v3257_v59 = vsub.f32 0.0, %v1593_v50  ;;  %v9243_v58 = vpop.eup %5987  ;;  %vm1337_vm13 = vcmp.ge.f32.partialorder %v1209_v18, 0.0 }
 0x459   : > { %v2356_v63 = vmul.f32 %v9226_v9, %v2228_v24  ;;  %v1720_v30 = vmul.f32 0.3275911, %v1592_v12  ;;  %v3891_v10 = vsub.f32 1.0, %v3763_v42  ;;  %v2102_v7 = vmul.f32 1.0614054, %v9243_v58 }
 0x45a   : > { %v2869_v14 = vmul.f32 %v9205_v1, %v2741_v27  ;;  %v1849_v38 = vadd.f32 1.0, %v1721_v56  ;;  %v3635_v55 = vmul.f32 1.442695, %v3383_v15  ;;  %v3256_v4 = vsub.f32 0.0, %v1592_v12 }
 0x45b   : > { %v2484_v61 = vadd.f32 1.4214138, %v2356_v63  ;;  %v1848_v21 = vadd.f32 1.0, %v1720_v30  ;;  %v2230_v8 = vadd.f32 -1.4531521, %v2102_v7  ;;  %v3385_v62 = vmul.f32 %v3257_v59, %v1593_v50  ;;  %v9909_v50 = vld [vmem:[#allocation11_spill] sm:$0xff] }
 0x45c   : > { %v2997_v37 = vadd.f32 0.2548296, %v2869_v14  ;;  %5995 = vrcp.f32 %v1849_v38  ;;  %v5990_v46 = vpop.eup %5989  ;;  %v4019_v32 = vmul.f32 %v3891_v10, %v9157_v45  ;;  %v9252_v42 = vsel %vm1337_vm13, 1.0, %v9641_v53  ;;  %v9911_v10 = vld [vmem:[#allocation37_spill] sm:$0xff]  ;;  %v9912_v14 = vld [vmem:[#allocation38_spill] sm:$0xff] }
 0x45d   : > { %v2612_v24 = vmul.f32 %v9226_v9, %v2484_v61  ;;  %5997 = vrcp.f32 %v1848_v21  ;;  %v9257_v15 = vmul.f32 %v4146_v17, %v9114_v60  ;;  %v2358_v63 = vmul.f32 %v9243_v58, %v2230_v8  ;;  %v9913_v38 = vld [vmem:[#allocation41_spill] sm:$0xff]  ;;  %v9914_v61 = vld [vmem:[#allocation35_spill] sm:$0xff] }
 0x45e   : > { %v9254_v27 = vpop.eup %5991  ;;  %v3125_v56 = vmul.f32 %v9205_v1, %v2997_v37  ;;  %v9263_v59 = vadd.f32 %v9909_v50, %v6387_v19  ;;  %v3384_v18 = vmul.f32 %v3256_v4, %v1592_v12  ;;  %v4320_v7 = vpack.c.bf16 %v9912_v14, %v9911_v10  ;;  %v9915_v50 = vld [vmem:[#allocation36_spill] sm:$0xff]  ;;  %v9916_v10 = vld [vmem:[#allocation19_spill] sm:$0xff]  ;;  %v9918_v14 = vld [vmem:[#allocation33_spill] sm:$0xff] }
 0x45f   : > { %v9265_v45 = vpop.eup %5993  ;;  %v2740_v30 = vadd.f32 -0.28449672, %v2612_v24  ;;  %v4322_v21 = vpack.c.bf16 %v9914_v61, %v9913_v38  ;;  %v2486_v17 = vadd.f32 1.4214138, %v2358_v63  ;;  %v3639_v37 = vmul.f32 1.442695, %v3385_v62 }
 0x460   : > { %9910 = vst [vmem:[#allocation11_spill] sm:$0xff] %v9263_v59  ;;  %v3765_v60 = vmul.f32 %v5986_v54, %v3125_v56  ;;  %v2103_v1 = vmul.f32 1.0614054, %v9265_v45  ;;  %v4147_v8 = vadd.f32 1.0, %v4019_v32  ;;  %5999 = vpow2.f32 %v3635_v55  ;;  %4714 = vmatprep.mubr.bf16.mxu0 %v4320_v7  ;;  %v9917_v32 = vld [vmem:[#allocation40_spill] sm:$0xff] }
 0x461   : > { %v2868_v34 = vmul.f32 %v9226_v9, %v2740_v30  ;;  %v9274_v19 = vmul.f32 0.70710677, %v9263_v59  ;;  %4875 = vmatprep.mubr.bf16.mxu1 %v4322_v21  ;;  %v2614_v4 = vmul.f32 %v9243_v58, %v2486_v17  ;;  %v4319_v54 = vpack.c.bf16 %v9916_v10, %v9915_v50  ;;  %v9919_v17 = vld [vmem:[#allocation17_spill] sm:$0xff] }
 0x462   : > { %v3893_v12 = vsub.f32 1.0, %v3765_v60  ;;  %v2231_v24 = vadd.f32 -1.4531521, %v2103_v1  ;;  %v3637_v63 = vmul.f32 1.442695, %v3384_v18  ;;  %v4321_v30 = vpack.c.bf16 %v9918_v14, %v9917_v32 }
 0x463   : > { %v2996_v56 = vadd.f32 0.2548296, %v2868_v34  ;;  %v1594_v62 = vand.u32 2147483647, %v9274_v19  ;;  %v2742_v38 = vadd.f32 -0.28449672, %v2614_v4  ;;  %6001 = vpow2.f32 %v3639_v37  ;;  %4715 = vmatmul.mubr.bf16.gmra.mrb[100].mxu0 %v4319_v54 }
 0x464   : > { %v4021_v55 = vmul.f32 %v3893_v12, %v9181_v11  ;;  %v2359_v7 = vmul.f32 %v9265_v45, %v2231_v24  ;;  %4876 = vmatmul.mubr.bf16.gmra.mrb[100].mxu1 %v4321_v30  ;;  %v9920_v34 = vld [vmem:[#allocation43_spill] sm:$0xff]  ;;  %v9290_v50 = vmul.f32 %v4147_v8, %v9150_v0  ;;  %v9921_v4 = vld [vmem:[#allocation42_spill] sm:$0xff]  ;;  %v9922_v24 = vld [vmem:[#allocation45_spill] sm:$0xff]  ;;  %6003 = vpow2.f32 %v3637_v63 }
 0x465   : > { %v3124_v61 = vmul.f32 %v9226_v9, %v2996_v56  ;;  %v1722_v21 = vmul.f32 0.3275911, %v1594_v62  ;;  %v3258_v60 = vsub.f32 0.0, %v1594_v62  ;;  %v4324_v18 = vpack.c.bf16 %v9920_v34, %v9919_v17  ;;  %v9926_v63 = vld [vmem:[#allocation9_spill] sm:$0xff] }
 0x466   : > { %v9287_v1 = vpop.eup %5995  ;;  %v2870_v11 = vmul.f32 %v9243_v58, %v2742_v38  ;;  %v2487_v12 = vadd.f32 1.4214138, %v2359_v7  ;;  %v4326_v37 = vpack.c.bf16 %v9922_v24, %v9921_v4  ;;  %v4149_v8 = vadd.f32 1.0, %v4021_v55  ;;  %v9924_v4 = vld [vmem:[#allocation27_spill] sm:$0xff] }
 0x467   : > { %v9295_v10 = vpop.eup %5997  ;;  %v3764_v9 = vmul.f32 %v5990_v46, %v3124_v61  ;;  %v2105_v54 = vmul.f32 1.0614054, %v9287_v1  ;;  %v1850_v56 = vadd.f32 1.0, %v1722_v21  ;;  %v3386_v32 = vmul.f32 %v3258_v60, %v1594_v62  ;;  %4722 = vmatprep.mubr.bf16.mxu0 %v4324_v18  ;;  %v9923_v61 = vld [vmem:[#allocation44_spill] sm:$0xff] }
 0x468   : > { %v2998_v14 = vadd.f32 0.2548296, %v2870_v11  ;;  %v2615_v30 = vmul.f32 %v9265_v45, %v2487_v12  ;;  %v2104_v0 = vmul.f32 1.0614054, %v9295_v10  ;;  %4883 = vmatprep.mubr.bf16.mxu1 %v4326_v37  ;;  %v4323_v21 = vpack.c.bf16 %v9924_v4, %v9923_v61  ;;  %v9925_v12 = vld [vmem:[#allocation26_spill] sm:$0xff]  ;;  %v9931_v61 = vld [vmem:[#allocation31_spill] sm:$0xff] }
 0x469   : > { %v3892_v38 = vsub.f32 1.0, %v3764_v9  ;;  %v2233_v7 = vadd.f32 -1.4531521, %v2105_v54  ;;  %6005 = vrcp.f32 %v1850_v56  ;;  %v3641_v11 = vmul.f32 1.442695, %v3386_v32  ;;  %v9307_v55 = vpop.f32.mrb[84].mxu0 }
 0x46a   : > { %v3126_v17 = vmul.f32 %v9243_v58, %v2998_v14  ;;  %v2743_v34 = vadd.f32 -0.28449672, %v2615_v30  ;;  %v2232_v46 = vadd.f32 -1.4531521, %v2104_v0  ;;  %v6000_v62 = vpop.eup %5999  ;;  %v4325_v24 = vpack.c.bf16 %v9926_v63, %v9925_v12  ;;  %v9927_v54 = vld [vmem:[#allocation32_spill] sm:$0xff]  ;;  %v9928_v56 = vld [vmem:[#allocation49_spill] sm:$0xff] }
 0x46b   : > { %v4020_v60 = vmul.f32 %v3892_v38, %v9202_v16  ;;  %v2361_v18 = vmul.f32 %v9287_v1, %v2233_v7  ;;  %4723 = vmatmul.mubr.bf16.gmra.mrb[104].mxu0 %v4323_v21  ;;  %v4328_v14 = vpack.c.bf16 %v9928_v56, %v9927_v54  ;;  %v9314_v30 = vpop.f32.mrb[85].mxu0  ;;  %v9317_v16 = vmul.f32 %v4149_v8, %v9174_v48  ;;  %v9929_v0 = vld [vmem:[#allocation55_spill] sm:$0xff]  ;;  %v9930_v38 = vld [vmem:[#allocation34_spill] sm:$0xff]  ;;  %v9935_v48 = vld [vmem:[#allocation52_spill] sm:$0xff] }
 0x46c   : > { %v3766_v37 = vmul.f32 %v9254_v27, %v3126_v17  ;;  %v2871_v58 = vmul.f32 %v9265_v45, %v2743_v34  ;;  %v2360_v9 = vmul.f32 %v9295_v10, %v2232_v46  ;;  %4884 = vmatmul.mubr.bf16.gmra.mrb[104].mxu1 %v4325_v24  ;;  %v4330_v7 = vpack.c.bf16 %v9930_v38, %v9929_v0  ;;  %v9932_v27 = vld [vmem:[#allocation48_spill] sm:$0xff]  ;;  %v9323_v34 = vpop.f32.mrb[84].mxu1  ;;  %v9325_v46 = vpop.f32.mrb[86].mxu0  ;;  %v9934_v54 = vld [vmem:[#allocation51_spill] sm:$0xff]  ;;  %v9936_v56 = vld [vmem:[#allocation25_spill] sm:$0xff] }
 0x46d   : > { %v2489_v32 = vadd.f32 1.4214138, %v2361_v18  ;;  %v4327_v17 = vpack.c.bf16 %v9932_v27, %v9931_v61  ;;  %9933 = vst [vmem:[#allocation37_spill] sm:$0xff] %v9325_v46  ;;  %v6002_v4 = vpop.eup %6001  ;;  %v4148_v21 = vadd.f32 1.0, %v4020_v60  ;;  %4730 = vmatprep.mubr.bf16.mxu0 %v4328_v14  ;;  %v4329_v8 = vpack.c.bf16 %v9935_v48, %v9934_v54  ;;  %v9329_v18 = vpop.f32.mrb[85].mxu1  ;;  %v9937_v0 = vld [vmem:[#allocation18_spill] sm:$0xff] }
 0x46e   : > { %v2999_v12 = vadd.f32 0.2548296, %v2871_v58  ;;  %v2488_v63 = vadd.f32 1.4214138, %v2360_v9  ;;  %6007 = vpow2.f32 %v3641_v11  ;;  %4891 = vmatprep.mubr.bf16.mxu1 %v4330_v7  ;;  %v4332_v38 = vpack.c.bf16 %v9937_v0, %v9936_v56  ;;  %v9938_v61 = vld [vmem:[#allocation21_spill] sm:$0xff]  ;;  %v9336_v59 = vpop.f32.mrb[86].mxu1 }
 0x46f   : > { %v2617_v24 = vmul.f32 %v9287_v1, %v2489_v32  ;;  %v4334_v27 = vpack.c.bf16 %v8855_v57, %v9938_v61  ;;  %v9338_v60 = vpop.f32.mrb[87].mxu0  ;;  %v3894_v58 = vsub.f32 1.0, %v3766_v37  ;;  %v9939_v54 = vld [vmem:[#allocation22_spill] sm:$0xff]  ;;  %v9940_v32 = vld [vmem:[#allocation20_spill] sm:$0xff]  ;;  %v9344_v7 = vpop.f32.mrb[87].mxu1  ;;  %v9941_v56 = vld [vmem:[#allocation23_spill] sm:$0xff]  ;;  %v4336_v57 = vpack.c.bf16 %v8998_v25, %v8902_v26 }
 0x470   : > { %v3127_v9 = vmul.f32 %v9265_v45, %v2999_v12  ;;  %v2616_v14 = vmul.f32 %v9295_v10, %v2488_v63  ;;  %v4331_v11 = vpack.c.bf16 %v9940_v32, %v9939_v54  ;;  %v9942_v0 = vld [vmem:[#allocation24_spill] sm:$0xff]  ;;  %v6004_v37 = vpop.eup %6003  ;;  %v9353_v45 = vmul.f32 %v4148_v21, %v9193_v13  ;;  %v9943_v26 = vld [vmem:[#allocation50_spill] sm:$0xff] }
 0x471   : > { %v2745_v48 = vadd.f32 -0.28449672, %v2617_v24  ;;  %vm1336_vm14 = vcmp.ge.f32.partialorder %v9224_v35, 0.0  ;;  %v9369_v21 = vmul.f32 %v3894_v58, %v9218_v51  ;;  %v9945_v58 = vld [vmem:[#allocation39_spill] sm:$0xff]  ;;  %v9947_v46 = vld [vmem:[#allocation46_spill] sm:$0xff]  ;;  %v5155_v51 = vadd.f32 %v9950_v43, %v9949_v52 }
 0x472   : > { %v3767_v12 = vmul.f32 %v6000_v62, %v3127_v9  ;;  %v2744_v63 = vadd.f32 -0.28449672, %v2616_v14  ;;  %v9964_v35 = vld [vmem:[#allocation62_spill] sm:$0xff]  ;;  %vm1338_vm15 = vcmp.ge.f32.partialorder %v9274_v19, 0.0 }
 0x473   : > { %v9359_v54 = vpop.eup %6005  ;;  %v2873_v32 = vmul.f32 %v9287_v1, %v2745_v48  ;;  %9944 = vst [vmem:[#allocation38_spill] sm:$0xff] %v9369_v21  ;;  %4731 = vmatmul.mubr.bf16.gmra.mrb[108].mxu0 %v4327_v17  ;;  %v9376_v48 = vld [vmem:[%s9611_s4] ss:$0 sm:$0xff] }
 0x474   : > { %v3895_v9 = vsub.f32 1.0, %v3767_v12  ;;  %v2872_v14 = vmul.f32 %v9295_v10, %v2744_v63  ;;  %v2106_v24 = vmul.f32 1.0614054, %v9359_v54  ;;  %4892 = vmatmul.mubr.bf16.gmra.mrb[108].mxu1 %v4329_v8  ;;  %4738 = vmatprep.mubr.bf16.mxu0 %v4332_v38  ;;  %v9946_v12 = vld [vmem:[#allocation47_spill] sm:$0xff] }
 0x475   : > { %v3001_v25 = vadd.f32 0.2548296, %v2873_v32  ;;  %v5152_v63 = vadd.f32 %v9946_v12, %v9945_v58  ;;  %4899 = vmatprep.mubr.bf16.mxu1 %v4334_v27  ;;  %v9948_v32 = vld [vmem:[#allocation7_spill] sm:$0xff]  ;;  %v5267_v58 = vadd.f32 %v9952_v44, %v9951_v23  ;;  %v9954_v27 = vld [vmem:[#allocation54_spill] sm:$0xff] }
 0x476   : > { %v4023_v17 = vmul.f32 %v3895_v9, %v9234_v31  ;;  %v3000_v13 = vadd.f32 0.2548296, %v2872_v14  ;;  %v2234_v61 = vadd.f32 -1.4531521, %v2106_v24  ;;  %v5264_v8 = vadd.f32 %v9948_v32, %v9947_v46  ;;  %v9953_v24 = vld [vmem:[#allocation10_spill] sm:$0xff]  ;;  %v9956_v32 = vld [vmem:[#allocation57_spill] sm:$0xff] }
 0x477   : > { %v3129_v38 = vmul.f32 %v9287_v1, %v3001_v25  ;;  %v4645_v62 = vadd.f32 %v5152_v63, %v9376_v48  ;;  %v5158_v9 = vadd.f32 %v9954_v27, %v9953_v24  ;;  %v4648_v25 = vadd.f32 %v5155_v51, %v9376_v48  ;;  %v9955_v63 = vld [vmem:[#allocation8_spill] sm:$0xff]  ;;  %v9958_v51 = vld [vmem:[#allocation59_spill] sm:$0xff]  ;;  %v9961_v24 = vld [vmem:[#allocation61_spill] sm:$0xff] }
 0x478   : > { %v4151_v12 = vadd.f32 1.0, %v4023_v17  ;;  %v3128_v21 = vmul.f32 %v9295_v10, %v3000_v13  ;;  %v2362_v31 = vmul.f32 %v9359_v54, %v2234_v61  ;;  %v9399_v14 = vpop.eup %6007  ;;  %v5270_v52 = vadd.f32 %v9956_v32, %v9955_v63  ;;  %v9957_v13 = vld [vmem:[#allocation58_spill] sm:$0xff]  ;;  %v9959_v17 = vld [vmem:[#allocation60_spill] sm:$0xff] }
 0x479   : > { %v3769_v46 = vmul.f32 %v6002_v4, %v3129_v38  ;;  %v4806_v1 = vadd.f32 %v5264_v8, %v4645_v62  ;;  %v4653_v10 = vadd.f32 %v5158_v9, %v9376_v48  ;;  %v4809_v4 = vadd.f32 %v5267_v58, %v4648_v25 }
 0x47a   : > { %v9405_v43 = vmul.f32 %v4151_v12, %v9220_v39  ;;  %v3768_v23 = vmul.f32 %v6004_v37, %v3128_v21  ;;  %v2490_v44 = vadd.f32 1.4214138, %v2362_v31  ;;  %v5161_v62 = vadd.f32 %v9024_v3, %v9957_v13  ;;  %v9971_v13 = vld [vmem:[#allocation71_spill] sm:$0xff] }
 0x47b   : > { %v3897_v61 = vsub.f32 1.0, %v3769_v46  ;;  %4932 = vst [vmem:[%s9408_s25] sm:$0xff] %v4806_v1  ;;  %v5273_v8 = vadd.f32 %v9959_v17, %v9958_v51  ;;  %4739 = vmatmul.mubr.bf16.gmra.mrb[112].mxu0 %v4331_v11  ;;  %v4814_v38 = vadd.f32 %v5270_v52, %v4653_v10  ;;  %v1464_v58 = vsel %vm1336_vm14, 1.0, %v9641_v53  ;;  %4933 = vst [vmem:[%s9408_s25 + $0x8] sm:$0xff] %v4809_v4  ;;  %v9962_v11 = vld [vmem:[#allocation63_spill] sm:$0xff]  ;;  %v9965_v1 = vld [vmem:[#allocation64_spill] sm:$0xff] }
 0x47c   : > { %v3896_v39 = vsub.f32 1.0, %v3768_v23  ;;  %v2618_v37 = vmul.f32 %v9359_v54, %v2490_v44  ;;  %v4343_v21 = vpack.c.bf16 %v9405_v43, %v9290_v50  ;;  %v9960_v3 = vpack.c.bf16 %v9942_v0, %v9941_v56  ;;  %4746 = vmatprep.mubr.bf16.mxu0 %v4336_v57  ;;  %v9966_v56 = vld [vmem:[#allocation65_spill] sm:$0xff]  ;;  %v9967_v0 = vld [vmem:[#allocation67_spill] sm:$0xff]  ;;  %v9968_v23 = vld [vmem:[#allocation66_spill] sm:$0xff] }
 0x47d   : > { %v4025_v12 = vmul.f32 %v3897_v61, %v9252_v42  ;;  %v4656_v31 = vadd.f32 %v5161_v62, %v9376_v48  ;;  %v5164_v27 = vadd.f32 %v9962_v11, %v9961_v24  ;;  %v9963_v42 = vpack.c.bf16 %v9072_v41, %v8935_v5  ;;  %4934 = vst [vmem:[%s9408_s25 + $0x10] sm:$0xff] %v4814_v38  ;;  %v9969_v44 = vld [vmem:[#allocation68_spill] sm:$0xff]  ;;  %v9970_v41 = vld [vmem:[#allocation69_spill] sm:$0xff] }
 0x47e   : > { %4900 = vmatmul.mubr.bf16.gmra.mrb[112].mxu1 %v9960_v3  ;;  %v4024_v9 = vmul.f32 %v3896_v39, %v1464_v58  ;;  %v2746_v46 = vadd.f32 -0.28449672, %v2618_v37  ;;  %v5276_v25 = vadd.f32 %v9965_v1, %v9964_v35  ;;  %v5167_v57 = vadd.f32 %v9967_v0, %v9966_v56  ;;  %v9973_v39 = vld [vmem:[#allocation72_spill] sm:$0xff]  ;;  %v9974_v38 = vld [vmem:[#allocation53_spill] sm:$0xff]  ;;  %v9978_v35 = vld [vmem:[#allocation75_spill] sm:$0xff] }
 0x47f   : > { %4907 = vmatprep.mubr.bf16.mxu1 %v9963_v42  ;;  %v4153_v63 = vadd.f32 1.0, %v4025_v12  ;;  %v4817_v32 = vadd.f32 %v5273_v8, %v4656_v31  ;;  %v4661_v52 = vadd.f32 %v5164_v27, %v9376_v48  ;;  %v5279_v10 = vadd.f32 %v9969_v44, %v9968_v23  ;;  %v9972_v8 = vld [vmem:[#allocation70_spill] sm:$0xff]  ;;  %v9975_v12 = vld [vmem:[#allocation73_spill] sm:$0xff] }
 0x480   : > { %v4152_v61 = vadd.f32 1.0, %v4024_v9  ;;  %v2874_v4 = vmul.f32 %v9359_v54, %v2746_v46  ;;  %v4664_v5 = vadd.f32 %v5167_v57, %v9376_v48  ;;  %v5170_v62 = vadd.f32 %v9971_v13, %v9970_v41  ;;  %v9976_v9 = vld [vmem:[#allocation29_spill] sm:$0xff]  ;;  %v9977_v46 = vld [vmem:[#allocation74_spill] sm:$0xff]  ;;  %v9990_v41 = vld [vmem:[#allocation11_spill] sm:$0xff] }
 0x481   : > { %v4281_v51 = vmul.f32 %v4153_v63, %v9238_v2  ;;  %4935 = vst [vmem:[%s9408_s25 + $0x18] sm:$0xff] %v4817_v32  ;;  %v4822_v17 = vadd.f32 %v5276_v25, %v4661_v52  ;;  %v5282_v37 = vadd.f32 %v9973_v39, %v9972_v8  ;;  %v5173_v58 = vadd.f32 %v9975_v12, %v9974_v38  ;;  %v9979_v1 = vld [vmem:[#allocation13_spill] sm:$0xff]  ;;  %v9984_v32 = vld [vmem:[#allocation76_spill] sm:$0xff]  ;;  %v9995_v8 = vld [vmem:[#allocation78_spill] sm:$0xff] }
 0x482   : > { %v4280_v3 = vmul.f32 %v4152_v61, %v9240_v33  ;;  %v3002_v31 = vadd.f32 0.2548296, %v2874_v4  ;;  %v4825_v24 = vadd.f32 %v5279_v10, %v4664_v5  ;;  %v4669_v11 = vadd.f32 %v5170_v62, %v9376_v48 }
 0x483   : > { %v4345_v27 = vpack.c.bf16 %v4281_v51, %v9317_v16  ;;  %4936 = vst [vmem:[%s9408_s25 + $0x20] sm:$0xff] %v4822_v17  ;;  %v4672_v2 = vadd.f32 %v5173_v58, %v9376_v48  ;;  %v5285_v42 = vadd.f32 %v9977_v46, %v9976_v9  ;;  %v5176_v25 = vadd.f32 %v9979_v1, %v9978_v35  ;;  %v9991_v51 = vld [vmem:[#allocation16_spill] sm:$0xff]  ;;  %v9992_v17 = vld [vmem:[#allocation77_spill] sm:$0xff] }
 0x484   : > { %v3130_v56 = vmul.f32 %v9359_v54, %v3002_v31  ;;  %v9980_v33 = vpack.c.bf16 %v8944_v40, %v8866_v28  ;;  %v4344_v0 = vpack.c.bf16 %v4280_v3, %v9353_v45  ;;  %4937 = vst [vmem:[%s9408_s25 + $0x28] sm:$0xff] %v4825_v24  ;;  %v4830_v16 = vadd.f32 %v5282_v37, %v4669_v11  ;;  %v9983_v45 = vld [vmem:[#allocation56_spill] sm:$0xff] }
 0x485   : > { %v5288_v57 = vadd.f32 %v9142_v47, %v9138_v22  ;;  %v9981_v63 = vpack.c.bf16 %v9943_v26, %v8891_v6  ;;  %v9982_v54 = vpack.c.bf16 %v9229_v29, %v9172_v49  ;;  %v4833_v28 = vadd.f32 %v5285_v42, %v4672_v2  ;;  %v9986_v6 = vld [vmem:[#allocation30_spill] sm:$0xff] }
 0x486   : > { %4747 = vmatmul.mubr.bf16.gmra.mrb[116].mxu0 %v9980_v33  ;;  %v4677_v40 = vadd.f32 %v5176_v25, %v9376_v48  ;;  %v5179_v52 = vadd.f32 %v9984_v32, %v9983_v45  ;;  %v3770_v23 = vmul.f32 %v9399_v14, %v3130_v56  ;;  %v9985_v22 = vpack.c.bf16 %v9257_v15, %v9177_v20  ;;  %v9987_v14 = vld [vmem:[#allocation37_spill] sm:$0xff] }
 0x487   : > { %4908 = vmatmul.mubr.bf16.gmra.mrb[116].mxu1 %v9981_v63  ;;  %4754 = vmatprep.mubr.bf16.mxu0 %v9982_v54  ;;  %4938 = vst [vmem:[%s9408_s25 + $0x30] sm:$0xff] %v4830_v16  ;;  %v5291_v47 = vadd.f32 %v9986_v6, %v9145_v36  ;;  %v5182_v49 = vadd.f32 %v9314_v30, %v9307_v55  ;;  %4939 = vst [vmem:[%s9408_s25 + $0x38] sm:$0xff] %v4833_v28  ;;  %v1466_v55 = vsel %vm1338_vm15, 1.0, %v9641_v53  ;;  %v9994_v53 = vld [vmem:[#allocation14_spill] sm:$0xff] }
 0x488   : > { %4915 = vmatprep.mubr.bf16.mxu1 %v9985_v22  ;;  %v5294_v29 = vadd.f32 %v9329_v18, %v9323_v34  ;;  %v4838_v26 = vadd.f32 %v5288_v57, %v4677_v40  ;;  %v4680_v44 = vadd.f32 %v5179_v52, %v9376_v48  ;;  %v5185_v10 = vadd.f32 %v9338_v60, %v9987_v14  ;;  %v9988_v18 = vld [vmem:[#allocation38_spill] sm:$0xff] }
 0x489   : > { %v5297_v20 = vadd.f32 %v9344_v7, %v9336_v59  ;;  %v3898_v15 = vsub.f32 1.0, %v3770_v23  ;;  %v4685_v36 = vadd.f32 %v5182_v49, %v9376_v48  ;;  %v4150_v61 = vadd.f32 1.0, %v9988_v18  ;;  %v9989_v59 = vld [vmem:[#allocation28_spill] sm:$0xff] }
 0x48a   : > { %4940 = vst [vmem:[%s9408_s25 + $0x40] sm:$0xff] %v4838_v26  ;;  %v4841_v30 = vadd.f32 %v5291_v47, %v4680_v44  ;;  %v4688_v34 = vadd.f32 %v5185_v10, %v9376_v48  ;;  %v1078_v7 = vmul.f32 0.5, %v9989_v59  ;;  %v1082_v13 = vmul.f32 0.5, %v9990_v41 }
 0x48b   : > { %v4026_v4 = vmul.f32 %v3898_v15, %v1466_v55  ;;  %v4846_v60 = vadd.f32 %v5294_v29, %v4685_v36  ;;  %v9993_v19 = vpack.c.bf16 %v9991_v51, %v9992_v17  ;;  %v9996_v39 = vpack.c.bf16 %v9994_v53, %v9995_v8 }
 0x48c   : > { %4941 = vst [vmem:[%s9408_s25 + $0x48] sm:$0xff] %v4841_v30  ;;  %v4849_v5 = vadd.f32 %v5297_v20, %v4688_v34  ;;  %v4278_v37 = vmul.f32 %v4150_v61, %v1078_v7 }
 0x48d   : > { %v4154_v62 = vadd.f32 1.0, %v4026_v4  ;;  %4942 = vst [vmem:[%s9408_s25 + $0x50] sm:$0xff] %v4846_v60 }
 0x48e   : > { %4755 = vmatmul.mubr.bf16.gmra.mrb[120].mxu0 %v9993_v19  ;;  %4943 = vst [vmem:[%s9408_s25 + $0x58] sm:$0xff] %v4849_v5 }
 0x48f   : > { %4916 = vmatmul.mubr.bf16.gmra.mrb[120].mxu1 %v9996_v39  ;;  %4762 = vmatprep.mubr.bf16.mxu0 %v4344_v0  ;;  %v4282_v38 = vmul.f32 %v4154_v62, %v1082_v13 }
 0x491   : > { %v4346_v12 = vpack.c.bf16 %v4282_v38, %v4278_v37 }
 0x493   : > { %4923 = vmatprep.mubr.bf16.mxu1 %v4346_v12 }
 0x496   : > { %4763 = vmatmul.mubr.bf16.gmra.mrb[124].mxu0 %v4343_v21 }
 0x497   : > { %4924 = vmatmul.mubr.bf16.gmra.mrb[124].mxu1 %v4345_v27 }
 0x49d   : > { %v5186_v58 = vpop.f32.mrb[88].mxu0 }
 0x49e   : > { %v5187_v3 = vpop.f32.mrb[89].mxu0 }
 0x49f   : > { %v5188_v24 = vadd.f32 %v5187_v3, %v5186_v58  ;;  %v5189_v11 = vpop.f32.mrb[90].mxu0 }
 0x4a0   : > { %v5298_v31 = vpop.f32.mrb[88].mxu1  ;;  %v5190_v9 = vpop.f32.mrb[91].mxu0 }
 0x4a1   : > { %v5299_v2 = vpop.f32.mrb[89].mxu1  ;;  %v4693_v46 = vadd.f32 %v5188_v24, %v9376_v48  ;;  %v5191_v1 = vadd.f32 %v5190_v9, %v5189_v11 }
 0x4a2   : > { %v5300_v42 = vadd.f32 %v5299_v2, %v5298_v31  ;;  %v5301_v35 = vpop.f32.mrb[90].mxu1 }
 0x4a3   : > { %v5302_v25 = vpop.f32.mrb[91].mxu1  ;;  %v4696_v50 = vadd.f32 %v5191_v1, %v9376_v48 }
 0x4a4   : > { %v4854_v56 = vadd.f32 %v5300_v42, %v4693_v46  ;;  %v5303_v43 = vadd.f32 %v5302_v25, %v5301_v35 }
 0x4a6   : > { %4944 = vst [vmem:[%s9408_s25 + $0x60] sm:$0xff] %v4854_v56  ;;  %v4857_v21 = vadd.f32 %v5303_v43, %v4696_v50 }
 0x4a8   : > { %4945 = vst [vmem:[%s9408_s25 + $0x68] sm:$0xff] %v4857_v21 }
 0x4d5   : > { %v5192_v27 = vpop.f32.mrb[92].mxu0 }
 0x4d6   : > { %v5193_v33 = vpop.f32.mrb[93].mxu0 }
 0x4d7   : > { %v5194_v0 = vadd.f32 %v5193_v33, %v5192_v27  ;;  %v5195_v16 = vpop.f32.mrb[94].mxu0 }
 0x4d8   : > { %v5196_v57 = vpop.f32.mrb[95].mxu0 }
 0x4d9   : > { %v5304_v63 = vpop.f32.mrb[92].mxu1  ;;  %v4701_v54 = vadd.f32 %v5194_v0, %v9376_v48  ;;  %v5197_v28 = vadd.f32 %v5196_v57, %v5195_v16 }
 0x4da   : > { %v5305_v40 = vpop.f32.mrb[93].mxu1 }
 0x4db   : > { %v5306_v45 = vadd.f32 %v5305_v40, %v5304_v63  ;;  %v5307_v32 = vpop.f32.mrb[94].mxu1  ;;  %v4704_v52 = vadd.f32 %v5197_v28, %v9376_v48 }
 0x4dc   : > { %v5308_v23 = vpop.f32.mrb[95].mxu1 }
 0x4dd   : > { %v4862_v22 = vadd.f32 %v5306_v45, %v4701_v54  ;;  %v5309_v6 = vadd.f32 %v5308_v23, %v5307_v32 }
 0x4df   : > { %4946 = vst [vmem:[%s9408_s25 + $0x70] sm:$0xff] %v4862_v22  ;;  %v4865_v47 = vadd.f32 %v5309_v6, %v4704_v52 }
 0x4e1   : > { %4947 = vst [vmem:[%s9408_s25 + $0x78] sm:$0xff] %v4865_v47 }
 0x50e   : > { %v5198_v49 = vpop.f32.mrb[96].mxu0 }
 0x50f   : > { %v5199_v29 = vpop.f32.mrb[97].mxu0 }
 0x510   : > { %v5200_v26 = vadd.f32 %v5199_v29, %v5198_v49  ;;  %v5201_v44 = vpop.f32.mrb[98].mxu0 }
 0x511   : > { %v5202_v14 = vpop.f32.mrb[99].mxu0 }
 0x512   : > { %v5310_v10 = vpop.f32.mrb[96].mxu1  ;;  %v4709_v20 = vadd.f32 %v5200_v26, %v9376_v48  ;;  %v5203_v15 = vadd.f32 %v5202_v14, %v5201_v44 }
 0x513   : > { %v5311_v36 = vpop.f32.mrb[97].mxu1 }
 0x514   : > { %v5312_v55 = vadd.f32 %v5311_v36, %v5310_v10  ;;  %v5313_v30 = vpop.f32.mrb[98].mxu1  ;;  %v4712_v34 = vadd.f32 %v5203_v15, %v9376_v48 }
 0x515   : > { %v5314_v18 = vpop.f32.mrb[99].mxu1 }
 0x516   : > { %v4870_v61 = vadd.f32 %v5312_v55, %v4709_v20  ;;  %v5315_v4 = vadd.f32 %v5314_v18, %v5313_v30 }
 0x518   : > { %4948 = vst [vmem:[%s9408_s25 + $0x80] sm:$0xff] %v4870_v61  ;;  %v4873_v60 = vadd.f32 %v5315_v4, %v4712_v34 }
 0x51a   : > { %4949 = vst [vmem:[%s9408_s25 + $0x88] sm:$0xff] %v4873_v60 }
 0x536   : > { %v5204_v5 = vpop.f32.mrb[100].mxu0 }
 0x537   : > { %v5316_v59 = vpop.f32.mrb[100].mxu1  ;;  %v5205_v7 = vpop.f32.mrb[101].mxu0 }
 0x538   : > { %v5206_v41 = vadd.f32 %v5205_v7, %v5204_v5  ;;  %v5317_v13 = vpop.f32.mrb[101].mxu1  ;;  %v5207_v62 = vpop.f32.mrb[102].mxu0 }
 0x539   : > { %v5318_v51 = vadd.f32 %v5317_v13, %v5316_v59  ;;  %v5319_v17 = vpop.f32.mrb[102].mxu1  ;;  %v5208_v19 = vpop.f32.mrb[103].mxu0 }
 0x53a   : > { %v4717_v53 = vadd.f32 %v5206_v41, %v9376_v48  ;;  %v5209_v8 = vadd.f32 %v5208_v19, %v5207_v62  ;;  %v5320_v39 = vpop.f32.mrb[103].mxu1 }
 0x53b   : > { %v5321_v37 = vadd.f32 %v5320_v39, %v5319_v17 }
 0x53c   : > { %v4878_v38 = vadd.f32 %v5318_v51, %v4717_v53  ;;  %v4720_v12 = vadd.f32 %v5209_v8, %v9376_v48 }
 0x53e   : > { %4950 = vst [vmem:[%s9408_s25 + $0x90] sm:$0xff] %v4878_v38  ;;  %v4881_v58 = vadd.f32 %v5321_v37, %v4720_v12  ;;  %v5210_v3 = vpop.f32.mrb[104].mxu0 }
 0x53f   : > { %v5322_v31 = vpop.f32.mrb[104].mxu1  ;;  %v5211_v24 = vpop.f32.mrb[105].mxu0 }
 0x540   : > { %4951 = vst [vmem:[%s9408_s25 + $0x98] sm:$0xff] %v4881_v58  ;;  %v5212_v11 = vadd.f32 %v5211_v24, %v5210_v3  ;;  %v5323_v2 = vpop.f32.mrb[105].mxu1  ;;  %v5213_v9 = vpop.f32.mrb[106].mxu0 }
 0x541   : > { %v5324_v46 = vadd.f32 %v5323_v2, %v5322_v31  ;;  %v5325_v42 = vpop.f32.mrb[106].mxu1  ;;  %v5214_v35 = vpop.f32.mrb[107].mxu0 }
 0x542   : > { %v4725_v1 = vadd.f32 %v5212_v11, %v9376_v48  ;;  %v5215_v25 = vadd.f32 %v5214_v35, %v5213_v9  ;;  %v5326_v56 = vpop.f32.mrb[107].mxu1 }
 0x543   : > { %v5327_v50 = vadd.f32 %v5326_v56, %v5325_v42 }
 0x544   : > { %v4886_v43 = vadd.f32 %v5324_v46, %v4725_v1  ;;  %v4728_v21 = vadd.f32 %v5215_v25, %v9376_v48 }
 0x546   : > { %4952 = vst [vmem:[%s9408_s25 + $0xa0] sm:$0xff] %v4886_v43  ;;  %v4889_v27 = vadd.f32 %v5327_v50, %v4728_v21  ;;  %v5216_v33 = vpop.f32.mrb[108].mxu0 }
 0x547   : > { %v5328_v0 = vpop.f32.mrb[108].mxu1  ;;  %v5217_v16 = vpop.f32.mrb[109].mxu0 }
 0x548   : > { %4953 = vst [vmem:[%s9408_s25 + $0xa8] sm:$0xff] %v4889_v27  ;;  %v5218_v57 = vadd.f32 %v5217_v16, %v5216_v33  ;;  %v5329_v63 = vpop.f32.mrb[109].mxu1  ;;  %v5219_v54 = vpop.f32.mrb[110].mxu0 }
 0x549   : > { %v5330_v28 = vadd.f32 %v5329_v63, %v5328_v0  ;;  %v5331_v40 = vpop.f32.mrb[110].mxu1  ;;  %v5220_v45 = vpop.f32.mrb[111].mxu0 }
 0x54a   : > { %v4733_v32 = vadd.f32 %v5218_v57, %v9376_v48  ;;  %v5221_v52 = vadd.f32 %v5220_v45, %v5219_v54  ;;  %v5332_v23 = vpop.f32.mrb[111].mxu1 }
 0x54b   : > { %v5333_v22 = vadd.f32 %v5332_v23, %v5331_v40 }
 0x54c   : > { %v4894_v6 = vadd.f32 %v5330_v28, %v4733_v32  ;;  %v4736_v47 = vadd.f32 %v5221_v52, %v9376_v48 }
 0x54e   : > { %4954 = vst [vmem:[%s9408_s25 + $0xb0] sm:$0xff] %v4894_v6  ;;  %v4897_v49 = vadd.f32 %v5333_v22, %v4736_v47  ;;  %v5222_v29 = vpop.f32.mrb[112].mxu0 }
 0x54f   : > { %v5223_v44 = vpop.f32.mrb[113].mxu0 }
 0x550   : > { %4955 = vst [vmem:[%s9408_s25 + $0xb8] sm:$0xff] %v4897_v49  ;;  %v5224_v14 = vadd.f32 %v5223_v44, %v5222_v29  ;;  %v5225_v20 = vpop.f32.mrb[114].mxu0 }
 0x551   : > { %v5334_v26 = vpop.f32.mrb[112].mxu1  ;;  %v5226_v55 = vpop.f32.mrb[115].mxu0 }
 0x552   : > { %v5335_v10 = vpop.f32.mrb[113].mxu1  ;;  %v4741_v30 = vadd.f32 %v5224_v14, %v9376_v48  ;;  %v5227_v34 = vadd.f32 %v5226_v55, %v5225_v20 }
 0x553   : > { %v5336_v15 = vadd.f32 %v5335_v10, %v5334_v26  ;;  %v5337_v36 = vpop.f32.mrb[114].mxu1 }
 0x554   : > { %v5338_v18 = vpop.f32.mrb[115].mxu1  ;;  %v4744_v60 = vadd.f32 %v5227_v34, %v9376_v48 }
 0x555   : > { %v5339_v61 = vadd.f32 %v5338_v18, %v5337_v36  ;;  %v4902_v4 = vadd.f32 %v5336_v15, %v4741_v30 }
 0x557   : > { %4956 = vst [vmem:[%s9408_s25 + $0xc0] sm:$0xff] %v4902_v4  ;;  %v4905_v5 = vadd.f32 %v5339_v61, %v4744_v60 }
 0x559   : > { %v5228_v59 = vpop.f32.mrb[116].mxu0  ;;  %4957 = vst [vmem:[%s9408_s25 + $0xc8] sm:$0xff] %v4905_v5 }
 0x55a   : > { %v5340_v7 = vpop.f32.mrb[116].mxu1  ;;  %v5229_v41 = vpop.f32.mrb[117].mxu0 }
 0x55b   : > { %v5230_v13 = vadd.f32 %v5229_v41, %v5228_v59  ;;  %v5341_v62 = vpop.f32.mrb[117].mxu1  ;;  %v5231_v51 = vpop.f32.mrb[118].mxu0 }
 0x55c   : > { %v5342_v17 = vadd.f32 %v5341_v62, %v5340_v7  ;;  %v5343_v19 = vpop.f32.mrb[118].mxu1  ;;  %v5232_v53 = vpop.f32.mrb[119].mxu0 }
 0x55d   : > { %v4749_v8 = vadd.f32 %v5230_v13, %v9376_v48  ;;  %v5233_v39 = vadd.f32 %v5232_v53, %v5231_v51  ;;  %v5344_v37 = vpop.f32.mrb[119].mxu1 }
 0x55e   : > { %v5345_v38 = vadd.f32 %v5344_v37, %v5343_v19 }
 0x55f   : > { %v4910_v12 = vadd.f32 %v5342_v17, %v4749_v8  ;;  %v4752_v58 = vadd.f32 %v5233_v39, %v9376_v48 }
 0x561   : > { %4958 = vst [vmem:[%s9408_s25 + $0xd0] sm:$0xff] %v4910_v12  ;;  %v4913_v3 = vadd.f32 %v5345_v38, %v4752_v58  ;;  %v5234_v31 = vpop.f32.mrb[120].mxu0 }
 0x562   : > { %v5346_v24 = vpop.f32.mrb[120].mxu1  ;;  %v5235_v11 = vpop.f32.mrb[121].mxu0 }
 0x563   : > { %4959 = vst [vmem:[%s9408_s25 + $0xd8] sm:$0xff] %v4913_v3  ;;  %v5236_v2 = vadd.f32 %v5235_v11, %v5234_v31  ;;  %v5347_v9 = vpop.f32.mrb[121].mxu1  ;;  %v5237_v46 = vpop.f32.mrb[122].mxu0 }
 0x564   : > { %v5348_v42 = vadd.f32 %v5347_v9, %v5346_v24  ;;  %v5349_v35 = vpop.f32.mrb[122].mxu1  ;;  %v5238_v1 = vpop.f32.mrb[123].mxu0 }
 0x565   : > { %v4757_v25 = vadd.f32 %v5236_v2, %v9376_v48  ;;  %v5239_v56 = vadd.f32 %v5238_v1, %v5237_v46  ;;  %v5350_v50 = vpop.f32.mrb[123].mxu1 }
 0x566   : > { %v5351_v43 = vadd.f32 %v5350_v50, %v5349_v35 }
 0x567   : > { %v4918_v21 = vadd.f32 %v5348_v42, %v4757_v25  ;;  %v4760_v27 = vadd.f32 %v5239_v56, %v9376_v48 }
 0x569   : > { %4960 = vst [vmem:[%s9408_s25 + $0xe0] sm:$0xff] %v4918_v21  ;;  %v4921_v33 = vadd.f32 %v5351_v43, %v4760_v27  ;;  %v5240_v0 = vpop.f32.mrb[124].mxu0 }
 0x56a   : > { %v5352_v16 = vpop.f32.mrb[124].mxu1  ;;  %v5241_v57 = vpop.f32.mrb[125].mxu0 }
 0x56b   : > { %4961 = vst [vmem:[%s9408_s25 + $0xe8] sm:$0xff] %v4921_v33  ;;  %v5242_v63 = vadd.f32 %v5241_v57, %v5240_v0  ;;  %v5353_v54 = vpop.f32.mrb[125].mxu1  ;;  %v5243_v28 = vpop.f32.mrb[126].mxu0 }
 0x56c   : > { %v5354_v40 = vadd.f32 %v5353_v54, %v5352_v16  ;;  %v5355_v45 = vpop.f32.mrb[126].mxu1  ;;  %v5244_v32 = vpop.f32.mrb[127].mxu0 }
 0x56d   : > { %v4765_v52 = vadd.f32 %v5242_v63, %v9376_v48  ;;  %v5245_v23 = vadd.f32 %v5244_v32, %v5243_v28  ;;  %v5356_v22 = vpop.f32.mrb[127].mxu1 }
 0x56e   : > { %v5357_v6 = vadd.f32 %v5356_v22, %v5355_v45 }
 0x56f   : > { %v4926_v47 = vadd.f32 %v5354_v40, %v4765_v52  ;;  %v4768_v49 = vadd.f32 %v5245_v23, %v9376_v48 }
 0x571   : > { %4962 = vst [vmem:[%s9408_s25 + $0xf0] sm:$0xff] %v4926_v47  ;;  %v4929_v29 = vadd.f32 %v5357_v6, %v4768_v49 }
 0x573   : > { %4963 = vst [vmem:[%s9408_s25 + $0xf8] sm:$0xff] %v4929_v29 }
 0x574   : > { %6022 = shalt.err (!%p6019_p3)
}
 0x575   : > { %s6023_s13 = scalar_lea.hbm %s9558_s10, 4096  ;;  %s6027_s17 = scalar_lea.hbm %s9612_s5, 8192 }
 0x576   : > { %p6024_p4 = scmp.ne.s32.totalorder %s9558_s10, %s6023_s13  ;;  %p6028_p9 = scmp.lt.u32.totalorder %s9558_s10, %s9612_s5 }
 0x577   : > { %p6029_p10 = scmp.lt.u32.totalorder %s6027_s17, %s6023_s13  ;;  %p6031_p12 = scmp.lt.u32.totalorder %s6023_s13, %s9558_s10 }
 0x578   : > { %p6025_p7 = pnand %p6024_p4, %p6146_p5 }
 0x579   : > { %p6030_p11 = por %p6029_p10, %p6028_p9 }
 0x57a   : > { %p6026_p8 = pneg %p6025_p7 }
 0x57b   : > { %p6032_p13 = por %p6031_p12, %p6030_p11 }
 0x57d   : > { %p6033_p0 = pnand %p6032_p13, %p6026_p8 }
 0x57f   : > { %6036 = shalt.err (!%p6033_p0)
}
 0x580   : > { %s6076_s25 = smov 128   ;;  %s6077_s30 = smov 8  }
 0x581   : > { %5358 = dma.vmem_to_hbm [thread:$0]  (%p6146_p5), %s9560_s6, 4096, %s9558_s10, %s9566_s22, %s6076_s25, %s6076_s25, %s6077_s30  }
 0x582 PF: > { %p5364_p1 = scmp.ge.s32.totalorder %s6071_s21, 2  ;;  %s4993_s8 = sand.u32 1, %s6059_s18  }
 0x583   : > { %s4994_s9 = scalar_lea.sflag [#allocation3], %s4993_s8 }
 0x584   : > { %p5361_p2 = pnand %p5364_p1, %p6150_p6 }
 0x586   : > { %6054 = dma.done.wait (!%p5361_p2), %s4994_s9, 4096  }
 0x587   : > { %6056 = vsyncadd (!%p5361_p2), %s4994_s9, 4294963200  ;;  %p15_p3 = scmp.ge.s32.totalorder %s6133_s24, 4   ;;  %s9997_s18 = smov %s6063_s19 }
 0x588   : > { %s9998_s19 = smov %s6067_s20  ;;  %s9999_s20 = smov %s6144_s27 }
 0x589   : > { %s10000_s21 = smov %s6133_s24  ;;  %17 = sbr.rel (!%p15_p3) target bundleno = 3 (0x3), region = 75 }
 0x590   :  { %4999 = vsyncpa [#allocation3], 1 }
 0x591   :  { %5001 = vsyncpa [#allocation3 + $0x1], 1 }

</bundles_post_ra>
